<compile_context>
chip_gen: v6e
topology: v6e:2x2x1
jax: 0.10.0
libtpu: 0.0.40
codegen_flags: <defaults>
</compile_context>

<pallas_src>
import functools
import math

import jax
import jax.numpy as jnp
from jax.experimental import pallas as pl
from jax.experimental.pallas import tpu as pltpu


_MIN_PALLAS_BYTES = 1 << 20      # below this, plain XLA fusion wins
_MIN_STEPS_BYTES = 8 << 20       # buffers at/above this get a >=4-step grid


def _ema_kernel(shadow_ref, x_ref, out_ref, *, decay):
    """out = (1 - decay) * shadow + decay * x, blended in f32."""
    d = jnp.float32(decay)
    s = shadow_ref[...].astype(jnp.float32)
    xv = x_ref[...].astype(jnp.float32)
    out_ref[...] = (s + d * (xv - s)).astype(out_ref.dtype)


@functools.lru_cache(maxsize=1)
def _hw_block_config():
    """(target block bytes, vmem_limit_bytes) per TPU generation."""
    target = 4 << 20                      # v6e default (~1.4 TB/s)
    vmem_limit = 32 * 1024 * 1024         # also lifts v5e above its 16 MiB scoped default
    try:
        info = pltpu.get_tpu_info()
        name = str(getattr(info, "chip_version", getattr(info, "version", ""))).lower()
        vmem_cap = getattr(info, "vmem_capacity_bytes", None)
        if "v5" in name:
            # v5e (~820 GB/s): 2 MiB steps are already <5% fixed overhead.
            target = 2 << 20
        elif vmem_cap is not None and vmem_cap <= (80 << 20):
            # v7x-class: 64 MiB VMEM/TC, ~3.2 TB/s HBM -> bigger blocks,
            # 3 streams x 2 buffers x 6 MiB = 36 MiB live, limit 48 MiB.
            target = 6 << 20
            vmem_limit = 48 * 1024 * 1024
    except Exception:
        pass
    return target, vmem_limit


def _choose_lane_width(total):
    """Largest lane width (multiple of 128) dividing the flat element count."""
    for lane in (4096, 2048, 1024, 512, 256, 128):
        if total % lane == 0:
            return lane
    return None


def _choose_tile_rows(rows, lane, itemsize, target_bytes, min_steps):
    """Row tile ~target_bytes, multiple of the sublane pack, >= min_steps grid."""
    sub = max(8, 32 // itemsize)          # 8 (f32), 16 (bf16/f16), 32 (1-byte)
    if rows <= sub:
        return rows                       # full extent -> always legal
    rows_floor = (rows // sub) * sub
    target = max(sub, (target_bytes // (lane * itemsize)) // sub * sub)
    target = min(target, rows_floor)
    # Guarantee at least `min_steps` grid steps (pipeline depth / 2-TC sharding).
    if min_steps > 1 and rows >= min_steps * sub:
        cap = max(sub, (rows // min_steps) // sub * sub)
        target = min(target, cap)
    # Prefer an exact divisor of `rows` (no masked stores), but only if it is
    # still >= half the target block; otherwise keep the target size and
    # accept a ragged (masked) last block.
    lo = max(sub, target // 2)
    t = target
    while t >= lo:
        if rows % t == 0:
            return t
        t -= sub
    return target


def _ema_pallas_2d(shadow2d, x2d, decay):
    rows, lane = shadow2d.shape
    itemsize = jnp.dtype(shadow2d.dtype).itemsize
    target_bytes, vmem_limit = _hw_block_config()
    min_steps = 4 if rows * lane * itemsize >= _MIN_STEPS_BYTES else 1
    tile_rows = _choose_tile_rows(rows, lane, itemsize, target_bytes, min_steps)
    grid = (pl.cdiv(rows, tile_rows),)

    kernel = functools.partial(_ema_kernel, decay=float(decay))

    return pl.pallas_call(
        kernel,
        out_shape=jax.ShapeDtypeStruct((rows, lane), shadow2d.dtype),
        grid_spec=pl.GridSpec(
            grid=grid,
            in_specs=[
                pl.BlockSpec((tile_rows, lane), lambda i: (i, 0)),   # shadow tile
                pl.BlockSpec((tile_rows, lane), lambda i: (i, 0)),   # x tile
            ],
            out_specs=pl.BlockSpec((tile_rows, lane), lambda i: (i, 0)),
        ),
        # In-place buffer update (shadow arg -> output); real under jit+donation.
        input_output_aliases={0: 0},
        compiler_params=pltpu.CompilerParams(
            dimension_semantics=("parallel",),
            vmem_limit_bytes=vmem_limit,
        ),
    )(shadow2d, x2d)


def _ema_update_impl(shadow, x, decay):
    """(1 - decay) * shadow + decay * x, matching the PyTorch module."""
    total = shadow.size
    itemsize = jnp.dtype(shadow.dtype).itemsize
    lane = _choose_lane_width(total)

    if lane is None or total * itemsize < _MIN_PALLAS_BYTES:
        # Tiny buffer or element count not a multiple of 128: fused XLA
        # elementwise beats a pallas_call launch (same math, f32 blend).
        d = jnp.float32(decay)
        s = shadow.astype(jnp.float32)
        res = s + d * (x.astype(jnp.float32) - s)
        return res.astype(shadow.dtype)

    # Lane-dense view: fold into [rows, lane] (purely elementwise, row-major
    # reshape is metadata-only under jit, so the alias stays in place).
    rows = total // lane
    out2d = _ema_pallas_2d(shadow.reshape(rows, lane), x.reshape(rows, lane), decay)
    return out2d.reshape(shadow.shape)


# decay is a static (compile-time) argument; the previous shadow is donated so
# the EMA buffer is genuinely updated in place in HBM.
_ema_update = jax.jit(_ema_update_impl, static_argnums=(2,), donate_argnums=(0,))


class ExponentialMovingAverage:
    """JAX/Pallas port of the PyTorch module (functional buffer update)."""

    def __init__(self, init_value, decay):
        # Mirror PyTorch's .clone().detach(): own a private copy of the buffer.
        self.shadow = None if init_value is None else jnp.array(init_value)
        self.decay = float(decay)

    def forward(self, x):
        x = jnp.asarray(x)
        if self.shadow is None:
            # First call adopts (a copy of) x as the shadow.
            self.shadow = jnp.array(x)
            return self.shadow
        if x.dtype != self.shadow.dtype:
            x = x.astype(self.shadow.dtype)
        assert x.shape == self.shadow.shape
        self.shadow = _ema_update(self.shadow, x, self.decay)
        return self.shadow

    __call__ = forward

    @property
    def Value(self):
        return self.shadow


if __name__ == "__main__":
    key = jax.random.PRNGKey(0)
    k1, k2, k3, k4, k5, k6 = jax.random.split(key, 6)
    decay = 0.1

    # --- Pallas path: codebook-sized f32 buffer (4096x512 = 8 MiB, >=4 grid steps) ---
    N, D = 4096, 512
    init_value = jax.random.normal(k1, (N, D), dtype=jnp.float32)
    x1 = jax.random.normal(k2, (N, D), dtype=jnp.float32)
    x2 = jax.random.normal(k3, (N, D), dtype=jnp.float32)
    ref1 = (1.0 - decay) * init_value + decay * x1
    ref2 = (1.0 - decay) * ref1 + decay * x2
    ema = ExponentialMovingAverage(init_value, decay)
    out1 = jax.block_until_ready(ema(x1))
    assert jnp.allclose(out1, ref1, atol=1e-5, rtol=1e-5), "EMA (pallas f32, step 1) mismatch"
    out2 = jax.block_until_ready(ema(x2))          # second step exercises donation chain
    assert jnp.allclose(out2, ref2, atol=1e-5, rtol=1e-5), "EMA (pallas f32, step 2) mismatch"

    # --- bf16 buffer: kernel blends in f32 internally ---
    init_b = jax.random.normal(k4, (N, D), dtype=jnp.float32).astype(jnp.bfloat16)
    x_b = jax.random.normal(k5, (N, D), dtype=jnp.float32).astype(jnp.bfloat16)
    sb = init_b.astype(jnp.float32)
    ref_b = (sb + jnp.float32(decay) * (x_b.astype(jnp.float32) - sb)).astype(jnp.bfloat16)
    ema_b = ExponentialMovingAverage(init_b, decay)
    out_b = jax.block_until_ready(ema_b(x_b))
    assert jnp.allclose(out_b.astype(jnp.float32), ref_b.astype(jnp.float32),
                        atol=1e-2, rtol=1e-2), "EMA (pallas bf16) mismatch"

    # --- ragged rows (2008 x 1024 f32): exercises the fixed tile-rows heuristic ---
    Rr, Dr = 2008, 1024
    init_r = jax.random.normal(k6, (Rr, Dr), dtype=jnp.float32)
    x_r = jax.random.normal(k1, (Rr, Dr), dtype=jnp.float32)
    ref_r = (1.0 - decay) * init_r + decay * x_r
    ema_r = ExponentialMovingAverage(init_r, decay)
    out_r = jax.block_until_ready(ema_r(x_r))
    assert jnp.allclose(out_r, ref_r, atol=1e-5, rtol=1e-5), "EMA (pallas ragged) mismatch"

    # --- tiny buffer: bypasses Pallas (XLA fused elementwise is faster at 8 KiB) ---
    small_init = jax.random.normal(k2, (16, 128), dtype=jnp.float32)
    small_x = jax.random.normal(k3, (16, 128), dtype=jnp.float32)
    ref_s = (1.0 - decay) * small_init + decay * small_x
    ema_s = ExponentialMovingAverage(small_init, decay)
    out_s = jax.block_until_ready(ema_s(small_x))
    assert jnp.allclose(out_s, ref_s, atol=1e-6, rtol=1e-6), "EMA (small path) mismatch"

    # --- shadow=None path: first forward adopts x ---
    ema_none = ExponentialMovingAverage(None, decay)
    out_n = jax.block_until_ready(ema_none(small_x))
    assert jnp.allclose(out_n, small_x), "shadow=None path mismatch"

    print("KERNEL_OK")
</pallas_src>

<mosaic_0001>
module attributes {stable_mosaic.version = 11 : i64} {
  func.func @_ema_kernel(%arg0: i32, %arg1: memref<128x4096xf32, #tpu.memory_space<vmem>>, %arg2: memref<128x4096xf32, #tpu.memory_space<vmem>>, %arg3: memref<128x4096xf32, #tpu.memory_space<vmem>>) attributes {dimension_semantics = [#tpu.dimension_semantics<parallel>], iteration_bounds = array<i64: 4>, scalar_prefetch = 0 : i64, scratch_operands = 0 : i64, tpu.core_type = #tpu.core_type<tc>, window_params = [{transform_indices = @transform_0, window_bounds = array<i64: 128, 4096>}, {transform_indices = @transform_1, window_bounds = array<i64: 128, 4096>}, {transform_indices = @transform_2, window_bounds = array<i64: 128, 4096>}]} {
    %c0 = arith.constant 0 : index
    %c0_0 = arith.constant 0 : index
    %0 = vector.load %arg1[%c0, %c0_0] : memref<128x4096xf32, #tpu.memory_space<vmem>>, vector<128x4096xf32>
    %c0_1 = arith.constant 0 : index
    %c0_2 = arith.constant 0 : index
    %1 = vector.load %arg2[%c0_1, %c0_2] : memref<128x4096xf32, #tpu.memory_space<vmem>>, vector<128x4096xf32>
    %2 = arith.subf %1, %0 : vector<128x4096xf32>
    %cst = arith.constant 1.000000e-01 : f32
    %3 = vector.broadcast %cst : f32 to vector<128x4096xf32>
    %4 = arith.mulf %3, %2 : vector<128x4096xf32>
    %5 = arith.addf %0, %4 : vector<128x4096xf32>
    %c0_3 = arith.constant 0 : index
    %c0_4 = arith.constant 0 : index
    %6 = vector.load %arg3[%c0_3, %c0_4] : memref<128x4096xf32, #tpu.memory_space<vmem>>, vector<128x4096xf32>
    tpu.vector_store %arg3[%c0_3, %c0_4], %5 {strides = array<i32>} : memref<128x4096xf32, #tpu.memory_space<vmem>>, vector<128x4096xf32>,
    return
  }
  func.func @transform_0(%arg0: i32) -> (i32, i32) {
    %c0_i32 = arith.constant 0 : i32
    %c0_i32_0 = arith.constant 0 : i32
    return %arg0, %c0_i32 : i32, i32
  }
  func.func @transform_1(%arg0: i32) -> (i32, i32) {
    %c0_i32 = arith.constant 0 : i32
    %c0_i32_0 = arith.constant 0 : i32
    return %arg0, %c0_i32 : i32, i32
  }
  func.func @transform_2(%arg0: i32) -> (i32, i32) {
    %c0_i32 = arith.constant 0 : i32
    %c0_i32_0 = arith.constant 0 : i32
    return %arg0, %c0_i32 : i32, i32
  }
}

</mosaic_0001>

<bundles_post_ra>
// kernel: _ema_update_impl.1
= control target key start
LH: loop header
LB: loop body
LE: loop exit
PB: predicated region body
PF: predicated region fallthrough
CT: control target
= control target key end

     0   :  { %s3376_s9 = smov 0   ;;  %s7026_s0 = inlined_call_operand.vmem [shape: f32[512,4096], index: 0, kind: input, shape index: {}, may-alias: {0,2}]   ;;  %s7027_s1 = inlined_call_operand.vmem [shape: f32[512,4096], index: 1, kind: input, shape index: {}]   ;;  %s7028_s2 = inlined_call_operand.vmem [shape: f32[512,4096], index: 2, kind: output, shape index: {}, may-alias: {0,2}]  }
   0x1 LB: > { %s3319_s10 = sadd.s32 4294967295, %s3359_s9   ;;  %p3323_p0 = scmp.ge.s32.totalorder %s3359_s9, 1  ;;  %s3359_s9 = sphi %s3376_s9, %s12_s9  }
   0x2   : > { %p126_p1 = scmp.lt.s32.totalorder %s3359_s9, 5 }
   0x4   : > { %p127_p2 = pnand %p3323_p0, %p126_p1 }
   0x6   : > { %130 = sbr.rel (%p127_p2) target bundleno = 749 (0x2ed), region = 28 }
   0xb   : > { %s3324_s11 = sshll.u32 %s3319_s10, 4 }
   0xc   : > { %p157_p3 = scmp.lt.s32.totalorder %s3324_s11, 63 }
   0xe   : > { %s8428_s11 = smov (!%p157_p3, %s3324_s11), 63 }
   0xf   : > { %s3384_s12 = sshll.u32 %s8428_s11, 8 }
  0x10   : > { %s3390_s15 = scalar_lea.vmem %s7026_s0, %s3384_s12  ;;  %s3396_s18 = scalar_lea.vmem %s7027_s1, %s3384_s12 }
  0x11   : > { %v177_v0 = vld [vmem:[%s3390_s15] sm:$0xff]  ;;  %v3400_v1 = vld [vmem:[%s3390_s15 + $0x8] sm:$0xff]  ;;  %v3403_v2 = vld [vmem:[%s3390_s15 + $0x10] sm:$0xff]  ;;  %s3469_s21 = scalar_lea.vmem %s7028_s2, %s3384_s12 }
  0x12   : > { %v3406_v3 = vld [vmem:[%s3390_s15 + $0x18] sm:$0xff]  ;;  %v3409_v4 = vld [vmem:[%s3390_s15 + $0x20] sm:$0xff]  ;;  %v3412_v5 = vld [vmem:[%s3390_s15 + $0x28] sm:$0xff] }
  0x13   : > { %v3415_v6 = vld [vmem:[%s3390_s15 + $0x30] sm:$0xff]  ;;  %v689_v7 = vld [vmem:[%s3396_s18] sm:$0xff]  ;;  %v3419_v9 = vld [vmem:[%s3396_s18 + $0x8] sm:$0xff] }
  0x14   : > { %v1201_v8 = vsub.f32 %v689_v7, %v177_v0  ;;  %v3422_v10 = vld [vmem:[%s3396_s18 + $0x10] sm:$0xff]  ;;  %v3425_v11 = vld [vmem:[%s3396_s18 + $0x18] sm:$0xff]  ;;  %v3428_v12 = vld [vmem:[%s3390_s15 + $0x40] sm:$0xff] }
  0x15   : > { %v3437_v16 = vld [vmem:[%s3396_s18 + $0x20] sm:$0xff]  ;;  %v3440_v17 = vld [vmem:[%s3396_s18 + $0x28] sm:$0xff]  ;;  %v3443_v18 = vld [vmem:[%s3396_s18 + $0x30] sm:$0xff] }
  0x16   : > { %v3446_v19 = vld [vmem:[%s3390_s15 + $0x48] sm:$0xff]  ;;  %v3449_v20 = vld [vmem:[%s3390_s15 + $0x50] sm:$0xff]  ;;  %v3452_v21 = vld [vmem:[%s3390_s15 + $0x58] sm:$0xff]  ;;  %v3454_v22 = vmul.f32 0.1, %v1201_v8 }
  0x17   : > { %v3463_v26 = vld [vmem:[%s3396_s18 + $0x38] sm:$0xff]  ;;  %v3472_v27 = vld [vmem:[%s3390_s15 + $0x60] sm:$0xff]  ;;  %v3475_v28 = vld [vmem:[%s3390_s15 + $0x68] sm:$0xff] }
  0x18   : > { %v3478_v29 = vld [vmem:[%s3390_s15 + $0x70] sm:$0xff]  ;;  %v3481_v30 = vld [vmem:[%s3390_s15 + $0x78] sm:$0xff]  ;;  %v3484_v31 = vld [vmem:[%s3390_s15 + $0x80] sm:$0xff] }
  0x19   : > { %v3487_v32 = vld [vmem:[%s3390_s15 + $0x88] sm:$0xff]  ;;  %v3490_v33 = vld [vmem:[%s3390_s15 + $0x90] sm:$0xff]  ;;  %v3493_v34 = vld [vmem:[%s3390_s15 + $0x98] sm:$0xff] }
  0x1a   : > { %v3496_v35 = vld [vmem:[%s3390_s15 + $0xa0] sm:$0xff]  ;;  %v3499_v36 = vld [vmem:[%s3390_s15 + $0xa8] sm:$0xff]  ;;  %v3502_v37 = vld [vmem:[%s3390_s15 + $0xb0] sm:$0xff] }
  0x1b   : > { %v3505_v38 = vld [vmem:[%s3390_s15 + $0xb8] sm:$0xff]  ;;  %v3508_v39 = vld [vmem:[%s3390_s15 + $0xc0] sm:$0xff]  ;;  %v3511_v40 = vld [vmem:[%s3390_s15 + $0xc8] sm:$0xff] }
  0x1c   : > { %v3514_v41 = vld [vmem:[%s3390_s15 + $0xd0] sm:$0xff]  ;;  %v3517_v42 = vld [vmem:[%s3390_s15 + $0xd8] sm:$0xff]  ;;  %v3520_v43 = vld [vmem:[%s3390_s15 + $0xe0] sm:$0xff] }
  0x1d   : > { %v3523_v44 = vld [vmem:[%s3390_s15 + $0xe8] sm:$0xff]  ;;  %v3526_v45 = vld [vmem:[%s3390_s15 + $0xf0] sm:$0xff]  ;;  %v3529_v46 = vld [vmem:[%s3390_s15 + $0xf8] sm:$0xff] }
  0x1e   : > { %v3532_v47 = vld [vmem:[%s3390_s15 + $0x100] sm:$0xff]  ;;  %v3535_v48 = vld [vmem:[%s3390_s15 + $0x108] sm:$0xff]  ;;  %v3538_v49 = vld [vmem:[%s3390_s15 + $0x110] sm:$0xff] }
  0x1f   : > { %v3541_v50 = vld [vmem:[%s3390_s15 + $0x118] sm:$0xff]  ;;  %v3544_v51 = vld [vmem:[%s3390_s15 + $0x120] sm:$0xff]  ;;  %v3547_v52 = vld [vmem:[%s3390_s15 + $0x128] sm:$0xff] }
  0x20   : > { %v3550_v53 = vld [vmem:[%s3390_s15 + $0x130] sm:$0xff]  ;;  %v3553_v54 = vld [vmem:[%s3390_s15 + $0x138] sm:$0xff]  ;;  %v3556_v55 = vld [vmem:[%s3390_s15 + $0x140] sm:$0xff] }
  0x21   : > { %v3559_v56 = vld [vmem:[%s3390_s15 + $0x148] sm:$0xff]  ;;  %v3562_v57 = vld [vmem:[%s3390_s15 + $0x150] sm:$0xff]  ;;  %v3565_v58 = vld [vmem:[%s3390_s15 + $0x158] sm:$0xff] }
  0x22   : > { %v3568_v59 = vld [vmem:[%s3390_s15 + $0x160] sm:$0xff]  ;;  %v3571_v60 = vld [vmem:[%s3390_s15 + $0x168] sm:$0xff]  ;;  %v3574_v61 = vld [vmem:[%s3390_s15 + $0x170] sm:$0xff] }
  0x23   : > { %v3577_v62 = vld [vmem:[%s3390_s15 + $0x178] sm:$0xff]  ;;  %v3580_v63 = vld [vmem:[%s3390_s15 + $0x180] sm:$0xff]  ;;  %v3583_v0 = vld [vmem:[%s3390_s15 + $0x188] sm:$0xff] }
  0x24   : > { %7493 = vst [vmem:[#allocation2_spill] sm:$0xff] %v3580_v63  ;;  %7494 = vst [vmem:[#allocation3_spill] sm:$0xff] %v3583_v0  ;;  %v3586_v7 = vld [vmem:[%s3390_s15 + $0x190] sm:$0xff]  ;;  %v3589_v8 = vld [vmem:[%s3390_s15 + $0x198] sm:$0xff] }
  0x25   : > { %7495 = vst [vmem:[#allocation4_spill] sm:$0xff] %v3586_v7  ;;  %7496 = vst [vmem:[#allocation5_spill] sm:$0xff] %v3589_v8  ;;  %v3592_v25 = vld [vmem:[%s3390_s15 + $0x1a0] sm:$0xff]  ;;  %v3595_v24 = vld [vmem:[%s3390_s15 + $0x1a8] sm:$0xff] }
  0x26   : > { %7497 = vst [vmem:[#allocation6_spill] sm:$0xff] %v3592_v25  ;;  %7498 = vst [vmem:[#allocation7_spill] sm:$0xff] %v3595_v24  ;;  %v3598_v23 = vld [vmem:[%s3390_s15 + $0x1b0] sm:$0xff]  ;;  %v3601_v15 = vld [vmem:[%s3390_s15 + $0x1b8] sm:$0xff] }
  0x27   : > { %7499 = vst [vmem:[#allocation8_spill] sm:$0xff] %v3598_v23  ;;  %7500 = vst [vmem:[#allocation9_spill] sm:$0xff] %v3601_v15  ;;  %v3604_v14 = vld [vmem:[%s3390_s15 + $0x1c0] sm:$0xff]  ;;  %v3607_v13 = vld [vmem:[%s3390_s15 + $0x1c8] sm:$0xff] }
  0x28   : > { %7501 = vst [vmem:[#allocation10_spill] sm:$0xff] %v3604_v14  ;;  %7502 = vst [vmem:[#allocation11_spill] sm:$0xff] %v3607_v13  ;;  %v3610_v8 = vld [vmem:[%s3390_s15 + $0x1d0] sm:$0xff]  ;;  %v3613_v25 = vld [vmem:[%s3390_s15 + $0x1d8] sm:$0xff] }
  0x29   : > { %7503 = vst [vmem:[#allocation12_spill] sm:$0xff] %v3610_v8  ;;  %7504 = vst [vmem:[#allocation13_spill] sm:$0xff] %v3613_v25  ;;  %v3616_v24 = vld [vmem:[%s3390_s15 + $0x1e0] sm:$0xff]  ;;  %v3619_v23 = vld [vmem:[%s3390_s15 + $0x1e8] sm:$0xff] }
  0x2a   : > { %7505 = vst [vmem:[#allocation14_spill] sm:$0xff] %v3616_v24  ;;  %7506 = vst [vmem:[#allocation15_spill] sm:$0xff] %v3619_v23  ;;  %v3622_v15 = vld [vmem:[%s3390_s15 + $0x1f0] sm:$0xff]  ;;  %v3625_v14 = vld [vmem:[%s3390_s15 + $0x1f8] sm:$0xff] }
  0x2b   : > { %7507 = vst [vmem:[#allocation16_spill] sm:$0xff] %v3622_v15  ;;  %7508 = vst [vmem:[#allocation17_spill] sm:$0xff] %v3625_v14  ;;  %v3628_v13 = vld [vmem:[%s3390_s15 + $0x200] sm:$0xff]  ;;  %v3631_v8 = vld [vmem:[%s3390_s15 + $0x208] sm:$0xff] }
  0x2c   : > { %7509 = vst [vmem:[#allocation18_spill] sm:$0xff] %v3628_v13  ;;  %7510 = vst [vmem:[#allocation19_spill] sm:$0xff] %v3631_v8  ;;  %v3634_v25 = vld [vmem:[%s3390_s15 + $0x210] sm:$0xff]  ;;  %v3637_v24 = vld [vmem:[%s3390_s15 + $0x218] sm:$0xff] }
  0x2d   : > { %7511 = vst [vmem:[#allocation20_spill] sm:$0xff] %v3634_v25  ;;  %7512 = vst [vmem:[#allocation21_spill] sm:$0xff] %v3637_v24  ;;  %v3640_v23 = vld [vmem:[%s3390_s15 + $0x220] sm:$0xff]  ;;  %v3643_v15 = vld [vmem:[%s3390_s15 + $0x228] sm:$0xff] }
  0x2e   : > { %7513 = vst [vmem:[#allocation22_spill] sm:$0xff] %v3640_v23  ;;  %7514 = vst [vmem:[#allocation23_spill] sm:$0xff] %v3643_v15  ;;  %v3646_v14 = vld [vmem:[%s3390_s15 + $0x230] sm:$0xff]  ;;  %v3649_v13 = vld [vmem:[%s3390_s15 + $0x238] sm:$0xff] }
  0x2f   : > { %7515 = vst [vmem:[#allocation24_spill] sm:$0xff] %v3646_v14  ;;  %7516 = vst [vmem:[#allocation25_spill] sm:$0xff] %v3649_v13  ;;  %v3652_v8 = vld [vmem:[%s3390_s15 + $0x240] sm:$0xff]  ;;  %v3655_v25 = vld [vmem:[%s3390_s15 + $0x248] sm:$0xff] }
  0x30   : > { %7517 = vst [vmem:[#allocation26_spill] sm:$0xff] %v3652_v8  ;;  %7518 = vst [vmem:[#allocation27_spill] sm:$0xff] %v3655_v25  ;;  %v3658_v24 = vld [vmem:[%s3390_s15 + $0x250] sm:$0xff]  ;;  %v3661_v23 = vld [vmem:[%s3390_s15 + $0x258] sm:$0xff] }
  0x31   : > { %7519 = vst [vmem:[#allocation28_spill] sm:$0xff] %v3658_v24  ;;  %7520 = vst [vmem:[#allocation29_spill] sm:$0xff] %v3661_v23  ;;  %v3664_v15 = vld [vmem:[%s3390_s15 + $0x260] sm:$0xff]  ;;  %v3667_v14 = vld [vmem:[%s3390_s15 + $0x268] sm:$0xff] }
  0x32   : > { %7521 = vst [vmem:[#allocation30_spill] sm:$0xff] %v3664_v15  ;;  %7522 = vst [vmem:[#allocation31_spill] sm:$0xff] %v3667_v14  ;;  %v3670_v13 = vld [vmem:[%s3390_s15 + $0x270] sm:$0xff]  ;;  %v3673_v8 = vld [vmem:[%s3390_s15 + $0x278] sm:$0xff] }
  0x33   : > { %7523 = vst [vmem:[#allocation32_spill] sm:$0xff] %v3670_v13  ;;  %7524 = vst [vmem:[#allocation33_spill] sm:$0xff] %v3673_v8  ;;  %v3676_v25 = vld [vmem:[%s3390_s15 + $0x280] sm:$0xff]  ;;  %v3679_v24 = vld [vmem:[%s3390_s15 + $0x288] sm:$0xff] }
  0x34   : > { %7525 = vst [vmem:[#allocation34_spill] sm:$0xff] %v3676_v25  ;;  %7526 = vst [vmem:[#allocation35_spill] sm:$0xff] %v3679_v24  ;;  %v3682_v23 = vld [vmem:[%s3390_s15 + $0x290] sm:$0xff]  ;;  %v3685_v15 = vld [vmem:[%s3390_s15 + $0x298] sm:$0xff] }
  0x35   : > { %7527 = vst [vmem:[#allocation36_spill] sm:$0xff] %v3682_v23  ;;  %7528 = vst [vmem:[#allocation37_spill] sm:$0xff] %v3685_v15  ;;  %v3688_v14 = vld [vmem:[%s3390_s15 + $0x2a0] sm:$0xff]  ;;  %v3691_v13 = vld [vmem:[%s3390_s15 + $0x2a8] sm:$0xff] }
  0x36   : > { %7529 = vst [vmem:[#allocation38_spill] sm:$0xff] %v3688_v14  ;;  %7530 = vst [vmem:[#allocation39_spill] sm:$0xff] %v3691_v13  ;;  %v3694_v8 = vld [vmem:[%s3390_s15 + $0x2b0] sm:$0xff]  ;;  %v3697_v25 = vld [vmem:[%s3390_s15 + $0x2b8] sm:$0xff] }
  0x37   : > { %7531 = vst [vmem:[#allocation40_spill] sm:$0xff] %v3694_v8  ;;  %7532 = vst [vmem:[#allocation41_spill] sm:$0xff] %v3697_v25  ;;  %v3700_v24 = vld [vmem:[%s3390_s15 + $0x2c0] sm:$0xff]  ;;  %v3703_v23 = vld [vmem:[%s3390_s15 + $0x2c8] sm:$0xff] }
  0x38   : > { %7533 = vst [vmem:[#allocation42_spill] sm:$0xff] %v3700_v24  ;;  %7534 = vst [vmem:[#allocation43_spill] sm:$0xff] %v3703_v23  ;;  %v3706_v15 = vld [vmem:[%s3390_s15 + $0x2d0] sm:$0xff]  ;;  %v3709_v14 = vld [vmem:[%s3390_s15 + $0x2d8] sm:$0xff] }
  0x39   : > { %7535 = vst [vmem:[#allocation44_spill] sm:$0xff] %v3706_v15  ;;  %7536 = vst [vmem:[#allocation45_spill] sm:$0xff] %v3709_v14  ;;  %v3712_v13 = vld [vmem:[%s3390_s15 + $0x2e0] sm:$0xff]  ;;  %v3715_v8 = vld [vmem:[%s3390_s15 + $0x2e8] sm:$0xff] }
  0x3a   : > { %7537 = vst [vmem:[#allocation46_spill] sm:$0xff] %v3712_v13  ;;  %7538 = vst [vmem:[#allocation47_spill] sm:$0xff] %v3715_v8  ;;  %v3718_v25 = vld [vmem:[%s3390_s15 + $0x2f0] sm:$0xff]  ;;  %v3721_v24 = vld [vmem:[%s3390_s15 + $0x2f8] sm:$0xff] }
  0x3b   : > { %7539 = vst [vmem:[#allocation48_spill] sm:$0xff] %v3718_v25  ;;  %7540 = vst [vmem:[#allocation49_spill] sm:$0xff] %v3721_v24  ;;  %v3724_v23 = vld [vmem:[%s3390_s15 + $0x300] sm:$0xff]  ;;  %v3727_v15 = vld [vmem:[%s3390_s15 + $0x308] sm:$0xff] }
  0x3c   : > { %7541 = vst [vmem:[#allocation50_spill] sm:$0xff] %v3724_v23  ;;  %7542 = vst [vmem:[#allocation51_spill] sm:$0xff] %v3727_v15  ;;  %v3730_v14 = vld [vmem:[%s3390_s15 + $0x310] sm:$0xff]  ;;  %v3733_v13 = vld [vmem:[%s3390_s15 + $0x318] sm:$0xff] }
  0x3d   : > { %7543 = vst [vmem:[#allocation52_spill] sm:$0xff] %v3730_v14  ;;  %7544 = vst [vmem:[#allocation53_spill] sm:$0xff] %v3733_v13  ;;  %v3736_v8 = vld [vmem:[%s3390_s15 + $0x320] sm:$0xff]  ;;  %v3739_v25 = vld [vmem:[%s3390_s15 + $0x328] sm:$0xff] }
  0x3e   : > { %7545 = vst [vmem:[#allocation54_spill] sm:$0xff] %v3736_v8  ;;  %7546 = vst [vmem:[#allocation55_spill] sm:$0xff] %v3739_v25  ;;  %v3742_v24 = vld [vmem:[%s3390_s15 + $0x330] sm:$0xff]  ;;  %v3745_v23 = vld [vmem:[%s3390_s15 + $0x338] sm:$0xff] }
  0x3f   : > { %7547 = vst [vmem:[#allocation56_spill] sm:$0xff] %v3742_v24  ;;  %7548 = vst [vmem:[#allocation57_spill] sm:$0xff] %v3745_v23  ;;  %v3748_v15 = vld [vmem:[%s3390_s15 + $0x340] sm:$0xff]  ;;  %v3751_v14 = vld [vmem:[%s3390_s15 + $0x348] sm:$0xff] }
  0x40   : > { %7549 = vst [vmem:[#allocation58_spill] sm:$0xff] %v3748_v15  ;;  %7550 = vst [vmem:[#allocation59_spill] sm:$0xff] %v3751_v14  ;;  %v3754_v13 = vld [vmem:[%s3390_s15 + $0x350] sm:$0xff]  ;;  %v3757_v8 = vld [vmem:[%s3390_s15 + $0x358] sm:$0xff] }
  0x41   : > { %7551 = vst [vmem:[#allocation60_spill] sm:$0xff] %v3754_v13  ;;  %7552 = vst [vmem:[#allocation61_spill] sm:$0xff] %v3757_v8  ;;  %v3760_v25 = vld [vmem:[%s3390_s15 + $0x360] sm:$0xff]  ;;  %v3763_v24 = vld [vmem:[%s3390_s15 + $0x368] sm:$0xff] }
  0x42   : > { %7553 = vst [vmem:[#allocation62_spill] sm:$0xff] %v3760_v25  ;;  %7554 = vst [vmem:[#allocation63_spill] sm:$0xff] %v3763_v24  ;;  %v3766_v23 = vld [vmem:[%s3390_s15 + $0x370] sm:$0xff]  ;;  %v3769_v15 = vld [vmem:[%s3390_s15 + $0x378] sm:$0xff] }
  0x43   : > { %7555 = vst [vmem:[#allocation64_spill] sm:$0xff] %v3766_v23  ;;  %7556 = vst [vmem:[#allocation65_spill] sm:$0xff] %v3769_v15  ;;  %v3772_v14 = vld [vmem:[%s3390_s15 + $0x380] sm:$0xff]  ;;  %v3775_v13 = vld [vmem:[%s3390_s15 + $0x388] sm:$0xff] }
  0x44   : > { %7557 = vst [vmem:[#allocation66_spill] sm:$0xff] %v3772_v14  ;;  %7558 = vst [vmem:[#allocation67_spill] sm:$0xff] %v3775_v13  ;;  %v3778_v8 = vld [vmem:[%s3390_s15 + $0x390] sm:$0xff]  ;;  %v3781_v25 = vld [vmem:[%s3390_s15 + $0x398] sm:$0xff] }
  0x45   : > { %7559 = vst [vmem:[#allocation68_spill] sm:$0xff] %v3778_v8  ;;  %7560 = vst [vmem:[#allocation69_spill] sm:$0xff] %v3781_v25  ;;  %v3784_v24 = vld [vmem:[%s3390_s15 + $0x3a0] sm:$0xff]  ;;  %v3787_v23 = vld [vmem:[%s3390_s15 + $0x3a8] sm:$0xff] }
  0x46   : > { %7561 = vst [vmem:[#allocation70_spill] sm:$0xff] %v3784_v24  ;;  %7562 = vst [vmem:[#allocation71_spill] sm:$0xff] %v3787_v23  ;;  %v3790_v15 = vld [vmem:[%s3390_s15 + $0x3b0] sm:$0xff]  ;;  %v3793_v14 = vld [vmem:[%s3390_s15 + $0x3b8] sm:$0xff] }
  0x47   : > { %7563 = vst [vmem:[#allocation72_spill] sm:$0xff] %v3790_v15  ;;  %7564 = vst [vmem:[#allocation73_spill] sm:$0xff] %v3793_v14  ;;  %v3796_v13 = vld [vmem:[%s3390_s15 + $0x3c0] sm:$0xff]  ;;  %v3799_v8 = vld [vmem:[%s3390_s15 + $0x3c8] sm:$0xff] }
  0x48   : > { %7565 = vst [vmem:[#allocation74_spill] sm:$0xff] %v3796_v13  ;;  %7566 = vst [vmem:[#allocation75_spill] sm:$0xff] %v3799_v8  ;;  %v3802_v25 = vld [vmem:[%s3390_s15 + $0x3d0] sm:$0xff]  ;;  %v3805_v24 = vld [vmem:[%s3390_s15 + $0x3d8] sm:$0xff] }
  0x49   : > { %7567 = vst [vmem:[#allocation76_spill] sm:$0xff] %v3802_v25  ;;  %7568 = vst [vmem:[#allocation77_spill] sm:$0xff] %v3805_v24  ;;  %v3808_v23 = vld [vmem:[%s3390_s15 + $0x3e0] sm:$0xff]  ;;  %v3811_v15 = vld [vmem:[%s3390_s15 + $0x3e8] sm:$0xff] }
  0x4a   : > { %7569 = vst [vmem:[#allocation78_spill] sm:$0xff] %v3808_v23  ;;  %7570 = vst [vmem:[#allocation79_spill] sm:$0xff] %v3811_v15  ;;  %v3814_v14 = vld [vmem:[%s3390_s15 + $0x3f0] sm:$0xff]  ;;  %v3817_v13 = vld [vmem:[%s3390_s15 + $0x3f8] sm:$0xff] }
  0x4b   : > { %7571 = vst [vmem:[#allocation80_spill] sm:$0xff] %v3814_v14  ;;  %7572 = vst [vmem:[#allocation81_spill] sm:$0xff] %v3817_v13  ;;  %v3820_v8 = vld [vmem:[%s3390_s15 + $0x400] sm:$0xff]  ;;  %v3823_v25 = vld [vmem:[%s3390_s15 + $0x408] sm:$0xff] }
  0x4c   : > { %7573 = vst [vmem:[#allocation82_spill] sm:$0xff] %v3820_v8  ;;  %7574 = vst [vmem:[#allocation83_spill] sm:$0xff] %v3823_v25  ;;  %v3826_v24 = vld [vmem:[%s3390_s15 + $0x410] sm:$0xff]  ;;  %v3829_v23 = vld [vmem:[%s3390_s15 + $0x418] sm:$0xff] }
  0x4d   : > { %7575 = vst [vmem:[#allocation84_spill] sm:$0xff] %v3826_v24  ;;  %7576 = vst [vmem:[#allocation85_spill] sm:$0xff] %v3829_v23  ;;  %v3832_v15 = vld [vmem:[%s3390_s15 + $0x420] sm:$0xff]  ;;  %v3835_v14 = vld [vmem:[%s3390_s15 + $0x428] sm:$0xff] }
  0x4e   : > { %7577 = vst [vmem:[#allocation86_spill] sm:$0xff] %v3832_v15  ;;  %7578 = vst [vmem:[#allocation87_spill] sm:$0xff] %v3835_v14  ;;  %v3838_v13 = vld [vmem:[%s3390_s15 + $0x430] sm:$0xff]  ;;  %v3841_v8 = vld [vmem:[%s3390_s15 + $0x438] sm:$0xff] }
  0x4f   : > { %7579 = vst [vmem:[#allocation88_spill] sm:$0xff] %v3838_v13  ;;  %7580 = vst [vmem:[#allocation89_spill] sm:$0xff] %v3841_v8  ;;  %v3844_v25 = vld [vmem:[%s3390_s15 + $0x440] sm:$0xff]  ;;  %v3847_v24 = vld [vmem:[%s3390_s15 + $0x448] sm:$0xff] }
  0x50   : > { %7581 = vst [vmem:[#allocation90_spill] sm:$0xff] %v3844_v25  ;;  %7582 = vst [vmem:[#allocation91_spill] sm:$0xff] %v3847_v24  ;;  %v3850_v23 = vld [vmem:[%s3390_s15 + $0x450] sm:$0xff]  ;;  %v3853_v15 = vld [vmem:[%s3390_s15 + $0x458] sm:$0xff] }
  0x51   : > { %7583 = vst [vmem:[#allocation92_spill] sm:$0xff] %v3850_v23  ;;  %7584 = vst [vmem:[#allocation93_spill] sm:$0xff] %v3853_v15  ;;  %v3856_v14 = vld [vmem:[%s3390_s15 + $0x460] sm:$0xff]  ;;  %v3859_v13 = vld [vmem:[%s3390_s15 + $0x468] sm:$0xff] }
  0x52   : > { %7585 = vst [vmem:[#allocation94_spill] sm:$0xff] %v3856_v14  ;;  %7586 = vst [vmem:[#allocation95_spill] sm:$0xff] %v3859_v13  ;;  %v3862_v8 = vld [vmem:[%s3390_s15 + $0x470] sm:$0xff]  ;;  %v3865_v25 = vld [vmem:[%s3390_s15 + $0x478] sm:$0xff] }
  0x53   : > { %7587 = vst [vmem:[#allocation96_spill] sm:$0xff] %v3862_v8  ;;  %7588 = vst [vmem:[#allocation97_spill] sm:$0xff] %v3865_v25  ;;  %v3868_v24 = vld [vmem:[%s3390_s15 + $0x480] sm:$0xff]  ;;  %v3871_v23 = vld [vmem:[%s3390_s15 + $0x488] sm:$0xff] }
  0x54   : > { %7589 = vst [vmem:[#allocation98_spill] sm:$0xff] %v3868_v24  ;;  %7590 = vst [vmem:[#allocation99_spill] sm:$0xff] %v3871_v23  ;;  %v3874_v15 = vld [vmem:[%s3390_s15 + $0x490] sm:$0xff]  ;;  %v3877_v14 = vld [vmem:[%s3390_s15 + $0x498] sm:$0xff] }
  0x55   : > { %7591 = vst [vmem:[#allocation100_spill] sm:$0xff] %v3874_v15  ;;  %7592 = vst [vmem:[#allocation101_spill] sm:$0xff] %v3877_v14  ;;  %v3880_v13 = vld [vmem:[%s3390_s15 + $0x4a0] sm:$0xff]  ;;  %v3883_v8 = vld [vmem:[%s3390_s15 + $0x4a8] sm:$0xff] }
  0x56   : > { %7593 = vst [vmem:[#allocation102_spill] sm:$0xff] %v3880_v13  ;;  %7594 = vst [vmem:[#allocation103_spill] sm:$0xff] %v3883_v8  ;;  %v3886_v25 = vld [vmem:[%s3390_s15 + $0x4b0] sm:$0xff]  ;;  %v3889_v24 = vld [vmem:[%s3390_s15 + $0x4b8] sm:$0xff] }
  0x57   : > { %7595 = vst [vmem:[#allocation104_spill] sm:$0xff] %v3886_v25  ;;  %7596 = vst [vmem:[#allocation105_spill] sm:$0xff] %v3889_v24  ;;  %v3892_v23 = vld [vmem:[%s3390_s15 + $0x4c0] sm:$0xff]  ;;  %v3895_v15 = vld [vmem:[%s3390_s15 + $0x4c8] sm:$0xff] }
  0x58   : > { %7597 = vst [vmem:[#allocation106_spill] sm:$0xff] %v3892_v23  ;;  %7598 = vst [vmem:[#allocation107_spill] sm:$0xff] %v3895_v15  ;;  %v3898_v14 = vld [vmem:[%s3390_s15 + $0x4d0] sm:$0xff]  ;;  %v3901_v13 = vld [vmem:[%s3390_s15 + $0x4d8] sm:$0xff] }
  0x59   : > { %7599 = vst [vmem:[#allocation108_spill] sm:$0xff] %v3898_v14  ;;  %7600 = vst [vmem:[#allocation109_spill] sm:$0xff] %v3901_v13  ;;  %v3904_v8 = vld [vmem:[%s3390_s15 + $0x4e0] sm:$0xff]  ;;  %v3907_v25 = vld [vmem:[%s3390_s15 + $0x4e8] sm:$0xff] }
  0x5a   : > { %7601 = vst [vmem:[#allocation110_spill] sm:$0xff] %v3904_v8  ;;  %7602 = vst [vmem:[#allocation111_spill] sm:$0xff] %v3907_v25  ;;  %v3910_v24 = vld [vmem:[%s3390_s15 + $0x4f0] sm:$0xff]  ;;  %v3913_v23 = vld [vmem:[%s3390_s15 + $0x4f8] sm:$0xff] }
  0x5b   : > { %7603 = vst [vmem:[#allocation112_spill] sm:$0xff] %v3910_v24  ;;  %7604 = vst [vmem:[#allocation113_spill] sm:$0xff] %v3913_v23  ;;  %v3916_v15 = vld [vmem:[%s3390_s15 + $0x500] sm:$0xff]  ;;  %v3919_v14 = vld [vmem:[%s3390_s15 + $0x508] sm:$0xff] }
  0x5c   : > { %7605 = vst [vmem:[#allocation114_spill] sm:$0xff] %v3916_v15  ;;  %7606 = vst [vmem:[#allocation115_spill] sm:$0xff] %v3919_v14  ;;  %v3922_v13 = vld [vmem:[%s3390_s15 + $0x510] sm:$0xff]  ;;  %v3925_v8 = vld [vmem:[%s3390_s15 + $0x518] sm:$0xff] }
  0x5d   : > { %7607 = vst [vmem:[#allocation116_spill] sm:$0xff] %v3922_v13  ;;  %7608 = vst [vmem:[#allocation117_spill] sm:$0xff] %v3925_v8  ;;  %v3928_v25 = vld [vmem:[%s3390_s15 + $0x520] sm:$0xff]  ;;  %v3931_v24 = vld [vmem:[%s3390_s15 + $0x528] sm:$0xff] }
  0x5e   : > { %7609 = vst [vmem:[#allocation118_spill] sm:$0xff] %v3928_v25  ;;  %7610 = vst [vmem:[#allocation119_spill] sm:$0xff] %v3931_v24  ;;  %v3934_v23 = vld [vmem:[%s3390_s15 + $0x530] sm:$0xff]  ;;  %v3937_v15 = vld [vmem:[%s3390_s15 + $0x538] sm:$0xff] }
  0x5f   : > { %7611 = vst [vmem:[#allocation120_spill] sm:$0xff] %v3934_v23  ;;  %7612 = vst [vmem:[#allocation121_spill] sm:$0xff] %v3937_v15  ;;  %v3940_v14 = vld [vmem:[%s3390_s15 + $0x540] sm:$0xff]  ;;  %v3943_v13 = vld [vmem:[%s3390_s15 + $0x548] sm:$0xff] }
  0x60   : > { %7613 = vst [vmem:[#allocation122_spill] sm:$0xff] %v3940_v14  ;;  %7614 = vst [vmem:[#allocation123_spill] sm:$0xff] %v3943_v13  ;;  %v3946_v8 = vld [vmem:[%s3390_s15 + $0x550] sm:$0xff]  ;;  %v3949_v25 = vld [vmem:[%s3390_s15 + $0x558] sm:$0xff] }
  0x61   : > { %7615 = vst [vmem:[#allocation124_spill] sm:$0xff] %v3946_v8  ;;  %7616 = vst [vmem:[#allocation125_spill] sm:$0xff] %v3949_v25  ;;  %v3952_v24 = vld [vmem:[%s3390_s15 + $0x560] sm:$0xff]  ;;  %v3955_v23 = vld [vmem:[%s3390_s15 + $0x568] sm:$0xff] }
  0x62   : > { %7617 = vst [vmem:[#allocation126_spill] sm:$0xff] %v3952_v24  ;;  %7618 = vst [vmem:[#allocation127_spill] sm:$0xff] %v3955_v23  ;;  %v3958_v15 = vld [vmem:[%s3390_s15 + $0x570] sm:$0xff]  ;;  %v3961_v14 = vld [vmem:[%s3390_s15 + $0x578] sm:$0xff] }
  0x63   : > { %7619 = vst [vmem:[#allocation128_spill] sm:$0xff] %v3958_v15  ;;  %7620 = vst [vmem:[#allocation129_spill] sm:$0xff] %v3961_v14  ;;  %v3964_v13 = vld [vmem:[%s3390_s15 + $0x580] sm:$0xff]  ;;  %v3967_v8 = vld [vmem:[%s3390_s15 + $0x588] sm:$0xff] }
  0x64   : > { %7621 = vst [vmem:[#allocation130_spill] sm:$0xff] %v3964_v13  ;;  %7622 = vst [vmem:[#allocation131_spill] sm:$0xff] %v3967_v8  ;;  %v3970_v25 = vld [vmem:[%s3390_s15 + $0x590] sm:$0xff]  ;;  %v3973_v24 = vld [vmem:[%s3390_s15 + $0x598] sm:$0xff] }
  0x65   : > { %7623 = vst [vmem:[#allocation132_spill] sm:$0xff] %v3970_v25  ;;  %7624 = vst [vmem:[#allocation133_spill] sm:$0xff] %v3973_v24  ;;  %v3976_v23 = vld [vmem:[%s3390_s15 + $0x5a0] sm:$0xff]  ;;  %v3979_v15 = vld [vmem:[%s3390_s15 + $0x5a8] sm:$0xff] }
  0x66   : > { %7625 = vst [vmem:[#allocation134_spill] sm:$0xff] %v3976_v23  ;;  %7626 = vst [vmem:[#allocation135_spill] sm:$0xff] %v3979_v15  ;;  %v3982_v14 = vld [vmem:[%s3390_s15 + $0x5b0] sm:$0xff]  ;;  %v3985_v13 = vld [vmem:[%s3390_s15 + $0x5b8] sm:$0xff] }
  0x67   : > { %7627 = vst [vmem:[#allocation136_spill] sm:$0xff] %v3982_v14  ;;  %7628 = vst [vmem:[#allocation137_spill] sm:$0xff] %v3985_v13  ;;  %v3988_v8 = vld [vmem:[%s3390_s15 + $0x5c0] sm:$0xff]  ;;  %v3991_v25 = vld [vmem:[%s3390_s15 + $0x5c8] sm:$0xff] }
  0x68   : > { %7629 = vst [vmem:[#allocation138_spill] sm:$0xff] %v3988_v8  ;;  %7630 = vst [vmem:[#allocation139_spill] sm:$0xff] %v3991_v25  ;;  %v3994_v24 = vld [vmem:[%s3390_s15 + $0x5d0] sm:$0xff]  ;;  %v3997_v23 = vld [vmem:[%s3390_s15 + $0x5d8] sm:$0xff] }
  0x69   : > { %7631 = vst [vmem:[#allocation140_spill] sm:$0xff] %v3994_v24  ;;  %7632 = vst [vmem:[#allocation141_spill] sm:$0xff] %v3997_v23  ;;  %v4000_v15 = vld [vmem:[%s3390_s15 + $0x5e0] sm:$0xff]  ;;  %v4003_v14 = vld [vmem:[%s3390_s15 + $0x5e8] sm:$0xff] }
  0x6a   : > { %7633 = vst [vmem:[#allocation142_spill] sm:$0xff] %v4000_v15  ;;  %7634 = vst [vmem:[#allocation143_spill] sm:$0xff] %v4003_v14  ;;  %v4006_v13 = vld [vmem:[%s3390_s15 + $0x5f0] sm:$0xff]  ;;  %v4009_v8 = vld [vmem:[%s3390_s15 + $0x5f8] sm:$0xff] }
  0x6b   : > { %7635 = vst [vmem:[#allocation144_spill] sm:$0xff] %v4006_v13  ;;  %7636 = vst [vmem:[#allocation145_spill] sm:$0xff] %v4009_v8  ;;  %v4012_v25 = vld [vmem:[%s3390_s15 + $0x600] sm:$0xff]  ;;  %v4015_v24 = vld [vmem:[%s3390_s15 + $0x608] sm:$0xff] }
  0x6c   : > { %7637 = vst [vmem:[#allocation146_spill] sm:$0xff] %v4012_v25  ;;  %7638 = vst [vmem:[#allocation147_spill] sm:$0xff] %v4015_v24  ;;  %v4018_v23 = vld [vmem:[%s3390_s15 + $0x610] sm:$0xff]  ;;  %v4021_v15 = vld [vmem:[%s3390_s15 + $0x618] sm:$0xff] }
  0x6d   : > { %7639 = vst [vmem:[#allocation148_spill] sm:$0xff] %v4018_v23  ;;  %7640 = vst [vmem:[#allocation149_spill] sm:$0xff] %v4021_v15  ;;  %v4024_v14 = vld [vmem:[%s3390_s15 + $0x620] sm:$0xff]  ;;  %v4027_v13 = vld [vmem:[%s3390_s15 + $0x628] sm:$0xff] }
  0x6e   : > { %7641 = vst [vmem:[#allocation150_spill] sm:$0xff] %v4024_v14  ;;  %7642 = vst [vmem:[#allocation151_spill] sm:$0xff] %v4027_v13  ;;  %v4030_v8 = vld [vmem:[%s3390_s15 + $0x630] sm:$0xff]  ;;  %v4033_v25 = vld [vmem:[%s3390_s15 + $0x638] sm:$0xff] }
  0x6f   : > { %7643 = vst [vmem:[#allocation152_spill] sm:$0xff] %v4030_v8  ;;  %7644 = vst [vmem:[#allocation153_spill] sm:$0xff] %v4033_v25  ;;  %v4036_v24 = vld [vmem:[%s3390_s15 + $0x640] sm:$0xff]  ;;  %v4039_v23 = vld [vmem:[%s3390_s15 + $0x648] sm:$0xff] }
  0x70   : > { %7645 = vst [vmem:[#allocation154_spill] sm:$0xff] %v4036_v24  ;;  %7646 = vst [vmem:[#allocation155_spill] sm:$0xff] %v4039_v23  ;;  %v4042_v15 = vld [vmem:[%s3390_s15 + $0x650] sm:$0xff]  ;;  %v4045_v14 = vld [vmem:[%s3390_s15 + $0x658] sm:$0xff] }
  0x71   : > { %7647 = vst [vmem:[#allocation156_spill] sm:$0xff] %v4042_v15  ;;  %7648 = vst [vmem:[#allocation157_spill] sm:$0xff] %v4045_v14  ;;  %v4048_v13 = vld [vmem:[%s3390_s15 + $0x660] sm:$0xff]  ;;  %v4051_v8 = vld [vmem:[%s3390_s15 + $0x668] sm:$0xff] }
  0x72   : > { %7649 = vst [vmem:[#allocation158_spill] sm:$0xff] %v4048_v13  ;;  %7650 = vst [vmem:[#allocation159_spill] sm:$0xff] %v4051_v8  ;;  %v4054_v25 = vld [vmem:[%s3390_s15 + $0x670] sm:$0xff]  ;;  %v4057_v24 = vld [vmem:[%s3390_s15 + $0x678] sm:$0xff] }
  0x73   : > { %7651 = vst [vmem:[#allocation160_spill] sm:$0xff] %v4054_v25  ;;  %7652 = vst [vmem:[#allocation161_spill] sm:$0xff] %v4057_v24  ;;  %v4060_v23 = vld [vmem:[%s3390_s15 + $0x680] sm:$0xff]  ;;  %v4063_v15 = vld [vmem:[%s3390_s15 + $0x688] sm:$0xff] }
  0x74   : > { %7653 = vst [vmem:[#allocation162_spill] sm:$0xff] %v4060_v23  ;;  %7654 = vst [vmem:[#allocation163_spill] sm:$0xff] %v4063_v15  ;;  %v4066_v14 = vld [vmem:[%s3390_s15 + $0x690] sm:$0xff]  ;;  %v4069_v13 = vld [vmem:[%s3390_s15 + $0x698] sm:$0xff] }
  0x75   : > { %7655 = vst [vmem:[#allocation164_spill] sm:$0xff] %v4066_v14  ;;  %7656 = vst [vmem:[#allocation165_spill] sm:$0xff] %v4069_v13  ;;  %v4072_v8 = vld [vmem:[%s3390_s15 + $0x6a0] sm:$0xff]  ;;  %v4075_v25 = vld [vmem:[%s3390_s15 + $0x6a8] sm:$0xff] }
  0x76   : > { %7657 = vst [vmem:[#allocation166_spill] sm:$0xff] %v4072_v8  ;;  %7658 = vst [vmem:[#allocation167_spill] sm:$0xff] %v4075_v25  ;;  %v4078_v24 = vld [vmem:[%s3390_s15 + $0x6b0] sm:$0xff]  ;;  %v4081_v23 = vld [vmem:[%s3390_s15 + $0x6b8] sm:$0xff] }
  0x77   : > { %7659 = vst [vmem:[#allocation168_spill] sm:$0xff] %v4078_v24  ;;  %7660 = vst [vmem:[#allocation169_spill] sm:$0xff] %v4081_v23  ;;  %v4084_v15 = vld [vmem:[%s3390_s15 + $0x6c0] sm:$0xff]  ;;  %v4087_v14 = vld [vmem:[%s3390_s15 + $0x6c8] sm:$0xff] }
  0x78   : > { %7661 = vst [vmem:[#allocation170_spill] sm:$0xff] %v4084_v15  ;;  %7662 = vst [vmem:[#allocation171_spill] sm:$0xff] %v4087_v14  ;;  %v4090_v13 = vld [vmem:[%s3390_s15 + $0x6d0] sm:$0xff]  ;;  %v4093_v8 = vld [vmem:[%s3390_s15 + $0x6d8] sm:$0xff] }
  0x79   : > { %7663 = vst [vmem:[#allocation172_spill] sm:$0xff] %v4090_v13  ;;  %7664 = vst [vmem:[#allocation173_spill] sm:$0xff] %v4093_v8  ;;  %v4096_v25 = vld [vmem:[%s3390_s15 + $0x6e0] sm:$0xff]  ;;  %v4099_v24 = vld [vmem:[%s3390_s15 + $0x6e8] sm:$0xff] }
  0x7a   : > { %7665 = vst [vmem:[#allocation174_spill] sm:$0xff] %v4096_v25  ;;  %7666 = vst [vmem:[#allocation175_spill] sm:$0xff] %v4099_v24  ;;  %v4102_v23 = vld [vmem:[%s3390_s15 + $0x6f0] sm:$0xff]  ;;  %v4105_v15 = vld [vmem:[%s3390_s15 + $0x6f8] sm:$0xff] }
  0x7b   : > { %7667 = vst [vmem:[#allocation176_spill] sm:$0xff] %v4102_v23  ;;  %7668 = vst [vmem:[#allocation177_spill] sm:$0xff] %v4105_v15  ;;  %v4108_v14 = vld [vmem:[%s3390_s15 + $0x700] sm:$0xff]  ;;  %v4111_v13 = vld [vmem:[%s3390_s15 + $0x708] sm:$0xff] }
  0x7c   : > { %7669 = vst [vmem:[#allocation178_spill] sm:$0xff] %v4108_v14  ;;  %7670 = vst [vmem:[#allocation179_spill] sm:$0xff] %v4111_v13  ;;  %v4114_v8 = vld [vmem:[%s3390_s15 + $0x710] sm:$0xff]  ;;  %v4117_v25 = vld [vmem:[%s3390_s15 + $0x718] sm:$0xff] }
  0x7d   : > { %7671 = vst [vmem:[#allocation180_spill] sm:$0xff] %v4114_v8  ;;  %7672 = vst [vmem:[#allocation181_spill] sm:$0xff] %v4117_v25  ;;  %v4120_v24 = vld [vmem:[%s3390_s15 + $0x720] sm:$0xff]  ;;  %v4123_v23 = vld [vmem:[%s3390_s15 + $0x728] sm:$0xff] }
  0x7e   : > { %7673 = vst [vmem:[#allocation182_spill] sm:$0xff] %v4120_v24  ;;  %7674 = vst [vmem:[#allocation183_spill] sm:$0xff] %v4123_v23  ;;  %v4126_v15 = vld [vmem:[%s3390_s15 + $0x730] sm:$0xff]  ;;  %v4129_v14 = vld [vmem:[%s3390_s15 + $0x738] sm:$0xff] }
  0x7f   : > { %7675 = vst [vmem:[#allocation184_spill] sm:$0xff] %v4126_v15  ;;  %7676 = vst [vmem:[#allocation185_spill] sm:$0xff] %v4129_v14  ;;  %v4132_v13 = vld [vmem:[%s3390_s15 + $0x740] sm:$0xff]  ;;  %v4135_v8 = vld [vmem:[%s3390_s15 + $0x748] sm:$0xff] }
  0x80   : > { %7677 = vst [vmem:[#allocation186_spill] sm:$0xff] %v4132_v13  ;;  %7678 = vst [vmem:[#allocation187_spill] sm:$0xff] %v4135_v8  ;;  %v4138_v25 = vld [vmem:[%s3390_s15 + $0x750] sm:$0xff]  ;;  %v4141_v24 = vld [vmem:[%s3390_s15 + $0x758] sm:$0xff] }
  0x81   : > { %7679 = vst [vmem:[#allocation188_spill] sm:$0xff] %v4138_v25  ;;  %7680 = vst [vmem:[#allocation189_spill] sm:$0xff] %v4141_v24  ;;  %v4144_v23 = vld [vmem:[%s3390_s15 + $0x760] sm:$0xff]  ;;  %v4147_v15 = vld [vmem:[%s3390_s15 + $0x768] sm:$0xff] }
  0x82   : > { %7681 = vst [vmem:[#allocation190_spill] sm:$0xff] %v4144_v23  ;;  %7682 = vst [vmem:[#allocation191_spill] sm:$0xff] %v4147_v15  ;;  %v4150_v14 = vld [vmem:[%s3390_s15 + $0x770] sm:$0xff]  ;;  %v4153_v13 = vld [vmem:[%s3390_s15 + $0x778] sm:$0xff] }
  0x83   : > { %7683 = vst [vmem:[#allocation192_spill] sm:$0xff] %v4150_v14  ;;  %7684 = vst [vmem:[#allocation193_spill] sm:$0xff] %v4153_v13  ;;  %v4156_v8 = vld [vmem:[%s3390_s15 + $0x780] sm:$0xff]  ;;  %v4159_v25 = vld [vmem:[%s3390_s15 + $0x788] sm:$0xff] }
  0x84   : > { %7685 = vst [vmem:[#allocation194_spill] sm:$0xff] %v4156_v8  ;;  %7686 = vst [vmem:[#allocation195_spill] sm:$0xff] %v4159_v25  ;;  %v4162_v24 = vld [vmem:[%s3390_s15 + $0x790] sm:$0xff]  ;;  %v4165_v23 = vld [vmem:[%s3390_s15 + $0x798] sm:$0xff] }
  0x85   : > { %7687 = vst [vmem:[#allocation196_spill] sm:$0xff] %v4162_v24  ;;  %7688 = vst [vmem:[#allocation197_spill] sm:$0xff] %v4165_v23  ;;  %v4168_v15 = vld [vmem:[%s3390_s15 + $0x7a0] sm:$0xff]  ;;  %v4171_v14 = vld [vmem:[%s3390_s15 + $0x7a8] sm:$0xff] }
  0x86   : > { %7689 = vst [vmem:[#allocation198_spill] sm:$0xff] %v4168_v15  ;;  %7690 = vst [vmem:[#allocation199_spill] sm:$0xff] %v4171_v14  ;;  %v4174_v13 = vld [vmem:[%s3390_s15 + $0x7b0] sm:$0xff]  ;;  %v4177_v8 = vld [vmem:[%s3390_s15 + $0x7b8] sm:$0xff] }
  0x87   : > { %7691 = vst [vmem:[#allocation200_spill] sm:$0xff] %v4174_v13  ;;  %7692 = vst [vmem:[#allocation201_spill] sm:$0xff] %v4177_v8  ;;  %v4180_v25 = vld [vmem:[%s3390_s15 + $0x7c0] sm:$0xff]  ;;  %v4183_v24 = vld [vmem:[%s3390_s15 + $0x7c8] sm:$0xff] }
  0x88   : > { %7693 = vst [vmem:[#allocation202_spill] sm:$0xff] %v4180_v25  ;;  %7694 = vst [vmem:[#allocation203_spill] sm:$0xff] %v4183_v24  ;;  %v4186_v23 = vld [vmem:[%s3390_s15 + $0x7d0] sm:$0xff]  ;;  %v4189_v15 = vld [vmem:[%s3390_s15 + $0x7d8] sm:$0xff] }
  0x89   : > { %7695 = vst [vmem:[#allocation204_spill] sm:$0xff] %v4186_v23  ;;  %7696 = vst [vmem:[#allocation205_spill] sm:$0xff] %v4189_v15  ;;  %v4192_v14 = vld [vmem:[%s3390_s15 + $0x7e0] sm:$0xff]  ;;  %v4195_v13 = vld [vmem:[%s3390_s15 + $0x7e8] sm:$0xff] }
  0x8a   : > { %7697 = vst [vmem:[#allocation206_spill] sm:$0xff] %v4192_v14  ;;  %7698 = vst [vmem:[#allocation207_spill] sm:$0xff] %v4195_v13  ;;  %v4198_v8 = vld [vmem:[%s3390_s15 + $0x7f0] sm:$0xff]  ;;  %v4201_v25 = vld [vmem:[%s3390_s15 + $0x7f8] sm:$0xff] }
  0x8b   : > { %7699 = vst [vmem:[#allocation208_spill] sm:$0xff] %v4198_v8  ;;  %7700 = vst [vmem:[#allocation209_spill] sm:$0xff] %v4201_v25  ;;  %v4204_v24 = vld [vmem:[%s3390_s15 + $0x800] sm:$0xff]  ;;  %v4207_v23 = vld [vmem:[%s3390_s15 + $0x808] sm:$0xff] }
  0x8c   : > { %7701 = vst [vmem:[#allocation210_spill] sm:$0xff] %v4204_v24  ;;  %7702 = vst [vmem:[#allocation211_spill] sm:$0xff] %v4207_v23  ;;  %v4210_v15 = vld [vmem:[%s3390_s15 + $0x810] sm:$0xff]  ;;  %v4213_v14 = vld [vmem:[%s3390_s15 + $0x818] sm:$0xff] }
  0x8d   : > { %7703 = vst [vmem:[#allocation212_spill] sm:$0xff] %v4210_v15  ;;  %7704 = vst [vmem:[#allocation213_spill] sm:$0xff] %v4213_v14  ;;  %v4216_v13 = vld [vmem:[%s3390_s15 + $0x820] sm:$0xff]  ;;  %v4219_v8 = vld [vmem:[%s3390_s15 + $0x828] sm:$0xff] }
  0x8e   : > { %7705 = vst [vmem:[#allocation214_spill] sm:$0xff] %v4216_v13  ;;  %7706 = vst [vmem:[#allocation215_spill] sm:$0xff] %v4219_v8  ;;  %v4222_v25 = vld [vmem:[%s3390_s15 + $0x830] sm:$0xff]  ;;  %v4225_v24 = vld [vmem:[%s3390_s15 + $0x838] sm:$0xff] }
  0x8f   : > { %7707 = vst [vmem:[#allocation216_spill] sm:$0xff] %v4222_v25  ;;  %7708 = vst [vmem:[#allocation217_spill] sm:$0xff] %v4225_v24  ;;  %v4228_v23 = vld [vmem:[%s3390_s15 + $0x840] sm:$0xff]  ;;  %v4231_v15 = vld [vmem:[%s3390_s15 + $0x848] sm:$0xff] }
  0x90   : > { %7709 = vst [vmem:[#allocation218_spill] sm:$0xff] %v4228_v23  ;;  %7710 = vst [vmem:[#allocation219_spill] sm:$0xff] %v4231_v15  ;;  %v4234_v14 = vld [vmem:[%s3390_s15 + $0x850] sm:$0xff]  ;;  %v4237_v13 = vld [vmem:[%s3390_s15 + $0x858] sm:$0xff] }
  0x91   : > { %7711 = vst [vmem:[#allocation220_spill] sm:$0xff] %v4234_v14  ;;  %7712 = vst [vmem:[#allocation221_spill] sm:$0xff] %v4237_v13  ;;  %v4240_v8 = vld [vmem:[%s3390_s15 + $0x860] sm:$0xff]  ;;  %v4243_v25 = vld [vmem:[%s3390_s15 + $0x868] sm:$0xff] }
  0x92   : > { %7713 = vst [vmem:[#allocation222_spill] sm:$0xff] %v4240_v8  ;;  %7714 = vst [vmem:[#allocation223_spill] sm:$0xff] %v4243_v25  ;;  %v4246_v24 = vld [vmem:[%s3390_s15 + $0x870] sm:$0xff]  ;;  %v4249_v23 = vld [vmem:[%s3390_s15 + $0x878] sm:$0xff] }
  0x93   : > { %7715 = vst [vmem:[#allocation224_spill] sm:$0xff] %v4246_v24  ;;  %7716 = vst [vmem:[#allocation225_spill] sm:$0xff] %v4249_v23  ;;  %v4252_v15 = vld [vmem:[%s3390_s15 + $0x880] sm:$0xff]  ;;  %v4255_v14 = vld [vmem:[%s3390_s15 + $0x888] sm:$0xff] }
  0x94   : > { %7717 = vst [vmem:[#allocation226_spill] sm:$0xff] %v4252_v15  ;;  %7718 = vst [vmem:[#allocation227_spill] sm:$0xff] %v4255_v14  ;;  %v4258_v13 = vld [vmem:[%s3390_s15 + $0x890] sm:$0xff]  ;;  %v4261_v8 = vld [vmem:[%s3390_s15 + $0x898] sm:$0xff] }
  0x95   : > { %7719 = vst [vmem:[#allocation228_spill] sm:$0xff] %v4258_v13  ;;  %7720 = vst [vmem:[#allocation229_spill] sm:$0xff] %v4261_v8  ;;  %v4264_v25 = vld [vmem:[%s3390_s15 + $0x8a0] sm:$0xff]  ;;  %v4267_v24 = vld [vmem:[%s3390_s15 + $0x8a8] sm:$0xff] }
  0x96   : > { %7721 = vst [vmem:[#allocation230_spill] sm:$0xff] %v4264_v25  ;;  %7722 = vst [vmem:[#allocation231_spill] sm:$0xff] %v4267_v24  ;;  %v4270_v23 = vld [vmem:[%s3390_s15 + $0x8b0] sm:$0xff]  ;;  %v4273_v15 = vld [vmem:[%s3390_s15 + $0x8b8] sm:$0xff] }
  0x97   : > { %7723 = vst [vmem:[#allocation232_spill] sm:$0xff] %v4270_v23  ;;  %7724 = vst [vmem:[#allocation233_spill] sm:$0xff] %v4273_v15  ;;  %v4276_v14 = vld [vmem:[%s3390_s15 + $0x8c0] sm:$0xff]  ;;  %v4279_v13 = vld [vmem:[%s3390_s15 + $0x8c8] sm:$0xff] }
  0x98   : > { %7725 = vst [vmem:[#allocation234_spill] sm:$0xff] %v4276_v14  ;;  %7726 = vst [vmem:[#allocation235_spill] sm:$0xff] %v4279_v13  ;;  %v4282_v8 = vld [vmem:[%s3390_s15 + $0x8d0] sm:$0xff]  ;;  %v4285_v25 = vld [vmem:[%s3390_s15 + $0x8d8] sm:$0xff] }
  0x99   : > { %7727 = vst [vmem:[#allocation236_spill] sm:$0xff] %v4282_v8  ;;  %7728 = vst [vmem:[#allocation237_spill] sm:$0xff] %v4285_v25  ;;  %v4288_v24 = vld [vmem:[%s3390_s15 + $0x8e0] sm:$0xff]  ;;  %v4291_v23 = vld [vmem:[%s3390_s15 + $0x8e8] sm:$0xff] }
  0x9a   : > { %7729 = vst [vmem:[#allocation238_spill] sm:$0xff] %v4288_v24  ;;  %7730 = vst [vmem:[#allocation239_spill] sm:$0xff] %v4291_v23  ;;  %v4294_v15 = vld [vmem:[%s3390_s15 + $0x8f0] sm:$0xff]  ;;  %v4297_v14 = vld [vmem:[%s3390_s15 + $0x8f8] sm:$0xff] }
  0x9b   : > { %7731 = vst [vmem:[#allocation240_spill] sm:$0xff] %v4294_v15  ;;  %7732 = vst [vmem:[#allocation241_spill] sm:$0xff] %v4297_v14  ;;  %v4300_v13 = vld [vmem:[%s3390_s15 + $0x900] sm:$0xff]  ;;  %v4303_v8 = vld [vmem:[%s3390_s15 + $0x908] sm:$0xff] }
  0x9c   : > { %7733 = vst [vmem:[#allocation242_spill] sm:$0xff] %v4300_v13  ;;  %7734 = vst [vmem:[#allocation243_spill] sm:$0xff] %v4303_v8  ;;  %v4306_v25 = vld [vmem:[%s3390_s15 + $0x910] sm:$0xff]  ;;  %v4309_v24 = vld [vmem:[%s3390_s15 + $0x918] sm:$0xff] }
  0x9d   : > { %7735 = vst [vmem:[#allocation244_spill] sm:$0xff] %v4306_v25  ;;  %7736 = vst [vmem:[#allocation245_spill] sm:$0xff] %v4309_v24  ;;  %v4312_v23 = vld [vmem:[%s3390_s15 + $0x920] sm:$0xff]  ;;  %v4315_v15 = vld [vmem:[%s3390_s15 + $0x928] sm:$0xff] }
  0x9e   : > { %7737 = vst [vmem:[#allocation246_spill] sm:$0xff] %v4312_v23  ;;  %7738 = vst [vmem:[#allocation247_spill] sm:$0xff] %v4315_v15  ;;  %v4318_v14 = vld [vmem:[%s3390_s15 + $0x930] sm:$0xff]  ;;  %v4321_v13 = vld [vmem:[%s3390_s15 + $0x938] sm:$0xff] }
  0x9f   : > { %7739 = vst [vmem:[#allocation248_spill] sm:$0xff] %v4318_v14  ;;  %7740 = vst [vmem:[#allocation249_spill] sm:$0xff] %v4321_v13  ;;  %v4324_v8 = vld [vmem:[%s3390_s15 + $0x940] sm:$0xff]  ;;  %v4327_v25 = vld [vmem:[%s3390_s15 + $0x948] sm:$0xff] }
  0xa0   : > { %7741 = vst [vmem:[#allocation250_spill] sm:$0xff] %v4324_v8  ;;  %7742 = vst [vmem:[#allocation251_spill] sm:$0xff] %v4327_v25  ;;  %v4330_v24 = vld [vmem:[%s3390_s15 + $0x950] sm:$0xff]  ;;  %v4333_v23 = vld [vmem:[%s3390_s15 + $0x958] sm:$0xff] }
  0xa1   : > { %7743 = vst [vmem:[#allocation252_spill] sm:$0xff] %v4330_v24  ;;  %7744 = vst [vmem:[#allocation253_spill] sm:$0xff] %v4333_v23  ;;  %v4336_v15 = vld [vmem:[%s3390_s15 + $0x960] sm:$0xff]  ;;  %v4339_v14 = vld [vmem:[%s3390_s15 + $0x968] sm:$0xff] }
  0xa2   : > { %7745 = vst [vmem:[#allocation254_spill] sm:$0xff] %v4336_v15  ;;  %7746 = vst [vmem:[#allocation255_spill] sm:$0xff] %v4339_v14  ;;  %v4342_v13 = vld [vmem:[%s3390_s15 + $0x970] sm:$0xff]  ;;  %v4345_v8 = vld [vmem:[%s3390_s15 + $0x978] sm:$0xff] }
  0xa3   : > { %7747 = vst [vmem:[#allocation256_spill] sm:$0xff] %v4342_v13  ;;  %7748 = vst [vmem:[#allocation257_spill] sm:$0xff] %v4345_v8  ;;  %v4348_v25 = vld [vmem:[%s3390_s15 + $0x980] sm:$0xff]  ;;  %v4351_v24 = vld [vmem:[%s3390_s15 + $0x988] sm:$0xff] }
  0xa4   : > { %7749 = vst [vmem:[#allocation258_spill] sm:$0xff] %v4348_v25  ;;  %7750 = vst [vmem:[#allocation259_spill] sm:$0xff] %v4351_v24  ;;  %v4354_v23 = vld [vmem:[%s3390_s15 + $0x990] sm:$0xff]  ;;  %v4357_v15 = vld [vmem:[%s3390_s15 + $0x998] sm:$0xff] }
  0xa5   : > { %7751 = vst [vmem:[#allocation260_spill] sm:$0xff] %v4354_v23  ;;  %7752 = vst [vmem:[#allocation261_spill] sm:$0xff] %v4357_v15  ;;  %v4360_v14 = vld [vmem:[%s3390_s15 + $0x9a0] sm:$0xff]  ;;  %v4363_v13 = vld [vmem:[%s3390_s15 + $0x9a8] sm:$0xff] }
  0xa6   : > { %7753 = vst [vmem:[#allocation262_spill] sm:$0xff] %v4360_v14  ;;  %7754 = vst [vmem:[#allocation263_spill] sm:$0xff] %v4363_v13  ;;  %v4366_v8 = vld [vmem:[%s3390_s15 + $0x9b0] sm:$0xff]  ;;  %v4369_v25 = vld [vmem:[%s3390_s15 + $0x9b8] sm:$0xff] }
  0xa7   : > { %7755 = vst [vmem:[#allocation264_spill] sm:$0xff] %v4366_v8  ;;  %7756 = vst [vmem:[#allocation265_spill] sm:$0xff] %v4369_v25  ;;  %v4372_v24 = vld [vmem:[%s3390_s15 + $0x9c0] sm:$0xff]  ;;  %v4375_v23 = vld [vmem:[%s3390_s15 + $0x9c8] sm:$0xff] }
  0xa8   : > { %7757 = vst [vmem:[#allocation266_spill] sm:$0xff] %v4372_v24  ;;  %7758 = vst [vmem:[#allocation267_spill] sm:$0xff] %v4375_v23  ;;  %v4378_v15 = vld [vmem:[%s3390_s15 + $0x9d0] sm:$0xff]  ;;  %v4381_v14 = vld [vmem:[%s3390_s15 + $0x9d8] sm:$0xff] }
  0xa9   : > { %7759 = vst [vmem:[#allocation268_spill] sm:$0xff] %v4378_v15  ;;  %7760 = vst [vmem:[#allocation269_spill] sm:$0xff] %v4381_v14  ;;  %v4384_v13 = vld [vmem:[%s3390_s15 + $0x9e0] sm:$0xff]  ;;  %v4387_v8 = vld [vmem:[%s3390_s15 + $0x9e8] sm:$0xff] }
  0xaa   : > { %7761 = vst [vmem:[#allocation270_spill] sm:$0xff] %v4384_v13  ;;  %7762 = vst [vmem:[#allocation271_spill] sm:$0xff] %v4387_v8  ;;  %v4390_v25 = vld [vmem:[%s3390_s15 + $0x9f0] sm:$0xff]  ;;  %v4393_v24 = vld [vmem:[%s3390_s15 + $0x9f8] sm:$0xff] }
  0xab   : > { %7763 = vst [vmem:[#allocation272_spill] sm:$0xff] %v4390_v25  ;;  %7764 = vst [vmem:[#allocation273_spill] sm:$0xff] %v4393_v24  ;;  %v4396_v23 = vld [vmem:[%s3390_s15 + $0xa00] sm:$0xff]  ;;  %v4399_v15 = vld [vmem:[%s3390_s15 + $0xa08] sm:$0xff] }
  0xac   : > { %7765 = vst [vmem:[#allocation274_spill] sm:$0xff] %v4396_v23  ;;  %7766 = vst [vmem:[#allocation275_spill] sm:$0xff] %v4399_v15  ;;  %v4402_v14 = vld [vmem:[%s3390_s15 + $0xa10] sm:$0xff]  ;;  %v4405_v13 = vld [vmem:[%s3390_s15 + $0xa18] sm:$0xff] }
  0xad   : > { %7767 = vst [vmem:[#allocation276_spill] sm:$0xff] %v4402_v14  ;;  %7768 = vst [vmem:[#allocation277_spill] sm:$0xff] %v4405_v13  ;;  %v4408_v8 = vld [vmem:[%s3390_s15 + $0xa20] sm:$0xff]  ;;  %v4411_v25 = vld [vmem:[%s3390_s15 + $0xa28] sm:$0xff] }
  0xae   : > { %7769 = vst [vmem:[#allocation278_spill] sm:$0xff] %v4408_v8  ;;  %7770 = vst [vmem:[#allocation279_spill] sm:$0xff] %v4411_v25  ;;  %v4414_v24 = vld [vmem:[%s3390_s15 + $0xa30] sm:$0xff]  ;;  %v4417_v23 = vld [vmem:[%s3390_s15 + $0xa38] sm:$0xff] }
  0xaf   : > { %7771 = vst [vmem:[#allocation280_spill] sm:$0xff] %v4414_v24  ;;  %7772 = vst [vmem:[#allocation281_spill] sm:$0xff] %v4417_v23  ;;  %v4420_v15 = vld [vmem:[%s3390_s15 + $0xa40] sm:$0xff]  ;;  %v4423_v14 = vld [vmem:[%s3390_s15 + $0xa48] sm:$0xff] }
  0xb0   : > { %7773 = vst [vmem:[#allocation282_spill] sm:$0xff] %v4420_v15  ;;  %7774 = vst [vmem:[#allocation283_spill] sm:$0xff] %v4423_v14  ;;  %v4426_v13 = vld [vmem:[%s3390_s15 + $0xa50] sm:$0xff]  ;;  %v4429_v8 = vld [vmem:[%s3390_s15 + $0xa58] sm:$0xff] }
  0xb1   : > { %7775 = vst [vmem:[#allocation284_spill] sm:$0xff] %v4426_v13  ;;  %7776 = vst [vmem:[#allocation285_spill] sm:$0xff] %v4429_v8  ;;  %v4432_v25 = vld [vmem:[%s3390_s15 + $0xa60] sm:$0xff]  ;;  %v4435_v24 = vld [vmem:[%s3390_s15 + $0xa68] sm:$0xff] }
  0xb2   : > { %7777 = vst [vmem:[#allocation286_spill] sm:$0xff] %v4432_v25  ;;  %7778 = vst [vmem:[#allocation287_spill] sm:$0xff] %v4435_v24  ;;  %v4438_v23 = vld [vmem:[%s3390_s15 + $0xa70] sm:$0xff]  ;;  %v4441_v15 = vld [vmem:[%s3390_s15 + $0xa78] sm:$0xff] }
  0xb3   : > { %7779 = vst [vmem:[#allocation288_spill] sm:$0xff] %v4438_v23  ;;  %7780 = vst [vmem:[#allocation289_spill] sm:$0xff] %v4441_v15  ;;  %v4444_v14 = vld [vmem:[%s3390_s15 + $0xa80] sm:$0xff]  ;;  %v4447_v13 = vld [vmem:[%s3390_s15 + $0xa88] sm:$0xff] }
  0xb4   : > { %7781 = vst [vmem:[#allocation290_spill] sm:$0xff] %v4444_v14  ;;  %7782 = vst [vmem:[#allocation291_spill] sm:$0xff] %v4447_v13  ;;  %v4450_v8 = vld [vmem:[%s3390_s15 + $0xa90] sm:$0xff]  ;;  %v4453_v25 = vld [vmem:[%s3390_s15 + $0xa98] sm:$0xff] }
  0xb5   : > { %7783 = vst [vmem:[#allocation292_spill] sm:$0xff] %v4450_v8  ;;  %7784 = vst [vmem:[#allocation293_spill] sm:$0xff] %v4453_v25  ;;  %v4456_v24 = vld [vmem:[%s3390_s15 + $0xaa0] sm:$0xff]  ;;  %v4459_v23 = vld [vmem:[%s3390_s15 + $0xaa8] sm:$0xff] }
  0xb6   : > { %7785 = vst [vmem:[#allocation294_spill] sm:$0xff] %v4456_v24  ;;  %7786 = vst [vmem:[#allocation295_spill] sm:$0xff] %v4459_v23  ;;  %v4462_v15 = vld [vmem:[%s3390_s15 + $0xab0] sm:$0xff]  ;;  %v4465_v14 = vld [vmem:[%s3390_s15 + $0xab8] sm:$0xff] }
  0xb7   : > { %7787 = vst [vmem:[#allocation296_spill] sm:$0xff] %v4462_v15  ;;  %7788 = vst [vmem:[#allocation297_spill] sm:$0xff] %v4465_v14  ;;  %v4468_v13 = vld [vmem:[%s3390_s15 + $0xac0] sm:$0xff]  ;;  %v4471_v8 = vld [vmem:[%s3390_s15 + $0xac8] sm:$0xff] }
  0xb8   : > { %7789 = vst [vmem:[#allocation298_spill] sm:$0xff] %v4468_v13  ;;  %7790 = vst [vmem:[#allocation299_spill] sm:$0xff] %v4471_v8  ;;  %v4474_v25 = vld [vmem:[%s3390_s15 + $0xad0] sm:$0xff]  ;;  %v4477_v24 = vld [vmem:[%s3390_s15 + $0xad8] sm:$0xff] }
  0xb9   : > { %7791 = vst [vmem:[#allocation300_spill] sm:$0xff] %v4474_v25  ;;  %7792 = vst [vmem:[#allocation301_spill] sm:$0xff] %v4477_v24  ;;  %v4480_v23 = vld [vmem:[%s3390_s15 + $0xae0] sm:$0xff]  ;;  %v4483_v15 = vld [vmem:[%s3390_s15 + $0xae8] sm:$0xff] }
  0xba   : > { %7793 = vst [vmem:[#allocation302_spill] sm:$0xff] %v4480_v23  ;;  %7794 = vst [vmem:[#allocation303_spill] sm:$0xff] %v4483_v15  ;;  %v4486_v14 = vld [vmem:[%s3390_s15 + $0xaf0] sm:$0xff]  ;;  %v4489_v13 = vld [vmem:[%s3390_s15 + $0xaf8] sm:$0xff] }
  0xbb   : > { %7795 = vst [vmem:[#allocation304_spill] sm:$0xff] %v4486_v14  ;;  %7796 = vst [vmem:[#allocation305_spill] sm:$0xff] %v4489_v13  ;;  %v4492_v8 = vld [vmem:[%s3390_s15 + $0xb00] sm:$0xff]  ;;  %v4495_v25 = vld [vmem:[%s3390_s15 + $0xb08] sm:$0xff] }
  0xbc   : > { %7797 = vst [vmem:[#allocation306_spill] sm:$0xff] %v4492_v8  ;;  %7798 = vst [vmem:[#allocation307_spill] sm:$0xff] %v4495_v25  ;;  %v4498_v24 = vld [vmem:[%s3390_s15 + $0xb10] sm:$0xff]  ;;  %v4501_v23 = vld [vmem:[%s3390_s15 + $0xb18] sm:$0xff] }
  0xbd   : > { %7799 = vst [vmem:[#allocation308_spill] sm:$0xff] %v4498_v24  ;;  %7800 = vst [vmem:[#allocation309_spill] sm:$0xff] %v4501_v23  ;;  %v4504_v15 = vld [vmem:[%s3390_s15 + $0xb20] sm:$0xff]  ;;  %v4507_v14 = vld [vmem:[%s3390_s15 + $0xb28] sm:$0xff] }
  0xbe   : > { %7801 = vst [vmem:[#allocation310_spill] sm:$0xff] %v4504_v15  ;;  %7802 = vst [vmem:[#allocation311_spill] sm:$0xff] %v4507_v14  ;;  %v4510_v13 = vld [vmem:[%s3390_s15 + $0xb30] sm:$0xff]  ;;  %v4513_v8 = vld [vmem:[%s3390_s15 + $0xb38] sm:$0xff] }
  0xbf   : > { %7803 = vst [vmem:[#allocation312_spill] sm:$0xff] %v4510_v13  ;;  %7804 = vst [vmem:[#allocation313_spill] sm:$0xff] %v4513_v8  ;;  %v4516_v25 = vld [vmem:[%s3390_s15 + $0xb40] sm:$0xff]  ;;  %v4519_v24 = vld [vmem:[%s3390_s15 + $0xb48] sm:$0xff] }
  0xc0   : > { %7805 = vst [vmem:[#allocation314_spill] sm:$0xff] %v4516_v25  ;;  %7806 = vst [vmem:[#allocation315_spill] sm:$0xff] %v4519_v24  ;;  %v4522_v23 = vld [vmem:[%s3390_s15 + $0xb50] sm:$0xff]  ;;  %v4525_v15 = vld [vmem:[%s3390_s15 + $0xb58] sm:$0xff] }
  0xc1   : > { %7807 = vst [vmem:[#allocation316_spill] sm:$0xff] %v4522_v23  ;;  %7808 = vst [vmem:[#allocation317_spill] sm:$0xff] %v4525_v15  ;;  %v4528_v14 = vld [vmem:[%s3390_s15 + $0xb60] sm:$0xff]  ;;  %v4531_v13 = vld [vmem:[%s3390_s15 + $0xb68] sm:$0xff] }
  0xc2   : > { %7809 = vst [vmem:[#allocation318_spill] sm:$0xff] %v4528_v14  ;;  %7810 = vst [vmem:[#allocation319_spill] sm:$0xff] %v4531_v13  ;;  %v4534_v8 = vld [vmem:[%s3390_s15 + $0xb70] sm:$0xff]  ;;  %v4537_v25 = vld [vmem:[%s3390_s15 + $0xb78] sm:$0xff] }
  0xc3   : > { %7811 = vst [vmem:[#allocation320_spill] sm:$0xff] %v4534_v8  ;;  %7812 = vst [vmem:[#allocation321_spill] sm:$0xff] %v4537_v25  ;;  %v4540_v24 = vld [vmem:[%s3390_s15 + $0xb80] sm:$0xff]  ;;  %v4543_v23 = vld [vmem:[%s3390_s15 + $0xb88] sm:$0xff] }
  0xc4   : > { %7813 = vst [vmem:[#allocation322_spill] sm:$0xff] %v4540_v24  ;;  %7814 = vst [vmem:[#allocation323_spill] sm:$0xff] %v4543_v23  ;;  %v4546_v15 = vld [vmem:[%s3390_s15 + $0xb90] sm:$0xff]  ;;  %v4549_v14 = vld [vmem:[%s3390_s15 + $0xb98] sm:$0xff] }
  0xc5   : > { %7815 = vst [vmem:[#allocation324_spill] sm:$0xff] %v4546_v15  ;;  %7816 = vst [vmem:[#allocation325_spill] sm:$0xff] %v4549_v14  ;;  %v4552_v13 = vld [vmem:[%s3390_s15 + $0xba0] sm:$0xff]  ;;  %v4555_v8 = vld [vmem:[%s3390_s15 + $0xba8] sm:$0xff] }
  0xc6   : > { %7817 = vst [vmem:[#allocation326_spill] sm:$0xff] %v4552_v13  ;;  %7818 = vst [vmem:[#allocation327_spill] sm:$0xff] %v4555_v8  ;;  %v4558_v25 = vld [vmem:[%s3390_s15 + $0xbb0] sm:$0xff]  ;;  %v4561_v24 = vld [vmem:[%s3390_s15 + $0xbb8] sm:$0xff] }
  0xc7   : > { %7819 = vst [vmem:[#allocation328_spill] sm:$0xff] %v4558_v25  ;;  %7820 = vst [vmem:[#allocation329_spill] sm:$0xff] %v4561_v24  ;;  %v4564_v23 = vld [vmem:[%s3390_s15 + $0xbc0] sm:$0xff]  ;;  %v4567_v15 = vld [vmem:[%s3390_s15 + $0xbc8] sm:$0xff] }
  0xc8   : > { %7821 = vst [vmem:[#allocation330_spill] sm:$0xff] %v4564_v23  ;;  %7822 = vst [vmem:[#allocation331_spill] sm:$0xff] %v4567_v15  ;;  %v4570_v14 = vld [vmem:[%s3390_s15 + $0xbd0] sm:$0xff]  ;;  %v4573_v13 = vld [vmem:[%s3390_s15 + $0xbd8] sm:$0xff] }
  0xc9   : > { %7823 = vst [vmem:[#allocation332_spill] sm:$0xff] %v4570_v14  ;;  %7824 = vst [vmem:[#allocation333_spill] sm:$0xff] %v4573_v13  ;;  %v4576_v8 = vld [vmem:[%s3390_s15 + $0xbe0] sm:$0xff]  ;;  %v4579_v25 = vld [vmem:[%s3390_s15 + $0xbe8] sm:$0xff] }
  0xca   : > { %7825 = vst [vmem:[#allocation334_spill] sm:$0xff] %v4576_v8  ;;  %7826 = vst [vmem:[#allocation335_spill] sm:$0xff] %v4579_v25  ;;  %v4582_v24 = vld [vmem:[%s3390_s15 + $0xbf0] sm:$0xff]  ;;  %v4585_v23 = vld [vmem:[%s3390_s15 + $0xbf8] sm:$0xff] }
  0xcb   : > { %7827 = vst [vmem:[#allocation336_spill] sm:$0xff] %v4582_v24  ;;  %7828 = vst [vmem:[#allocation337_spill] sm:$0xff] %v4585_v23  ;;  %v4588_v15 = vld [vmem:[%s3390_s15 + $0xc00] sm:$0xff]  ;;  %v4591_v14 = vld [vmem:[%s3390_s15 + $0xc08] sm:$0xff] }
  0xcc   : > { %7829 = vst [vmem:[#allocation338_spill] sm:$0xff] %v4588_v15  ;;  %7830 = vst [vmem:[#allocation339_spill] sm:$0xff] %v4591_v14  ;;  %v4594_v13 = vld [vmem:[%s3390_s15 + $0xc10] sm:$0xff]  ;;  %v4597_v8 = vld [vmem:[%s3390_s15 + $0xc18] sm:$0xff] }
  0xcd   : > { %7831 = vst [vmem:[#allocation340_spill] sm:$0xff] %v4594_v13  ;;  %7832 = vst [vmem:[#allocation341_spill] sm:$0xff] %v4597_v8  ;;  %v4600_v25 = vld [vmem:[%s3390_s15 + $0xc20] sm:$0xff]  ;;  %v4603_v24 = vld [vmem:[%s3390_s15 + $0xc28] sm:$0xff] }
  0xce   : > { %7833 = vst [vmem:[#allocation342_spill] sm:$0xff] %v4600_v25  ;;  %7834 = vst [vmem:[#allocation343_spill] sm:$0xff] %v4603_v24  ;;  %v4606_v23 = vld [vmem:[%s3390_s15 + $0xc30] sm:$0xff]  ;;  %v4609_v15 = vld [vmem:[%s3390_s15 + $0xc38] sm:$0xff] }
  0xcf   : > { %7835 = vst [vmem:[#allocation344_spill] sm:$0xff] %v4606_v23  ;;  %7836 = vst [vmem:[#allocation345_spill] sm:$0xff] %v4609_v15  ;;  %v4612_v14 = vld [vmem:[%s3390_s15 + $0xc40] sm:$0xff]  ;;  %v4615_v13 = vld [vmem:[%s3390_s15 + $0xc48] sm:$0xff] }
  0xd0   : > { %7837 = vst [vmem:[#allocation346_spill] sm:$0xff] %v4612_v14  ;;  %7838 = vst [vmem:[#allocation347_spill] sm:$0xff] %v4615_v13  ;;  %v4618_v8 = vld [vmem:[%s3390_s15 + $0xc50] sm:$0xff]  ;;  %v4621_v25 = vld [vmem:[%s3390_s15 + $0xc58] sm:$0xff] }
  0xd1   : > { %7839 = vst [vmem:[#allocation348_spill] sm:$0xff] %v4618_v8  ;;  %7840 = vst [vmem:[#allocation349_spill] sm:$0xff] %v4621_v25  ;;  %v4624_v24 = vld [vmem:[%s3390_s15 + $0xc60] sm:$0xff]  ;;  %v4627_v23 = vld [vmem:[%s3390_s15 + $0xc68] sm:$0xff] }
  0xd2   : > { %7841 = vst [vmem:[#allocation350_spill] sm:$0xff] %v4624_v24  ;;  %7842 = vst [vmem:[#allocation351_spill] sm:$0xff] %v4627_v23  ;;  %v4630_v15 = vld [vmem:[%s3390_s15 + $0xc70] sm:$0xff]  ;;  %v4633_v14 = vld [vmem:[%s3390_s15 + $0xc78] sm:$0xff] }
  0xd3   : > { %7843 = vst [vmem:[#allocation352_spill] sm:$0xff] %v4630_v15  ;;  %7844 = vst [vmem:[#allocation353_spill] sm:$0xff] %v4633_v14  ;;  %v4636_v13 = vld [vmem:[%s3390_s15 + $0xc80] sm:$0xff]  ;;  %v4639_v8 = vld [vmem:[%s3390_s15 + $0xc88] sm:$0xff] }
  0xd4   : > { %7845 = vst [vmem:[#allocation354_spill] sm:$0xff] %v4636_v13  ;;  %7846 = vst [vmem:[#allocation355_spill] sm:$0xff] %v4639_v8  ;;  %v4642_v25 = vld [vmem:[%s3390_s15 + $0xc90] sm:$0xff]  ;;  %v4645_v24 = vld [vmem:[%s3390_s15 + $0xc98] sm:$0xff] }
  0xd5   : > { %7847 = vst [vmem:[#allocation356_spill] sm:$0xff] %v4642_v25  ;;  %7848 = vst [vmem:[#allocation357_spill] sm:$0xff] %v4645_v24  ;;  %v4648_v23 = vld [vmem:[%s3390_s15 + $0xca0] sm:$0xff]  ;;  %v4651_v15 = vld [vmem:[%s3390_s15 + $0xca8] sm:$0xff] }
  0xd6   : > { %7849 = vst [vmem:[#allocation358_spill] sm:$0xff] %v4648_v23  ;;  %7850 = vst [vmem:[#allocation359_spill] sm:$0xff] %v4651_v15  ;;  %v4654_v14 = vld [vmem:[%s3390_s15 + $0xcb0] sm:$0xff]  ;;  %v4657_v13 = vld [vmem:[%s3390_s15 + $0xcb8] sm:$0xff] }
  0xd7   : > { %7851 = vst [vmem:[#allocation360_spill] sm:$0xff] %v4654_v14  ;;  %7852 = vst [vmem:[#allocation361_spill] sm:$0xff] %v4657_v13  ;;  %v4660_v8 = vld [vmem:[%s3390_s15 + $0xcc0] sm:$0xff]  ;;  %v4663_v25 = vld [vmem:[%s3390_s15 + $0xcc8] sm:$0xff] }
  0xd8   : > { %7853 = vst [vmem:[#allocation362_spill] sm:$0xff] %v4660_v8  ;;  %7854 = vst [vmem:[#allocation363_spill] sm:$0xff] %v4663_v25  ;;  %v4666_v24 = vld [vmem:[%s3390_s15 + $0xcd0] sm:$0xff]  ;;  %v4669_v23 = vld [vmem:[%s3390_s15 + $0xcd8] sm:$0xff] }
  0xd9   : > { %7855 = vst [vmem:[#allocation364_spill] sm:$0xff] %v4666_v24  ;;  %7856 = vst [vmem:[#allocation365_spill] sm:$0xff] %v4669_v23  ;;  %v4672_v15 = vld [vmem:[%s3390_s15 + $0xce0] sm:$0xff]  ;;  %v4675_v14 = vld [vmem:[%s3390_s15 + $0xce8] sm:$0xff] }
  0xda   : > { %7857 = vst [vmem:[#allocation366_spill] sm:$0xff] %v4672_v15  ;;  %7858 = vst [vmem:[#allocation367_spill] sm:$0xff] %v4675_v14  ;;  %v4678_v13 = vld [vmem:[%s3390_s15 + $0xcf0] sm:$0xff]  ;;  %v4681_v8 = vld [vmem:[%s3390_s15 + $0xcf8] sm:$0xff] }
  0xdb   : > { %7859 = vst [vmem:[#allocation368_spill] sm:$0xff] %v4678_v13  ;;  %7860 = vst [vmem:[#allocation369_spill] sm:$0xff] %v4681_v8  ;;  %v4684_v25 = vld [vmem:[%s3390_s15 + $0xd00] sm:$0xff]  ;;  %v4687_v24 = vld [vmem:[%s3390_s15 + $0xd08] sm:$0xff] }
  0xdc   : > { %7861 = vst [vmem:[#allocation370_spill] sm:$0xff] %v4684_v25  ;;  %7862 = vst [vmem:[#allocation371_spill] sm:$0xff] %v4687_v24  ;;  %v4690_v23 = vld [vmem:[%s3390_s15 + $0xd10] sm:$0xff]  ;;  %v4693_v15 = vld [vmem:[%s3390_s15 + $0xd18] sm:$0xff] }
  0xdd   : > { %7863 = vst [vmem:[#allocation372_spill] sm:$0xff] %v4690_v23  ;;  %7864 = vst [vmem:[#allocation373_spill] sm:$0xff] %v4693_v15  ;;  %v4696_v14 = vld [vmem:[%s3390_s15 + $0xd20] sm:$0xff]  ;;  %v4699_v13 = vld [vmem:[%s3390_s15 + $0xd28] sm:$0xff] }
  0xde   : > { %7865 = vst [vmem:[#allocation374_spill] sm:$0xff] %v4696_v14  ;;  %7866 = vst [vmem:[#allocation375_spill] sm:$0xff] %v4699_v13  ;;  %v4702_v8 = vld [vmem:[%s3390_s15 + $0xd30] sm:$0xff]  ;;  %v4705_v25 = vld [vmem:[%s3390_s15 + $0xd38] sm:$0xff] }
  0xdf   : > { %7867 = vst [vmem:[#allocation376_spill] sm:$0xff] %v4702_v8  ;;  %7868 = vst [vmem:[#allocation377_spill] sm:$0xff] %v4705_v25  ;;  %v4708_v24 = vld [vmem:[%s3390_s15 + $0xd40] sm:$0xff]  ;;  %v4711_v23 = vld [vmem:[%s3390_s15 + $0xd48] sm:$0xff] }
  0xe0   : > { %7869 = vst [vmem:[#allocation378_spill] sm:$0xff] %v4708_v24  ;;  %7870 = vst [vmem:[#allocation379_spill] sm:$0xff] %v4711_v23  ;;  %v4714_v15 = vld [vmem:[%s3390_s15 + $0xd50] sm:$0xff]  ;;  %v4717_v14 = vld [vmem:[%s3390_s15 + $0xd58] sm:$0xff] }
  0xe1   : > { %7871 = vst [vmem:[#allocation380_spill] sm:$0xff] %v4714_v15  ;;  %7872 = vst [vmem:[#allocation381_spill] sm:$0xff] %v4717_v14  ;;  %v4720_v13 = vld [vmem:[%s3390_s15 + $0xd60] sm:$0xff]  ;;  %v4723_v8 = vld [vmem:[%s3390_s15 + $0xd68] sm:$0xff] }
  0xe2   : > { %7873 = vst [vmem:[#allocation382_spill] sm:$0xff] %v4720_v13  ;;  %7874 = vst [vmem:[#allocation383_spill] sm:$0xff] %v4723_v8  ;;  %v4726_v25 = vld [vmem:[%s3390_s15 + $0xd70] sm:$0xff]  ;;  %v4729_v24 = vld [vmem:[%s3390_s15 + $0xd78] sm:$0xff] }
  0xe3   : > { %7875 = vst [vmem:[#allocation384_spill] sm:$0xff] %v4726_v25  ;;  %7876 = vst [vmem:[#allocation385_spill] sm:$0xff] %v4729_v24  ;;  %v4732_v23 = vld [vmem:[%s3390_s15 + $0xd80] sm:$0xff]  ;;  %v4735_v15 = vld [vmem:[%s3390_s15 + $0xd88] sm:$0xff] }
  0xe4   : > { %7877 = vst [vmem:[#allocation386_spill] sm:$0xff] %v4732_v23  ;;  %7878 = vst [vmem:[#allocation387_spill] sm:$0xff] %v4735_v15  ;;  %v4738_v14 = vld [vmem:[%s3390_s15 + $0xd90] sm:$0xff]  ;;  %v4741_v13 = vld [vmem:[%s3390_s15 + $0xd98] sm:$0xff] }
  0xe5   : > { %7879 = vst [vmem:[#allocation388_spill] sm:$0xff] %v4738_v14  ;;  %7880 = vst [vmem:[#allocation389_spill] sm:$0xff] %v4741_v13  ;;  %v4744_v8 = vld [vmem:[%s3390_s15 + $0xda0] sm:$0xff]  ;;  %v4747_v25 = vld [vmem:[%s3390_s15 + $0xda8] sm:$0xff] }
  0xe6   : > { %7881 = vst [vmem:[#allocation390_spill] sm:$0xff] %v4744_v8  ;;  %7882 = vst [vmem:[#allocation391_spill] sm:$0xff] %v4747_v25  ;;  %v4750_v24 = vld [vmem:[%s3390_s15 + $0xdb0] sm:$0xff]  ;;  %v4753_v23 = vld [vmem:[%s3390_s15 + $0xdb8] sm:$0xff] }
  0xe7   : > { %7883 = vst [vmem:[#allocation392_spill] sm:$0xff] %v4750_v24  ;;  %7884 = vst [vmem:[#allocation393_spill] sm:$0xff] %v4753_v23  ;;  %v4756_v15 = vld [vmem:[%s3390_s15 + $0xdc0] sm:$0xff]  ;;  %v4759_v14 = vld [vmem:[%s3390_s15 + $0xdc8] sm:$0xff] }
  0xe8   : > { %7885 = vst [vmem:[#allocation394_spill] sm:$0xff] %v4756_v15  ;;  %7886 = vst [vmem:[#allocation395_spill] sm:$0xff] %v4759_v14  ;;  %v4762_v13 = vld [vmem:[%s3390_s15 + $0xdd0] sm:$0xff]  ;;  %v4765_v8 = vld [vmem:[%s3390_s15 + $0xdd8] sm:$0xff] }
  0xe9   : > { %7887 = vst [vmem:[#allocation396_spill] sm:$0xff] %v4762_v13  ;;  %7888 = vst [vmem:[#allocation397_spill] sm:$0xff] %v4765_v8  ;;  %v4768_v25 = vld [vmem:[%s3390_s15 + $0xde0] sm:$0xff]  ;;  %v4771_v24 = vld [vmem:[%s3390_s15 + $0xde8] sm:$0xff] }
  0xea   : > { %7889 = vst [vmem:[#allocation398_spill] sm:$0xff] %v4768_v25  ;;  %7890 = vst [vmem:[#allocation399_spill] sm:$0xff] %v4771_v24  ;;  %v4774_v23 = vld [vmem:[%s3390_s15 + $0xdf0] sm:$0xff]  ;;  %v4777_v15 = vld [vmem:[%s3390_s15 + $0xdf8] sm:$0xff] }
  0xeb   : > { %7891 = vst [vmem:[#allocation400_spill] sm:$0xff] %v4774_v23  ;;  %7892 = vst [vmem:[#allocation401_spill] sm:$0xff] %v4777_v15  ;;  %v4780_v14 = vld [vmem:[%s3390_s15 + $0xe00] sm:$0xff]  ;;  %v4783_v13 = vld [vmem:[%s3390_s15 + $0xe08] sm:$0xff] }
  0xec   : > { %7893 = vst [vmem:[#allocation402_spill] sm:$0xff] %v4780_v14  ;;  %7894 = vst [vmem:[#allocation403_spill] sm:$0xff] %v4783_v13  ;;  %v4786_v8 = vld [vmem:[%s3390_s15 + $0xe10] sm:$0xff]  ;;  %v4789_v25 = vld [vmem:[%s3390_s15 + $0xe18] sm:$0xff] }
  0xed   : > { %7895 = vst [vmem:[#allocation404_spill] sm:$0xff] %v4786_v8  ;;  %7896 = vst [vmem:[#allocation405_spill] sm:$0xff] %v4789_v25  ;;  %v4792_v24 = vld [vmem:[%s3390_s15 + $0xe20] sm:$0xff]  ;;  %v4795_v23 = vld [vmem:[%s3390_s15 + $0xe28] sm:$0xff] }
  0xee   : > { %7897 = vst [vmem:[#allocation406_spill] sm:$0xff] %v4792_v24  ;;  %7898 = vst [vmem:[#allocation407_spill] sm:$0xff] %v4795_v23  ;;  %v4798_v15 = vld [vmem:[%s3390_s15 + $0xe30] sm:$0xff]  ;;  %v4801_v14 = vld [vmem:[%s3390_s15 + $0xe38] sm:$0xff] }
  0xef   : > { %7899 = vst [vmem:[#allocation408_spill] sm:$0xff] %v4798_v15  ;;  %7900 = vst [vmem:[#allocation409_spill] sm:$0xff] %v4801_v14  ;;  %v4804_v13 = vld [vmem:[%s3390_s15 + $0xe40] sm:$0xff]  ;;  %v4807_v8 = vld [vmem:[%s3390_s15 + $0xe48] sm:$0xff] }
  0xf0   : > { %7901 = vst [vmem:[#allocation410_spill] sm:$0xff] %v4804_v13  ;;  %7902 = vst [vmem:[#allocation411_spill] sm:$0xff] %v4807_v8  ;;  %v4810_v25 = vld [vmem:[%s3390_s15 + $0xe50] sm:$0xff]  ;;  %v4813_v24 = vld [vmem:[%s3390_s15 + $0xe58] sm:$0xff] }
  0xf1   : > { %7903 = vst [vmem:[#allocation412_spill] sm:$0xff] %v4810_v25  ;;  %7904 = vst [vmem:[#allocation413_spill] sm:$0xff] %v4813_v24  ;;  %v4816_v23 = vld [vmem:[%s3390_s15 + $0xe60] sm:$0xff]  ;;  %v4819_v15 = vld [vmem:[%s3390_s15 + $0xe68] sm:$0xff] }
  0xf2   : > { %7905 = vst [vmem:[#allocation414_spill] sm:$0xff] %v4816_v23  ;;  %7906 = vst [vmem:[#allocation415_spill] sm:$0xff] %v4819_v15  ;;  %v4822_v14 = vld [vmem:[%s3390_s15 + $0xe70] sm:$0xff]  ;;  %v4825_v13 = vld [vmem:[%s3390_s15 + $0xe78] sm:$0xff] }
  0xf3   : > { %7907 = vst [vmem:[#allocation416_spill] sm:$0xff] %v4822_v14  ;;  %7908 = vst [vmem:[#allocation417_spill] sm:$0xff] %v4825_v13  ;;  %v4828_v8 = vld [vmem:[%s3390_s15 + $0xe80] sm:$0xff]  ;;  %v4831_v25 = vld [vmem:[%s3390_s15 + $0xe88] sm:$0xff] }
  0xf4   : > { %7909 = vst [vmem:[#allocation418_spill] sm:$0xff] %v4828_v8  ;;  %7910 = vst [vmem:[#allocation419_spill] sm:$0xff] %v4831_v25  ;;  %v4834_v24 = vld [vmem:[%s3390_s15 + $0xe90] sm:$0xff]  ;;  %v4837_v23 = vld [vmem:[%s3390_s15 + $0xe98] sm:$0xff] }
  0xf5   : > { %7911 = vst [vmem:[#allocation420_spill] sm:$0xff] %v4834_v24  ;;  %7912 = vst [vmem:[#allocation421_spill] sm:$0xff] %v4837_v23  ;;  %v4840_v15 = vld [vmem:[%s3390_s15 + $0xea0] sm:$0xff]  ;;  %v4843_v14 = vld [vmem:[%s3390_s15 + $0xea8] sm:$0xff] }
  0xf6   : > { %7913 = vst [vmem:[#allocation422_spill] sm:$0xff] %v4840_v15  ;;  %7914 = vst [vmem:[#allocation423_spill] sm:$0xff] %v4843_v14  ;;  %v4846_v13 = vld [vmem:[%s3390_s15 + $0xeb0] sm:$0xff]  ;;  %v4849_v8 = vld [vmem:[%s3390_s15 + $0xeb8] sm:$0xff] }
  0xf7   : > { %7915 = vst [vmem:[#allocation424_spill] sm:$0xff] %v4846_v13  ;;  %7916 = vst [vmem:[#allocation425_spill] sm:$0xff] %v4849_v8  ;;  %v4852_v25 = vld [vmem:[%s3390_s15 + $0xec0] sm:$0xff]  ;;  %v4855_v24 = vld [vmem:[%s3390_s15 + $0xec8] sm:$0xff] }
  0xf8   : > { %7917 = vst [vmem:[#allocation426_spill] sm:$0xff] %v4852_v25  ;;  %7918 = vst [vmem:[#allocation427_spill] sm:$0xff] %v4855_v24  ;;  %v4858_v23 = vld [vmem:[%s3390_s15 + $0xed0] sm:$0xff]  ;;  %v4861_v15 = vld [vmem:[%s3390_s15 + $0xed8] sm:$0xff] }
  0xf9   : > { %7919 = vst [vmem:[#allocation428_spill] sm:$0xff] %v4858_v23  ;;  %7920 = vst [vmem:[#allocation429_spill] sm:$0xff] %v4861_v15  ;;  %v4864_v14 = vld [vmem:[%s3390_s15 + $0xee0] sm:$0xff]  ;;  %v4867_v13 = vld [vmem:[%s3390_s15 + $0xee8] sm:$0xff] }
  0xfa   : > { %7921 = vst [vmem:[#allocation430_spill] sm:$0xff] %v4864_v14  ;;  %7922 = vst [vmem:[#allocation431_spill] sm:$0xff] %v4867_v13  ;;  %v4870_v8 = vld [vmem:[%s3390_s15 + $0xef0] sm:$0xff]  ;;  %v4873_v25 = vld [vmem:[%s3390_s15 + $0xef8] sm:$0xff] }
  0xfb   : > { %7923 = vst [vmem:[#allocation432_spill] sm:$0xff] %v4870_v8  ;;  %7924 = vst [vmem:[#allocation433_spill] sm:$0xff] %v4873_v25  ;;  %v4876_v24 = vld [vmem:[%s3390_s15 + $0xf00] sm:$0xff]  ;;  %v4879_v23 = vld [vmem:[%s3390_s15 + $0xf08] sm:$0xff] }
  0xfc   : > { %7925 = vst [vmem:[#allocation434_spill] sm:$0xff] %v4876_v24  ;;  %7926 = vst [vmem:[#allocation435_spill] sm:$0xff] %v4879_v23  ;;  %v4882_v15 = vld [vmem:[%s3390_s15 + $0xf10] sm:$0xff]  ;;  %v4885_v14 = vld [vmem:[%s3390_s15 + $0xf18] sm:$0xff] }
  0xfd   : > { %7927 = vst [vmem:[#allocation436_spill] sm:$0xff] %v4882_v15  ;;  %7928 = vst [vmem:[#allocation437_spill] sm:$0xff] %v4885_v14  ;;  %v4888_v13 = vld [vmem:[%s3390_s15 + $0xf20] sm:$0xff]  ;;  %v4891_v8 = vld [vmem:[%s3390_s15 + $0xf28] sm:$0xff] }
  0xfe   : > { %7929 = vst [vmem:[#allocation438_spill] sm:$0xff] %v4888_v13  ;;  %7930 = vst [vmem:[#allocation439_spill] sm:$0xff] %v4891_v8  ;;  %v4894_v25 = vld [vmem:[%s3390_s15 + $0xf30] sm:$0xff]  ;;  %v4897_v24 = vld [vmem:[%s3390_s15 + $0xf38] sm:$0xff] }
  0xff   : > { %7931 = vst [vmem:[#allocation440_spill] sm:$0xff] %v4894_v25  ;;  %7932 = vst [vmem:[#allocation441_spill] sm:$0xff] %v4897_v24  ;;  %v4900_v23 = vld [vmem:[%s3390_s15 + $0xf40] sm:$0xff]  ;;  %v4903_v15 = vld [vmem:[%s3390_s15 + $0xf48] sm:$0xff] }
 0x100   : > { %7933 = vst [vmem:[#allocation442_spill] sm:$0xff] %v4900_v23  ;;  %7934 = vst [vmem:[#allocation443_spill] sm:$0xff] %v4903_v15  ;;  %v4906_v14 = vld [vmem:[%s3390_s15 + $0xf50] sm:$0xff]  ;;  %v4909_v13 = vld [vmem:[%s3390_s15 + $0xf58] sm:$0xff] }
 0x101   : > { %7935 = vst [vmem:[#allocation444_spill] sm:$0xff] %v4906_v14  ;;  %7936 = vst [vmem:[#allocation445_spill] sm:$0xff] %v4909_v13  ;;  %v4912_v8 = vld [vmem:[%s3390_s15 + $0xf60] sm:$0xff]  ;;  %v4915_v25 = vld [vmem:[%s3390_s15 + $0xf68] sm:$0xff] }
 0x102   : > { %7937 = vst [vmem:[#allocation446_spill] sm:$0xff] %v4912_v8  ;;  %7938 = vst [vmem:[#allocation447_spill] sm:$0xff] %v4915_v25  ;;  %v4918_v24 = vld [vmem:[%s3390_s15 + $0xf70] sm:$0xff]  ;;  %v4921_v23 = vld [vmem:[%s3390_s15 + $0xf78] sm:$0xff] }
 0x103   : > { %7939 = vst [vmem:[#allocation448_spill] sm:$0xff] %v4918_v24  ;;  %7940 = vst [vmem:[#allocation449_spill] sm:$0xff] %v4921_v23  ;;  %v4924_v15 = vld [vmem:[%s3390_s15 + $0xf80] sm:$0xff]  ;;  %v4927_v7 = vld [vmem:[%s3390_s15 + $0xf88] sm:$0xff] }
 0x104   : > { %7941 = vst [vmem:[#allocation450_spill] sm:$0xff] %v4924_v15  ;;  %7942 = vst [vmem:[#allocation451_spill] sm:$0xff] %v4927_v7  ;;  %v4930_v14 = vld [vmem:[%s3390_s15 + $0xf90] sm:$0xff]  ;;  %v4933_v13 = vld [vmem:[%s3390_s15 + $0xf98] sm:$0xff] }
 0x105   : > { %7943 = vst [vmem:[#allocation452_spill] sm:$0xff] %v4930_v14  ;;  %7944 = vst [vmem:[#allocation453_spill] sm:$0xff] %v4933_v13  ;;  %v4936_v8 = vld [vmem:[%s3390_s15 + $0xfa0] sm:$0xff]  ;;  %v4939_v0 = vld [vmem:[%s3390_s15 + $0xfa8] sm:$0xff] }
 0x106   : > { %7945 = vst [vmem:[#allocation454_spill] sm:$0xff] %v4936_v8  ;;  %7946 = vst [vmem:[#allocation455_spill] sm:$0xff] %v4939_v0  ;;  %v4942_v25 = vld [vmem:[%s3390_s15 + $0xfb0] sm:$0xff]  ;;  %v4945_v24 = vld [vmem:[%s3390_s15 + $0xfb8] sm:$0xff] }
 0x107   : > { %7947 = vst [vmem:[#allocation456_spill] sm:$0xff] %v4942_v25  ;;  %7948 = vst [vmem:[#allocation457_spill] sm:$0xff] %v4945_v24  ;;  %v4948_v23 = vld [vmem:[%s3390_s15 + $0xfc0] sm:$0xff]  ;;  %v4951_v63 = vld [vmem:[%s3390_s15 + $0xfc8] sm:$0xff] }
 0x108   : > { %7949 = vst [vmem:[#allocation458_spill] sm:$0xff] %v4948_v23  ;;  %7950 = vst [vmem:[#allocation459_spill] sm:$0xff] %v4951_v63  ;;  %v4954_v15 = vld [vmem:[%s3390_s15 + $0xfd0] sm:$0xff]  ;;  %v4957_v14 = vld [vmem:[%s3390_s15 + $0xfd8] sm:$0xff]  ;;  %v7957_v23 = vsub.f32 %v3419_v9, %v3400_v1  ;;  %v7960_v1 = vsub.f32 %v3437_v16, %v3409_v4 }
 0x109   : > { %7951 = vst [vmem:[#allocation460_spill] sm:$0xff] %v4954_v15  ;;  %7952 = vst [vmem:[#allocation461_spill] sm:$0xff] %v4957_v14  ;;  %v4960_v13 = vld [vmem:[%s3390_s15 + $0xfe0] sm:$0xff]  ;;  %v4963_v8 = vld [vmem:[%s3390_s15 + $0xfe8] sm:$0xff]  ;;  %v7958_v15 = vsub.f32 %v3422_v10, %v3403_v2  ;;  %v7959_v14 = vsub.f32 %v3425_v11, %v3406_v3  ;;  %v7961_v2 = vsub.f32 %v3440_v17, %v3412_v5 }
 0x10a   : > { %7953 = vst [vmem:[#allocation462_spill] sm:$0xff] %v4960_v13  ;;  %7954 = vst [vmem:[#allocation463_spill] sm:$0xff] %v4963_v8  ;;  %v4966_v0 = vld [vmem:[%s3390_s15 + $0xff0] sm:$0xff]  ;;  %v4969_v25 = vld [vmem:[%s3390_s15 + $0xff8] sm:$0xff]  ;;  %v1714_v24 = vmul.f32 0.1, %v7957_v23  ;;  %v7962_v3 = vsub.f32 %v3443_v18, %v3415_v6 }
 0x10b   : > { %7955 = vst [vmem:[#allocation464_spill] sm:$0xff] %v4966_v0  ;;  %7956 = vst [vmem:[#allocation465_spill] sm:$0xff] %v4969_v25  ;;  %v1715_v63 = vmul.f32 0.1, %v7958_v15  ;;  %v1716_v13 = vmul.f32 0.1, %v7959_v14 }
 0x10c   : > { %v3346_v8 = vld [vmem:[%s3390_s15 + $0x38] sm:$0xff]  ;;  %v3347_v25 = vld [vmem:[%s3390_s15] sm:$0xff]  ;;  %v1717_v9 = vmul.f32 0.1, %v7960_v1  ;;  %v1718_v10 = vmul.f32 0.1, %v7961_v2 }
 0x10d   : > { %v1208_v0 = vsub.f32 %v3463_v26, %v3346_v8  ;;  %v2225_v7 = vadd.f32 %v3347_v25, %v3454_v22  ;;  %v1719_v11 = vmul.f32 0.1, %v7962_v3  ;;  %v3348_v14 = vld [vmem:[%s3390_s15 + $0x8] sm:$0xff]  ;;  %v3349_v23 = vld [vmem:[%s3390_s15 + $0x10] sm:$0xff]  ;;  %v3350_v25 = vld [vmem:[%s3390_s15 + $0x18] sm:$0xff] }
 0x10e   : > { %v2226_v15 = vadd.f32 %v3348_v14, %v1714_v24  ;;  %v2227_v22 = vadd.f32 %v3349_v23, %v1715_v63  ;;  %v2228_v16 = vadd.f32 %v3350_v25, %v1716_v13  ;;  %v699_v17 = vld [vmem:[%s3396_s18 + $0x50] sm:$0xff]  ;;  %v700_v1 = vld [vmem:[%s3396_s18 + $0x58] sm:$0xff]  ;;  %v701_v2 = vld [vmem:[%s3396_s18 + $0x60] sm:$0xff]  ;;  %v2229_v18 = vadd.f32 %v1717_v9, %v3409_v4 }
 0x10f   : > { %v1720_v26 = vmul.f32 0.1, %v1208_v0  ;;  %2737 = vst [vmem:[%s3469_s21] sm:$0xff] %v2225_v7  ;;  %v2230_v24 = vadd.f32 %v1718_v10, %v3412_v5  ;;  %v2231_v3 = vadd.f32 %v1719_v11, %v3415_v6  ;;  %v3351_v63 = vld [vmem:[%s3396_s18 + $0x40] sm:$0xff]  ;;  %v702_v14 = vld [vmem:[%s3396_s18 + $0x68] sm:$0xff]  ;;  %v703_v0 = vld [vmem:[%s3396_s18 + $0x70] sm:$0xff]  ;;  %v1211_v6 = vsub.f32 %v699_v17, %v3449_v20 }
 0x110   : > { %v1209_v13 = vsub.f32 %v3351_v63, %v3428_v12  ;;  %v704_v23 = vld [vmem:[%s3396_s18 + $0x78] sm:$0xff]  ;;  %2738 = vst [vmem:[%s3469_s21 + $0x8] sm:$0xff] %v2226_v15  ;;  %2739 = vst [vmem:[%s3469_s21 + $0x10] sm:$0xff] %v2227_v22  ;;  %v3352_v5 = vld [vmem:[%s3396_s18 + $0x48] sm:$0xff]  ;;  %v1212_v9 = vsub.f32 %v700_v1, %v3452_v21  ;;  %v1213_v15 = vsub.f32 %v701_v2, %v3472_v27 }
 0x111   : > { %2740 = vst [vmem:[%s3469_s21 + $0x18] sm:$0xff] %v2228_v16  ;;  %v2232_v4 = vadd.f32 %v3346_v8, %v1720_v26  ;;  %v1210_v7 = vsub.f32 %v3352_v5, %v3446_v19  ;;  %v705_v10 = vld [vmem:[%s3396_s18 + $0x80] sm:$0xff]  ;;  %2741 = vst [vmem:[%s3469_s21 + $0x20] sm:$0xff] %v2229_v18  ;;  %v1214_v22 = vsub.f32 %v702_v14, %v3475_v28  ;;  %v706_v8 = vld [vmem:[%s3396_s18 + $0x88] sm:$0xff]  ;;  %v1723_v1 = vmul.f32 0.1, %v1211_v6 }
 0x112   : > { %2742 = vst [vmem:[%s3469_s21 + $0x28] sm:$0xff] %v2230_v24  ;;  %2743 = vst [vmem:[%s3469_s21 + $0x30] sm:$0xff] %v2231_v3  ;;  %v1721_v11 = vmul.f32 0.1, %v1209_v13  ;;  %v1215_v25 = vsub.f32 %v703_v0, %v3478_v29  ;;  %v707_v16 = vld [vmem:[%s3396_s18 + $0x90] sm:$0xff]  ;;  %v708_v26 = vld [vmem:[%s3396_s18 + $0x98] sm:$0xff]  ;;  %v1216_v24 = vsub.f32 %v704_v23, %v3481_v30 }
 0x113   : > { %2744 = vst [vmem:[%s3469_s21 + $0x38] sm:$0xff] %v2232_v4  ;;  %v1722_v17 = vmul.f32 0.1, %v1210_v7  ;;  %v1724_v18 = vmul.f32 0.1, %v1212_v9  ;;  %v2235_v0 = vadd.f32 %v1723_v1, %v3449_v20  ;;  %v709_v7 = vld [vmem:[%s3396_s18 + $0xa0] sm:$0xff] }
 0x114   : > { %v2233_v3 = vadd.f32 %v1721_v11, %v3428_v12  ;;  %v1725_v2 = vmul.f32 0.1, %v1213_v15  ;;  %v1726_v63 = vmul.f32 0.1, %v1214_v22  ;;  %v1727_v13 = vmul.f32 0.1, %v1215_v25 }
 0x115   : > { %v2234_v14 = vadd.f32 %v1722_v17, %v3446_v19  ;;  %v2236_v4 = vadd.f32 %v1724_v18, %v3452_v21  ;;  %v1728_v5 = vmul.f32 0.1, %v1216_v24  ;;  %v710_v6 = vld [vmem:[%s3396_s18 + $0xa8] sm:$0xff]  ;;  %v711_v23 = vld [vmem:[%s3396_s18 + $0xb0] sm:$0xff]  ;;  %v1217_v19 = vsub.f32 %v705_v10, %v3484_v31  ;;  %v712_v20 = vld [vmem:[%s3396_s18 + $0xb8] sm:$0xff]  ;;  %2747 = vst [vmem:[%s3469_s21 + $0x50] sm:$0xff] %v2235_v0 }
 0x116   : > { %2745 = vst [vmem:[%s3469_s21 + $0x40] sm:$0xff] %v2233_v3  ;;  %v2237_v12 = vadd.f32 %v1725_v2, %v3472_v27  ;;  %v2238_v9 = vadd.f32 %v1726_v63, %v3475_v28  ;;  %v2239_v11 = vadd.f32 %v1727_v13, %v3478_v29  ;;  %v1218_v15 = vsub.f32 %v706_v8, %v3487_v32  ;;  %v713_v22 = vld [vmem:[%s3396_s18 + $0xc0] sm:$0xff]  ;;  %v714_v1 = vld [vmem:[%s3396_s18 + $0xc8] sm:$0xff]  ;;  %v716_v8 = vld [vmem:[%s3396_s18 + $0xd8] sm:$0xff] }
 0x117   : > { %2746 = vst [vmem:[%s3469_s21 + $0x48] sm:$0xff] %v2234_v14  ;;  %2748 = vst [vmem:[%s3469_s21 + $0x58] sm:$0xff] %v2236_v4  ;;  %v2240_v21 = vadd.f32 %v1728_v5, %v3481_v30  ;;  %v1219_v27 = vsub.f32 %v707_v16, %v3490_v33  ;;  %v1220_v28 = vsub.f32 %v708_v26, %v3493_v34  ;;  %v1729_v29 = vmul.f32 0.1, %v1217_v19  ;;  %v715_v30 = vld [vmem:[%s3396_s18 + $0xd0] sm:$0xff]  ;;  %v721_v19 = vld [vmem:[%s3396_s18 + $0x100] sm:$0xff] }
 0x118   : > { %2749 = vst [vmem:[%s3469_s21 + $0x60] sm:$0xff] %v2237_v12  ;;  %2750 = vst [vmem:[%s3469_s21 + $0x68] sm:$0xff] %v2238_v9  ;;  %v1221_v10 = vsub.f32 %v709_v7, %v3496_v35  ;;  %v1222_v25 = vsub.f32 %v710_v6, %v3499_v36  ;;  %v1223_v17 = vsub.f32 %v711_v23, %v3502_v37  ;;  %v1730_v16 = vmul.f32 0.1, %v1218_v15  ;;  %v717_v7 = vld [vmem:[%s3396_s18 + $0xe0] sm:$0xff]  ;;  %v718_v6 = vld [vmem:[%s3396_s18 + $0xe8] sm:$0xff] }
 0x119   : > { %2751 = vst [vmem:[%s3469_s21 + $0x70] sm:$0xff] %v2239_v11  ;;  %2752 = vst [vmem:[%s3469_s21 + $0x78] sm:$0xff] %v2240_v21  ;;  %v1731_v26 = vmul.f32 0.1, %v1219_v27  ;;  %v1732_v18 = vmul.f32 0.1, %v1220_v28  ;;  %v1224_v24 = vsub.f32 %v712_v20, %v3505_v38  ;;  %v2241_v3 = vadd.f32 %v1729_v29, %v3484_v31 }
 0x11a   : > { %v1733_v2 = vmul.f32 0.1, %v1221_v10  ;;  %v1734_v63 = vmul.f32 0.1, %v1222_v25  ;;  %v1735_v13 = vmul.f32 0.1, %v1223_v17  ;;  %v2242_v14 = vadd.f32 %v1730_v16, %v3487_v32 }
 0x11b   : > { %v2243_v0 = vadd.f32 %v1731_v26, %v3490_v33  ;;  %v2244_v4 = vadd.f32 %v1732_v18, %v3493_v34  ;;  %v1736_v5 = vmul.f32 0.1, %v1224_v24  ;;  %v719_v23 = vld [vmem:[%s3396_s18 + $0xf0] sm:$0xff]  ;;  %2753 = vst [vmem:[%s3469_s21 + $0x80] sm:$0xff] %v2241_v3  ;;  %v1225_v32 = vsub.f32 %v713_v22, %v3508_v39  ;;  %v720_v33 = vld [vmem:[%s3396_s18 + $0xf8] sm:$0xff]  ;;  %v722_v27 = vld [vmem:[%s3396_s18 + $0x108] sm:$0xff] }
 0x11c   : > { %v2245_v31 = vadd.f32 %v1733_v2, %v3496_v35  ;;  %v2246_v12 = vadd.f32 %v1734_v63, %v3499_v36  ;;  %v2247_v9 = vadd.f32 %v1735_v13, %v3502_v37  ;;  %2754 = vst [vmem:[%s3469_s21 + $0x88] sm:$0xff] %v2242_v14  ;;  %v1226_v11 = vsub.f32 %v714_v1, %v3511_v40  ;;  %v724_v28 = vld [vmem:[%s3396_s18 + $0x118] sm:$0xff]  ;;  %v725_v3 = vld [vmem:[%s3396_s18 + $0x120] sm:$0xff]  ;;  %v726_v2 = vld [vmem:[%s3396_s18 + $0x128] sm:$0xff] }
 0x11d   : > { %2755 = vst [vmem:[%s3469_s21 + $0x90] sm:$0xff] %v2243_v0  ;;  %2756 = vst [vmem:[%s3469_s21 + $0x98] sm:$0xff] %v2244_v4  ;;  %v2248_v34 = vadd.f32 %v1736_v5, %v3505_v38  ;;  %v1227_v35 = vsub.f32 %v715_v30, %v3514_v41  ;;  %v1228_v36 = vsub.f32 %v716_v8, %v3517_v42  ;;  %v1737_v37 = vmul.f32 0.1, %v1225_v32  ;;  %v723_v38 = vld [vmem:[%s3396_s18 + $0x110] sm:$0xff]  ;;  %v729_v4 = vld [vmem:[%s3396_s18 + $0x140] sm:$0xff] }
 0x11e   : > { %2757 = vst [vmem:[%s3469_s21 + $0xa0] sm:$0xff] %v2245_v31  ;;  %2758 = vst [vmem:[%s3469_s21 + $0xa8] sm:$0xff] %v2246_v12  ;;  %v1229_v20 = vsub.f32 %v717_v7, %v3520_v43  ;;  %v1230_v21 = vsub.f32 %v718_v6, %v3523_v44  ;;  %v1231_v15 = vsub.f32 %v719_v23, %v3526_v45  ;;  %v1738_v22 = vmul.f32 0.1, %v1226_v11  ;;  %v727_v63 = vld [vmem:[%s3396_s18 + $0x130] sm:$0xff]  ;;  %v730_v23 = vld [vmem:[%s3396_s18 + $0x148] sm:$0xff] }
 0x11f   : > { %2759 = vst [vmem:[%s3469_s21 + $0xb0] sm:$0xff] %v2247_v9  ;;  %2760 = vst [vmem:[%s3469_s21 + $0xb8] sm:$0xff] %v2248_v34  ;;  %v1739_v29 = vmul.f32 0.1, %v1227_v35  ;;  %v1740_v10 = vmul.f32 0.1, %v1228_v36  ;;  %v1232_v25 = vsub.f32 %v720_v33, %v3529_v46  ;;  %v2249_v17 = vadd.f32 %v1737_v37, %v3508_v39 }
 0x120   : > { %v1741_v1 = vmul.f32 0.1, %v1229_v20  ;;  %v1742_v30 = vmul.f32 0.1, %v1230_v21  ;;  %v1743_v8 = vmul.f32 0.1, %v1231_v15  ;;  %v2250_v16 = vadd.f32 %v1738_v22, %v3511_v40 }
 0x121   : > { %v2251_v26 = vadd.f32 %v1739_v29, %v3514_v41  ;;  %v2252_v18 = vadd.f32 %v1740_v10, %v3517_v42  ;;  %v1744_v24 = vmul.f32 0.1, %v1232_v25  ;;  %2761 = vst [vmem:[%s3469_s21 + $0xc0] sm:$0xff] %v2249_v17  ;;  %v1233_v40 = vsub.f32 %v721_v19, %v3532_v47  ;;  %v728_v41 = vld [vmem:[%s3396_s18 + $0x138] sm:$0xff]  ;;  %v733_v15 = vld [vmem:[%s3396_s18 + $0x160] sm:$0xff] }
 0x122   : > { %v2253_v39 = vadd.f32 %v1741_v1, %v3520_v43  ;;  %v2254_v13 = vadd.f32 %v1742_v30, %v3523_v44  ;;  %v2255_v14 = vadd.f32 %v1743_v8, %v3526_v45  ;;  %2762 = vst [vmem:[%s3469_s21 + $0xc8] sm:$0xff] %v2250_v16  ;;  %v1234_v0 = vsub.f32 %v722_v27, %v3535_v48  ;;  %v732_v31 = vld [vmem:[%s3396_s18 + $0x158] sm:$0xff]  ;;  %v734_v27 = vld [vmem:[%s3396_s18 + $0x168] sm:$0xff]  ;;  %v737_v10 = vld [vmem:[%s3396_s18 + $0x180] sm:$0xff] }
 0x123   : > { %2763 = vst [vmem:[%s3469_s21 + $0xd0] sm:$0xff] %v2251_v26  ;;  %2764 = vst [vmem:[%s3469_s21 + $0xd8] sm:$0xff] %v2252_v18  ;;  %v2256_v42 = vadd.f32 %v1744_v24, %v3529_v46  ;;  %v1235_v43 = vsub.f32 %v723_v38, %v3538_v49  ;;  %v1236_v44 = vsub.f32 %v724_v28, %v3541_v50  ;;  %v1745_v45 = vmul.f32 0.1, %v1233_v40  ;;  %v731_v46 = vld [vmem:[%s3396_s18 + $0x150] sm:$0xff]  ;;  %v738_v30 = vld [vmem:[%s3396_s18 + $0x188] sm:$0xff] }
 0x124   : > { %2765 = vst [vmem:[%s3469_s21 + $0xe0] sm:$0xff] %v2253_v39  ;;  %2766 = vst [vmem:[%s3469_s21 + $0xe8] sm:$0xff] %v2254_v13  ;;  %v1237_v5 = vsub.f32 %v725_v3, %v3544_v51  ;;  %v1238_v7 = vsub.f32 %v726_v2, %v3547_v52  ;;  %v1239_v6 = vsub.f32 %v727_v63, %v3550_v53  ;;  %v1746_v12 = vmul.f32 0.1, %v1234_v0  ;;  %v735_v38 = vld [vmem:[%s3396_s18 + $0x170] sm:$0xff]  ;;  %v740_v8 = vld [vmem:[%s3396_s18 + $0x198] sm:$0xff] }
 0x125   : > { %2767 = vst [vmem:[%s3469_s21 + $0xf0] sm:$0xff] %v2255_v14  ;;  %2768 = vst [vmem:[%s3469_s21 + $0xf8] sm:$0xff] %v2256_v42  ;;  %v1747_v9 = vmul.f32 0.1, %v1235_v43  ;;  %v1748_v32 = vmul.f32 0.1, %v1236_v44  ;;  %v1240_v33 = vsub.f32 %v728_v41, %v3553_v54  ;;  %v2257_v34 = vadd.f32 %v1745_v45, %v3532_v47 }
 0x126   : > { %v1749_v11 = vmul.f32 0.1, %v1237_v5  ;;  %v1750_v35 = vmul.f32 0.1, %v1238_v7  ;;  %v1751_v36 = vmul.f32 0.1, %v1239_v6  ;;  %v2258_v19 = vadd.f32 %v1746_v12, %v3535_v48 }
 0x127   : > { %v2259_v37 = vadd.f32 %v1747_v9, %v3538_v49  ;;  %v2260_v20 = vadd.f32 %v1748_v32, %v3541_v50  ;;  %v1752_v21 = vmul.f32 0.1, %v1240_v33  ;;  %2769 = vst [vmem:[%s3469_s21 + $0x100] sm:$0xff] %v2257_v34  ;;  %v1241_v48 = vsub.f32 %v729_v4, %v3556_v55  ;;  %v736_v49 = vld [vmem:[%s3396_s18 + $0x178] sm:$0xff]  ;;  %v741_v42 = vld [vmem:[%s3396_s18 + $0x1a0] sm:$0xff]  ;;  %v742_v0 = vld [vmem:[%s3396_s18 + $0x1a8] sm:$0xff] }
 0x128   : > { %v2261_v47 = vadd.f32 %v1749_v11, %v3544_v51  ;;  %v2262_v28 = vadd.f32 %v1750_v35, %v3547_v52  ;;  %v2263_v22 = vadd.f32 %v1751_v36, %v3550_v53  ;;  %2770 = vst [vmem:[%s3469_s21 + $0x108] sm:$0xff] %v2258_v19  ;;  %v1242_v29 = vsub.f32 %v730_v23, %v3559_v56  ;;  %v743_v43 = vld [vmem:[%s3396_s18 + $0x1b0] sm:$0xff]  ;;  %v7964_v5 = vld [vmem:[#allocation3_spill] sm:$0xff]  ;;  %v7966_v23 = vld [vmem:[#allocation5_spill] sm:$0xff] }
 0x129   : > { %2771 = vst [vmem:[%s3469_s21 + $0x110] sm:$0xff] %v2259_v37  ;;  %2772 = vst [vmem:[%s3469_s21 + $0x118] sm:$0xff] %v2260_v20  ;;  %v2264_v50 = vadd.f32 %v1752_v21, %v3553_v54  ;;  %v1243_v51 = vsub.f32 %v731_v46, %v3562_v57  ;;  %v1244_v52 = vsub.f32 %v732_v31, %v3565_v58  ;;  %v1753_v53 = vmul.f32 0.1, %v1241_v48  ;;  %v739_v54 = vld [vmem:[%s3396_s18 + $0x190] sm:$0xff]  ;;  %v745_v46 = vld [vmem:[%s3396_s18 + $0x1c0] sm:$0xff] }
 0x12a   : > { %2773 = vst [vmem:[%s3469_s21 + $0x120] sm:$0xff] %v2261_v47  ;;  %2774 = vst [vmem:[%s3469_s21 + $0x128] sm:$0xff] %v2262_v28  ;;  %v1245_v25 = vsub.f32 %v733_v15, %v3568_v59  ;;  %v1246_v17 = vsub.f32 %v734_v27, %v3571_v60  ;;  %v1247_v1 = vsub.f32 %v735_v38, %v3574_v61  ;;  %v1754_v16 = vmul.f32 0.1, %v1242_v29  ;;  %v7965_v6 = vld [vmem:[#allocation4_spill] sm:$0xff]  ;;  %v7967_v31 = vld [vmem:[#allocation6_spill] sm:$0xff] }
 0x12b   : > { %2775 = vst [vmem:[%s3469_s21 + $0x130] sm:$0xff] %v2263_v22  ;;  %2776 = vst [vmem:[%s3469_s21 + $0x138] sm:$0xff] %v2264_v50  ;;  %v1755_v26 = vmul.f32 0.1, %v1243_v51  ;;  %v1756_v18 = vmul.f32 0.1, %v1244_v52  ;;  %v1248_v24 = vsub.f32 %v736_v49, %v3577_v62  ;;  %v2265_v3 = vadd.f32 %v1753_v53, %v3556_v55 }
 0x12c   : > { %v1757_v2 = vmul.f32 0.1, %v1245_v25  ;;  %v1758_v63 = vmul.f32 0.1, %v1246_v17  ;;  %v1759_v39 = vmul.f32 0.1, %v1247_v1  ;;  %v2266_v13 = vadd.f32 %v1754_v16, %v3559_v56 }
 0x12d   : > { %v2267_v14 = vadd.f32 %v1755_v26, %v3562_v57  ;;  %v2268_v40 = vadd.f32 %v1756_v18, %v3565_v58  ;;  %v1760_v41 = vmul.f32 0.1, %v1248_v24  ;;  %2777 = vst [vmem:[%s3469_s21 + $0x140] sm:$0xff] %v2265_v3  ;;  %v7963_v56 = vld [vmem:[#allocation2_spill] sm:$0xff]  ;;  %v744_v57 = vld [vmem:[%s3396_s18 + $0x1b8] sm:$0xff]  ;;  %v1250_v7 = vsub.f32 %v738_v30, %v7964_v5  ;;  %v7968_v9 = vld [vmem:[#allocation7_spill] sm:$0xff] }
 0x12e   : > { %v2269_v55 = vadd.f32 %v1757_v2, %v3568_v59  ;;  %v2270_v44 = vadd.f32 %v1758_v63, %v3571_v60  ;;  %v2271_v4 = vadd.f32 %v1759_v39, %v3574_v61  ;;  %v1249_v45 = vsub.f32 %v737_v10, %v7963_v56  ;;  %2778 = vst [vmem:[%s3469_s21 + $0x148] sm:$0xff] %v2266_v13  ;;  %v7969_v33 = vld [vmem:[#allocation8_spill] sm:$0xff]  ;;  %v746_v11 = vld [vmem:[%s3396_s18 + $0x1c8] sm:$0xff]  ;;  %v748_v35 = vld [vmem:[%s3396_s18 + $0x1d8] sm:$0xff] }
 0x12f   : > { %2779 = vst [vmem:[%s3469_s21 + $0x150] sm:$0xff] %v2267_v14  ;;  %2780 = vst [vmem:[%s3469_s21 + $0x158] sm:$0xff] %v2268_v40  ;;  %v2272_v58 = vadd.f32 %v1760_v41, %v3577_v62  ;;  %v1251_v59 = vsub.f32 %v739_v54, %v7965_v6  ;;  %v1252_v60 = vsub.f32 %v740_v8, %v7966_v23  ;;  %v747_v62 = vld [vmem:[%s3396_s18 + $0x1d0] sm:$0xff]  ;;  %v1762_v36 = vmul.f32 0.1, %v1250_v7  ;;  %v7970_v20 = vld [vmem:[#allocation9_spill] sm:$0xff] }
 0x130   : > { %2781 = vst [vmem:[%s3469_s21 + $0x160] sm:$0xff] %v2269_v55  ;;  %2782 = vst [vmem:[%s3469_s21 + $0x168] sm:$0xff] %v2270_v44  ;;  %v1761_v61 = vmul.f32 0.1, %v1249_v45  ;;  %v1253_v12 = vsub.f32 %v741_v42, %v7967_v31  ;;  %v1254_v32 = vsub.f32 %v742_v0, %v7968_v9  ;;  %v1255_v34 = vsub.f32 %v743_v43, %v7969_v33  ;;  %v749_v50 = vld [vmem:[%s3396_s18 + $0x1e0] sm:$0xff]  ;;  %v750_v29 = vld [vmem:[%s3396_s18 + $0x1e8] sm:$0xff] }
 0x131   : > { %2783 = vst [vmem:[%s3469_s21 + $0x170] sm:$0xff] %v2271_v4  ;;  %2784 = vst [vmem:[%s3469_s21 + $0x178] sm:$0xff] %v2272_v58  ;;  %v1763_v19 = vmul.f32 0.1, %v1251_v59  ;;  %v1764_v37 = vmul.f32 0.1, %v1252_v60  ;;  %v1256_v21 = vsub.f32 %v744_v57, %v7970_v20  ;;  %v2274_v28 = vadd.f32 %v1762_v36, %v7964_v5 }
 0x132   : > { %v2273_v15 = vadd.f32 %v1761_v61, %v7963_v56  ;;  %v1765_v27 = vmul.f32 0.1, %v1253_v12  ;;  %v1766_v38 = vmul.f32 0.1, %v1254_v32  ;;  %v1767_v47 = vmul.f32 0.1, %v1255_v34 }
 0x133   : > { %v2275_v22 = vadd.f32 %v1763_v19, %v7965_v6  ;;  %v2276_v48 = vadd.f32 %v1764_v37, %v7966_v23  ;;  %v1768_v49 = vmul.f32 0.1, %v1256_v21  ;;  %v751_v51 = vld [vmem:[%s3396_s18 + $0x1f0] sm:$0xff]  ;;  %v7971_v25 = vld [vmem:[#allocation10_spill] sm:$0xff]  ;;  %v752_v1 = vld [vmem:[%s3396_s18 + $0x1f8] sm:$0xff]  ;;  %2786 = vst [vmem:[%s3469_s21 + $0x188] sm:$0xff] %v2274_v28 }
 0x134   : > { %2785 = vst [vmem:[%s3469_s21 + $0x180] sm:$0xff] %v2273_v15  ;;  %v2277_v52 = vadd.f32 %v1765_v27, %v7967_v31  ;;  %v2278_v10 = vadd.f32 %v1766_v38, %v7968_v9  ;;  %v2279_v53 = vadd.f32 %v1767_v47, %v7969_v33  ;;  %v1257_v17 = vsub.f32 %v745_v46, %v7971_v25  ;;  %v7972_v54 = vld [vmem:[#allocation11_spill] sm:$0xff]  ;;  %v7973_v16 = vld [vmem:[#allocation12_spill] sm:$0xff]  ;;  %v7974_v18 = vld [vmem:[#allocation13_spill] sm:$0xff] }
 0x135   : > { %2787 = vst [vmem:[%s3469_s21 + $0x190] sm:$0xff] %v2275_v22  ;;  %2788 = vst [vmem:[%s3469_s21 + $0x198] sm:$0xff] %v2276_v48  ;;  %v2280_v30 = vadd.f32 %v1768_v49, %v7970_v20  ;;  %v1258_v8 = vsub.f32 %v746_v11, %v7972_v54  ;;  %v1259_v26 = vsub.f32 %v747_v62, %v7973_v16  ;;  %v753_v3 = vld [vmem:[%s3396_s18 + $0x200] sm:$0xff]  ;;  %v7976_v13 = vld [vmem:[#allocation15_spill] sm:$0xff] }
 0x136   : > { %v1260_v24 = vsub.f32 %v748_v35, %v7974_v18  ;;  %2789 = vst [vmem:[%s3469_s21 + $0x1a0] sm:$0xff] %v2277_v52  ;;  %2790 = vst [vmem:[%s3469_s21 + $0x1a8] sm:$0xff] %v2278_v10  ;;  %v1769_v2 = vmul.f32 0.1, %v1257_v17  ;;  %v7975_v63 = vld [vmem:[#allocation14_spill] sm:$0xff]  ;;  %v1262_v14 = vsub.f32 %v750_v29, %v7976_v13  ;;  %v7977_v40 = vld [vmem:[#allocation16_spill] sm:$0xff] }
 0x137   : > { %2791 = vst [vmem:[%s3469_s21 + $0x1b0] sm:$0xff] %v2279_v53  ;;  %v1261_v39 = vsub.f32 %v749_v50, %v7975_v63  ;;  %v1263_v41 = vsub.f32 %v751_v51, %v7977_v40  ;;  %v754_v42 = vld [vmem:[%s3396_s18 + $0x208] sm:$0xff]  ;;  %v755_v0 = vld [vmem:[%s3396_s18 + $0x210] sm:$0xff]  ;;  %v756_v43 = vld [vmem:[%s3396_s18 + $0x218] sm:$0xff]  ;;  %v1770_v55 = vmul.f32 0.1, %v1258_v8 }
 0x138   : > { %2792 = vst [vmem:[%s3469_s21 + $0x1b8] sm:$0xff] %v2280_v30  ;;  %v1771_v44 = vmul.f32 0.1, %v1259_v26  ;;  %v1772_v4 = vmul.f32 0.1, %v1260_v24  ;;  %v7978_v56 = vld [vmem:[#allocation17_spill] sm:$0xff]  ;;  %v2281_v57 = vadd.f32 %v1769_v2, %v7971_v25 }
 0x139   : > { %v1264_v45 = vsub.f32 %v752_v1, %v7978_v56  ;;  %v1773_v58 = vmul.f32 0.1, %v1261_v39  ;;  %v1774_v5 = vmul.f32 0.1, %v1262_v14  ;;  %v1775_v7 = vmul.f32 0.1, %v1263_v41 }
 0x13a   : > { %v2282_v6 = vadd.f32 %v1770_v55, %v7972_v54  ;;  %v2283_v59 = vadd.f32 %v1771_v44, %v7973_v16  ;;  %v2284_v23 = vadd.f32 %v1772_v4, %v7974_v18  ;;  %v757_v46 = vld [vmem:[%s3396_s18 + $0x220] sm:$0xff]  ;;  %v758_v61 = vld [vmem:[%s3396_s18 + $0x228] sm:$0xff]  ;;  %v759_v31 = vld [vmem:[%s3396_s18 + $0x230] sm:$0xff]  ;;  %2793 = vst [vmem:[%s3469_s21 + $0x1c0] sm:$0xff] %v2281_v57 }
 0x13b   : > { %v1776_v60 = vmul.f32 0.1, %v1264_v45  ;;  %v2285_v12 = vadd.f32 %v1773_v58, %v7975_v63  ;;  %v2286_v9 = vadd.f32 %v1774_v5, %v7976_v13  ;;  %v2287_v32 = vadd.f32 %v1775_v7, %v7977_v40  ;;  %v7979_v33 = vld [vmem:[#allocation18_spill] sm:$0xff]  ;;  %v760_v11 = vld [vmem:[%s3396_s18 + $0x238] sm:$0xff]  ;;  %v7980_v35 = vld [vmem:[#allocation19_spill] sm:$0xff] }
 0x13c   : > { %v1265_v34 = vsub.f32 %v753_v3, %v7979_v33  ;;  %2794 = vst [vmem:[%s3469_s21 + $0x1c8] sm:$0xff] %v2282_v6  ;;  %2795 = vst [vmem:[%s3469_s21 + $0x1d0] sm:$0xff] %v2283_v59  ;;  %v1266_v36 = vsub.f32 %v754_v42, %v7980_v35  ;;  %v7981_v19 = vld [vmem:[#allocation20_spill] sm:$0xff]  ;;  %v7982_v20 = vld [vmem:[#allocation21_spill] sm:$0xff] }
 0x13d   : > { %2796 = vst [vmem:[%s3469_s21 + $0x1d8] sm:$0xff] %v2284_v23  ;;  %v2288_v62 = vadd.f32 %v1776_v60, %v7978_v56  ;;  %v1267_v37 = vsub.f32 %v755_v0, %v7981_v19  ;;  %v1268_v21 = vsub.f32 %v756_v43, %v7982_v20  ;;  %v761_v15 = vld [vmem:[%s3396_s18 + $0x240] sm:$0xff]  ;;  %2797 = vst [vmem:[%s3469_s21 + $0x1e0] sm:$0xff] %v2285_v12  ;;  %v7984_v28 = vld [vmem:[#allocation23_spill] sm:$0xff] }
 0x13e   : > { %2798 = vst [vmem:[%s3469_s21 + $0x1e8] sm:$0xff] %v2286_v9  ;;  %2799 = vst [vmem:[%s3469_s21 + $0x1f0] sm:$0xff] %v2287_v32  ;;  %v1777_v27 = vmul.f32 0.1, %v1265_v34  ;;  %v7983_v38 = vld [vmem:[#allocation22_spill] sm:$0xff]  ;;  %v1270_v22 = vsub.f32 %v758_v61, %v7984_v28  ;;  %v7985_v48 = vld [vmem:[#allocation24_spill] sm:$0xff] }
 0x13f   : > { %v1269_v47 = vsub.f32 %v757_v46, %v7983_v38  ;;  %v1271_v49 = vsub.f32 %v759_v31, %v7985_v48  ;;  %v762_v50 = vld [vmem:[%s3396_s18 + $0x248] sm:$0xff]  ;;  %v763_v29 = vld [vmem:[%s3396_s18 + $0x250] sm:$0xff]  ;;  %v764_v51 = vld [vmem:[%s3396_s18 + $0x258] sm:$0xff]  ;;  %2800 = vst [vmem:[%s3469_s21 + $0x1f8] sm:$0xff] %v2288_v62  ;;  %v1778_v52 = vmul.f32 0.1, %v1266_v36 }
 0x140   : > { %v1779_v10 = vmul.f32 0.1, %v1267_v37  ;;  %v1780_v53 = vmul.f32 0.1, %v1268_v21  ;;  %v7986_v25 = vld [vmem:[#allocation25_spill] sm:$0xff]  ;;  %v2289_v1 = vadd.f32 %v1777_v27, %v7979_v33  ;;  %v765_v3 = vld [vmem:[%s3396_s18 + $0x260] sm:$0xff] }
 0x141   : > { %v1272_v17 = vsub.f32 %v760_v11, %v7986_v25  ;;  %v1781_v30 = vmul.f32 0.1, %v1269_v47  ;;  %v1782_v54 = vmul.f32 0.1, %v1270_v22  ;;  %v1783_v8 = vmul.f32 0.1, %v1271_v49 }
 0x142   : > { %v2290_v16 = vadd.f32 %v1778_v52, %v7980_v35  ;;  %v2291_v26 = vadd.f32 %v1779_v10, %v7981_v19  ;;  %v2292_v18 = vadd.f32 %v1780_v53, %v7982_v20  ;;  %v766_v2 = vld [vmem:[%s3396_s18 + $0x268] sm:$0xff]  ;;  %v767_v63 = vld [vmem:[%s3396_s18 + $0x270] sm:$0xff]  ;;  %2801 = vst [vmem:[%s3469_s21 + $0x200] sm:$0xff] %v2289_v1  ;;  %v7987_v40 = vld [vmem:[#allocation26_spill] sm:$0xff] }
 0x143   : > { %v1784_v24 = vmul.f32 0.1, %v1272_v17  ;;  %v2293_v39 = vadd.f32 %v1781_v30, %v7983_v38  ;;  %v2294_v13 = vadd.f32 %v1782_v54, %v7984_v28  ;;  %v2295_v14 = vadd.f32 %v1783_v8, %v7985_v48  ;;  %v768_v42 = vld [vmem:[%s3396_s18 + $0x278] sm:$0xff]  ;;  %v7988_v43 = vld [vmem:[#allocation27_spill] sm:$0xff]  ;;  %v7989_v44 = vld [vmem:[#allocation28_spill] sm:$0xff] }
 0x144   : > { %v1273_v41 = vsub.f32 %v761_v15, %v7987_v40  ;;  %2802 = vst [vmem:[%s3469_s21 + $0x208] sm:$0xff] %v2290_v16  ;;  %2803 = vst [vmem:[%s3469_s21 + $0x210] sm:$0xff] %v2291_v26  ;;  %v1274_v55 = vsub.f32 %v762_v50, %v7988_v43  ;;  %v1275_v4 = vsub.f32 %v763_v29, %v7989_v44  ;;  %v7990_v56 = vld [vmem:[#allocation29_spill] sm:$0xff]  ;;  %v769_v57 = vld [vmem:[%s3396_s18 + $0x280] sm:$0xff] }
 0x145   : > { %2804 = vst [vmem:[%s3469_s21 + $0x218] sm:$0xff] %v2292_v18  ;;  %v2296_v0 = vadd.f32 %v1784_v24, %v7986_v25  ;;  %v1276_v45 = vsub.f32 %v764_v51, %v7990_v56  ;;  %2805 = vst [vmem:[%s3469_s21 + $0x220] sm:$0xff] %v2293_v39  ;;  %v7991_v5 = vld [vmem:[#allocation30_spill] sm:$0xff]  ;;  %v7992_v6 = vld [vmem:[#allocation31_spill] sm:$0xff] }
 0x146   : > { %2806 = vst [vmem:[%s3469_s21 + $0x228] sm:$0xff] %v2294_v13  ;;  %2807 = vst [vmem:[%s3469_s21 + $0x230] sm:$0xff] %v2295_v14  ;;  %v1785_v58 = vmul.f32 0.1, %v1273_v41  ;;  %v1277_v7 = vsub.f32 %v765_v3, %v7991_v5  ;;  %v1278_v59 = vsub.f32 %v766_v2, %v7992_v6  ;;  %v7993_v23 = vld [vmem:[#allocation32_spill] sm:$0xff]  ;;  %v770_v46 = vld [vmem:[%s3396_s18 + $0x288] sm:$0xff] }
 0x147   : > { %v1279_v60 = vsub.f32 %v767_v63, %v7993_v23  ;;  %v771_v61 = vld [vmem:[%s3396_s18 + $0x290] sm:$0xff]  ;;  %v772_v31 = vld [vmem:[%s3396_s18 + $0x298] sm:$0xff]  ;;  %2808 = vst [vmem:[%s3469_s21 + $0x238] sm:$0xff] %v2296_v0  ;;  %v1786_v12 = vmul.f32 0.1, %v1274_v55  ;;  %v773_v15 = vld [vmem:[%s3396_s18 + $0x2a0] sm:$0xff] }
 0x148   : > { %v1787_v9 = vmul.f32 0.1, %v1275_v4  ;;  %v1788_v32 = vmul.f32 0.1, %v1276_v45  ;;  %v7994_v33 = vld [vmem:[#allocation33_spill] sm:$0xff]  ;;  %v2297_v11 = vadd.f32 %v1785_v58, %v7987_v40  ;;  %v774_v27 = vld [vmem:[%s3396_s18 + $0x2a8] sm:$0xff] }
 0x149   : > { %v1280_v34 = vsub.f32 %v768_v42, %v7994_v33  ;;  %v1789_v62 = vmul.f32 0.1, %v1277_v7  ;;  %v1790_v35 = vmul.f32 0.1, %v1278_v59  ;;  %v1791_v36 = vmul.f32 0.1, %v1279_v60 }
 0x14a   : > { %v2298_v19 = vadd.f32 %v1786_v12, %v7988_v43  ;;  %v2299_v37 = vadd.f32 %v1787_v9, %v7989_v44  ;;  %v2300_v20 = vadd.f32 %v1788_v32, %v7990_v56  ;;  %v775_v38 = vld [vmem:[%s3396_s18 + $0x2b0] sm:$0xff]  ;;  %2809 = vst [vmem:[%s3469_s21 + $0x240] sm:$0xff] %v2297_v11  ;;  %v7995_v48 = vld [vmem:[#allocation34_spill] sm:$0xff]  ;;  %v776_v50 = vld [vmem:[%s3396_s18 + $0x2b8] sm:$0xff] }
 0x14b   : > { %v1792_v21 = vmul.f32 0.1, %v1280_v34  ;;  %v2301_v47 = vadd.f32 %v1789_v62, %v7991_v5  ;;  %v2302_v28 = vadd.f32 %v1790_v35, %v7992_v6  ;;  %v2303_v22 = vadd.f32 %v1791_v36, %v7993_v23  ;;  %v7996_v51 = vld [vmem:[#allocation35_spill] sm:$0xff]  ;;  %v7997_v10 = vld [vmem:[#allocation36_spill] sm:$0xff]  ;;  %v7998_v25 = vld [vmem:[#allocation37_spill] sm:$0xff] }
 0x14c   : > { %v1281_v49 = vsub.f32 %v769_v57, %v7995_v48  ;;  %2810 = vst [vmem:[%s3469_s21 + $0x248] sm:$0xff] %v2298_v19  ;;  %2811 = vst [vmem:[%s3469_s21 + $0x250] sm:$0xff] %v2299_v37  ;;  %v1282_v52 = vsub.f32 %v770_v46, %v7996_v51  ;;  %v1283_v53 = vsub.f32 %v771_v61, %v7997_v10  ;;  %v777_v1 = vld [vmem:[%s3396_s18 + $0x2c0] sm:$0xff]  ;;  %v8000_v16 = vld [vmem:[#allocation39_spill] sm:$0xff] }
 0x14d   : > { %2812 = vst [vmem:[%s3469_s21 + $0x258] sm:$0xff] %v2300_v20  ;;  %v2304_v29 = vadd.f32 %v1792_v21, %v7994_v33  ;;  %v1284_v17 = vsub.f32 %v772_v31, %v7998_v25  ;;  %2813 = vst [vmem:[%s3469_s21 + $0x260] sm:$0xff] %v2301_v47  ;;  %v7999_v54 = vld [vmem:[#allocation38_spill] sm:$0xff]  ;;  %v1286_v26 = vsub.f32 %v774_v27, %v8000_v16  ;;  %v8001_v18 = vld [vmem:[#allocation40_spill] sm:$0xff] }
 0x14e   : > { %2814 = vst [vmem:[%s3469_s21 + $0x268] sm:$0xff] %v2302_v28  ;;  %2815 = vst [vmem:[%s3469_s21 + $0x270] sm:$0xff] %v2303_v22  ;;  %v1793_v30 = vmul.f32 0.1, %v1281_v49  ;;  %v1285_v8 = vsub.f32 %v773_v15, %v7999_v54  ;;  %v1287_v24 = vsub.f32 %v775_v38, %v8001_v18  ;;  %v778_v3 = vld [vmem:[%s3396_s18 + $0x2c8] sm:$0xff]  ;;  %v779_v2 = vld [vmem:[%s3396_s18 + $0x2d0] sm:$0xff] }
 0x14f   : > { %v780_v63 = vld [vmem:[%s3396_s18 + $0x2d8] sm:$0xff]  ;;  %2816 = vst [vmem:[%s3469_s21 + $0x278] sm:$0xff] %v2304_v29  ;;  %v1794_v39 = vmul.f32 0.1, %v1282_v52  ;;  %v1795_v13 = vmul.f32 0.1, %v1283_v53 }
 0x150   : > { %v1796_v14 = vmul.f32 0.1, %v1284_v17  ;;  %v8002_v40 = vld [vmem:[#allocation41_spill] sm:$0xff]  ;;  %v2305_v42 = vadd.f32 %v1793_v30, %v7995_v48  ;;  %v1797_v0 = vmul.f32 0.1, %v1285_v8  ;;  %v781_v57 = vld [vmem:[%s3396_s18 + $0x2e0] sm:$0xff] }
 0x151   : > { %v1288_v41 = vsub.f32 %v776_v50, %v8002_v40  ;;  %v1798_v43 = vmul.f32 0.1, %v1286_v26  ;;  %v1799_v55 = vmul.f32 0.1, %v1287_v24  ;;  %v2306_v44 = vadd.f32 %v1794_v39, %v7996_v51  ;;  %v782_v58 = vld [vmem:[%s3396_s18 + $0x2e8] sm:$0xff]  ;;  %v783_v5 = vld [vmem:[%s3396_s18 + $0x2f0] sm:$0xff] }
 0x152   : > { %v2307_v4 = vadd.f32 %v1795_v13, %v7997_v10  ;;  %v2308_v56 = vadd.f32 %v1796_v14, %v7998_v25  ;;  %2817 = vst [vmem:[%s3469_s21 + $0x280] sm:$0xff] %v2305_v42  ;;  %v2309_v7 = vadd.f32 %v1797_v0, %v7999_v54  ;;  %v8003_v23 = vld [vmem:[#allocation42_spill] sm:$0xff]  ;;  %v784_v46 = vld [vmem:[%s3396_s18 + $0x2f8] sm:$0xff]  ;;  %v8004_v31 = vld [vmem:[#allocation43_spill] sm:$0xff] }
 0x153   : > { %v1800_v45 = vmul.f32 0.1, %v1288_v41  ;;  %v2310_v6 = vadd.f32 %v1798_v43, %v8000_v16  ;;  %v2311_v59 = vadd.f32 %v1799_v55, %v8001_v18  ;;  %v1289_v60 = vsub.f32 %v777_v1, %v8003_v23  ;;  %2818 = vst [vmem:[%s3469_s21 + $0x288] sm:$0xff] %v2306_v44  ;;  %v8005_v9 = vld [vmem:[#allocation44_spill] sm:$0xff]  ;;  %v8006_v33 = vld [vmem:[#allocation45_spill] sm:$0xff]  ;;  %v785_v11 = vld [vmem:[%s3396_s18 + $0x300] sm:$0xff] }
 0x154   : > { %2819 = vst [vmem:[%s3469_s21 + $0x290] sm:$0xff] %v2307_v4  ;;  %2820 = vst [vmem:[%s3469_s21 + $0x298] sm:$0xff] %v2308_v56  ;;  %v1290_v12 = vsub.f32 %v778_v3, %v8004_v31  ;;  %v1291_v32 = vsub.f32 %v779_v2, %v8005_v9  ;;  %v1292_v34 = vsub.f32 %v780_v63, %v8006_v33  ;;  %v8007_v35 = vld [vmem:[#allocation46_spill] sm:$0xff]  ;;  %v8008_v19 = vld [vmem:[#allocation47_spill] sm:$0xff] }
 0x155   : > { %v2312_v61 = vadd.f32 %v1800_v45, %v8002_v40  ;;  %2821 = vst [vmem:[%s3469_s21 + $0x2a0] sm:$0xff] %v2309_v7  ;;  %2822 = vst [vmem:[%s3469_s21 + $0x2a8] sm:$0xff] %v2310_v6  ;;  %v1801_v62 = vmul.f32 0.1, %v1289_v60  ;;  %v1293_v36 = vsub.f32 %v781_v57, %v8007_v35  ;;  %v1294_v37 = vsub.f32 %v782_v58, %v8008_v19  ;;  %v8009_v20 = vld [vmem:[#allocation48_spill] sm:$0xff]  ;;  %v786_v15 = vld [vmem:[%s3396_s18 + $0x308] sm:$0xff] }
 0x156   : > { %2823 = vst [vmem:[%s3469_s21 + $0x2b0] sm:$0xff] %v2311_v59  ;;  %v1295_v21 = vsub.f32 %v783_v5, %v8009_v20  ;;  %v787_v27 = vld [vmem:[%s3396_s18 + $0x310] sm:$0xff]  ;;  %v788_v38 = vld [vmem:[%s3396_s18 + $0x318] sm:$0xff]  ;;  %v1802_v47 = vmul.f32 0.1, %v1290_v12  ;;  %v789_v1 = vld [vmem:[%s3396_s18 + $0x320] sm:$0xff] }
 0x157   : > { %2824 = vst [vmem:[%s3469_s21 + $0x2b8] sm:$0xff] %v2312_v61  ;;  %v1803_v28 = vmul.f32 0.1, %v1291_v32  ;;  %v1804_v22 = vmul.f32 0.1, %v1292_v34  ;;  %v8010_v48 = vld [vmem:[#allocation49_spill] sm:$0xff]  ;;  %v2313_v50 = vadd.f32 %v1801_v62, %v8003_v23 }
 0x158   : > { %v1296_v49 = vsub.f32 %v784_v46, %v8010_v48  ;;  %v1805_v29 = vmul.f32 0.1, %v1293_v36  ;;  %v1806_v51 = vmul.f32 0.1, %v1294_v37  ;;  %v1807_v52 = vmul.f32 0.1, %v1295_v21 }
 0x159   : > { %v2314_v10 = vadd.f32 %v1802_v47, %v8004_v31  ;;  %v2315_v53 = vadd.f32 %v1803_v28, %v8005_v9  ;;  %v2316_v25 = vadd.f32 %v1804_v22, %v8006_v33  ;;  %v790_v30 = vld [vmem:[%s3396_s18 + $0x328] sm:$0xff]  ;;  %v791_v54 = vld [vmem:[%s3396_s18 + $0x330] sm:$0xff]  ;;  %2825 = vst [vmem:[%s3469_s21 + $0x2c0] sm:$0xff] %v2313_v50  ;;  %v8011_v18 = vld [vmem:[#allocation50_spill] sm:$0xff] }
 0x15a   : > { %v1808_v17 = vmul.f32 0.1, %v1296_v49  ;;  %v2317_v8 = vadd.f32 %v1805_v29, %v8007_v35  ;;  %v2318_v16 = vadd.f32 %v1806_v51, %v8008_v19  ;;  %v2319_v26 = vadd.f32 %v1807_v52, %v8009_v20  ;;  %v792_v3 = vld [vmem:[%s3396_s18 + $0x338] sm:$0xff]  ;;  %v8012_v63 = vld [vmem:[#allocation51_spill] sm:$0xff]  ;;  %v8013_v13 = vld [vmem:[#allocation52_spill] sm:$0xff] }
 0x15b   : > { %v1297_v24 = vsub.f32 %v785_v11, %v8011_v18  ;;  %2826 = vst [vmem:[%s3469_s21 + $0x2c8] sm:$0xff] %v2314_v10  ;;  %2827 = vst [vmem:[%s3469_s21 + $0x2d0] sm:$0xff] %v2315_v53  ;;  %v1298_v39 = vsub.f32 %v786_v15, %v8012_v63  ;;  %v1299_v14 = vsub.f32 %v787_v27, %v8013_v13  ;;  %v8014_v40 = vld [vmem:[#allocation53_spill] sm:$0xff]  ;;  %v793_v42 = vld [vmem:[%s3396_s18 + $0x340] sm:$0xff] }
 0x15c   : > { %2828 = vst [vmem:[%s3469_s21 + $0x2d8] sm:$0xff] %v2316_v25  ;;  %v2320_v2 = vadd.f32 %v1808_v17, %v8010_v48  ;;  %v1300_v41 = vsub.f32 %v788_v38, %v8014_v40  ;;  %2829 = vst [vmem:[%s3469_s21 + $0x2e0] sm:$0xff] %v2317_v8  ;;  %v8015_v43 = vld [vmem:[#allocation54_spill] sm:$0xff]  ;;  %v8016_v44 = vld [vmem:[#allocation55_spill] sm:$0xff] }
 0x15d   : > { %2830 = vst [vmem:[%s3469_s21 + $0x2e8] sm:$0xff] %v2318_v16  ;;  %2831 = vst [vmem:[%s3469_s21 + $0x2f0] sm:$0xff] %v2319_v26  ;;  %v1809_v0 = vmul.f32 0.1, %v1297_v24  ;;  %v1301_v55 = vsub.f32 %v789_v1, %v8015_v43  ;;  %v1302_v4 = vsub.f32 %v790_v30, %v8016_v44  ;;  %v8017_v56 = vld [vmem:[#allocation56_spill] sm:$0xff]  ;;  %v794_v57 = vld [vmem:[%s3396_s18 + $0x348] sm:$0xff] }
 0x15e   : > { %v1303_v45 = vsub.f32 %v791_v54, %v8017_v56  ;;  %v795_v58 = vld [vmem:[%s3396_s18 + $0x350] sm:$0xff]  ;;  %v796_v5 = vld [vmem:[%s3396_s18 + $0x358] sm:$0xff]  ;;  %2832 = vst [vmem:[%s3469_s21 + $0x2f8] sm:$0xff] %v2320_v2  ;;  %v1810_v7 = vmul.f32 0.1, %v1298_v39  ;;  %v797_v11 = vld [vmem:[%s3396_s18 + $0x360] sm:$0xff] }
 0x15f   : > { %v1811_v6 = vmul.f32 0.1, %v1299_v14  ;;  %v1812_v59 = vmul.f32 0.1, %v1300_v41  ;;  %v8018_v23 = vld [vmem:[#allocation57_spill] sm:$0xff]  ;;  %v2321_v46 = vadd.f32 %v1809_v0, %v8011_v18  ;;  %v798_v62 = vld [vmem:[%s3396_s18 + $0x368] sm:$0xff] }
 0x160   : > { %v1304_v60 = vsub.f32 %v792_v3, %v8018_v23  ;;  %v1813_v61 = vmul.f32 0.1, %v1301_v55  ;;  %v1814_v31 = vmul.f32 0.1, %v1302_v4  ;;  %v1815_v12 = vmul.f32 0.1, %v1303_v45 }
 0x161   : > { %v2322_v9 = vadd.f32 %v1810_v7, %v8012_v63  ;;  %v2323_v32 = vadd.f32 %v1811_v6, %v8013_v13  ;;  %v2324_v33 = vadd.f32 %v1812_v59, %v8014_v40  ;;  %v799_v35 = vld [vmem:[%s3396_s18 + $0x370] sm:$0xff]  ;;  %2833 = vst [vmem:[%s3469_s21 + $0x300] sm:$0xff] %v2321_v46  ;;  %v8019_v20 = vld [vmem:[#allocation58_spill] sm:$0xff]  ;;  %v800_v15 = vld [vmem:[%s3396_s18 + $0x378] sm:$0xff] }
 0x162   : > { %v1816_v34 = vmul.f32 0.1, %v1304_v60  ;;  %v2325_v36 = vadd.f32 %v1813_v61, %v8015_v43  ;;  %v2326_v19 = vadd.f32 %v1814_v31, %v8016_v44  ;;  %v2327_v37 = vadd.f32 %v1815_v12, %v8017_v56  ;;  %v8020_v38 = vld [vmem:[#allocation59_spill] sm:$0xff]  ;;  %v8021_v28 = vld [vmem:[#allocation60_spill] sm:$0xff]  ;;  %v8022_v48 = vld [vmem:[#allocation61_spill] sm:$0xff] }
 0x163   : > { %v1305_v21 = vsub.f32 %v793_v42, %v8019_v20  ;;  %2834 = vst [vmem:[%s3469_s21 + $0x308] sm:$0xff] %v2322_v9  ;;  %2835 = vst [vmem:[%s3469_s21 + $0x310] sm:$0xff] %v2323_v32  ;;  %v1306_v47 = vsub.f32 %v794_v57, %v8020_v38  ;;  %v1307_v22 = vsub.f32 %v795_v58, %v8021_v28  ;;  %v801_v50 = vld [vmem:[%s3396_s18 + $0x380] sm:$0xff]  ;;  %v8024_v10 = vld [vmem:[#allocation63_spill] sm:$0xff] }
 0x164   : > { %2836 = vst [vmem:[%s3469_s21 + $0x318] sm:$0xff] %v2324_v33  ;;  %v2328_v27 = vadd.f32 %v1816_v34, %v8018_v23  ;;  %v1308_v49 = vsub.f32 %v796_v5, %v8022_v48  ;;  %2837 = vst [vmem:[%s3469_s21 + $0x320] sm:$0xff] %v2325_v36  ;;  %v8023_v51 = vld [vmem:[#allocation62_spill] sm:$0xff]  ;;  %v1310_v53 = vsub.f32 %v798_v62, %v8024_v10  ;;  %v8025_v25 = vld [vmem:[#allocation64_spill] sm:$0xff] }
 0x165   : > { %2838 = vst [vmem:[%s3469_s21 + $0x328] sm:$0xff] %v2326_v19  ;;  %2839 = vst [vmem:[%s3469_s21 + $0x330] sm:$0xff] %v2327_v37  ;;  %v1817_v29 = vmul.f32 0.1, %v1305_v21  ;;  %v1309_v52 = vsub.f32 %v797_v11, %v8023_v51  ;;  %v1311_v17 = vsub.f32 %v799_v35, %v8025_v25  ;;  %v802_v1 = vld [vmem:[%s3396_s18 + $0x388] sm:$0xff]  ;;  %v803_v30 = vld [vmem:[%s3396_s18 + $0x390] sm:$0xff] }
 0x166   : > { %v804_v54 = vld [vmem:[%s3396_s18 + $0x398] sm:$0xff]  ;;  %2840 = vst [vmem:[%s3469_s21 + $0x338] sm:$0xff] %v2328_v27  ;;  %v1818_v8 = vmul.f32 0.1, %v1306_v47  ;;  %v1819_v16 = vmul.f32 0.1, %v1307_v22 }
 0x167   : > { %v1820_v26 = vmul.f32 0.1, %v1308_v49  ;;  %v8026_v18 = vld [vmem:[#allocation65_spill] sm:$0xff]  ;;  %v2329_v3 = vadd.f32 %v1817_v29, %v8019_v20  ;;  %v1821_v2 = vmul.f32 0.1, %v1309_v52  ;;  %v805_v42 = vld [vmem:[%s3396_s18 + $0x3a0] sm:$0xff] }
 0x168   : > { %v1312_v24 = vsub.f32 %v800_v15, %v8026_v18  ;;  %v1822_v63 = vmul.f32 0.1, %v1310_v53  ;;  %v1823_v39 = vmul.f32 0.1, %v1311_v17  ;;  %v2330_v13 = vadd.f32 %v1818_v8, %v8020_v38  ;;  %v806_v0 = vld [vmem:[%s3396_s18 + $0x3a8] sm:$0xff]  ;;  %v807_v43 = vld [vmem:[%s3396_s18 + $0x3b0] sm:$0xff] }
 0x169   : > { %v2331_v14 = vadd.f32 %v1819_v16, %v8021_v28  ;;  %v2332_v40 = vadd.f32 %v1820_v26, %v8022_v48  ;;  %2841 = vst [vmem:[%s3469_s21 + $0x340] sm:$0xff] %v2329_v3  ;;  %v2333_v55 = vadd.f32 %v1821_v2, %v8023_v51  ;;  %v8027_v56 = vld [vmem:[#allocation66_spill] sm:$0xff]  ;;  %v808_v57 = vld [vmem:[%s3396_s18 + $0x3b8] sm:$0xff]  ;;  %v8028_v5 = vld [vmem:[#allocation67_spill] sm:$0xff] }
 0x16a   : > { %v1824_v41 = vmul.f32 0.1, %v1312_v24  ;;  %v2334_v44 = vadd.f32 %v1822_v63, %v8024_v10  ;;  %v2335_v4 = vadd.f32 %v1823_v39, %v8025_v25  ;;  %v1313_v45 = vsub.f32 %v801_v50, %v8027_v56  ;;  %2842 = vst [vmem:[%s3469_s21 + $0x348] sm:$0xff] %v2330_v13  ;;  %v8029_v6 = vld [vmem:[#allocation68_spill] sm:$0xff]  ;;  %v8030_v23 = vld [vmem:[#allocation69_spill] sm:$0xff]  ;;  %v809_v46 = vld [vmem:[%s3396_s18 + $0x3c0] sm:$0xff] }
 0x16b   : > { %2843 = vst [vmem:[%s3469_s21 + $0x350] sm:$0xff] %v2331_v14  ;;  %2844 = vst [vmem:[%s3469_s21 + $0x358] sm:$0xff] %v2332_v40  ;;  %v1314_v7 = vsub.f32 %v802_v1, %v8028_v5  ;;  %v1315_v59 = vsub.f32 %v803_v30, %v8029_v6  ;;  %v1316_v60 = vsub.f32 %v804_v54, %v8030_v23  ;;  %v8031_v31 = vld [vmem:[#allocation70_spill] sm:$0xff]  ;;  %v8032_v9 = vld [vmem:[#allocation71_spill] sm:$0xff] }
 0x16c   : > { %v2336_v58 = vadd.f32 %v1824_v41, %v8026_v18  ;;  %2845 = vst [vmem:[%s3469_s21 + $0x360] sm:$0xff] %v2333_v55  ;;  %2846 = vst [vmem:[%s3469_s21 + $0x368] sm:$0xff] %v2334_v44  ;;  %v1825_v61 = vmul.f32 0.1, %v1313_v45  ;;  %v1317_v12 = vsub.f32 %v805_v42, %v8031_v31  ;;  %v1318_v32 = vsub.f32 %v806_v0, %v8032_v9  ;;  %v8033_v33 = vld [vmem:[#allocation72_spill] sm:$0xff]  ;;  %v810_v11 = vld [vmem:[%s3396_s18 + $0x3c8] sm:$0xff] }
 0x16d   : > { %2847 = vst [vmem:[%s3469_s21 + $0x370] sm:$0xff] %v2335_v4  ;;  %v1319_v34 = vsub.f32 %v807_v43, %v8033_v33  ;;  %v811_v62 = vld [vmem:[%s3396_s18 + $0x3d0] sm:$0xff]  ;;  %v812_v35 = vld [vmem:[%s3396_s18 + $0x3d8] sm:$0xff]  ;;  %v1826_v36 = vmul.f32 0.1, %v1314_v7  ;;  %v813_v50 = vld [vmem:[%s3396_s18 + $0x3e0] sm:$0xff] }
 0x16e   : > { %2848 = vst [vmem:[%s3469_s21 + $0x378] sm:$0xff] %v2336_v58  ;;  %v1827_v19 = vmul.f32 0.1, %v1315_v59  ;;  %v1828_v37 = vmul.f32 0.1, %v1316_v60  ;;  %v8034_v20 = vld [vmem:[#allocation73_spill] sm:$0xff]  ;;  %v2337_v15 = vadd.f32 %v1825_v61, %v8027_v56 }
 0x16f   : > { %v1320_v21 = vsub.f32 %v808_v57, %v8034_v20  ;;  %v1829_v27 = vmul.f32 0.1, %v1317_v12  ;;  %v1830_v38 = vmul.f32 0.1, %v1318_v32  ;;  %v1831_v47 = vmul.f32 0.1, %v1319_v34 }
 0x170   : > { %v2338_v28 = vadd.f32 %v1826_v36, %v8028_v5  ;;  %v2339_v22 = vadd.f32 %v1827_v19, %v8029_v6  ;;  %v2340_v48 = vadd.f32 %v1828_v37, %v8030_v23  ;;  %v814_v29 = vld [vmem:[%s3396_s18 + $0x3e8] sm:$0xff]  ;;  %v815_v51 = vld [vmem:[%s3396_s18 + $0x3f0] sm:$0xff]  ;;  %2849 = vst [vmem:[%s3469_s21 + $0x380] sm:$0xff] %v2337_v15  ;;  %v8035_v25 = vld [vmem:[#allocation74_spill] sm:$0xff] }
 0x171   : > { %v1832_v49 = vmul.f32 0.1, %v1320_v21  ;;  %v2341_v52 = vadd.f32 %v1829_v27, %v8031_v31  ;;  %v2342_v10 = vadd.f32 %v1830_v38, %v8032_v9  ;;  %v2343_v53 = vadd.f32 %v1831_v47, %v8033_v33  ;;  %v816_v1 = vld [vmem:[%s3396_s18 + $0x3f8] sm:$0xff]  ;;  %v8036_v54 = vld [vmem:[#allocation75_spill] sm:$0xff]  ;;  %v8037_v16 = vld [vmem:[#allocation76_spill] sm:$0xff] }
 0x172   : > { %v1321_v17 = vsub.f32 %v809_v46, %v8035_v25  ;;  %2850 = vst [vmem:[%s3469_s21 + $0x388] sm:$0xff] %v2338_v28  ;;  %2851 = vst [vmem:[%s3469_s21 + $0x390] sm:$0xff] %v2339_v22  ;;  %v1322_v8 = vsub.f32 %v810_v11, %v8036_v54  ;;  %v1323_v26 = vsub.f32 %v811_v62, %v8037_v16  ;;  %v8038_v18 = vld [vmem:[#allocation77_spill] sm:$0xff]  ;;  %v817_v3 = vld [vmem:[%s3396_s18 + $0x400] sm:$0xff] }
 0x173   : > { %2852 = vst [vmem:[%s3469_s21 + $0x398] sm:$0xff] %v2340_v48  ;;  %v2344_v30 = vadd.f32 %v1832_v49, %v8034_v20  ;;  %v1324_v24 = vsub.f32 %v812_v35, %v8038_v18  ;;  %2853 = vst [vmem:[%s3469_s21 + $0x3a0] sm:$0xff] %v2341_v52  ;;  %v8039_v63 = vld [vmem:[#allocation78_spill] sm:$0xff]  ;;  %v8040_v13 = vld [vmem:[#allocation79_spill] sm:$0xff] }
 0x174   : > { %2854 = vst [vmem:[%s3469_s21 + $0x3a8] sm:$0xff] %v2342_v10  ;;  %2855 = vst [vmem:[%s3469_s21 + $0x3b0] sm:$0xff] %v2343_v53  ;;  %v1833_v2 = vmul.f32 0.1, %v1321_v17  ;;  %v1325_v39 = vsub.f32 %v813_v50, %v8039_v63  ;;  %v1326_v14 = vsub.f32 %v814_v29, %v8040_v13  ;;  %v8041_v40 = vld [vmem:[#allocation80_spill] sm:$0xff]  ;;  %v818_v42 = vld [vmem:[%s3396_s18 + $0x408] sm:$0xff] }
 0x175   : > { %v1327_v41 = vsub.f32 %v815_v51, %v8041_v40  ;;  %v819_v0 = vld [vmem:[%s3396_s18 + $0x410] sm:$0xff]  ;;  %v820_v43 = vld [vmem:[%s3396_s18 + $0x418] sm:$0xff]  ;;  %2856 = vst [vmem:[%s3469_s21 + $0x3b8] sm:$0xff] %v2344_v30  ;;  %v1834_v55 = vmul.f32 0.1, %v1322_v8  ;;  %v821_v46 = vld [vmem:[%s3396_s18 + $0x420] sm:$0xff] }
 0x176   : > { %v1835_v44 = vmul.f32 0.1, %v1323_v26  ;;  %v1836_v4 = vmul.f32 0.1, %v1324_v24  ;;  %v8042_v56 = vld [vmem:[#allocation81_spill] sm:$0xff]  ;;  %v2345_v57 = vadd.f32 %v1833_v2, %v8035_v25  ;;  %v822_v61 = vld [vmem:[%s3396_s18 + $0x428] sm:$0xff] }
 0x177   : > { %v1328_v45 = vsub.f32 %v816_v1, %v8042_v56  ;;  %v1837_v58 = vmul.f32 0.1, %v1325_v39  ;;  %v1838_v5 = vmul.f32 0.1, %v1326_v14  ;;  %v1839_v7 = vmul.f32 0.1, %v1327_v41 }
 0x178   : > { %v2346_v6 = vadd.f32 %v1834_v55, %v8036_v54  ;;  %v2347_v59 = vadd.f32 %v1835_v44, %v8037_v16  ;;  %v2348_v23 = vadd.f32 %v1836_v4, %v8038_v18  ;;  %v823_v31 = vld [vmem:[%s3396_s18 + $0x430] sm:$0xff]  ;;  %2857 = vst [vmem:[%s3469_s21 + $0x3c0] sm:$0xff] %v2345_v57  ;;  %v8043_v33 = vld [vmem:[#allocation82_spill] sm:$0xff]  ;;  %v824_v11 = vld [vmem:[%s3396_s18 + $0x438] sm:$0xff] }
 0x179   : > { %v1840_v60 = vmul.f32 0.1, %v1328_v45  ;;  %v2349_v12 = vadd.f32 %v1837_v58, %v8039_v63  ;;  %v2350_v9 = vadd.f32 %v1838_v5, %v8040_v13  ;;  %v2351_v32 = vadd.f32 %v1839_v7, %v8041_v40  ;;  %v8044_v35 = vld [vmem:[#allocation83_spill] sm:$0xff]  ;;  %v8045_v19 = vld [vmem:[#allocation84_spill] sm:$0xff]  ;;  %v8046_v20 = vld [vmem:[#allocation85_spill] sm:$0xff] }
 0x17a   : > { %v1329_v34 = vsub.f32 %v817_v3, %v8043_v33  ;;  %2858 = vst [vmem:[%s3469_s21 + $0x3c8] sm:$0xff] %v2346_v6  ;;  %2859 = vst [vmem:[%s3469_s21 + $0x3d0] sm:$0xff] %v2347_v59  ;;  %v1330_v36 = vsub.f32 %v818_v42, %v8044_v35  ;;  %v1331_v37 = vsub.f32 %v819_v0, %v8045_v19  ;;  %v825_v15 = vld [vmem:[%s3396_s18 + $0x440] sm:$0xff]  ;;  %v8048_v28 = vld [vmem:[#allocation87_spill] sm:$0xff] }
 0x17b   : > { %2860 = vst [vmem:[%s3469_s21 + $0x3d8] sm:$0xff] %v2348_v23  ;;  %v2352_v62 = vadd.f32 %v1840_v60, %v8042_v56  ;;  %v1332_v21 = vsub.f32 %v820_v43, %v8046_v20  ;;  %2861 = vst [vmem:[%s3469_s21 + $0x3e0] sm:$0xff] %v2349_v12  ;;  %v8047_v38 = vld [vmem:[#allocation86_spill] sm:$0xff]  ;;  %v1334_v22 = vsub.f32 %v822_v61, %v8048_v28  ;;  %v8049_v48 = vld [vmem:[#allocation88_spill] sm:$0xff] }
 0x17c   : > { %2862 = vst [vmem:[%s3469_s21 + $0x3e8] sm:$0xff] %v2350_v9  ;;  %2863 = vst [vmem:[%s3469_s21 + $0x3f0] sm:$0xff] %v2351_v32  ;;  %v1841_v27 = vmul.f32 0.1, %v1329_v34  ;;  %v1333_v47 = vsub.f32 %v821_v46, %v8047_v38  ;;  %v1335_v49 = vsub.f32 %v823_v31, %v8049_v48  ;;  %v826_v50 = vld [vmem:[%s3396_s18 + $0x448] sm:$0xff]  ;;  %v827_v29 = vld [vmem:[%s3396_s18 + $0x450] sm:$0xff] }
 0x17d   : > { %v828_v51 = vld [vmem:[%s3396_s18 + $0x458] sm:$0xff]  ;;  %2864 = vst [vmem:[%s3469_s21 + $0x3f8] sm:$0xff] %v2352_v62  ;;  %v1842_v52 = vmul.f32 0.1, %v1330_v36  ;;  %v1843_v10 = vmul.f32 0.1, %v1331_v37 }
 0x17e   : > { %v1844_v53 = vmul.f32 0.1, %v1332_v21  ;;  %v8050_v25 = vld [vmem:[#allocation89_spill] sm:$0xff]  ;;  %v2353_v1 = vadd.f32 %v1841_v27, %v8043_v33  ;;  %v1845_v30 = vmul.f32 0.1, %v1333_v47  ;;  %v829_v3 = vld [vmem:[%s3396_s18 + $0x460] sm:$0xff] }
 0x17f   : > { %v1336_v17 = vsub.f32 %v824_v11, %v8050_v25  ;;  %v1846_v54 = vmul.f32 0.1, %v1334_v22  ;;  %v1847_v8 = vmul.f32 0.1, %v1335_v49  ;;  %v2354_v16 = vadd.f32 %v1842_v52, %v8044_v35  ;;  %v830_v2 = vld [vmem:[%s3396_s18 + $0x468] sm:$0xff]  ;;  %v831_v63 = vld [vmem:[%s3396_s18 + $0x470] sm:$0xff] }
 0x180   : > { %v2355_v26 = vadd.f32 %v1843_v10, %v8045_v19  ;;  %v2356_v18 = vadd.f32 %v1844_v53, %v8046_v20  ;;  %2865 = vst [vmem:[%s3469_s21 + $0x400] sm:$0xff] %v2353_v1  ;;  %v2357_v39 = vadd.f32 %v1845_v30, %v8047_v38  ;;  %v8051_v40 = vld [vmem:[#allocation90_spill] sm:$0xff]  ;;  %v832_v42 = vld [vmem:[%s3396_s18 + $0x478] sm:$0xff]  ;;  %v8052_v43 = vld [vmem:[#allocation91_spill] sm:$0xff] }
 0x181   : > { %v1848_v24 = vmul.f32 0.1, %v1336_v17  ;;  %v2358_v13 = vadd.f32 %v1846_v54, %v8048_v28  ;;  %v2359_v14 = vadd.f32 %v1847_v8, %v8049_v48  ;;  %v1337_v41 = vsub.f32 %v825_v15, %v8051_v40  ;;  %2866 = vst [vmem:[%s3469_s21 + $0x408] sm:$0xff] %v2354_v16  ;;  %v8053_v44 = vld [vmem:[#allocation92_spill] sm:$0xff]  ;;  %v8054_v56 = vld [vmem:[#allocation93_spill] sm:$0xff]  ;;  %v833_v57 = vld [vmem:[%s3396_s18 + $0x480] sm:$0xff] }
 0x182   : > { %2867 = vst [vmem:[%s3469_s21 + $0x410] sm:$0xff] %v2355_v26  ;;  %2868 = vst [vmem:[%s3469_s21 + $0x418] sm:$0xff] %v2356_v18  ;;  %v1338_v55 = vsub.f32 %v826_v50, %v8052_v43  ;;  %v1339_v4 = vsub.f32 %v827_v29, %v8053_v44  ;;  %v1340_v45 = vsub.f32 %v828_v51, %v8054_v56  ;;  %v8055_v5 = vld [vmem:[#allocation94_spill] sm:$0xff]  ;;  %v8056_v6 = vld [vmem:[#allocation95_spill] sm:$0xff] }
 0x183   : > { %v2360_v0 = vadd.f32 %v1848_v24, %v8050_v25  ;;  %2869 = vst [vmem:[%s3469_s21 + $0x420] sm:$0xff] %v2357_v39  ;;  %2870 = vst [vmem:[%s3469_s21 + $0x428] sm:$0xff] %v2358_v13  ;;  %v1849_v58 = vmul.f32 0.1, %v1337_v41  ;;  %v1341_v7 = vsub.f32 %v829_v3, %v8055_v5  ;;  %v1342_v59 = vsub.f32 %v830_v2, %v8056_v6  ;;  %v8057_v23 = vld [vmem:[#allocation96_spill] sm:$0xff]  ;;  %v834_v46 = vld [vmem:[%s3396_s18 + $0x488] sm:$0xff] }
 0x184   : > { %2871 = vst [vmem:[%s3469_s21 + $0x430] sm:$0xff] %v2359_v14  ;;  %v1343_v60 = vsub.f32 %v831_v63, %v8057_v23  ;;  %v835_v61 = vld [vmem:[%s3396_s18 + $0x490] sm:$0xff]  ;;  %v836_v31 = vld [vmem:[%s3396_s18 + $0x498] sm:$0xff]  ;;  %v1850_v12 = vmul.f32 0.1, %v1338_v55  ;;  %v837_v15 = vld [vmem:[%s3396_s18 + $0x4a0] sm:$0xff] }
 0x185   : > { %2872 = vst [vmem:[%s3469_s21 + $0x438] sm:$0xff] %v2360_v0  ;;  %v1851_v9 = vmul.f32 0.1, %v1339_v4  ;;  %v1852_v32 = vmul.f32 0.1, %v1340_v45  ;;  %v8058_v33 = vld [vmem:[#allocation97_spill] sm:$0xff]  ;;  %v2361_v11 = vadd.f32 %v1849_v58, %v8051_v40 }
 0x186   : > { %v1344_v34 = vsub.f32 %v832_v42, %v8058_v33  ;;  %v1853_v62 = vmul.f32 0.1, %v1341_v7  ;;  %v1854_v35 = vmul.f32 0.1, %v1342_v59  ;;  %v1855_v36 = vmul.f32 0.1, %v1343_v60 }
 0x187   : > { %v2362_v19 = vadd.f32 %v1850_v12, %v8052_v43  ;;  %v2363_v37 = vadd.f32 %v1851_v9, %v8053_v44  ;;  %v2364_v20 = vadd.f32 %v1852_v32, %v8054_v56  ;;  %v838_v27 = vld [vmem:[%s3396_s18 + $0x4a8] sm:$0xff]  ;;  %v839_v38 = vld [vmem:[%s3396_s18 + $0x4b0] sm:$0xff]  ;;  %2873 = vst [vmem:[%s3469_s21 + $0x440] sm:$0xff] %v2361_v11  ;;  %v8059_v48 = vld [vmem:[#allocation98_spill] sm:$0xff] }
 0x188   : > { %v1856_v21 = vmul.f32 0.1, %v1344_v34  ;;  %v2365_v47 = vadd.f32 %v1853_v62, %v8055_v5  ;;  %v2366_v28 = vadd.f32 %v1854_v35, %v8056_v6  ;;  %v2367_v22 = vadd.f32 %v1855_v36, %v8057_v23  ;;  %v840_v50 = vld [vmem:[%s3396_s18 + $0x4b8] sm:$0xff]  ;;  %v8060_v51 = vld [vmem:[#allocation99_spill] sm:$0xff]  ;;  %v8061_v10 = vld [vmem:[#allocation100_spill] sm:$0xff] }
 0x189   : > { %v1345_v49 = vsub.f32 %v833_v57, %v8059_v48  ;;  %2874 = vst [vmem:[%s3469_s21 + $0x448] sm:$0xff] %v2362_v19  ;;  %2875 = vst [vmem:[%s3469_s21 + $0x450] sm:$0xff] %v2363_v37  ;;  %v1346_v52 = vsub.f32 %v834_v46, %v8060_v51  ;;  %v1347_v53 = vsub.f32 %v835_v61, %v8061_v10  ;;  %v8062_v25 = vld [vmem:[#allocation101_spill] sm:$0xff]  ;;  %v841_v1 = vld [vmem:[%s3396_s18 + $0x4c0] sm:$0xff] }
 0x18a   : > { %2876 = vst [vmem:[%s3469_s21 + $0x458] sm:$0xff] %v2364_v20  ;;  %v2368_v29 = vadd.f32 %v1856_v21, %v8058_v33  ;;  %v1348_v17 = vsub.f32 %v836_v31, %v8062_v25  ;;  %2877 = vst [vmem:[%s3469_s21 + $0x460] sm:$0xff] %v2365_v47  ;;  %v8063_v54 = vld [vmem:[#allocation102_spill] sm:$0xff]  ;;  %v8064_v16 = vld [vmem:[#allocation103_spill] sm:$0xff] }
 0x18b   : > { %2878 = vst [vmem:[%s3469_s21 + $0x468] sm:$0xff] %v2366_v28  ;;  %2879 = vst [vmem:[%s3469_s21 + $0x470] sm:$0xff] %v2367_v22  ;;  %v1857_v30 = vmul.f32 0.1, %v1345_v49  ;;  %v1349_v8 = vsub.f32 %v837_v15, %v8063_v54  ;;  %v1350_v26 = vsub.f32 %v838_v27, %v8064_v16  ;;  %v8065_v18 = vld [vmem:[#allocation104_spill] sm:$0xff]  ;;  %v842_v3 = vld [vmem:[%s3396_s18 + $0x4c8] sm:$0xff] }
 0x18c   : > { %v1351_v24 = vsub.f32 %v839_v38, %v8065_v18  ;;  %v843_v2 = vld [vmem:[%s3396_s18 + $0x4d0] sm:$0xff]  ;;  %v844_v63 = vld [vmem:[%s3396_s18 + $0x4d8] sm:$0xff]  ;;  %2880 = vst [vmem:[%s3469_s21 + $0x478] sm:$0xff] %v2368_v29  ;;  %v1858_v39 = vmul.f32 0.1, %v1346_v52  ;;  %v845_v57 = vld [vmem:[%s3396_s18 + $0x4e0] sm:$0xff] }
 0x18d   : > { %v1859_v13 = vmul.f32 0.1, %v1347_v53  ;;  %v1860_v14 = vmul.f32 0.1, %v1348_v17  ;;  %v8066_v40 = vld [vmem:[#allocation105_spill] sm:$0xff]  ;;  %v2369_v42 = vadd.f32 %v1857_v30, %v8059_v48  ;;  %v846_v58 = vld [vmem:[%s3396_s18 + $0x4e8] sm:$0xff] }
 0x18e   : > { %v1352_v41 = vsub.f32 %v840_v50, %v8066_v40  ;;  %v1861_v0 = vmul.f32 0.1, %v1349_v8  ;;  %v1862_v43 = vmul.f32 0.1, %v1350_v26  ;;  %v1863_v55 = vmul.f32 0.1, %v1351_v24 }
 0x18f   : > { %v2370_v44 = vadd.f32 %v1858_v39, %v8060_v51  ;;  %v2371_v4 = vadd.f32 %v1859_v13, %v8061_v10  ;;  %v2372_v56 = vadd.f32 %v1860_v14, %v8062_v25  ;;  %v847_v5 = vld [vmem:[%s3396_s18 + $0x4f0] sm:$0xff]  ;;  %2881 = vst [vmem:[%s3469_s21 + $0x480] sm:$0xff] %v2369_v42  ;;  %v8067_v23 = vld [vmem:[#allocation106_spill] sm:$0xff]  ;;  %v848_v46 = vld [vmem:[%s3396_s18 + $0x4f8] sm:$0xff] }
 0x190   : > { %v1864_v45 = vmul.f32 0.1, %v1352_v41  ;;  %v2373_v7 = vadd.f32 %v1861_v0, %v8063_v54  ;;  %v2374_v6 = vadd.f32 %v1862_v43, %v8064_v16  ;;  %v2375_v59 = vadd.f32 %v1863_v55, %v8065_v18  ;;  %v8068_v31 = vld [vmem:[#allocation107_spill] sm:$0xff]  ;;  %v8069_v9 = vld [vmem:[#allocation108_spill] sm:$0xff]  ;;  %v8070_v33 = vld [vmem:[#allocation109_spill] sm:$0xff] }
 0x191   : > { %v1353_v60 = vsub.f32 %v841_v1, %v8067_v23  ;;  %2882 = vst [vmem:[%s3469_s21 + $0x488] sm:$0xff] %v2370_v44  ;;  %2883 = vst [vmem:[%s3469_s21 + $0x490] sm:$0xff] %v2371_v4  ;;  %v1354_v12 = vsub.f32 %v842_v3, %v8068_v31  ;;  %v1355_v32 = vsub.f32 %v843_v2, %v8069_v9  ;;  %v849_v11 = vld [vmem:[%s3396_s18 + $0x500] sm:$0xff]  ;;  %v8072_v19 = vld [vmem:[#allocation111_spill] sm:$0xff] }
 0x192   : > { %2884 = vst [vmem:[%s3469_s21 + $0x498] sm:$0xff] %v2372_v56  ;;  %v2376_v61 = vadd.f32 %v1864_v45, %v8066_v40  ;;  %v1356_v34 = vsub.f32 %v844_v63, %v8070_v33  ;;  %2885 = vst [vmem:[%s3469_s21 + $0x4a0] sm:$0xff] %v2373_v7  ;;  %v8071_v35 = vld [vmem:[#allocation110_spill] sm:$0xff]  ;;  %v1358_v37 = vsub.f32 %v846_v58, %v8072_v19  ;;  %v8073_v20 = vld [vmem:[#allocation112_spill] sm:$0xff] }
 0x193   : > { %2886 = vst [vmem:[%s3469_s21 + $0x4a8] sm:$0xff] %v2374_v6  ;;  %2887 = vst [vmem:[%s3469_s21 + $0x4b0] sm:$0xff] %v2375_v59  ;;  %v1865_v62 = vmul.f32 0.1, %v1353_v60  ;;  %v1357_v36 = vsub.f32 %v845_v57, %v8071_v35  ;;  %v1359_v21 = vsub.f32 %v847_v5, %v8073_v20  ;;  %v850_v15 = vld [vmem:[%s3396_s18 + $0x508] sm:$0xff]  ;;  %v851_v27 = vld [vmem:[%s3396_s18 + $0x510] sm:$0xff] }
 0x194   : > { %v852_v38 = vld [vmem:[%s3396_s18 + $0x518] sm:$0xff]  ;;  %2888 = vst [vmem:[%s3469_s21 + $0x4b8] sm:$0xff] %v2376_v61  ;;  %v1866_v47 = vmul.f32 0.1, %v1354_v12  ;;  %v1867_v28 = vmul.f32 0.1, %v1355_v32 }
 0x195   : > { %v1868_v22 = vmul.f32 0.1, %v1356_v34  ;;  %v8074_v48 = vld [vmem:[#allocation113_spill] sm:$0xff]  ;;  %v2377_v50 = vadd.f32 %v1865_v62, %v8067_v23  ;;  %v1869_v29 = vmul.f32 0.1, %v1357_v36  ;;  %v853_v1 = vld [vmem:[%s3396_s18 + $0x520] sm:$0xff] }
 0x196   : > { %v1360_v49 = vsub.f32 %v848_v46, %v8074_v48  ;;  %v1870_v51 = vmul.f32 0.1, %v1358_v37  ;;  %v1871_v52 = vmul.f32 0.1, %v1359_v21  ;;  %v2378_v10 = vadd.f32 %v1866_v47, %v8068_v31  ;;  %v854_v30 = vld [vmem:[%s3396_s18 + $0x528] sm:$0xff]  ;;  %v855_v54 = vld [vmem:[%s3396_s18 + $0x530] sm:$0xff] }
 0x197   : > { %v2379_v53 = vadd.f32 %v1867_v28, %v8069_v9  ;;  %v2380_v25 = vadd.f32 %v1868_v22, %v8070_v33  ;;  %2889 = vst [vmem:[%s3469_s21 + $0x4c0] sm:$0xff] %v2377_v50  ;;  %v2381_v8 = vadd.f32 %v1869_v29, %v8071_v35  ;;  %v8075_v18 = vld [vmem:[#allocation114_spill] sm:$0xff]  ;;  %v856_v3 = vld [vmem:[%s3396_s18 + $0x538] sm:$0xff]  ;;  %v8076_v63 = vld [vmem:[#allocation115_spill] sm:$0xff] }
 0x198   : > { %v1872_v17 = vmul.f32 0.1, %v1360_v49  ;;  %v2382_v16 = vadd.f32 %v1870_v51, %v8072_v19  ;;  %v2383_v26 = vadd.f32 %v1871_v52, %v8073_v20  ;;  %v1361_v24 = vsub.f32 %v849_v11, %v8075_v18  ;;  %2890 = vst [vmem:[%s3469_s21 + $0x4c8] sm:$0xff] %v2378_v10  ;;  %v8077_v13 = vld [vmem:[#allocation116_spill] sm:$0xff]  ;;  %v8078_v40 = vld [vmem:[#allocation117_spill] sm:$0xff]  ;;  %v857_v42 = vld [vmem:[%s3396_s18 + $0x540] sm:$0xff] }
 0x199   : > { %2891 = vst [vmem:[%s3469_s21 + $0x4d0] sm:$0xff] %v2379_v53  ;;  %2892 = vst [vmem:[%s3469_s21 + $0x4d8] sm:$0xff] %v2380_v25  ;;  %v1362_v39 = vsub.f32 %v850_v15, %v8076_v63  ;;  %v1363_v14 = vsub.f32 %v851_v27, %v8077_v13  ;;  %v1364_v41 = vsub.f32 %v852_v38, %v8078_v40  ;;  %v8079_v43 = vld [vmem:[#allocation118_spill] sm:$0xff]  ;;  %v8080_v44 = vld [vmem:[#allocation119_spill] sm:$0xff] }
 0x19a   : > { %v2384_v2 = vadd.f32 %v1872_v17, %v8074_v48  ;;  %2893 = vst [vmem:[%s3469_s21 + $0x4e0] sm:$0xff] %v2381_v8  ;;  %2894 = vst [vmem:[%s3469_s21 + $0x4e8] sm:$0xff] %v2382_v16  ;;  %v1873_v0 = vmul.f32 0.1, %v1361_v24  ;;  %v1365_v55 = vsub.f32 %v853_v1, %v8079_v43  ;;  %v1366_v4 = vsub.f32 %v854_v30, %v8080_v44  ;;  %v8081_v56 = vld [vmem:[#allocation120_spill] sm:$0xff]  ;;  %v858_v57 = vld [vmem:[%s3396_s18 + $0x548] sm:$0xff] }
 0x19b   : > { %2895 = vst [vmem:[%s3469_s21 + $0x4f0] sm:$0xff] %v2383_v26  ;;  %v1367_v45 = vsub.f32 %v855_v54, %v8081_v56  ;;  %v859_v58 = vld [vmem:[%s3396_s18 + $0x550] sm:$0xff]  ;;  %v860_v5 = vld [vmem:[%s3396_s18 + $0x558] sm:$0xff]  ;;  %v1874_v7 = vmul.f32 0.1, %v1362_v39  ;;  %v861_v11 = vld [vmem:[%s3396_s18 + $0x560] sm:$0xff] }
 0x19c   : > { %2896 = vst [vmem:[%s3469_s21 + $0x4f8] sm:$0xff] %v2384_v2  ;;  %v1875_v6 = vmul.f32 0.1, %v1363_v14  ;;  %v1876_v59 = vmul.f32 0.1, %v1364_v41  ;;  %v8082_v23 = vld [vmem:[#allocation121_spill] sm:$0xff]  ;;  %v2385_v46 = vadd.f32 %v1873_v0, %v8075_v18 }
 0x19d   : > { %v1368_v60 = vsub.f32 %v856_v3, %v8082_v23  ;;  %v1877_v61 = vmul.f32 0.1, %v1365_v55  ;;  %v1878_v31 = vmul.f32 0.1, %v1366_v4  ;;  %v1879_v12 = vmul.f32 0.1, %v1367_v45 }
 0x19e   : > { %v2386_v9 = vadd.f32 %v1874_v7, %v8076_v63  ;;  %v2387_v32 = vadd.f32 %v1875_v6, %v8077_v13  ;;  %v2388_v33 = vadd.f32 %v1876_v59, %v8078_v40  ;;  %v862_v62 = vld [vmem:[%s3396_s18 + $0x568] sm:$0xff]  ;;  %v863_v35 = vld [vmem:[%s3396_s18 + $0x570] sm:$0xff]  ;;  %2897 = vst [vmem:[%s3469_s21 + $0x500] sm:$0xff] %v2385_v46  ;;  %v8083_v20 = vld [vmem:[#allocation122_spill] sm:$0xff] }
 0x19f   : > { %v1880_v34 = vmul.f32 0.1, %v1368_v60  ;;  %v2389_v36 = vadd.f32 %v1877_v61, %v8079_v43  ;;  %v2390_v19 = vadd.f32 %v1878_v31, %v8080_v44  ;;  %v2391_v37 = vadd.f32 %v1879_v12, %v8081_v56  ;;  %v864_v15 = vld [vmem:[%s3396_s18 + $0x578] sm:$0xff]  ;;  %v8084_v38 = vld [vmem:[#allocation123_spill] sm:$0xff]  ;;  %v8085_v28 = vld [vmem:[#allocation124_spill] sm:$0xff] }
 0x1a0   : > { %v1369_v21 = vsub.f32 %v857_v42, %v8083_v20  ;;  %2898 = vst [vmem:[%s3469_s21 + $0x508] sm:$0xff] %v2386_v9  ;;  %2899 = vst [vmem:[%s3469_s21 + $0x510] sm:$0xff] %v2387_v32  ;;  %v1370_v47 = vsub.f32 %v858_v57, %v8084_v38  ;;  %v1371_v22 = vsub.f32 %v859_v58, %v8085_v28  ;;  %v8086_v48 = vld [vmem:[#allocation125_spill] sm:$0xff]  ;;  %v865_v50 = vld [vmem:[%s3396_s18 + $0x580] sm:$0xff] }
 0x1a1   : > { %2900 = vst [vmem:[%s3469_s21 + $0x518] sm:$0xff] %v2388_v33  ;;  %v2392_v27 = vadd.f32 %v1880_v34, %v8082_v23  ;;  %v1372_v49 = vsub.f32 %v860_v5, %v8086_v48  ;;  %2901 = vst [vmem:[%s3469_s21 + $0x520] sm:$0xff] %v2389_v36  ;;  %v8087_v51 = vld [vmem:[#allocation126_spill] sm:$0xff]  ;;  %v8088_v10 = vld [vmem:[#allocation127_spill] sm:$0xff] }
 0x1a2   : > { %2902 = vst [vmem:[%s3469_s21 + $0x528] sm:$0xff] %v2390_v19  ;;  %2903 = vst [vmem:[%s3469_s21 + $0x530] sm:$0xff] %v2391_v37  ;;  %v1881_v29 = vmul.f32 0.1, %v1369_v21  ;;  %v1373_v52 = vsub.f32 %v861_v11, %v8087_v51  ;;  %v1374_v53 = vsub.f32 %v862_v62, %v8088_v10  ;;  %v8089_v25 = vld [vmem:[#allocation128_spill] sm:$0xff]  ;;  %v866_v1 = vld [vmem:[%s3396_s18 + $0x588] sm:$0xff] }
 0x1a3   : > { %v1375_v17 = vsub.f32 %v863_v35, %v8089_v25  ;;  %v867_v30 = vld [vmem:[%s3396_s18 + $0x590] sm:$0xff]  ;;  %v868_v54 = vld [vmem:[%s3396_s18 + $0x598] sm:$0xff]  ;;  %2904 = vst [vmem:[%s3469_s21 + $0x538] sm:$0xff] %v2392_v27  ;;  %v1882_v8 = vmul.f32 0.1, %v1370_v47  ;;  %v869_v42 = vld [vmem:[%s3396_s18 + $0x5a0] sm:$0xff] }
 0x1a4   : > { %v1883_v16 = vmul.f32 0.1, %v1371_v22  ;;  %v1884_v26 = vmul.f32 0.1, %v1372_v49  ;;  %v8090_v18 = vld [vmem:[#allocation129_spill] sm:$0xff]  ;;  %v2393_v3 = vadd.f32 %v1881_v29, %v8083_v20  ;;  %v870_v0 = vld [vmem:[%s3396_s18 + $0x5a8] sm:$0xff] }
 0x1a5   : > { %v1376_v24 = vsub.f32 %v864_v15, %v8090_v18  ;;  %v1885_v2 = vmul.f32 0.1, %v1373_v52  ;;  %v1886_v63 = vmul.f32 0.1, %v1374_v53  ;;  %v1887_v39 = vmul.f32 0.1, %v1375_v17 }
 0x1a6   : > { %v2394_v13 = vadd.f32 %v1882_v8, %v8084_v38  ;;  %v2395_v14 = vadd.f32 %v1883_v16, %v8085_v28  ;;  %v2396_v40 = vadd.f32 %v1884_v26, %v8086_v48  ;;  %v871_v43 = vld [vmem:[%s3396_s18 + $0x5b0] sm:$0xff]  ;;  %2905 = vst [vmem:[%s3469_s21 + $0x540] sm:$0xff] %v2393_v3  ;;  %v8091_v56 = vld [vmem:[#allocation130_spill] sm:$0xff]  ;;  %v872_v57 = vld [vmem:[%s3396_s18 + $0x5b8] sm:$0xff] }
 0x1a7   : > { %v1888_v41 = vmul.f32 0.1, %v1376_v24  ;;  %v2397_v55 = vadd.f32 %v1885_v2, %v8087_v51  ;;  %v2398_v44 = vadd.f32 %v1886_v63, %v8088_v10  ;;  %v2399_v4 = vadd.f32 %v1887_v39, %v8089_v25  ;;  %v8092_v5 = vld [vmem:[#allocation131_spill] sm:$0xff]  ;;  %v8093_v6 = vld [vmem:[#allocation132_spill] sm:$0xff]  ;;  %v8094_v23 = vld [vmem:[#allocation133_spill] sm:$0xff] }
 0x1a8   : > { %v1377_v45 = vsub.f32 %v865_v50, %v8091_v56  ;;  %2906 = vst [vmem:[%s3469_s21 + $0x548] sm:$0xff] %v2394_v13  ;;  %2907 = vst [vmem:[%s3469_s21 + $0x550] sm:$0xff] %v2395_v14  ;;  %v1378_v7 = vsub.f32 %v866_v1, %v8092_v5  ;;  %v1379_v59 = vsub.f32 %v867_v30, %v8093_v6  ;;  %v873_v46 = vld [vmem:[%s3396_s18 + $0x5c0] sm:$0xff]  ;;  %v8096_v9 = vld [vmem:[#allocation135_spill] sm:$0xff] }
 0x1a9   : > { %2908 = vst [vmem:[%s3469_s21 + $0x558] sm:$0xff] %v2396_v40  ;;  %v2400_v58 = vadd.f32 %v1888_v41, %v8090_v18  ;;  %v1380_v60 = vsub.f32 %v868_v54, %v8094_v23  ;;  %2909 = vst [vmem:[%s3469_s21 + $0x560] sm:$0xff] %v2397_v55  ;;  %v8095_v31 = vld [vmem:[#allocation134_spill] sm:$0xff]  ;;  %v1382_v32 = vsub.f32 %v870_v0, %v8096_v9  ;;  %v8097_v33 = vld [vmem:[#allocation136_spill] sm:$0xff] }
 0x1aa   : > { %2910 = vst [vmem:[%s3469_s21 + $0x568] sm:$0xff] %v2398_v44  ;;  %2911 = vst [vmem:[%s3469_s21 + $0x570] sm:$0xff] %v2399_v4  ;;  %v1889_v61 = vmul.f32 0.1, %v1377_v45  ;;  %v1381_v12 = vsub.f32 %v869_v42, %v8095_v31  ;;  %v1383_v34 = vsub.f32 %v871_v43, %v8097_v33  ;;  %v874_v11 = vld [vmem:[%s3396_s18 + $0x5c8] sm:$0xff]  ;;  %v875_v62 = vld [vmem:[%s3396_s18 + $0x5d0] sm:$0xff] }
 0x1ab   : > { %v876_v35 = vld [vmem:[%s3396_s18 + $0x5d8] sm:$0xff]  ;;  %2912 = vst [vmem:[%s3469_s21 + $0x578] sm:$0xff] %v2400_v58  ;;  %v1890_v36 = vmul.f32 0.1, %v1378_v7  ;;  %v1891_v19 = vmul.f32 0.1, %v1379_v59 }
 0x1ac   : > { %v1892_v37 = vmul.f32 0.1, %v1380_v60  ;;  %v8098_v20 = vld [vmem:[#allocation137_spill] sm:$0xff]  ;;  %v2401_v15 = vadd.f32 %v1889_v61, %v8091_v56  ;;  %v1893_v27 = vmul.f32 0.1, %v1381_v12  ;;  %v877_v50 = vld [vmem:[%s3396_s18 + $0x5e0] sm:$0xff] }
 0x1ad   : > { %v1384_v21 = vsub.f32 %v872_v57, %v8098_v20  ;;  %v1894_v38 = vmul.f32 0.1, %v1382_v32  ;;  %v1895_v47 = vmul.f32 0.1, %v1383_v34  ;;  %v2402_v28 = vadd.f32 %v1890_v36, %v8092_v5  ;;  %v878_v29 = vld [vmem:[%s3396_s18 + $0x5e8] sm:$0xff]  ;;  %v879_v51 = vld [vmem:[%s3396_s18 + $0x5f0] sm:$0xff] }
 0x1ae   : > { %v2403_v22 = vadd.f32 %v1891_v19, %v8093_v6  ;;  %v2404_v48 = vadd.f32 %v1892_v37, %v8094_v23  ;;  %2913 = vst [vmem:[%s3469_s21 + $0x580] sm:$0xff] %v2401_v15  ;;  %v2405_v52 = vadd.f32 %v1893_v27, %v8095_v31  ;;  %v8099_v25 = vld [vmem:[#allocation138_spill] sm:$0xff]  ;;  %v880_v1 = vld [vmem:[%s3396_s18 + $0x5f8] sm:$0xff]  ;;  %v8100_v54 = vld [vmem:[#allocation139_spill] sm:$0xff] }
 0x1af   : > { %v1896_v49 = vmul.f32 0.1, %v1384_v21  ;;  %v2406_v10 = vadd.f32 %v1894_v38, %v8096_v9  ;;  %v2407_v53 = vadd.f32 %v1895_v47, %v8097_v33  ;;  %v1385_v17 = vsub.f32 %v873_v46, %v8099_v25  ;;  %2914 = vst [vmem:[%s3469_s21 + $0x588] sm:$0xff] %v2402_v28  ;;  %v8101_v16 = vld [vmem:[#allocation140_spill] sm:$0xff]  ;;  %v8102_v18 = vld [vmem:[#allocation141_spill] sm:$0xff]  ;;  %v881_v3 = vld [vmem:[%s3396_s18 + $0x600] sm:$0xff] }
 0x1b0   : > { %2915 = vst [vmem:[%s3469_s21 + $0x590] sm:$0xff] %v2403_v22  ;;  %2916 = vst [vmem:[%s3469_s21 + $0x598] sm:$0xff] %v2404_v48  ;;  %v1386_v8 = vsub.f32 %v874_v11, %v8100_v54  ;;  %v1387_v26 = vsub.f32 %v875_v62, %v8101_v16  ;;  %v1388_v24 = vsub.f32 %v876_v35, %v8102_v18  ;;  %v8103_v63 = vld [vmem:[#allocation142_spill] sm:$0xff]  ;;  %v8104_v13 = vld [vmem:[#allocation143_spill] sm:$0xff] }
 0x1b1   : > { %v2408_v30 = vadd.f32 %v1896_v49, %v8098_v20  ;;  %2917 = vst [vmem:[%s3469_s21 + $0x5a0] sm:$0xff] %v2405_v52  ;;  %2918 = vst [vmem:[%s3469_s21 + $0x5a8] sm:$0xff] %v2406_v10  ;;  %v1897_v2 = vmul.f32 0.1, %v1385_v17  ;;  %v1389_v39 = vsub.f32 %v877_v50, %v8103_v63  ;;  %v1390_v14 = vsub.f32 %v878_v29, %v8104_v13  ;;  %v8105_v40 = vld [vmem:[#allocation144_spill] sm:$0xff]  ;;  %v882_v42 = vld [vmem:[%s3396_s18 + $0x608] sm:$0xff] }
 0x1b2   : > { %2919 = vst [vmem:[%s3469_s21 + $0x5b0] sm:$0xff] %v2407_v53  ;;  %v1391_v41 = vsub.f32 %v879_v51, %v8105_v40  ;;  %v883_v0 = vld [vmem:[%s3396_s18 + $0x610] sm:$0xff]  ;;  %v884_v43 = vld [vmem:[%s3396_s18 + $0x618] sm:$0xff]  ;;  %v1898_v55 = vmul.f32 0.1, %v1386_v8  ;;  %v885_v46 = vld [vmem:[%s3396_s18 + $0x620] sm:$0xff] }
 0x1b3   : > { %2920 = vst [vmem:[%s3469_s21 + $0x5b8] sm:$0xff] %v2408_v30  ;;  %v1899_v44 = vmul.f32 0.1, %v1387_v26  ;;  %v1900_v4 = vmul.f32 0.1, %v1388_v24  ;;  %v8106_v56 = vld [vmem:[#allocation145_spill] sm:$0xff]  ;;  %v2409_v57 = vadd.f32 %v1897_v2, %v8099_v25 }
 0x1b4   : > { %v1392_v45 = vsub.f32 %v880_v1, %v8106_v56  ;;  %v1901_v58 = vmul.f32 0.1, %v1389_v39  ;;  %v1902_v5 = vmul.f32 0.1, %v1390_v14  ;;  %v1903_v7 = vmul.f32 0.1, %v1391_v41 }
 0x1b5   : > { %v2410_v6 = vadd.f32 %v1898_v55, %v8100_v54  ;;  %v2411_v59 = vadd.f32 %v1899_v44, %v8101_v16  ;;  %v2412_v23 = vadd.f32 %v1900_v4, %v8102_v18  ;;  %v886_v61 = vld [vmem:[%s3396_s18 + $0x628] sm:$0xff]  ;;  %v887_v31 = vld [vmem:[%s3396_s18 + $0x630] sm:$0xff]  ;;  %2921 = vst [vmem:[%s3469_s21 + $0x5c0] sm:$0xff] %v2409_v57  ;;  %v8107_v33 = vld [vmem:[#allocation146_spill] sm:$0xff] }
 0x1b6   : > { %v1904_v60 = vmul.f32 0.1, %v1392_v45  ;;  %v2413_v12 = vadd.f32 %v1901_v58, %v8103_v63  ;;  %v2414_v9 = vadd.f32 %v1902_v5, %v8104_v13  ;;  %v2415_v32 = vadd.f32 %v1903_v7, %v8105_v40  ;;  %v888_v11 = vld [vmem:[%s3396_s18 + $0x638] sm:$0xff]  ;;  %v8108_v35 = vld [vmem:[#allocation147_spill] sm:$0xff]  ;;  %v8109_v19 = vld [vmem:[#allocation148_spill] sm:$0xff] }
 0x1b7   : > { %v1393_v34 = vsub.f32 %v881_v3, %v8107_v33  ;;  %2922 = vst [vmem:[%s3469_s21 + $0x5c8] sm:$0xff] %v2410_v6  ;;  %2923 = vst [vmem:[%s3469_s21 + $0x5d0] sm:$0xff] %v2411_v59  ;;  %v1394_v36 = vsub.f32 %v882_v42, %v8108_v35  ;;  %v1395_v37 = vsub.f32 %v883_v0, %v8109_v19  ;;  %v8110_v20 = vld [vmem:[#allocation149_spill] sm:$0xff]  ;;  %v889_v15 = vld [vmem:[%s3396_s18 + $0x640] sm:$0xff] }
 0x1b8   : > { %2924 = vst [vmem:[%s3469_s21 + $0x5d8] sm:$0xff] %v2412_v23  ;;  %v2416_v62 = vadd.f32 %v1904_v60, %v8106_v56  ;;  %v1396_v21 = vsub.f32 %v884_v43, %v8110_v20  ;;  %2925 = vst [vmem:[%s3469_s21 + $0x5e0] sm:$0xff] %v2413_v12  ;;  %v8111_v38 = vld [vmem:[#allocation150_spill] sm:$0xff]  ;;  %v8112_v28 = vld [vmem:[#allocation151_spill] sm:$0xff] }
 0x1b9   : > { %2926 = vst [vmem:[%s3469_s21 + $0x5e8] sm:$0xff] %v2414_v9  ;;  %2927 = vst [vmem:[%s3469_s21 + $0x5f0] sm:$0xff] %v2415_v32  ;;  %v1905_v27 = vmul.f32 0.1, %v1393_v34  ;;  %v1397_v47 = vsub.f32 %v885_v46, %v8111_v38  ;;  %v1398_v22 = vsub.f32 %v886_v61, %v8112_v28  ;;  %v8113_v48 = vld [vmem:[#allocation152_spill] sm:$0xff]  ;;  %v890_v50 = vld [vmem:[%s3396_s18 + $0x648] sm:$0xff] }
 0x1ba   : > { %v1399_v49 = vsub.f32 %v887_v31, %v8113_v48  ;;  %v891_v29 = vld [vmem:[%s3396_s18 + $0x650] sm:$0xff]  ;;  %v892_v51 = vld [vmem:[%s3396_s18 + $0x658] sm:$0xff]  ;;  %2928 = vst [vmem:[%s3469_s21 + $0x5f8] sm:$0xff] %v2416_v62  ;;  %v1906_v52 = vmul.f32 0.1, %v1394_v36  ;;  %v893_v3 = vld [vmem:[%s3396_s18 + $0x660] sm:$0xff] }
 0x1bb   : > { %v1907_v10 = vmul.f32 0.1, %v1395_v37  ;;  %v1908_v53 = vmul.f32 0.1, %v1396_v21  ;;  %v8114_v25 = vld [vmem:[#allocation153_spill] sm:$0xff]  ;;  %v2417_v1 = vadd.f32 %v1905_v27, %v8107_v33  ;;  %v894_v2 = vld [vmem:[%s3396_s18 + $0x668] sm:$0xff] }
 0x1bc   : > { %v1400_v17 = vsub.f32 %v888_v11, %v8114_v25  ;;  %v1909_v30 = vmul.f32 0.1, %v1397_v47  ;;  %v1910_v54 = vmul.f32 0.1, %v1398_v22  ;;  %v1911_v8 = vmul.f32 0.1, %v1399_v49 }
 0x1bd   : > { %v2418_v16 = vadd.f32 %v1906_v52, %v8108_v35  ;;  %v2419_v26 = vadd.f32 %v1907_v10, %v8109_v19  ;;  %v2420_v18 = vadd.f32 %v1908_v53, %v8110_v20  ;;  %v895_v63 = vld [vmem:[%s3396_s18 + $0x670] sm:$0xff]  ;;  %2929 = vst [vmem:[%s3469_s21 + $0x600] sm:$0xff] %v2417_v1  ;;  %v8115_v40 = vld [vmem:[#allocation154_spill] sm:$0xff]  ;;  %v896_v42 = vld [vmem:[%s3396_s18 + $0x678] sm:$0xff] }
 0x1be   : > { %v1912_v24 = vmul.f32 0.1, %v1400_v17  ;;  %v2421_v39 = vadd.f32 %v1909_v30, %v8111_v38  ;;  %v2422_v13 = vadd.f32 %v1910_v54, %v8112_v28  ;;  %v2423_v14 = vadd.f32 %v1911_v8, %v8113_v48  ;;  %v8116_v43 = vld [vmem:[#allocation155_spill] sm:$0xff]  ;;  %v8117_v44 = vld [vmem:[#allocation156_spill] sm:$0xff]  ;;  %v8118_v56 = vld [vmem:[#allocation157_spill] sm:$0xff] }
 0x1bf   : > { %v1401_v41 = vsub.f32 %v889_v15, %v8115_v40  ;;  %2930 = vst [vmem:[%s3469_s21 + $0x608] sm:$0xff] %v2418_v16  ;;  %2931 = vst [vmem:[%s3469_s21 + $0x610] sm:$0xff] %v2419_v26  ;;  %v1402_v55 = vsub.f32 %v890_v50, %v8116_v43  ;;  %v1403_v4 = vsub.f32 %v891_v29, %v8117_v44  ;;  %v897_v57 = vld [vmem:[%s3396_s18 + $0x680] sm:$0xff]  ;;  %v8120_v6 = vld [vmem:[#allocation159_spill] sm:$0xff] }
 0x1c0   : > { %2932 = vst [vmem:[%s3469_s21 + $0x618] sm:$0xff] %v2420_v18  ;;  %v2424_v0 = vadd.f32 %v1912_v24, %v8114_v25  ;;  %v1404_v45 = vsub.f32 %v892_v51, %v8118_v56  ;;  %2933 = vst [vmem:[%s3469_s21 + $0x620] sm:$0xff] %v2421_v39  ;;  %v8119_v5 = vld [vmem:[#allocation158_spill] sm:$0xff]  ;;  %v1406_v59 = vsub.f32 %v894_v2, %v8120_v6  ;;  %v8121_v23 = vld [vmem:[#allocation160_spill] sm:$0xff] }
 0x1c1   : > { %2934 = vst [vmem:[%s3469_s21 + $0x628] sm:$0xff] %v2422_v13  ;;  %2935 = vst [vmem:[%s3469_s21 + $0x630] sm:$0xff] %v2423_v14  ;;  %v1913_v58 = vmul.f32 0.1, %v1401_v41  ;;  %v1405_v7 = vsub.f32 %v893_v3, %v8119_v5  ;;  %v1407_v60 = vsub.f32 %v895_v63, %v8121_v23  ;;  %v898_v46 = vld [vmem:[%s3396_s18 + $0x688] sm:$0xff]  ;;  %v899_v61 = vld [vmem:[%s3396_s18 + $0x690] sm:$0xff] }
 0x1c2   : > { %v900_v31 = vld [vmem:[%s3396_s18 + $0x698] sm:$0xff]  ;;  %2936 = vst [vmem:[%s3469_s21 + $0x638] sm:$0xff] %v2424_v0  ;;  %v1914_v12 = vmul.f32 0.1, %v1402_v55  ;;  %v1915_v9 = vmul.f32 0.1, %v1403_v4 }
 0x1c3   : > { %v1916_v32 = vmul.f32 0.1, %v1404_v45  ;;  %v8122_v33 = vld [vmem:[#allocation161_spill] sm:$0xff]  ;;  %v2425_v11 = vadd.f32 %v1913_v58, %v8115_v40  ;;  %v1917_v62 = vmul.f32 0.1, %v1405_v7  ;;  %v901_v15 = vld [vmem:[%s3396_s18 + $0x6a0] sm:$0xff] }
 0x1c4   : > { %v1408_v34 = vsub.f32 %v896_v42, %v8122_v33  ;;  %v1918_v35 = vmul.f32 0.1, %v1406_v59  ;;  %v1919_v36 = vmul.f32 0.1, %v1407_v60  ;;  %v2426_v19 = vadd.f32 %v1914_v12, %v8116_v43  ;;  %v902_v27 = vld [vmem:[%s3396_s18 + $0x6a8] sm:$0xff]  ;;  %v903_v38 = vld [vmem:[%s3396_s18 + $0x6b0] sm:$0xff] }
 0x1c5   : > { %v2427_v37 = vadd.f32 %v1915_v9, %v8117_v44  ;;  %v2428_v20 = vadd.f32 %v1916_v32, %v8118_v56  ;;  %2937 = vst [vmem:[%s3469_s21 + $0x640] sm:$0xff] %v2425_v11  ;;  %v2429_v47 = vadd.f32 %v1917_v62, %v8119_v5  ;;  %v8123_v48 = vld [vmem:[#allocation162_spill] sm:$0xff]  ;;  %v904_v50 = vld [vmem:[%s3396_s18 + $0x6b8] sm:$0xff]  ;;  %v8124_v51 = vld [vmem:[#allocation163_spill] sm:$0xff] }
 0x1c6   : > { %v1920_v21 = vmul.f32 0.1, %v1408_v34  ;;  %v2430_v28 = vadd.f32 %v1918_v35, %v8120_v6  ;;  %v2431_v22 = vadd.f32 %v1919_v36, %v8121_v23  ;;  %v1409_v49 = vsub.f32 %v897_v57, %v8123_v48  ;;  %2938 = vst [vmem:[%s3469_s21 + $0x648] sm:$0xff] %v2426_v19  ;;  %v8125_v10 = vld [vmem:[#allocation164_spill] sm:$0xff]  ;;  %v8126_v25 = vld [vmem:[#allocation165_spill] sm:$0xff]  ;;  %v905_v1 = vld [vmem:[%s3396_s18 + $0x6c0] sm:$0xff] }
 0x1c7   : > { %2939 = vst [vmem:[%s3469_s21 + $0x650] sm:$0xff] %v2427_v37  ;;  %2940 = vst [vmem:[%s3469_s21 + $0x658] sm:$0xff] %v2428_v20  ;;  %v1410_v52 = vsub.f32 %v898_v46, %v8124_v51  ;;  %v1411_v53 = vsub.f32 %v899_v61, %v8125_v10  ;;  %v1412_v17 = vsub.f32 %v900_v31, %v8126_v25  ;;  %v8127_v54 = vld [vmem:[#allocation166_spill] sm:$0xff]  ;;  %v8128_v16 = vld [vmem:[#allocation167_spill] sm:$0xff] }
 0x1c8   : > { %v2432_v29 = vadd.f32 %v1920_v21, %v8122_v33  ;;  %2941 = vst [vmem:[%s3469_s21 + $0x660] sm:$0xff] %v2429_v47  ;;  %2942 = vst [vmem:[%s3469_s21 + $0x668] sm:$0xff] %v2430_v28  ;;  %v1921_v30 = vmul.f32 0.1, %v1409_v49  ;;  %v1413_v8 = vsub.f32 %v901_v15, %v8127_v54  ;;  %v1414_v26 = vsub.f32 %v902_v27, %v8128_v16  ;;  %v8129_v18 = vld [vmem:[#allocation168_spill] sm:$0xff]  ;;  %v906_v3 = vld [vmem:[%s3396_s18 + $0x6c8] sm:$0xff] }
 0x1c9   : > { %2943 = vst [vmem:[%s3469_s21 + $0x670] sm:$0xff] %v2431_v22  ;;  %v1415_v24 = vsub.f32 %v903_v38, %v8129_v18  ;;  %v907_v2 = vld [vmem:[%s3396_s18 + $0x6d0] sm:$0xff]  ;;  %v908_v63 = vld [vmem:[%s3396_s18 + $0x6d8] sm:$0xff]  ;;  %v1922_v39 = vmul.f32 0.1, %v1410_v52  ;;  %v909_v57 = vld [vmem:[%s3396_s18 + $0x6e0] sm:$0xff] }
 0x1ca   : > { %2944 = vst [vmem:[%s3469_s21 + $0x678] sm:$0xff] %v2432_v29  ;;  %v1923_v13 = vmul.f32 0.1, %v1411_v53  ;;  %v1924_v14 = vmul.f32 0.1, %v1412_v17  ;;  %v8130_v40 = vld [vmem:[#allocation169_spill] sm:$0xff]  ;;  %v2433_v42 = vadd.f32 %v1921_v30, %v8123_v48 }
 0x1cb   : > { %v1416_v41 = vsub.f32 %v904_v50, %v8130_v40  ;;  %v1925_v0 = vmul.f32 0.1, %v1413_v8  ;;  %v1926_v43 = vmul.f32 0.1, %v1414_v26  ;;  %v1927_v55 = vmul.f32 0.1, %v1415_v24 }
 0x1cc   : > { %v2434_v44 = vadd.f32 %v1922_v39, %v8124_v51  ;;  %v2435_v4 = vadd.f32 %v1923_v13, %v8125_v10  ;;  %v2436_v56 = vadd.f32 %v1924_v14, %v8126_v25  ;;  %v910_v58 = vld [vmem:[%s3396_s18 + $0x6e8] sm:$0xff]  ;;  %v911_v5 = vld [vmem:[%s3396_s18 + $0x6f0] sm:$0xff]  ;;  %2945 = vst [vmem:[%s3469_s21 + $0x680] sm:$0xff] %v2433_v42  ;;  %v8131_v23 = vld [vmem:[#allocation170_spill] sm:$0xff] }
 0x1cd   : > { %v1928_v45 = vmul.f32 0.1, %v1416_v41  ;;  %v2437_v7 = vadd.f32 %v1925_v0, %v8127_v54  ;;  %v2438_v6 = vadd.f32 %v1926_v43, %v8128_v16  ;;  %v2439_v59 = vadd.f32 %v1927_v55, %v8129_v18  ;;  %v912_v46 = vld [vmem:[%s3396_s18 + $0x6f8] sm:$0xff]  ;;  %v8132_v31 = vld [vmem:[#allocation171_spill] sm:$0xff]  ;;  %v8133_v9 = vld [vmem:[#allocation172_spill] sm:$0xff] }
 0x1ce   : > { %v1417_v60 = vsub.f32 %v905_v1, %v8131_v23  ;;  %2946 = vst [vmem:[%s3469_s21 + $0x688] sm:$0xff] %v2434_v44  ;;  %2947 = vst [vmem:[%s3469_s21 + $0x690] sm:$0xff] %v2435_v4  ;;  %v1418_v12 = vsub.f32 %v906_v3, %v8132_v31  ;;  %v1419_v32 = vsub.f32 %v907_v2, %v8133_v9  ;;  %v8134_v33 = vld [vmem:[#allocation173_spill] sm:$0xff]  ;;  %v913_v11 = vld [vmem:[%s3396_s18 + $0x700] sm:$0xff] }
 0x1cf   : > { %2948 = vst [vmem:[%s3469_s21 + $0x698] sm:$0xff] %v2436_v56  ;;  %v2440_v61 = vadd.f32 %v1928_v45, %v8130_v40  ;;  %v1420_v34 = vsub.f32 %v908_v63, %v8134_v33  ;;  %2949 = vst [vmem:[%s3469_s21 + $0x6a0] sm:$0xff] %v2437_v7  ;;  %v8135_v35 = vld [vmem:[#allocation174_spill] sm:$0xff]  ;;  %v8136_v19 = vld [vmem:[#allocation175_spill] sm:$0xff] }
 0x1d0   : > { %2950 = vst [vmem:[%s3469_s21 + $0x6a8] sm:$0xff] %v2438_v6  ;;  %2951 = vst [vmem:[%s3469_s21 + $0x6b0] sm:$0xff] %v2439_v59  ;;  %v1929_v62 = vmul.f32 0.1, %v1417_v60  ;;  %v1421_v36 = vsub.f32 %v909_v57, %v8135_v35  ;;  %v1422_v37 = vsub.f32 %v910_v58, %v8136_v19  ;;  %v8137_v20 = vld [vmem:[#allocation176_spill] sm:$0xff]  ;;  %v914_v15 = vld [vmem:[%s3396_s18 + $0x708] sm:$0xff] }
 0x1d1   : > { %v1423_v21 = vsub.f32 %v911_v5, %v8137_v20  ;;  %v915_v27 = vld [vmem:[%s3396_s18 + $0x710] sm:$0xff]  ;;  %v916_v38 = vld [vmem:[%s3396_s18 + $0x718] sm:$0xff]  ;;  %2952 = vst [vmem:[%s3469_s21 + $0x6b8] sm:$0xff] %v2440_v61  ;;  %v1930_v47 = vmul.f32 0.1, %v1418_v12  ;;  %v917_v1 = vld [vmem:[%s3396_s18 + $0x720] sm:$0xff] }
 0x1d2   : > { %v1931_v28 = vmul.f32 0.1, %v1419_v32  ;;  %v1932_v22 = vmul.f32 0.1, %v1420_v34  ;;  %v8138_v48 = vld [vmem:[#allocation177_spill] sm:$0xff]  ;;  %v2441_v50 = vadd.f32 %v1929_v62, %v8131_v23  ;;  %v918_v30 = vld [vmem:[%s3396_s18 + $0x728] sm:$0xff] }
 0x1d3   : > { %v1424_v49 = vsub.f32 %v912_v46, %v8138_v48  ;;  %v1933_v29 = vmul.f32 0.1, %v1421_v36  ;;  %v1934_v51 = vmul.f32 0.1, %v1422_v37  ;;  %v1935_v52 = vmul.f32 0.1, %v1423_v21 }
 0x1d4   : > { %v2442_v10 = vadd.f32 %v1930_v47, %v8132_v31  ;;  %v2443_v53 = vadd.f32 %v1931_v28, %v8133_v9  ;;  %v2444_v25 = vadd.f32 %v1932_v22, %v8134_v33  ;;  %v919_v54 = vld [vmem:[%s3396_s18 + $0x730] sm:$0xff]  ;;  %2953 = vst [vmem:[%s3469_s21 + $0x6c0] sm:$0xff] %v2441_v50  ;;  %v8139_v18 = vld [vmem:[#allocation178_spill] sm:$0xff]  ;;  %v920_v3 = vld [vmem:[%s3396_s18 + $0x738] sm:$0xff] }
 0x1d5   : > { %v1936_v17 = vmul.f32 0.1, %v1424_v49  ;;  %v2445_v8 = vadd.f32 %v1933_v29, %v8135_v35  ;;  %v2446_v16 = vadd.f32 %v1934_v51, %v8136_v19  ;;  %v2447_v26 = vadd.f32 %v1935_v52, %v8137_v20  ;;  %v8140_v63 = vld [vmem:[#allocation179_spill] sm:$0xff]  ;;  %v8141_v13 = vld [vmem:[#allocation180_spill] sm:$0xff]  ;;  %v8142_v40 = vld [vmem:[#allocation181_spill] sm:$0xff] }
 0x1d6   : > { %v1425_v24 = vsub.f32 %v913_v11, %v8139_v18  ;;  %2954 = vst [vmem:[%s3469_s21 + $0x6c8] sm:$0xff] %v2442_v10  ;;  %2955 = vst [vmem:[%s3469_s21 + $0x6d0] sm:$0xff] %v2443_v53  ;;  %v1426_v39 = vsub.f32 %v914_v15, %v8140_v63  ;;  %v1427_v14 = vsub.f32 %v915_v27, %v8141_v13  ;;  %v921_v42 = vld [vmem:[%s3396_s18 + $0x740] sm:$0xff]  ;;  %v8144_v44 = vld [vmem:[#allocation183_spill] sm:$0xff] }
 0x1d7   : > { %2956 = vst [vmem:[%s3469_s21 + $0x6d8] sm:$0xff] %v2444_v25  ;;  %v2448_v2 = vadd.f32 %v1936_v17, %v8138_v48  ;;  %v1428_v41 = vsub.f32 %v916_v38, %v8142_v40  ;;  %2957 = vst [vmem:[%s3469_s21 + $0x6e0] sm:$0xff] %v2445_v8  ;;  %v8143_v43 = vld [vmem:[#allocation182_spill] sm:$0xff]  ;;  %v1430_v4 = vsub.f32 %v918_v30, %v8144_v44  ;;  %v8145_v56 = vld [vmem:[#allocation184_spill] sm:$0xff] }
 0x1d8   : > { %2958 = vst [vmem:[%s3469_s21 + $0x6e8] sm:$0xff] %v2446_v16  ;;  %2959 = vst [vmem:[%s3469_s21 + $0x6f0] sm:$0xff] %v2447_v26  ;;  %v1937_v0 = vmul.f32 0.1, %v1425_v24  ;;  %v1429_v55 = vsub.f32 %v917_v1, %v8143_v43  ;;  %v1431_v45 = vsub.f32 %v919_v54, %v8145_v56  ;;  %v922_v57 = vld [vmem:[%s3396_s18 + $0x748] sm:$0xff]  ;;  %v923_v58 = vld [vmem:[%s3396_s18 + $0x750] sm:$0xff] }
 0x1d9   : > { %v924_v5 = vld [vmem:[%s3396_s18 + $0x758] sm:$0xff]  ;;  %2960 = vst [vmem:[%s3469_s21 + $0x6f8] sm:$0xff] %v2448_v2  ;;  %v1938_v7 = vmul.f32 0.1, %v1426_v39  ;;  %v1939_v6 = vmul.f32 0.1, %v1427_v14 }
 0x1da   : > { %v1940_v59 = vmul.f32 0.1, %v1428_v41  ;;  %v8146_v23 = vld [vmem:[#allocation185_spill] sm:$0xff]  ;;  %v2449_v46 = vadd.f32 %v1937_v0, %v8139_v18  ;;  %v1941_v61 = vmul.f32 0.1, %v1429_v55  ;;  %v925_v11 = vld [vmem:[%s3396_s18 + $0x760] sm:$0xff] }
 0x1db   : > { %v1432_v60 = vsub.f32 %v920_v3, %v8146_v23  ;;  %v1942_v31 = vmul.f32 0.1, %v1430_v4  ;;  %v1943_v12 = vmul.f32 0.1, %v1431_v45  ;;  %v2450_v9 = vadd.f32 %v1938_v7, %v8140_v63  ;;  %v926_v62 = vld [vmem:[%s3396_s18 + $0x768] sm:$0xff]  ;;  %v927_v35 = vld [vmem:[%s3396_s18 + $0x770] sm:$0xff] }
 0x1dc   : > { %v2451_v32 = vadd.f32 %v1939_v6, %v8141_v13  ;;  %v2452_v33 = vadd.f32 %v1940_v59, %v8142_v40  ;;  %2961 = vst [vmem:[%s3469_s21 + $0x700] sm:$0xff] %v2449_v46  ;;  %v2453_v36 = vadd.f32 %v1941_v61, %v8143_v43  ;;  %v8147_v20 = vld [vmem:[#allocation186_spill] sm:$0xff]  ;;  %v928_v15 = vld [vmem:[%s3396_s18 + $0x778] sm:$0xff]  ;;  %v8148_v38 = vld [vmem:[#allocation187_spill] sm:$0xff] }
 0x1dd   : > { %v1944_v34 = vmul.f32 0.1, %v1432_v60  ;;  %v2454_v19 = vadd.f32 %v1942_v31, %v8144_v44  ;;  %v2455_v37 = vadd.f32 %v1943_v12, %v8145_v56  ;;  %v1433_v21 = vsub.f32 %v921_v42, %v8147_v20  ;;  %2962 = vst [vmem:[%s3469_s21 + $0x708] sm:$0xff] %v2450_v9  ;;  %v8149_v28 = vld [vmem:[#allocation188_spill] sm:$0xff]  ;;  %v8150_v48 = vld [vmem:[#allocation189_spill] sm:$0xff]  ;;  %v929_v50 = vld [vmem:[%s3396_s18 + $0x780] sm:$0xff] }
 0x1de   : > { %2963 = vst [vmem:[%s3469_s21 + $0x710] sm:$0xff] %v2451_v32  ;;  %2964 = vst [vmem:[%s3469_s21 + $0x718] sm:$0xff] %v2452_v33  ;;  %v1434_v47 = vsub.f32 %v922_v57, %v8148_v38  ;;  %v1435_v22 = vsub.f32 %v923_v58, %v8149_v28  ;;  %v1436_v49 = vsub.f32 %v924_v5, %v8150_v48  ;;  %v8151_v51 = vld [vmem:[#allocation190_spill] sm:$0xff]  ;;  %v8152_v10 = vld [vmem:[#allocation191_spill] sm:$0xff] }
 0x1df   : > { %v2456_v27 = vadd.f32 %v1944_v34, %v8146_v23  ;;  %2965 = vst [vmem:[%s3469_s21 + $0x720] sm:$0xff] %v2453_v36  ;;  %2966 = vst [vmem:[%s3469_s21 + $0x728] sm:$0xff] %v2454_v19  ;;  %v1945_v29 = vmul.f32 0.1, %v1433_v21  ;;  %v1437_v52 = vsub.f32 %v925_v11, %v8151_v51  ;;  %v1438_v53 = vsub.f32 %v926_v62, %v8152_v10  ;;  %v8153_v25 = vld [vmem:[#allocation192_spill] sm:$0xff]  ;;  %v930_v1 = vld [vmem:[%s3396_s18 + $0x788] sm:$0xff] }
 0x1e0   : > { %2967 = vst [vmem:[%s3469_s21 + $0x730] sm:$0xff] %v2455_v37  ;;  %v1439_v17 = vsub.f32 %v927_v35, %v8153_v25  ;;  %v931_v30 = vld [vmem:[%s3396_s18 + $0x790] sm:$0xff]  ;;  %v932_v54 = vld [vmem:[%s3396_s18 + $0x798] sm:$0xff]  ;;  %v1946_v8 = vmul.f32 0.1, %v1434_v47  ;;  %v933_v42 = vld [vmem:[%s3396_s18 + $0x7a0] sm:$0xff] }
 0x1e1   : > { %2968 = vst [vmem:[%s3469_s21 + $0x738] sm:$0xff] %v2456_v27  ;;  %v1947_v16 = vmul.f32 0.1, %v1435_v22  ;;  %v1948_v26 = vmul.f32 0.1, %v1436_v49  ;;  %v8154_v18 = vld [vmem:[#allocation193_spill] sm:$0xff]  ;;  %v2457_v3 = vadd.f32 %v1945_v29, %v8147_v20 }
 0x1e2   : > { %v1440_v24 = vsub.f32 %v928_v15, %v8154_v18  ;;  %v1949_v2 = vmul.f32 0.1, %v1437_v52  ;;  %v1950_v63 = vmul.f32 0.1, %v1438_v53  ;;  %v1951_v39 = vmul.f32 0.1, %v1439_v17 }
 0x1e3   : > { %v2458_v13 = vadd.f32 %v1946_v8, %v8148_v38  ;;  %v2459_v14 = vadd.f32 %v1947_v16, %v8149_v28  ;;  %v2460_v40 = vadd.f32 %v1948_v26, %v8150_v48  ;;  %v934_v0 = vld [vmem:[%s3396_s18 + $0x7a8] sm:$0xff]  ;;  %v935_v43 = vld [vmem:[%s3396_s18 + $0x7b0] sm:$0xff]  ;;  %2969 = vst [vmem:[%s3469_s21 + $0x740] sm:$0xff] %v2457_v3  ;;  %v8155_v56 = vld [vmem:[#allocation194_spill] sm:$0xff] }
 0x1e4   : > { %v1952_v41 = vmul.f32 0.1, %v1440_v24  ;;  %v2461_v55 = vadd.f32 %v1949_v2, %v8151_v51  ;;  %v2462_v44 = vadd.f32 %v1950_v63, %v8152_v10  ;;  %v2463_v4 = vadd.f32 %v1951_v39, %v8153_v25  ;;  %v936_v57 = vld [vmem:[%s3396_s18 + $0x7b8] sm:$0xff]  ;;  %v8156_v5 = vld [vmem:[#allocation195_spill] sm:$0xff]  ;;  %v8157_v6 = vld [vmem:[#allocation196_spill] sm:$0xff] }
 0x1e5   : > { %v1441_v45 = vsub.f32 %v929_v50, %v8155_v56  ;;  %2970 = vst [vmem:[%s3469_s21 + $0x748] sm:$0xff] %v2458_v13  ;;  %2971 = vst [vmem:[%s3469_s21 + $0x750] sm:$0xff] %v2459_v14  ;;  %v1442_v7 = vsub.f32 %v930_v1, %v8156_v5  ;;  %v1443_v59 = vsub.f32 %v931_v30, %v8157_v6  ;;  %v8158_v23 = vld [vmem:[#allocation197_spill] sm:$0xff]  ;;  %v937_v46 = vld [vmem:[%s3396_s18 + $0x7c0] sm:$0xff] }
 0x1e6   : > { %2972 = vst [vmem:[%s3469_s21 + $0x758] sm:$0xff] %v2460_v40  ;;  %v2464_v58 = vadd.f32 %v1952_v41, %v8154_v18  ;;  %v1444_v60 = vsub.f32 %v932_v54, %v8158_v23  ;;  %2973 = vst [vmem:[%s3469_s21 + $0x760] sm:$0xff] %v2461_v55  ;;  %v8159_v31 = vld [vmem:[#allocation198_spill] sm:$0xff]  ;;  %v8160_v9 = vld [vmem:[#allocation199_spill] sm:$0xff] }
 0x1e7   : > { %2974 = vst [vmem:[%s3469_s21 + $0x768] sm:$0xff] %v2462_v44  ;;  %2975 = vst [vmem:[%s3469_s21 + $0x770] sm:$0xff] %v2463_v4  ;;  %v1953_v61 = vmul.f32 0.1, %v1441_v45  ;;  %v1445_v12 = vsub.f32 %v933_v42, %v8159_v31  ;;  %v1446_v32 = vsub.f32 %v934_v0, %v8160_v9  ;;  %v8161_v33 = vld [vmem:[#allocation200_spill] sm:$0xff]  ;;  %v938_v11 = vld [vmem:[%s3396_s18 + $0x7c8] sm:$0xff] }
 0x1e8   : > { %v1447_v34 = vsub.f32 %v935_v43, %v8161_v33  ;;  %v939_v62 = vld [vmem:[%s3396_s18 + $0x7d0] sm:$0xff]  ;;  %v940_v35 = vld [vmem:[%s3396_s18 + $0x7d8] sm:$0xff]  ;;  %2976 = vst [vmem:[%s3469_s21 + $0x778] sm:$0xff] %v2464_v58  ;;  %v1954_v36 = vmul.f32 0.1, %v1442_v7  ;;  %v941_v50 = vld [vmem:[%s3396_s18 + $0x7e0] sm:$0xff] }
 0x1e9   : > { %v1955_v19 = vmul.f32 0.1, %v1443_v59  ;;  %v1956_v37 = vmul.f32 0.1, %v1444_v60  ;;  %v8162_v20 = vld [vmem:[#allocation201_spill] sm:$0xff]  ;;  %v2465_v15 = vadd.f32 %v1953_v61, %v8155_v56  ;;  %v942_v29 = vld [vmem:[%s3396_s18 + $0x7e8] sm:$0xff] }
 0x1ea   : > { %v1448_v21 = vsub.f32 %v936_v57, %v8162_v20  ;;  %v1957_v27 = vmul.f32 0.1, %v1445_v12  ;;  %v1958_v38 = vmul.f32 0.1, %v1446_v32  ;;  %v1959_v47 = vmul.f32 0.1, %v1447_v34 }
 0x1eb   : > { %v2466_v28 = vadd.f32 %v1954_v36, %v8156_v5  ;;  %v2467_v22 = vadd.f32 %v1955_v19, %v8157_v6  ;;  %v2468_v48 = vadd.f32 %v1956_v37, %v8158_v23  ;;  %v943_v51 = vld [vmem:[%s3396_s18 + $0x7f0] sm:$0xff]  ;;  %2977 = vst [vmem:[%s3469_s21 + $0x780] sm:$0xff] %v2465_v15  ;;  %v8163_v25 = vld [vmem:[#allocation202_spill] sm:$0xff]  ;;  %v944_v1 = vld [vmem:[%s3396_s18 + $0x7f8] sm:$0xff] }
 0x1ec   : > { %v1960_v49 = vmul.f32 0.1, %v1448_v21  ;;  %v2469_v52 = vadd.f32 %v1957_v27, %v8159_v31  ;;  %v2470_v10 = vadd.f32 %v1958_v38, %v8160_v9  ;;  %v2471_v53 = vadd.f32 %v1959_v47, %v8161_v33  ;;  %v8164_v54 = vld [vmem:[#allocation203_spill] sm:$0xff]  ;;  %v8165_v16 = vld [vmem:[#allocation204_spill] sm:$0xff]  ;;  %v8166_v18 = vld [vmem:[#allocation205_spill] sm:$0xff] }
 0x1ed   : > { %v1449_v17 = vsub.f32 %v937_v46, %v8163_v25  ;;  %2978 = vst [vmem:[%s3469_s21 + $0x788] sm:$0xff] %v2466_v28  ;;  %2979 = vst [vmem:[%s3469_s21 + $0x790] sm:$0xff] %v2467_v22  ;;  %v1450_v8 = vsub.f32 %v938_v11, %v8164_v54  ;;  %v1451_v26 = vsub.f32 %v939_v62, %v8165_v16  ;;  %v945_v3 = vld [vmem:[%s3396_s18 + $0x800] sm:$0xff]  ;;  %v8168_v13 = vld [vmem:[#allocation207_spill] sm:$0xff] }
 0x1ee   : > { %2980 = vst [vmem:[%s3469_s21 + $0x798] sm:$0xff] %v2468_v48  ;;  %v2472_v30 = vadd.f32 %v1960_v49, %v8162_v20  ;;  %v1452_v24 = vsub.f32 %v940_v35, %v8166_v18  ;;  %2981 = vst [vmem:[%s3469_s21 + $0x7a0] sm:$0xff] %v2469_v52  ;;  %v8167_v63 = vld [vmem:[#allocation206_spill] sm:$0xff]  ;;  %v1454_v14 = vsub.f32 %v942_v29, %v8168_v13  ;;  %v8169_v40 = vld [vmem:[#allocation208_spill] sm:$0xff] }
 0x1ef   : > { %2982 = vst [vmem:[%s3469_s21 + $0x7a8] sm:$0xff] %v2470_v10  ;;  %2983 = vst [vmem:[%s3469_s21 + $0x7b0] sm:$0xff] %v2471_v53  ;;  %v1961_v2 = vmul.f32 0.1, %v1449_v17  ;;  %v1453_v39 = vsub.f32 %v941_v50, %v8167_v63  ;;  %v1455_v41 = vsub.f32 %v943_v51, %v8169_v40  ;;  %v946_v42 = vld [vmem:[%s3396_s18 + $0x808] sm:$0xff]  ;;  %v947_v0 = vld [vmem:[%s3396_s18 + $0x810] sm:$0xff] }
 0x1f0   : > { %v948_v43 = vld [vmem:[%s3396_s18 + $0x818] sm:$0xff]  ;;  %2984 = vst [vmem:[%s3469_s21 + $0x7b8] sm:$0xff] %v2472_v30  ;;  %v1962_v55 = vmul.f32 0.1, %v1450_v8  ;;  %v1963_v44 = vmul.f32 0.1, %v1451_v26 }
 0x1f1   : > { %v1964_v4 = vmul.f32 0.1, %v1452_v24  ;;  %v8170_v56 = vld [vmem:[#allocation209_spill] sm:$0xff]  ;;  %v2473_v57 = vadd.f32 %v1961_v2, %v8163_v25  ;;  %v1965_v58 = vmul.f32 0.1, %v1453_v39  ;;  %v949_v46 = vld [vmem:[%s3396_s18 + $0x820] sm:$0xff] }
 0x1f2   : > { %v1456_v45 = vsub.f32 %v944_v1, %v8170_v56  ;;  %v1966_v5 = vmul.f32 0.1, %v1454_v14  ;;  %v1967_v7 = vmul.f32 0.1, %v1455_v41  ;;  %v2474_v6 = vadd.f32 %v1962_v55, %v8164_v54  ;;  %v950_v61 = vld [vmem:[%s3396_s18 + $0x828] sm:$0xff]  ;;  %v951_v31 = vld [vmem:[%s3396_s18 + $0x830] sm:$0xff] }
 0x1f3   : > { %v2475_v59 = vadd.f32 %v1963_v44, %v8165_v16  ;;  %v2476_v23 = vadd.f32 %v1964_v4, %v8166_v18  ;;  %2985 = vst [vmem:[%s3469_s21 + $0x7c0] sm:$0xff] %v2473_v57  ;;  %v2477_v12 = vadd.f32 %v1965_v58, %v8167_v63  ;;  %v8171_v33 = vld [vmem:[#allocation210_spill] sm:$0xff]  ;;  %v952_v11 = vld [vmem:[%s3396_s18 + $0x838] sm:$0xff]  ;;  %v8172_v35 = vld [vmem:[#allocation211_spill] sm:$0xff] }
 0x1f4   : > { %v1968_v60 = vmul.f32 0.1, %v1456_v45  ;;  %v2478_v9 = vadd.f32 %v1966_v5, %v8168_v13  ;;  %v2479_v32 = vadd.f32 %v1967_v7, %v8169_v40  ;;  %v1457_v34 = vsub.f32 %v945_v3, %v8171_v33  ;;  %2986 = vst [vmem:[%s3469_s21 + $0x7c8] sm:$0xff] %v2474_v6  ;;  %v8173_v19 = vld [vmem:[#allocation212_spill] sm:$0xff]  ;;  %v8174_v20 = vld [vmem:[#allocation213_spill] sm:$0xff]  ;;  %v953_v15 = vld [vmem:[%s3396_s18 + $0x840] sm:$0xff] }
 0x1f5   : > { %2987 = vst [vmem:[%s3469_s21 + $0x7d0] sm:$0xff] %v2475_v59  ;;  %2988 = vst [vmem:[%s3469_s21 + $0x7d8] sm:$0xff] %v2476_v23  ;;  %v1458_v36 = vsub.f32 %v946_v42, %v8172_v35  ;;  %v1459_v37 = vsub.f32 %v947_v0, %v8173_v19  ;;  %v1460_v21 = vsub.f32 %v948_v43, %v8174_v20  ;;  %v8175_v38 = vld [vmem:[#allocation214_spill] sm:$0xff]  ;;  %v8176_v28 = vld [vmem:[#allocation215_spill] sm:$0xff] }
 0x1f6   : > { %v2480_v62 = vadd.f32 %v1968_v60, %v8170_v56  ;;  %2989 = vst [vmem:[%s3469_s21 + $0x7e0] sm:$0xff] %v2477_v12  ;;  %2990 = vst [vmem:[%s3469_s21 + $0x7e8] sm:$0xff] %v2478_v9  ;;  %v1969_v27 = vmul.f32 0.1, %v1457_v34  ;;  %v1461_v47 = vsub.f32 %v949_v46, %v8175_v38  ;;  %v1462_v22 = vsub.f32 %v950_v61, %v8176_v28  ;;  %v8177_v48 = vld [vmem:[#allocation216_spill] sm:$0xff]  ;;  %v954_v50 = vld [vmem:[%s3396_s18 + $0x848] sm:$0xff] }
 0x1f7   : > { %2991 = vst [vmem:[%s3469_s21 + $0x7f0] sm:$0xff] %v2479_v32  ;;  %v1463_v49 = vsub.f32 %v951_v31, %v8177_v48  ;;  %v955_v29 = vld [vmem:[%s3396_s18 + $0x850] sm:$0xff]  ;;  %v956_v51 = vld [vmem:[%s3396_s18 + $0x858] sm:$0xff]  ;;  %v1970_v52 = vmul.f32 0.1, %v1458_v36  ;;  %v957_v3 = vld [vmem:[%s3396_s18 + $0x860] sm:$0xff] }
 0x1f8   : > { %2992 = vst [vmem:[%s3469_s21 + $0x7f8] sm:$0xff] %v2480_v62  ;;  %v1971_v10 = vmul.f32 0.1, %v1459_v37  ;;  %v1972_v53 = vmul.f32 0.1, %v1460_v21  ;;  %v8178_v25 = vld [vmem:[#allocation217_spill] sm:$0xff]  ;;  %v2481_v1 = vadd.f32 %v1969_v27, %v8171_v33 }
 0x1f9   : > { %v1464_v17 = vsub.f32 %v952_v11, %v8178_v25  ;;  %v1973_v30 = vmul.f32 0.1, %v1461_v47  ;;  %v1974_v54 = vmul.f32 0.1, %v1462_v22  ;;  %v1975_v8 = vmul.f32 0.1, %v1463_v49 }
 0x1fa   : > { %v2482_v16 = vadd.f32 %v1970_v52, %v8172_v35  ;;  %v2483_v26 = vadd.f32 %v1971_v10, %v8173_v19  ;;  %v2484_v18 = vadd.f32 %v1972_v53, %v8174_v20  ;;  %v958_v2 = vld [vmem:[%s3396_s18 + $0x868] sm:$0xff]  ;;  %v959_v63 = vld [vmem:[%s3396_s18 + $0x870] sm:$0xff]  ;;  %2993 = vst [vmem:[%s3469_s21 + $0x800] sm:$0xff] %v2481_v1  ;;  %v8179_v40 = vld [vmem:[#allocation218_spill] sm:$0xff] }
 0x1fb   : > { %v1976_v24 = vmul.f32 0.1, %v1464_v17  ;;  %v2485_v39 = vadd.f32 %v1973_v30, %v8175_v38  ;;  %v2486_v13 = vadd.f32 %v1974_v54, %v8176_v28  ;;  %v2487_v14 = vadd.f32 %v1975_v8, %v8177_v48  ;;  %v960_v42 = vld [vmem:[%s3396_s18 + $0x878] sm:$0xff]  ;;  %v8180_v43 = vld [vmem:[#allocation219_spill] sm:$0xff]  ;;  %v8181_v44 = vld [vmem:[#allocation220_spill] sm:$0xff] }
 0x1fc   : > { %v1465_v41 = vsub.f32 %v953_v15, %v8179_v40  ;;  %2994 = vst [vmem:[%s3469_s21 + $0x808] sm:$0xff] %v2482_v16  ;;  %2995 = vst [vmem:[%s3469_s21 + $0x810] sm:$0xff] %v2483_v26  ;;  %v1466_v55 = vsub.f32 %v954_v50, %v8180_v43  ;;  %v1467_v4 = vsub.f32 %v955_v29, %v8181_v44  ;;  %v8182_v56 = vld [vmem:[#allocation221_spill] sm:$0xff]  ;;  %v961_v57 = vld [vmem:[%s3396_s18 + $0x880] sm:$0xff] }
 0x1fd   : > { %2996 = vst [vmem:[%s3469_s21 + $0x818] sm:$0xff] %v2484_v18  ;;  %v2488_v0 = vadd.f32 %v1976_v24, %v8178_v25  ;;  %v1468_v45 = vsub.f32 %v956_v51, %v8182_v56  ;;  %2997 = vst [vmem:[%s3469_s21 + $0x820] sm:$0xff] %v2485_v39  ;;  %v8183_v5 = vld [vmem:[#allocation222_spill] sm:$0xff]  ;;  %v8184_v6 = vld [vmem:[#allocation223_spill] sm:$0xff] }
 0x1fe   : > { %2998 = vst [vmem:[%s3469_s21 + $0x828] sm:$0xff] %v2486_v13  ;;  %2999 = vst [vmem:[%s3469_s21 + $0x830] sm:$0xff] %v2487_v14  ;;  %v1977_v58 = vmul.f32 0.1, %v1465_v41  ;;  %v1469_v7 = vsub.f32 %v957_v3, %v8183_v5  ;;  %v1470_v59 = vsub.f32 %v958_v2, %v8184_v6  ;;  %v8185_v23 = vld [vmem:[#allocation224_spill] sm:$0xff]  ;;  %v962_v46 = vld [vmem:[%s3396_s18 + $0x888] sm:$0xff] }
 0x1ff   : > { %v1471_v60 = vsub.f32 %v959_v63, %v8185_v23  ;;  %v963_v61 = vld [vmem:[%s3396_s18 + $0x890] sm:$0xff]  ;;  %v964_v31 = vld [vmem:[%s3396_s18 + $0x898] sm:$0xff]  ;;  %3000 = vst [vmem:[%s3469_s21 + $0x838] sm:$0xff] %v2488_v0  ;;  %v1978_v12 = vmul.f32 0.1, %v1466_v55  ;;  %v965_v15 = vld [vmem:[%s3396_s18 + $0x8a0] sm:$0xff] }
 0x200   : > { %v1979_v9 = vmul.f32 0.1, %v1467_v4  ;;  %v1980_v32 = vmul.f32 0.1, %v1468_v45  ;;  %v8186_v33 = vld [vmem:[#allocation225_spill] sm:$0xff]  ;;  %v2489_v11 = vadd.f32 %v1977_v58, %v8179_v40  ;;  %v966_v27 = vld [vmem:[%s3396_s18 + $0x8a8] sm:$0xff] }
 0x201   : > { %v1472_v34 = vsub.f32 %v960_v42, %v8186_v33  ;;  %v1981_v62 = vmul.f32 0.1, %v1469_v7  ;;  %v1982_v35 = vmul.f32 0.1, %v1470_v59  ;;  %v1983_v36 = vmul.f32 0.1, %v1471_v60 }
 0x202   : > { %v2490_v19 = vadd.f32 %v1978_v12, %v8180_v43  ;;  %v2491_v37 = vadd.f32 %v1979_v9, %v8181_v44  ;;  %v2492_v20 = vadd.f32 %v1980_v32, %v8182_v56  ;;  %v967_v38 = vld [vmem:[%s3396_s18 + $0x8b0] sm:$0xff]  ;;  %3001 = vst [vmem:[%s3469_s21 + $0x840] sm:$0xff] %v2489_v11  ;;  %v8187_v48 = vld [vmem:[#allocation226_spill] sm:$0xff]  ;;  %v968_v50 = vld [vmem:[%s3396_s18 + $0x8b8] sm:$0xff] }
 0x203   : > { %v1984_v21 = vmul.f32 0.1, %v1472_v34  ;;  %v2493_v47 = vadd.f32 %v1981_v62, %v8183_v5  ;;  %v2494_v28 = vadd.f32 %v1982_v35, %v8184_v6  ;;  %v2495_v22 = vadd.f32 %v1983_v36, %v8185_v23  ;;  %v8188_v51 = vld [vmem:[#allocation227_spill] sm:$0xff]  ;;  %v8189_v10 = vld [vmem:[#allocation228_spill] sm:$0xff]  ;;  %v8190_v25 = vld [vmem:[#allocation229_spill] sm:$0xff] }
 0x204   : > { %v1473_v49 = vsub.f32 %v961_v57, %v8187_v48  ;;  %3002 = vst [vmem:[%s3469_s21 + $0x848] sm:$0xff] %v2490_v19  ;;  %3003 = vst [vmem:[%s3469_s21 + $0x850] sm:$0xff] %v2491_v37  ;;  %v1474_v52 = vsub.f32 %v962_v46, %v8188_v51  ;;  %v1475_v53 = vsub.f32 %v963_v61, %v8189_v10  ;;  %v969_v1 = vld [vmem:[%s3396_s18 + $0x8c0] sm:$0xff]  ;;  %v8192_v16 = vld [vmem:[#allocation231_spill] sm:$0xff] }
 0x205   : > { %3004 = vst [vmem:[%s3469_s21 + $0x858] sm:$0xff] %v2492_v20  ;;  %v2496_v29 = vadd.f32 %v1984_v21, %v8186_v33  ;;  %v1476_v17 = vsub.f32 %v964_v31, %v8190_v25  ;;  %3005 = vst [vmem:[%s3469_s21 + $0x860] sm:$0xff] %v2493_v47  ;;  %v8191_v54 = vld [vmem:[#allocation230_spill] sm:$0xff]  ;;  %v1478_v26 = vsub.f32 %v966_v27, %v8192_v16  ;;  %v8193_v18 = vld [vmem:[#allocation232_spill] sm:$0xff] }
 0x206   : > { %3006 = vst [vmem:[%s3469_s21 + $0x868] sm:$0xff] %v2494_v28  ;;  %3007 = vst [vmem:[%s3469_s21 + $0x870] sm:$0xff] %v2495_v22  ;;  %v1985_v30 = vmul.f32 0.1, %v1473_v49  ;;  %v1477_v8 = vsub.f32 %v965_v15, %v8191_v54  ;;  %v1479_v24 = vsub.f32 %v967_v38, %v8193_v18  ;;  %v970_v3 = vld [vmem:[%s3396_s18 + $0x8c8] sm:$0xff]  ;;  %v971_v2 = vld [vmem:[%s3396_s18 + $0x8d0] sm:$0xff] }
 0x207   : > { %v972_v63 = vld [vmem:[%s3396_s18 + $0x8d8] sm:$0xff]  ;;  %3008 = vst [vmem:[%s3469_s21 + $0x878] sm:$0xff] %v2496_v29  ;;  %v1986_v39 = vmul.f32 0.1, %v1474_v52  ;;  %v1987_v13 = vmul.f32 0.1, %v1475_v53 }
 0x208   : > { %v1988_v14 = vmul.f32 0.1, %v1476_v17  ;;  %v8194_v40 = vld [vmem:[#allocation233_spill] sm:$0xff]  ;;  %v2497_v42 = vadd.f32 %v1985_v30, %v8187_v48  ;;  %v1989_v0 = vmul.f32 0.1, %v1477_v8  ;;  %v973_v57 = vld [vmem:[%s3396_s18 + $0x8e0] sm:$0xff] }
 0x209   : > { %v1480_v41 = vsub.f32 %v968_v50, %v8194_v40  ;;  %v1990_v43 = vmul.f32 0.1, %v1478_v26  ;;  %v1991_v55 = vmul.f32 0.1, %v1479_v24  ;;  %v2498_v44 = vadd.f32 %v1986_v39, %v8188_v51  ;;  %v974_v58 = vld [vmem:[%s3396_s18 + $0x8e8] sm:$0xff]  ;;  %v975_v5 = vld [vmem:[%s3396_s18 + $0x8f0] sm:$0xff] }
 0x20a   : > { %v2499_v4 = vadd.f32 %v1987_v13, %v8189_v10  ;;  %v2500_v56 = vadd.f32 %v1988_v14, %v8190_v25  ;;  %3009 = vst [vmem:[%s3469_s21 + $0x880] sm:$0xff] %v2497_v42  ;;  %v2501_v7 = vadd.f32 %v1989_v0, %v8191_v54  ;;  %v8195_v23 = vld [vmem:[#allocation234_spill] sm:$0xff]  ;;  %v976_v46 = vld [vmem:[%s3396_s18 + $0x8f8] sm:$0xff]  ;;  %v8196_v31 = vld [vmem:[#allocation235_spill] sm:$0xff] }
 0x20b   : > { %v1992_v45 = vmul.f32 0.1, %v1480_v41  ;;  %v2502_v6 = vadd.f32 %v1990_v43, %v8192_v16  ;;  %v2503_v59 = vadd.f32 %v1991_v55, %v8193_v18  ;;  %v1481_v60 = vsub.f32 %v969_v1, %v8195_v23  ;;  %3010 = vst [vmem:[%s3469_s21 + $0x888] sm:$0xff] %v2498_v44  ;;  %v8197_v9 = vld [vmem:[#allocation236_spill] sm:$0xff]  ;;  %v8198_v33 = vld [vmem:[#allocation237_spill] sm:$0xff]  ;;  %v977_v11 = vld [vmem:[%s3396_s18 + $0x900] sm:$0xff] }
 0x20c   : > { %3011 = vst [vmem:[%s3469_s21 + $0x890] sm:$0xff] %v2499_v4  ;;  %3012 = vst [vmem:[%s3469_s21 + $0x898] sm:$0xff] %v2500_v56  ;;  %v1482_v12 = vsub.f32 %v970_v3, %v8196_v31  ;;  %v1483_v32 = vsub.f32 %v971_v2, %v8197_v9  ;;  %v1484_v34 = vsub.f32 %v972_v63, %v8198_v33  ;;  %v8199_v35 = vld [vmem:[#allocation238_spill] sm:$0xff]  ;;  %v8200_v19 = vld [vmem:[#allocation239_spill] sm:$0xff] }
 0x20d   : > { %v2504_v61 = vadd.f32 %v1992_v45, %v8194_v40  ;;  %3013 = vst [vmem:[%s3469_s21 + $0x8a0] sm:$0xff] %v2501_v7  ;;  %3014 = vst [vmem:[%s3469_s21 + $0x8a8] sm:$0xff] %v2502_v6  ;;  %v1993_v62 = vmul.f32 0.1, %v1481_v60  ;;  %v1485_v36 = vsub.f32 %v973_v57, %v8199_v35  ;;  %v1486_v37 = vsub.f32 %v974_v58, %v8200_v19  ;;  %v8201_v20 = vld [vmem:[#allocation240_spill] sm:$0xff]  ;;  %v978_v15 = vld [vmem:[%s3396_s18 + $0x908] sm:$0xff] }
 0x20e   : > { %3015 = vst [vmem:[%s3469_s21 + $0x8b0] sm:$0xff] %v2503_v59  ;;  %v1487_v21 = vsub.f32 %v975_v5, %v8201_v20  ;;  %v979_v27 = vld [vmem:[%s3396_s18 + $0x910] sm:$0xff]  ;;  %v980_v38 = vld [vmem:[%s3396_s18 + $0x918] sm:$0xff]  ;;  %v1994_v47 = vmul.f32 0.1, %v1482_v12  ;;  %v981_v1 = vld [vmem:[%s3396_s18 + $0x920] sm:$0xff] }
 0x20f   : > { %3016 = vst [vmem:[%s3469_s21 + $0x8b8] sm:$0xff] %v2504_v61  ;;  %v1995_v28 = vmul.f32 0.1, %v1483_v32  ;;  %v1996_v22 = vmul.f32 0.1, %v1484_v34  ;;  %v8202_v48 = vld [vmem:[#allocation241_spill] sm:$0xff]  ;;  %v2505_v50 = vadd.f32 %v1993_v62, %v8195_v23 }
 0x210   : > { %v1488_v49 = vsub.f32 %v976_v46, %v8202_v48  ;;  %v1997_v29 = vmul.f32 0.1, %v1485_v36  ;;  %v1998_v51 = vmul.f32 0.1, %v1486_v37  ;;  %v1999_v52 = vmul.f32 0.1, %v1487_v21 }
 0x211   : > { %v2506_v10 = vadd.f32 %v1994_v47, %v8196_v31  ;;  %v2507_v53 = vadd.f32 %v1995_v28, %v8197_v9  ;;  %v2508_v25 = vadd.f32 %v1996_v22, %v8198_v33  ;;  %v982_v30 = vld [vmem:[%s3396_s18 + $0x928] sm:$0xff]  ;;  %v983_v54 = vld [vmem:[%s3396_s18 + $0x930] sm:$0xff]  ;;  %3017 = vst [vmem:[%s3469_s21 + $0x8c0] sm:$0xff] %v2505_v50  ;;  %v8203_v18 = vld [vmem:[#allocation242_spill] sm:$0xff] }
 0x212   : > { %v2000_v17 = vmul.f32 0.1, %v1488_v49  ;;  %v2509_v8 = vadd.f32 %v1997_v29, %v8199_v35  ;;  %v2510_v16 = vadd.f32 %v1998_v51, %v8200_v19  ;;  %v2511_v26 = vadd.f32 %v1999_v52, %v8201_v20  ;;  %v984_v3 = vld [vmem:[%s3396_s18 + $0x938] sm:$0xff]  ;;  %v8204_v63 = vld [vmem:[#allocation243_spill] sm:$0xff]  ;;  %v8205_v13 = vld [vmem:[#allocation244_spill] sm:$0xff] }
 0x213   : > { %v1489_v24 = vsub.f32 %v977_v11, %v8203_v18  ;;  %3018 = vst [vmem:[%s3469_s21 + $0x8c8] sm:$0xff] %v2506_v10  ;;  %3019 = vst [vmem:[%s3469_s21 + $0x8d0] sm:$0xff] %v2507_v53  ;;  %v1490_v39 = vsub.f32 %v978_v15, %v8204_v63  ;;  %v1491_v14 = vsub.f32 %v979_v27, %v8205_v13  ;;  %v8206_v40 = vld [vmem:[#allocation245_spill] sm:$0xff]  ;;  %v985_v42 = vld [vmem:[%s3396_s18 + $0x940] sm:$0xff] }
 0x214   : > { %3020 = vst [vmem:[%s3469_s21 + $0x8d8] sm:$0xff] %v2508_v25  ;;  %v2512_v2 = vadd.f32 %v2000_v17, %v8202_v48  ;;  %v1492_v41 = vsub.f32 %v980_v38, %v8206_v40  ;;  %3021 = vst [vmem:[%s3469_s21 + $0x8e0] sm:$0xff] %v2509_v8  ;;  %v8207_v43 = vld [vmem:[#allocation246_spill] sm:$0xff]  ;;  %v8208_v44 = vld [vmem:[#allocation247_spill] sm:$0xff] }
 0x215   : > { %3022 = vst [vmem:[%s3469_s21 + $0x8e8] sm:$0xff] %v2510_v16  ;;  %3023 = vst [vmem:[%s3469_s21 + $0x8f0] sm:$0xff] %v2511_v26  ;;  %v2001_v0 = vmul.f32 0.1, %v1489_v24  ;;  %v1493_v55 = vsub.f32 %v981_v1, %v8207_v43  ;;  %v1494_v4 = vsub.f32 %v982_v30, %v8208_v44  ;;  %v8209_v56 = vld [vmem:[#allocation248_spill] sm:$0xff]  ;;  %v986_v57 = vld [vmem:[%s3396_s18 + $0x948] sm:$0xff] }
 0x216   : > { %v1495_v45 = vsub.f32 %v983_v54, %v8209_v56  ;;  %v987_v58 = vld [vmem:[%s3396_s18 + $0x950] sm:$0xff]  ;;  %v988_v5 = vld [vmem:[%s3396_s18 + $0x958] sm:$0xff]  ;;  %3024 = vst [vmem:[%s3469_s21 + $0x8f8] sm:$0xff] %v2512_v2  ;;  %v2002_v7 = vmul.f32 0.1, %v1490_v39  ;;  %v989_v11 = vld [vmem:[%s3396_s18 + $0x960] sm:$0xff] }
 0x217   : > { %v2003_v6 = vmul.f32 0.1, %v1491_v14  ;;  %v2004_v59 = vmul.f32 0.1, %v1492_v41  ;;  %v8210_v23 = vld [vmem:[#allocation249_spill] sm:$0xff]  ;;  %v2513_v46 = vadd.f32 %v2001_v0, %v8203_v18  ;;  %v990_v62 = vld [vmem:[%s3396_s18 + $0x968] sm:$0xff] }
 0x218   : > { %v1496_v60 = vsub.f32 %v984_v3, %v8210_v23  ;;  %v2005_v61 = vmul.f32 0.1, %v1493_v55  ;;  %v2006_v31 = vmul.f32 0.1, %v1494_v4  ;;  %v2007_v12 = vmul.f32 0.1, %v1495_v45 }
 0x219   : > { %v2514_v9 = vadd.f32 %v2002_v7, %v8204_v63  ;;  %v2515_v32 = vadd.f32 %v2003_v6, %v8205_v13  ;;  %v2516_v33 = vadd.f32 %v2004_v59, %v8206_v40  ;;  %v991_v35 = vld [vmem:[%s3396_s18 + $0x970] sm:$0xff]  ;;  %3025 = vst [vmem:[%s3469_s21 + $0x900] sm:$0xff] %v2513_v46  ;;  %v8211_v20 = vld [vmem:[#allocation250_spill] sm:$0xff]  ;;  %v992_v15 = vld [vmem:[%s3396_s18 + $0x978] sm:$0xff] }
 0x21a   : > { %v2008_v34 = vmul.f32 0.1, %v1496_v60  ;;  %v2517_v36 = vadd.f32 %v2005_v61, %v8207_v43  ;;  %v2518_v19 = vadd.f32 %v2006_v31, %v8208_v44  ;;  %v2519_v37 = vadd.f32 %v2007_v12, %v8209_v56  ;;  %v8212_v38 = vld [vmem:[#allocation251_spill] sm:$0xff]  ;;  %v8213_v28 = vld [vmem:[#allocation252_spill] sm:$0xff]  ;;  %v8214_v48 = vld [vmem:[#allocation253_spill] sm:$0xff] }
 0x21b   : > { %v1497_v21 = vsub.f32 %v985_v42, %v8211_v20  ;;  %3026 = vst [vmem:[%s3469_s21 + $0x908] sm:$0xff] %v2514_v9  ;;  %3027 = vst [vmem:[%s3469_s21 + $0x910] sm:$0xff] %v2515_v32  ;;  %v1498_v47 = vsub.f32 %v986_v57, %v8212_v38  ;;  %v1499_v22 = vsub.f32 %v987_v58, %v8213_v28  ;;  %v993_v50 = vld [vmem:[%s3396_s18 + $0x980] sm:$0xff]  ;;  %v8216_v10 = vld [vmem:[#allocation255_spill] sm:$0xff] }
 0x21c   : > { %3028 = vst [vmem:[%s3469_s21 + $0x918] sm:$0xff] %v2516_v33  ;;  %v2520_v27 = vadd.f32 %v2008_v34, %v8210_v23  ;;  %v1500_v49 = vsub.f32 %v988_v5, %v8214_v48  ;;  %3029 = vst [vmem:[%s3469_s21 + $0x920] sm:$0xff] %v2517_v36  ;;  %v8215_v51 = vld [vmem:[#allocation254_spill] sm:$0xff]  ;;  %v1502_v53 = vsub.f32 %v990_v62, %v8216_v10  ;;  %v8217_v25 = vld [vmem:[#allocation256_spill] sm:$0xff] }
 0x21d   : > { %3030 = vst [vmem:[%s3469_s21 + $0x928] sm:$0xff] %v2518_v19  ;;  %3031 = vst [vmem:[%s3469_s21 + $0x930] sm:$0xff] %v2519_v37  ;;  %v2009_v29 = vmul.f32 0.1, %v1497_v21  ;;  %v1501_v52 = vsub.f32 %v989_v11, %v8215_v51  ;;  %v1503_v17 = vsub.f32 %v991_v35, %v8217_v25  ;;  %v994_v1 = vld [vmem:[%s3396_s18 + $0x988] sm:$0xff]  ;;  %v995_v30 = vld [vmem:[%s3396_s18 + $0x990] sm:$0xff] }
 0x21e   : > { %v996_v54 = vld [vmem:[%s3396_s18 + $0x998] sm:$0xff]  ;;  %3032 = vst [vmem:[%s3469_s21 + $0x938] sm:$0xff] %v2520_v27  ;;  %v2010_v8 = vmul.f32 0.1, %v1498_v47  ;;  %v2011_v16 = vmul.f32 0.1, %v1499_v22 }
 0x21f   : > { %v2012_v26 = vmul.f32 0.1, %v1500_v49  ;;  %v8218_v18 = vld [vmem:[#allocation257_spill] sm:$0xff]  ;;  %v2521_v3 = vadd.f32 %v2009_v29, %v8211_v20  ;;  %v2013_v2 = vmul.f32 0.1, %v1501_v52  ;;  %v997_v42 = vld [vmem:[%s3396_s18 + $0x9a0] sm:$0xff] }
 0x220   : > { %v1504_v24 = vsub.f32 %v992_v15, %v8218_v18  ;;  %v2014_v63 = vmul.f32 0.1, %v1502_v53  ;;  %v2015_v39 = vmul.f32 0.1, %v1503_v17  ;;  %v2522_v13 = vadd.f32 %v2010_v8, %v8212_v38  ;;  %v998_v0 = vld [vmem:[%s3396_s18 + $0x9a8] sm:$0xff]  ;;  %v999_v43 = vld [vmem:[%s3396_s18 + $0x9b0] sm:$0xff] }
 0x221   : > { %v2523_v14 = vadd.f32 %v2011_v16, %v8213_v28  ;;  %v2524_v40 = vadd.f32 %v2012_v26, %v8214_v48  ;;  %3033 = vst [vmem:[%s3469_s21 + $0x940] sm:$0xff] %v2521_v3  ;;  %v2525_v55 = vadd.f32 %v2013_v2, %v8215_v51  ;;  %v8219_v56 = vld [vmem:[#allocation258_spill] sm:$0xff]  ;;  %v1000_v57 = vld [vmem:[%s3396_s18 + $0x9b8] sm:$0xff]  ;;  %v8220_v5 = vld [vmem:[#allocation259_spill] sm:$0xff] }
 0x222   : > { %v2016_v41 = vmul.f32 0.1, %v1504_v24  ;;  %v2526_v44 = vadd.f32 %v2014_v63, %v8216_v10  ;;  %v2527_v4 = vadd.f32 %v2015_v39, %v8217_v25  ;;  %v1505_v45 = vsub.f32 %v993_v50, %v8219_v56  ;;  %3034 = vst [vmem:[%s3469_s21 + $0x948] sm:$0xff] %v2522_v13  ;;  %v8221_v6 = vld [vmem:[#allocation260_spill] sm:$0xff]  ;;  %v8222_v23 = vld [vmem:[#allocation261_spill] sm:$0xff]  ;;  %v1001_v46 = vld [vmem:[%s3396_s18 + $0x9c0] sm:$0xff] }
 0x223   : > { %3035 = vst [vmem:[%s3469_s21 + $0x950] sm:$0xff] %v2523_v14  ;;  %3036 = vst [vmem:[%s3469_s21 + $0x958] sm:$0xff] %v2524_v40  ;;  %v1506_v7 = vsub.f32 %v994_v1, %v8220_v5  ;;  %v1507_v59 = vsub.f32 %v995_v30, %v8221_v6  ;;  %v1508_v60 = vsub.f32 %v996_v54, %v8222_v23  ;;  %v8223_v31 = vld [vmem:[#allocation262_spill] sm:$0xff]  ;;  %v8224_v9 = vld [vmem:[#allocation263_spill] sm:$0xff] }
 0x224   : > { %v2528_v58 = vadd.f32 %v2016_v41, %v8218_v18  ;;  %3037 = vst [vmem:[%s3469_s21 + $0x960] sm:$0xff] %v2525_v55  ;;  %3038 = vst [vmem:[%s3469_s21 + $0x968] sm:$0xff] %v2526_v44  ;;  %v2017_v61 = vmul.f32 0.1, %v1505_v45  ;;  %v1509_v12 = vsub.f32 %v997_v42, %v8223_v31  ;;  %v1510_v32 = vsub.f32 %v998_v0, %v8224_v9  ;;  %v8225_v33 = vld [vmem:[#allocation264_spill] sm:$0xff]  ;;  %v1002_v11 = vld [vmem:[%s3396_s18 + $0x9c8] sm:$0xff] }
 0x225   : > { %3039 = vst [vmem:[%s3469_s21 + $0x970] sm:$0xff] %v2527_v4  ;;  %v1511_v34 = vsub.f32 %v999_v43, %v8225_v33  ;;  %v1003_v62 = vld [vmem:[%s3396_s18 + $0x9d0] sm:$0xff]  ;;  %v1004_v35 = vld [vmem:[%s3396_s18 + $0x9d8] sm:$0xff]  ;;  %v2018_v36 = vmul.f32 0.1, %v1506_v7  ;;  %v1005_v50 = vld [vmem:[%s3396_s18 + $0x9e0] sm:$0xff] }
 0x226   : > { %3040 = vst [vmem:[%s3469_s21 + $0x978] sm:$0xff] %v2528_v58  ;;  %v2019_v19 = vmul.f32 0.1, %v1507_v59  ;;  %v2020_v37 = vmul.f32 0.1, %v1508_v60  ;;  %v8226_v20 = vld [vmem:[#allocation265_spill] sm:$0xff]  ;;  %v2529_v15 = vadd.f32 %v2017_v61, %v8219_v56 }
 0x227   : > { %v1512_v21 = vsub.f32 %v1000_v57, %v8226_v20  ;;  %v2021_v27 = vmul.f32 0.1, %v1509_v12  ;;  %v2022_v38 = vmul.f32 0.1, %v1510_v32  ;;  %v2023_v47 = vmul.f32 0.1, %v1511_v34 }
 0x228   : > { %v2530_v28 = vadd.f32 %v2018_v36, %v8220_v5  ;;  %v2531_v22 = vadd.f32 %v2019_v19, %v8221_v6  ;;  %v2532_v48 = vadd.f32 %v2020_v37, %v8222_v23  ;;  %v1006_v29 = vld [vmem:[%s3396_s18 + $0x9e8] sm:$0xff]  ;;  %v1007_v51 = vld [vmem:[%s3396_s18 + $0x9f0] sm:$0xff]  ;;  %3041 = vst [vmem:[%s3469_s21 + $0x980] sm:$0xff] %v2529_v15  ;;  %v8227_v25 = vld [vmem:[#allocation266_spill] sm:$0xff] }
 0x229   : > { %v2024_v49 = vmul.f32 0.1, %v1512_v21  ;;  %v2533_v52 = vadd.f32 %v2021_v27, %v8223_v31  ;;  %v2534_v10 = vadd.f32 %v2022_v38, %v8224_v9  ;;  %v2535_v53 = vadd.f32 %v2023_v47, %v8225_v33  ;;  %v1008_v1 = vld [vmem:[%s3396_s18 + $0x9f8] sm:$0xff]  ;;  %v8228_v54 = vld [vmem:[#allocation267_spill] sm:$0xff]  ;;  %v8229_v16 = vld [vmem:[#allocation268_spill] sm:$0xff] }
 0x22a   : > { %v1513_v17 = vsub.f32 %v1001_v46, %v8227_v25  ;;  %3042 = vst [vmem:[%s3469_s21 + $0x988] sm:$0xff] %v2530_v28  ;;  %3043 = vst [vmem:[%s3469_s21 + $0x990] sm:$0xff] %v2531_v22  ;;  %v1514_v8 = vsub.f32 %v1002_v11, %v8228_v54  ;;  %v1515_v26 = vsub.f32 %v1003_v62, %v8229_v16  ;;  %v8230_v18 = vld [vmem:[#allocation269_spill] sm:$0xff]  ;;  %v1009_v3 = vld [vmem:[%s3396_s18 + $0xa00] sm:$0xff] }
 0x22b   : > { %3044 = vst [vmem:[%s3469_s21 + $0x998] sm:$0xff] %v2532_v48  ;;  %v2536_v30 = vadd.f32 %v2024_v49, %v8226_v20  ;;  %v1516_v24 = vsub.f32 %v1004_v35, %v8230_v18  ;;  %3045 = vst [vmem:[%s3469_s21 + $0x9a0] sm:$0xff] %v2533_v52  ;;  %v8231_v63 = vld [vmem:[#allocation270_spill] sm:$0xff]  ;;  %v8232_v13 = vld [vmem:[#allocation271_spill] sm:$0xff] }
 0x22c   : > { %3046 = vst [vmem:[%s3469_s21 + $0x9a8] sm:$0xff] %v2534_v10  ;;  %3047 = vst [vmem:[%s3469_s21 + $0x9b0] sm:$0xff] %v2535_v53  ;;  %v2025_v2 = vmul.f32 0.1, %v1513_v17  ;;  %v1517_v39 = vsub.f32 %v1005_v50, %v8231_v63  ;;  %v1518_v14 = vsub.f32 %v1006_v29, %v8232_v13  ;;  %v8233_v40 = vld [vmem:[#allocation272_spill] sm:$0xff]  ;;  %v1010_v42 = vld [vmem:[%s3396_s18 + $0xa08] sm:$0xff] }
 0x22d   : > { %v1519_v41 = vsub.f32 %v1007_v51, %v8233_v40  ;;  %v1011_v0 = vld [vmem:[%s3396_s18 + $0xa10] sm:$0xff]  ;;  %v1012_v43 = vld [vmem:[%s3396_s18 + $0xa18] sm:$0xff]  ;;  %3048 = vst [vmem:[%s3469_s21 + $0x9b8] sm:$0xff] %v2536_v30  ;;  %v2026_v55 = vmul.f32 0.1, %v1514_v8  ;;  %v1013_v46 = vld [vmem:[%s3396_s18 + $0xa20] sm:$0xff] }
 0x22e   : > { %v2027_v44 = vmul.f32 0.1, %v1515_v26  ;;  %v2028_v4 = vmul.f32 0.1, %v1516_v24  ;;  %v8234_v56 = vld [vmem:[#allocation273_spill] sm:$0xff]  ;;  %v2537_v57 = vadd.f32 %v2025_v2, %v8227_v25  ;;  %v1014_v61 = vld [vmem:[%s3396_s18 + $0xa28] sm:$0xff] }
 0x22f   : > { %v1520_v45 = vsub.f32 %v1008_v1, %v8234_v56  ;;  %v2029_v58 = vmul.f32 0.1, %v1517_v39  ;;  %v2030_v5 = vmul.f32 0.1, %v1518_v14  ;;  %v2031_v7 = vmul.f32 0.1, %v1519_v41 }
 0x230   : > { %v2538_v6 = vadd.f32 %v2026_v55, %v8228_v54  ;;  %v2539_v59 = vadd.f32 %v2027_v44, %v8229_v16  ;;  %v2540_v23 = vadd.f32 %v2028_v4, %v8230_v18  ;;  %v1015_v31 = vld [vmem:[%s3396_s18 + $0xa30] sm:$0xff]  ;;  %3049 = vst [vmem:[%s3469_s21 + $0x9c0] sm:$0xff] %v2537_v57  ;;  %v8235_v33 = vld [vmem:[#allocation274_spill] sm:$0xff]  ;;  %v1016_v11 = vld [vmem:[%s3396_s18 + $0xa38] sm:$0xff] }
 0x231   : > { %v2032_v60 = vmul.f32 0.1, %v1520_v45  ;;  %v2541_v12 = vadd.f32 %v2029_v58, %v8231_v63  ;;  %v2542_v9 = vadd.f32 %v2030_v5, %v8232_v13  ;;  %v2543_v32 = vadd.f32 %v2031_v7, %v8233_v40  ;;  %v8236_v35 = vld [vmem:[#allocation275_spill] sm:$0xff]  ;;  %v8237_v19 = vld [vmem:[#allocation276_spill] sm:$0xff]  ;;  %v8238_v20 = vld [vmem:[#allocation277_spill] sm:$0xff] }
 0x232   : > { %v1521_v34 = vsub.f32 %v1009_v3, %v8235_v33  ;;  %3050 = vst [vmem:[%s3469_s21 + $0x9c8] sm:$0xff] %v2538_v6  ;;  %3051 = vst [vmem:[%s3469_s21 + $0x9d0] sm:$0xff] %v2539_v59  ;;  %v1522_v36 = vsub.f32 %v1010_v42, %v8236_v35  ;;  %v1523_v37 = vsub.f32 %v1011_v0, %v8237_v19  ;;  %v1017_v15 = vld [vmem:[%s3396_s18 + $0xa40] sm:$0xff]  ;;  %v8240_v28 = vld [vmem:[#allocation279_spill] sm:$0xff] }
 0x233   : > { %3052 = vst [vmem:[%s3469_s21 + $0x9d8] sm:$0xff] %v2540_v23  ;;  %v2544_v62 = vadd.f32 %v2032_v60, %v8234_v56  ;;  %v1524_v21 = vsub.f32 %v1012_v43, %v8238_v20  ;;  %3053 = vst [vmem:[%s3469_s21 + $0x9e0] sm:$0xff] %v2541_v12  ;;  %v8239_v38 = vld [vmem:[#allocation278_spill] sm:$0xff]  ;;  %v1526_v22 = vsub.f32 %v1014_v61, %v8240_v28  ;;  %v8241_v48 = vld [vmem:[#allocation280_spill] sm:$0xff] }
 0x234   : > { %3054 = vst [vmem:[%s3469_s21 + $0x9e8] sm:$0xff] %v2542_v9  ;;  %3055 = vst [vmem:[%s3469_s21 + $0x9f0] sm:$0xff] %v2543_v32  ;;  %v2033_v27 = vmul.f32 0.1, %v1521_v34  ;;  %v1525_v47 = vsub.f32 %v1013_v46, %v8239_v38  ;;  %v1527_v49 = vsub.f32 %v1015_v31, %v8241_v48  ;;  %v1018_v50 = vld [vmem:[%s3396_s18 + $0xa48] sm:$0xff]  ;;  %v1019_v29 = vld [vmem:[%s3396_s18 + $0xa50] sm:$0xff] }
 0x235   : > { %v1020_v51 = vld [vmem:[%s3396_s18 + $0xa58] sm:$0xff]  ;;  %3056 = vst [vmem:[%s3469_s21 + $0x9f8] sm:$0xff] %v2544_v62  ;;  %v2034_v52 = vmul.f32 0.1, %v1522_v36  ;;  %v2035_v10 = vmul.f32 0.1, %v1523_v37 }
 0x236   : > { %v2036_v53 = vmul.f32 0.1, %v1524_v21  ;;  %v8242_v25 = vld [vmem:[#allocation281_spill] sm:$0xff]  ;;  %v2545_v1 = vadd.f32 %v2033_v27, %v8235_v33  ;;  %v2037_v30 = vmul.f32 0.1, %v1525_v47  ;;  %v1021_v3 = vld [vmem:[%s3396_s18 + $0xa60] sm:$0xff] }
 0x237   : > { %v1528_v17 = vsub.f32 %v1016_v11, %v8242_v25  ;;  %v2038_v54 = vmul.f32 0.1, %v1526_v22  ;;  %v2039_v8 = vmul.f32 0.1, %v1527_v49  ;;  %v2546_v16 = vadd.f32 %v2034_v52, %v8236_v35  ;;  %v1022_v2 = vld [vmem:[%s3396_s18 + $0xa68] sm:$0xff]  ;;  %v1023_v63 = vld [vmem:[%s3396_s18 + $0xa70] sm:$0xff] }
 0x238   : > { %v2547_v26 = vadd.f32 %v2035_v10, %v8237_v19  ;;  %v2548_v18 = vadd.f32 %v2036_v53, %v8238_v20  ;;  %3057 = vst [vmem:[%s3469_s21 + $0xa00] sm:$0xff] %v2545_v1  ;;  %v2549_v39 = vadd.f32 %v2037_v30, %v8239_v38  ;;  %v8243_v40 = vld [vmem:[#allocation282_spill] sm:$0xff]  ;;  %v1024_v42 = vld [vmem:[%s3396_s18 + $0xa78] sm:$0xff]  ;;  %v8244_v43 = vld [vmem:[#allocation283_spill] sm:$0xff] }
 0x239   : > { %v2040_v24 = vmul.f32 0.1, %v1528_v17  ;;  %v2550_v13 = vadd.f32 %v2038_v54, %v8240_v28  ;;  %v2551_v14 = vadd.f32 %v2039_v8, %v8241_v48  ;;  %v1529_v41 = vsub.f32 %v1017_v15, %v8243_v40  ;;  %3058 = vst [vmem:[%s3469_s21 + $0xa08] sm:$0xff] %v2546_v16  ;;  %v8245_v44 = vld [vmem:[#allocation284_spill] sm:$0xff]  ;;  %v8246_v56 = vld [vmem:[#allocation285_spill] sm:$0xff]  ;;  %v1025_v57 = vld [vmem:[%s3396_s18 + $0xa80] sm:$0xff] }
 0x23a   : > { %3059 = vst [vmem:[%s3469_s21 + $0xa10] sm:$0xff] %v2547_v26  ;;  %3060 = vst [vmem:[%s3469_s21 + $0xa18] sm:$0xff] %v2548_v18  ;;  %v1530_v55 = vsub.f32 %v1018_v50, %v8244_v43  ;;  %v1531_v4 = vsub.f32 %v1019_v29, %v8245_v44  ;;  %v1532_v45 = vsub.f32 %v1020_v51, %v8246_v56  ;;  %v8247_v5 = vld [vmem:[#allocation286_spill] sm:$0xff]  ;;  %v8248_v6 = vld [vmem:[#allocation287_spill] sm:$0xff] }
 0x23b   : > { %v2552_v0 = vadd.f32 %v2040_v24, %v8242_v25  ;;  %3061 = vst [vmem:[%s3469_s21 + $0xa20] sm:$0xff] %v2549_v39  ;;  %3062 = vst [vmem:[%s3469_s21 + $0xa28] sm:$0xff] %v2550_v13  ;;  %v2041_v58 = vmul.f32 0.1, %v1529_v41  ;;  %v1533_v7 = vsub.f32 %v1021_v3, %v8247_v5  ;;  %v1534_v59 = vsub.f32 %v1022_v2, %v8248_v6  ;;  %v8249_v23 = vld [vmem:[#allocation288_spill] sm:$0xff]  ;;  %v1026_v46 = vld [vmem:[%s3396_s18 + $0xa88] sm:$0xff] }
 0x23c   : > { %3063 = vst [vmem:[%s3469_s21 + $0xa30] sm:$0xff] %v2551_v14  ;;  %v1535_v60 = vsub.f32 %v1023_v63, %v8249_v23  ;;  %v1027_v61 = vld [vmem:[%s3396_s18 + $0xa90] sm:$0xff]  ;;  %v1028_v31 = vld [vmem:[%s3396_s18 + $0xa98] sm:$0xff]  ;;  %v2042_v12 = vmul.f32 0.1, %v1530_v55  ;;  %v1029_v15 = vld [vmem:[%s3396_s18 + $0xaa0] sm:$0xff] }
 0x23d   : > { %3064 = vst [vmem:[%s3469_s21 + $0xa38] sm:$0xff] %v2552_v0  ;;  %v2043_v9 = vmul.f32 0.1, %v1531_v4  ;;  %v2044_v32 = vmul.f32 0.1, %v1532_v45  ;;  %v8250_v33 = vld [vmem:[#allocation289_spill] sm:$0xff]  ;;  %v2553_v11 = vadd.f32 %v2041_v58, %v8243_v40 }
 0x23e   : > { %v1536_v34 = vsub.f32 %v1024_v42, %v8250_v33  ;;  %v2045_v62 = vmul.f32 0.1, %v1533_v7  ;;  %v2046_v35 = vmul.f32 0.1, %v1534_v59  ;;  %v2047_v36 = vmul.f32 0.1, %v1535_v60 }
 0x23f   : > { %v2554_v19 = vadd.f32 %v2042_v12, %v8244_v43  ;;  %v2555_v37 = vadd.f32 %v2043_v9, %v8245_v44  ;;  %v2556_v20 = vadd.f32 %v2044_v32, %v8246_v56  ;;  %v1030_v27 = vld [vmem:[%s3396_s18 + $0xaa8] sm:$0xff]  ;;  %v1031_v38 = vld [vmem:[%s3396_s18 + $0xab0] sm:$0xff]  ;;  %3065 = vst [vmem:[%s3469_s21 + $0xa40] sm:$0xff] %v2553_v11  ;;  %v8251_v48 = vld [vmem:[#allocation290_spill] sm:$0xff] }
 0x240   : > { %v2048_v21 = vmul.f32 0.1, %v1536_v34  ;;  %v2557_v47 = vadd.f32 %v2045_v62, %v8247_v5  ;;  %v2558_v28 = vadd.f32 %v2046_v35, %v8248_v6  ;;  %v2559_v22 = vadd.f32 %v2047_v36, %v8249_v23  ;;  %v1032_v50 = vld [vmem:[%s3396_s18 + $0xab8] sm:$0xff]  ;;  %v8252_v51 = vld [vmem:[#allocation291_spill] sm:$0xff]  ;;  %v8253_v10 = vld [vmem:[#allocation292_spill] sm:$0xff] }
 0x241   : > { %v1537_v49 = vsub.f32 %v1025_v57, %v8251_v48  ;;  %3066 = vst [vmem:[%s3469_s21 + $0xa48] sm:$0xff] %v2554_v19  ;;  %3067 = vst [vmem:[%s3469_s21 + $0xa50] sm:$0xff] %v2555_v37  ;;  %v1538_v52 = vsub.f32 %v1026_v46, %v8252_v51  ;;  %v1539_v53 = vsub.f32 %v1027_v61, %v8253_v10  ;;  %v8254_v25 = vld [vmem:[#allocation293_spill] sm:$0xff]  ;;  %v1033_v1 = vld [vmem:[%s3396_s18 + $0xac0] sm:$0xff] }
 0x242   : > { %3068 = vst [vmem:[%s3469_s21 + $0xa58] sm:$0xff] %v2556_v20  ;;  %v2560_v29 = vadd.f32 %v2048_v21, %v8250_v33  ;;  %v1540_v17 = vsub.f32 %v1028_v31, %v8254_v25  ;;  %3069 = vst [vmem:[%s3469_s21 + $0xa60] sm:$0xff] %v2557_v47  ;;  %v8255_v54 = vld [vmem:[#allocation294_spill] sm:$0xff]  ;;  %v8256_v16 = vld [vmem:[#allocation295_spill] sm:$0xff] }
 0x243   : > { %3070 = vst [vmem:[%s3469_s21 + $0xa68] sm:$0xff] %v2558_v28  ;;  %3071 = vst [vmem:[%s3469_s21 + $0xa70] sm:$0xff] %v2559_v22  ;;  %v2049_v30 = vmul.f32 0.1, %v1537_v49  ;;  %v1541_v8 = vsub.f32 %v1029_v15, %v8255_v54  ;;  %v1542_v26 = vsub.f32 %v1030_v27, %v8256_v16  ;;  %v8257_v18 = vld [vmem:[#allocation296_spill] sm:$0xff]  ;;  %v1034_v3 = vld [vmem:[%s3396_s18 + $0xac8] sm:$0xff] }
 0x244   : > { %v1543_v24 = vsub.f32 %v1031_v38, %v8257_v18  ;;  %v1035_v2 = vld [vmem:[%s3396_s18 + $0xad0] sm:$0xff]  ;;  %v1036_v63 = vld [vmem:[%s3396_s18 + $0xad8] sm:$0xff]  ;;  %3072 = vst [vmem:[%s3469_s21 + $0xa78] sm:$0xff] %v2560_v29  ;;  %v2050_v39 = vmul.f32 0.1, %v1538_v52  ;;  %v1037_v57 = vld [vmem:[%s3396_s18 + $0xae0] sm:$0xff] }
 0x245   : > { %v2051_v13 = vmul.f32 0.1, %v1539_v53  ;;  %v2052_v14 = vmul.f32 0.1, %v1540_v17  ;;  %v8258_v40 = vld [vmem:[#allocation297_spill] sm:$0xff]  ;;  %v2561_v42 = vadd.f32 %v2049_v30, %v8251_v48  ;;  %v1038_v58 = vld [vmem:[%s3396_s18 + $0xae8] sm:$0xff] }
 0x246   : > { %v1544_v41 = vsub.f32 %v1032_v50, %v8258_v40  ;;  %v2053_v0 = vmul.f32 0.1, %v1541_v8  ;;  %v2054_v43 = vmul.f32 0.1, %v1542_v26  ;;  %v2055_v55 = vmul.f32 0.1, %v1543_v24 }
 0x247   : > { %v2562_v44 = vadd.f32 %v2050_v39, %v8252_v51  ;;  %v2563_v4 = vadd.f32 %v2051_v13, %v8253_v10  ;;  %v2564_v56 = vadd.f32 %v2052_v14, %v8254_v25  ;;  %v1039_v5 = vld [vmem:[%s3396_s18 + $0xaf0] sm:$0xff]  ;;  %3073 = vst [vmem:[%s3469_s21 + $0xa80] sm:$0xff] %v2561_v42  ;;  %v8259_v23 = vld [vmem:[#allocation298_spill] sm:$0xff]  ;;  %v1040_v46 = vld [vmem:[%s3396_s18 + $0xaf8] sm:$0xff] }
 0x248   : > { %v2056_v45 = vmul.f32 0.1, %v1544_v41  ;;  %v2565_v7 = vadd.f32 %v2053_v0, %v8255_v54  ;;  %v2566_v6 = vadd.f32 %v2054_v43, %v8256_v16  ;;  %v2567_v59 = vadd.f32 %v2055_v55, %v8257_v18  ;;  %v8260_v31 = vld [vmem:[#allocation299_spill] sm:$0xff]  ;;  %v8261_v9 = vld [vmem:[#allocation300_spill] sm:$0xff]  ;;  %v8262_v33 = vld [vmem:[#allocation301_spill] sm:$0xff] }
 0x249   : > { %v1545_v60 = vsub.f32 %v1033_v1, %v8259_v23  ;;  %3074 = vst [vmem:[%s3469_s21 + $0xa88] sm:$0xff] %v2562_v44  ;;  %3075 = vst [vmem:[%s3469_s21 + $0xa90] sm:$0xff] %v2563_v4  ;;  %v1546_v12 = vsub.f32 %v1034_v3, %v8260_v31  ;;  %v1547_v32 = vsub.f32 %v1035_v2, %v8261_v9  ;;  %v1041_v11 = vld [vmem:[%s3396_s18 + $0xb00] sm:$0xff]  ;;  %v8264_v19 = vld [vmem:[#allocation303_spill] sm:$0xff] }
 0x24a   : > { %3076 = vst [vmem:[%s3469_s21 + $0xa98] sm:$0xff] %v2564_v56  ;;  %v2568_v61 = vadd.f32 %v2056_v45, %v8258_v40  ;;  %v1548_v34 = vsub.f32 %v1036_v63, %v8262_v33  ;;  %3077 = vst [vmem:[%s3469_s21 + $0xaa0] sm:$0xff] %v2565_v7  ;;  %v8263_v35 = vld [vmem:[#allocation302_spill] sm:$0xff]  ;;  %v1550_v37 = vsub.f32 %v1038_v58, %v8264_v19  ;;  %v8265_v20 = vld [vmem:[#allocation304_spill] sm:$0xff] }
 0x24b   : > { %3078 = vst [vmem:[%s3469_s21 + $0xaa8] sm:$0xff] %v2566_v6  ;;  %3079 = vst [vmem:[%s3469_s21 + $0xab0] sm:$0xff] %v2567_v59  ;;  %v2057_v62 = vmul.f32 0.1, %v1545_v60  ;;  %v1549_v36 = vsub.f32 %v1037_v57, %v8263_v35  ;;  %v1551_v21 = vsub.f32 %v1039_v5, %v8265_v20  ;;  %v1042_v15 = vld [vmem:[%s3396_s18 + $0xb08] sm:$0xff]  ;;  %v1043_v27 = vld [vmem:[%s3396_s18 + $0xb10] sm:$0xff] }
 0x24c   : > { %v1044_v38 = vld [vmem:[%s3396_s18 + $0xb18] sm:$0xff]  ;;  %3080 = vst [vmem:[%s3469_s21 + $0xab8] sm:$0xff] %v2568_v61  ;;  %v2058_v47 = vmul.f32 0.1, %v1546_v12  ;;  %v2059_v28 = vmul.f32 0.1, %v1547_v32 }
 0x24d   : > { %v2060_v22 = vmul.f32 0.1, %v1548_v34  ;;  %v8266_v48 = vld [vmem:[#allocation305_spill] sm:$0xff]  ;;  %v2569_v50 = vadd.f32 %v2057_v62, %v8259_v23  ;;  %v2061_v29 = vmul.f32 0.1, %v1549_v36  ;;  %v1045_v1 = vld [vmem:[%s3396_s18 + $0xb20] sm:$0xff] }
 0x24e   : > { %v1552_v49 = vsub.f32 %v1040_v46, %v8266_v48  ;;  %v2062_v51 = vmul.f32 0.1, %v1550_v37  ;;  %v2063_v52 = vmul.f32 0.1, %v1551_v21  ;;  %v2570_v10 = vadd.f32 %v2058_v47, %v8260_v31  ;;  %v1046_v30 = vld [vmem:[%s3396_s18 + $0xb28] sm:$0xff]  ;;  %v1047_v54 = vld [vmem:[%s3396_s18 + $0xb30] sm:$0xff] }
 0x24f   : > { %v2571_v53 = vadd.f32 %v2059_v28, %v8261_v9  ;;  %v2572_v25 = vadd.f32 %v2060_v22, %v8262_v33  ;;  %3081 = vst [vmem:[%s3469_s21 + $0xac0] sm:$0xff] %v2569_v50  ;;  %v2573_v8 = vadd.f32 %v2061_v29, %v8263_v35  ;;  %v8267_v18 = vld [vmem:[#allocation306_spill] sm:$0xff]  ;;  %v1048_v3 = vld [vmem:[%s3396_s18 + $0xb38] sm:$0xff]  ;;  %v8268_v63 = vld [vmem:[#allocation307_spill] sm:$0xff] }
 0x250   : > { %v2064_v17 = vmul.f32 0.1, %v1552_v49  ;;  %v2574_v16 = vadd.f32 %v2062_v51, %v8264_v19  ;;  %v2575_v26 = vadd.f32 %v2063_v52, %v8265_v20  ;;  %v1553_v24 = vsub.f32 %v1041_v11, %v8267_v18  ;;  %3082 = vst [vmem:[%s3469_s21 + $0xac8] sm:$0xff] %v2570_v10  ;;  %v8269_v13 = vld [vmem:[#allocation308_spill] sm:$0xff]  ;;  %v8270_v40 = vld [vmem:[#allocation309_spill] sm:$0xff]  ;;  %v1049_v42 = vld [vmem:[%s3396_s18 + $0xb40] sm:$0xff] }
 0x251   : > { %3083 = vst [vmem:[%s3469_s21 + $0xad0] sm:$0xff] %v2571_v53  ;;  %3084 = vst [vmem:[%s3469_s21 + $0xad8] sm:$0xff] %v2572_v25  ;;  %v1554_v39 = vsub.f32 %v1042_v15, %v8268_v63  ;;  %v1555_v14 = vsub.f32 %v1043_v27, %v8269_v13  ;;  %v1556_v41 = vsub.f32 %v1044_v38, %v8270_v40  ;;  %v8271_v43 = vld [vmem:[#allocation310_spill] sm:$0xff]  ;;  %v8272_v44 = vld [vmem:[#allocation311_spill] sm:$0xff] }
 0x252   : > { %v2576_v2 = vadd.f32 %v2064_v17, %v8266_v48  ;;  %3085 = vst [vmem:[%s3469_s21 + $0xae0] sm:$0xff] %v2573_v8  ;;  %3086 = vst [vmem:[%s3469_s21 + $0xae8] sm:$0xff] %v2574_v16  ;;  %v2065_v0 = vmul.f32 0.1, %v1553_v24  ;;  %v1557_v55 = vsub.f32 %v1045_v1, %v8271_v43  ;;  %v1558_v4 = vsub.f32 %v1046_v30, %v8272_v44  ;;  %v8273_v56 = vld [vmem:[#allocation312_spill] sm:$0xff]  ;;  %v1050_v57 = vld [vmem:[%s3396_s18 + $0xb48] sm:$0xff] }
 0x253   : > { %3087 = vst [vmem:[%s3469_s21 + $0xaf0] sm:$0xff] %v2575_v26  ;;  %v1559_v45 = vsub.f32 %v1047_v54, %v8273_v56  ;;  %v1051_v58 = vld [vmem:[%s3396_s18 + $0xb50] sm:$0xff]  ;;  %v1052_v5 = vld [vmem:[%s3396_s18 + $0xb58] sm:$0xff]  ;;  %v2066_v7 = vmul.f32 0.1, %v1554_v39  ;;  %v1053_v11 = vld [vmem:[%s3396_s18 + $0xb60] sm:$0xff] }
 0x254   : > { %3088 = vst [vmem:[%s3469_s21 + $0xaf8] sm:$0xff] %v2576_v2  ;;  %v2067_v6 = vmul.f32 0.1, %v1555_v14  ;;  %v2068_v59 = vmul.f32 0.1, %v1556_v41  ;;  %v8274_v23 = vld [vmem:[#allocation313_spill] sm:$0xff]  ;;  %v2577_v46 = vadd.f32 %v2065_v0, %v8267_v18 }
 0x255   : > { %v1560_v60 = vsub.f32 %v1048_v3, %v8274_v23  ;;  %v2069_v61 = vmul.f32 0.1, %v1557_v55  ;;  %v2070_v31 = vmul.f32 0.1, %v1558_v4  ;;  %v2071_v12 = vmul.f32 0.1, %v1559_v45 }
 0x256   : > { %v2578_v9 = vadd.f32 %v2066_v7, %v8268_v63  ;;  %v2579_v32 = vadd.f32 %v2067_v6, %v8269_v13  ;;  %v2580_v33 = vadd.f32 %v2068_v59, %v8270_v40  ;;  %v1054_v62 = vld [vmem:[%s3396_s18 + $0xb68] sm:$0xff]  ;;  %v1055_v35 = vld [vmem:[%s3396_s18 + $0xb70] sm:$0xff]  ;;  %3089 = vst [vmem:[%s3469_s21 + $0xb00] sm:$0xff] %v2577_v46  ;;  %v8275_v20 = vld [vmem:[#allocation314_spill] sm:$0xff] }
 0x257   : > { %v2072_v34 = vmul.f32 0.1, %v1560_v60  ;;  %v2581_v36 = vadd.f32 %v2069_v61, %v8271_v43  ;;  %v2582_v19 = vadd.f32 %v2070_v31, %v8272_v44  ;;  %v2583_v37 = vadd.f32 %v2071_v12, %v8273_v56  ;;  %v1056_v15 = vld [vmem:[%s3396_s18 + $0xb78] sm:$0xff]  ;;  %v8276_v38 = vld [vmem:[#allocation315_spill] sm:$0xff]  ;;  %v8277_v28 = vld [vmem:[#allocation316_spill] sm:$0xff] }
 0x258   : > { %v1561_v21 = vsub.f32 %v1049_v42, %v8275_v20  ;;  %3090 = vst [vmem:[%s3469_s21 + $0xb08] sm:$0xff] %v2578_v9  ;;  %3091 = vst [vmem:[%s3469_s21 + $0xb10] sm:$0xff] %v2579_v32  ;;  %v1562_v47 = vsub.f32 %v1050_v57, %v8276_v38  ;;  %v1563_v22 = vsub.f32 %v1051_v58, %v8277_v28  ;;  %v8278_v48 = vld [vmem:[#allocation317_spill] sm:$0xff]  ;;  %v1057_v50 = vld [vmem:[%s3396_s18 + $0xb80] sm:$0xff] }
 0x259   : > { %3092 = vst [vmem:[%s3469_s21 + $0xb18] sm:$0xff] %v2580_v33  ;;  %v2584_v27 = vadd.f32 %v2072_v34, %v8274_v23  ;;  %v1564_v49 = vsub.f32 %v1052_v5, %v8278_v48  ;;  %3093 = vst [vmem:[%s3469_s21 + $0xb20] sm:$0xff] %v2581_v36  ;;  %v8279_v51 = vld [vmem:[#allocation318_spill] sm:$0xff]  ;;  %v8280_v10 = vld [vmem:[#allocation319_spill] sm:$0xff] }
 0x25a   : > { %3094 = vst [vmem:[%s3469_s21 + $0xb28] sm:$0xff] %v2582_v19  ;;  %3095 = vst [vmem:[%s3469_s21 + $0xb30] sm:$0xff] %v2583_v37  ;;  %v2073_v29 = vmul.f32 0.1, %v1561_v21  ;;  %v1565_v52 = vsub.f32 %v1053_v11, %v8279_v51  ;;  %v1566_v53 = vsub.f32 %v1054_v62, %v8280_v10  ;;  %v8281_v25 = vld [vmem:[#allocation320_spill] sm:$0xff]  ;;  %v1058_v1 = vld [vmem:[%s3396_s18 + $0xb88] sm:$0xff] }
 0x25b   : > { %v1567_v17 = vsub.f32 %v1055_v35, %v8281_v25  ;;  %v1059_v30 = vld [vmem:[%s3396_s18 + $0xb90] sm:$0xff]  ;;  %v1060_v54 = vld [vmem:[%s3396_s18 + $0xb98] sm:$0xff]  ;;  %3096 = vst [vmem:[%s3469_s21 + $0xb38] sm:$0xff] %v2584_v27  ;;  %v2074_v8 = vmul.f32 0.1, %v1562_v47  ;;  %v1061_v42 = vld [vmem:[%s3396_s18 + $0xba0] sm:$0xff] }
 0x25c   : > { %v2075_v16 = vmul.f32 0.1, %v1563_v22  ;;  %v2076_v26 = vmul.f32 0.1, %v1564_v49  ;;  %v8282_v18 = vld [vmem:[#allocation321_spill] sm:$0xff]  ;;  %v2585_v3 = vadd.f32 %v2073_v29, %v8275_v20  ;;  %v1062_v0 = vld [vmem:[%s3396_s18 + $0xba8] sm:$0xff] }
 0x25d   : > { %v1568_v24 = vsub.f32 %v1056_v15, %v8282_v18  ;;  %v2077_v2 = vmul.f32 0.1, %v1565_v52  ;;  %v2078_v63 = vmul.f32 0.1, %v1566_v53  ;;  %v2079_v39 = vmul.f32 0.1, %v1567_v17 }
 0x25e   : > { %v2586_v13 = vadd.f32 %v2074_v8, %v8276_v38  ;;  %v2587_v14 = vadd.f32 %v2075_v16, %v8277_v28  ;;  %v2588_v40 = vadd.f32 %v2076_v26, %v8278_v48  ;;  %v1063_v43 = vld [vmem:[%s3396_s18 + $0xbb0] sm:$0xff]  ;;  %3097 = vst [vmem:[%s3469_s21 + $0xb40] sm:$0xff] %v2585_v3  ;;  %v8283_v56 = vld [vmem:[#allocation322_spill] sm:$0xff]  ;;  %v1064_v57 = vld [vmem:[%s3396_s18 + $0xbb8] sm:$0xff] }
 0x25f   : > { %v2080_v41 = vmul.f32 0.1, %v1568_v24  ;;  %v2589_v55 = vadd.f32 %v2077_v2, %v8279_v51  ;;  %v2590_v44 = vadd.f32 %v2078_v63, %v8280_v10  ;;  %v2591_v4 = vadd.f32 %v2079_v39, %v8281_v25  ;;  %v8284_v5 = vld [vmem:[#allocation323_spill] sm:$0xff]  ;;  %v8285_v6 = vld [vmem:[#allocation324_spill] sm:$0xff]  ;;  %v8286_v23 = vld [vmem:[#allocation325_spill] sm:$0xff] }
 0x260   : > { %v1569_v45 = vsub.f32 %v1057_v50, %v8283_v56  ;;  %3098 = vst [vmem:[%s3469_s21 + $0xb48] sm:$0xff] %v2586_v13  ;;  %3099 = vst [vmem:[%s3469_s21 + $0xb50] sm:$0xff] %v2587_v14  ;;  %v1570_v7 = vsub.f32 %v1058_v1, %v8284_v5  ;;  %v1571_v59 = vsub.f32 %v1059_v30, %v8285_v6  ;;  %v1065_v46 = vld [vmem:[%s3396_s18 + $0xbc0] sm:$0xff]  ;;  %v8288_v9 = vld [vmem:[#allocation327_spill] sm:$0xff] }
 0x261   : > { %3100 = vst [vmem:[%s3469_s21 + $0xb58] sm:$0xff] %v2588_v40  ;;  %v2592_v58 = vadd.f32 %v2080_v41, %v8282_v18  ;;  %v1572_v60 = vsub.f32 %v1060_v54, %v8286_v23  ;;  %3101 = vst [vmem:[%s3469_s21 + $0xb60] sm:$0xff] %v2589_v55  ;;  %v8287_v31 = vld [vmem:[#allocation326_spill] sm:$0xff]  ;;  %v1574_v32 = vsub.f32 %v1062_v0, %v8288_v9  ;;  %v8289_v33 = vld [vmem:[#allocation328_spill] sm:$0xff] }
 0x262   : > { %3102 = vst [vmem:[%s3469_s21 + $0xb68] sm:$0xff] %v2590_v44  ;;  %3103 = vst [vmem:[%s3469_s21 + $0xb70] sm:$0xff] %v2591_v4  ;;  %v2081_v61 = vmul.f32 0.1, %v1569_v45  ;;  %v1573_v12 = vsub.f32 %v1061_v42, %v8287_v31  ;;  %v1575_v34 = vsub.f32 %v1063_v43, %v8289_v33  ;;  %v1066_v11 = vld [vmem:[%s3396_s18 + $0xbc8] sm:$0xff]  ;;  %v1067_v62 = vld [vmem:[%s3396_s18 + $0xbd0] sm:$0xff] }
 0x263   : > { %v1068_v35 = vld [vmem:[%s3396_s18 + $0xbd8] sm:$0xff]  ;;  %3104 = vst [vmem:[%s3469_s21 + $0xb78] sm:$0xff] %v2592_v58  ;;  %v2082_v36 = vmul.f32 0.1, %v1570_v7  ;;  %v2083_v19 = vmul.f32 0.1, %v1571_v59 }
 0x264   : > { %v2084_v37 = vmul.f32 0.1, %v1572_v60  ;;  %v8290_v20 = vld [vmem:[#allocation329_spill] sm:$0xff]  ;;  %v2593_v15 = vadd.f32 %v2081_v61, %v8283_v56  ;;  %v2085_v27 = vmul.f32 0.1, %v1573_v12  ;;  %v1069_v50 = vld [vmem:[%s3396_s18 + $0xbe0] sm:$0xff] }
 0x265   : > { %v1576_v21 = vsub.f32 %v1064_v57, %v8290_v20  ;;  %v2086_v38 = vmul.f32 0.1, %v1574_v32  ;;  %v2087_v47 = vmul.f32 0.1, %v1575_v34  ;;  %v2594_v28 = vadd.f32 %v2082_v36, %v8284_v5  ;;  %v1070_v29 = vld [vmem:[%s3396_s18 + $0xbe8] sm:$0xff]  ;;  %v1071_v51 = vld [vmem:[%s3396_s18 + $0xbf0] sm:$0xff] }
 0x266   : > { %v2595_v22 = vadd.f32 %v2083_v19, %v8285_v6  ;;  %v2596_v48 = vadd.f32 %v2084_v37, %v8286_v23  ;;  %3105 = vst [vmem:[%s3469_s21 + $0xb80] sm:$0xff] %v2593_v15  ;;  %v2597_v52 = vadd.f32 %v2085_v27, %v8287_v31  ;;  %v8291_v25 = vld [vmem:[#allocation330_spill] sm:$0xff]  ;;  %v1072_v1 = vld [vmem:[%s3396_s18 + $0xbf8] sm:$0xff]  ;;  %v8292_v54 = vld [vmem:[#allocation331_spill] sm:$0xff] }
 0x267   : > { %v2088_v49 = vmul.f32 0.1, %v1576_v21  ;;  %v2598_v10 = vadd.f32 %v2086_v38, %v8288_v9  ;;  %v2599_v53 = vadd.f32 %v2087_v47, %v8289_v33  ;;  %v1577_v17 = vsub.f32 %v1065_v46, %v8291_v25  ;;  %3106 = vst [vmem:[%s3469_s21 + $0xb88] sm:$0xff] %v2594_v28  ;;  %v8293_v16 = vld [vmem:[#allocation332_spill] sm:$0xff]  ;;  %v8294_v18 = vld [vmem:[#allocation333_spill] sm:$0xff]  ;;  %v1073_v3 = vld [vmem:[%s3396_s18 + $0xc00] sm:$0xff] }
 0x268   : > { %3107 = vst [vmem:[%s3469_s21 + $0xb90] sm:$0xff] %v2595_v22  ;;  %3108 = vst [vmem:[%s3469_s21 + $0xb98] sm:$0xff] %v2596_v48  ;;  %v1578_v8 = vsub.f32 %v1066_v11, %v8292_v54  ;;  %v1579_v26 = vsub.f32 %v1067_v62, %v8293_v16  ;;  %v1580_v24 = vsub.f32 %v1068_v35, %v8294_v18  ;;  %v8295_v63 = vld [vmem:[#allocation334_spill] sm:$0xff]  ;;  %v8296_v13 = vld [vmem:[#allocation335_spill] sm:$0xff] }
 0x269   : > { %v2600_v30 = vadd.f32 %v2088_v49, %v8290_v20  ;;  %3109 = vst [vmem:[%s3469_s21 + $0xba0] sm:$0xff] %v2597_v52  ;;  %3110 = vst [vmem:[%s3469_s21 + $0xba8] sm:$0xff] %v2598_v10  ;;  %v2089_v2 = vmul.f32 0.1, %v1577_v17  ;;  %v1581_v39 = vsub.f32 %v1069_v50, %v8295_v63  ;;  %v1582_v14 = vsub.f32 %v1070_v29, %v8296_v13  ;;  %v8297_v40 = vld [vmem:[#allocation336_spill] sm:$0xff]  ;;  %v1074_v42 = vld [vmem:[%s3396_s18 + $0xc08] sm:$0xff] }
 0x26a   : > { %3111 = vst [vmem:[%s3469_s21 + $0xbb0] sm:$0xff] %v2599_v53  ;;  %v1583_v41 = vsub.f32 %v1071_v51, %v8297_v40  ;;  %v1075_v0 = vld [vmem:[%s3396_s18 + $0xc10] sm:$0xff]  ;;  %v1076_v43 = vld [vmem:[%s3396_s18 + $0xc18] sm:$0xff]  ;;  %v2090_v55 = vmul.f32 0.1, %v1578_v8  ;;  %v1077_v46 = vld [vmem:[%s3396_s18 + $0xc20] sm:$0xff] }
 0x26b   : > { %3112 = vst [vmem:[%s3469_s21 + $0xbb8] sm:$0xff] %v2600_v30  ;;  %v2091_v44 = vmul.f32 0.1, %v1579_v26  ;;  %v2092_v4 = vmul.f32 0.1, %v1580_v24  ;;  %v8298_v56 = vld [vmem:[#allocation337_spill] sm:$0xff]  ;;  %v2601_v57 = vadd.f32 %v2089_v2, %v8291_v25 }
 0x26c   : > { %v1584_v45 = vsub.f32 %v1072_v1, %v8298_v56  ;;  %v2093_v58 = vmul.f32 0.1, %v1581_v39  ;;  %v2094_v5 = vmul.f32 0.1, %v1582_v14  ;;  %v2095_v7 = vmul.f32 0.1, %v1583_v41 }
 0x26d   : > { %v2602_v6 = vadd.f32 %v2090_v55, %v8292_v54  ;;  %v2603_v59 = vadd.f32 %v2091_v44, %v8293_v16  ;;  %v2604_v23 = vadd.f32 %v2092_v4, %v8294_v18  ;;  %v1078_v61 = vld [vmem:[%s3396_s18 + $0xc28] sm:$0xff]  ;;  %v1079_v31 = vld [vmem:[%s3396_s18 + $0xc30] sm:$0xff]  ;;  %3113 = vst [vmem:[%s3469_s21 + $0xbc0] sm:$0xff] %v2601_v57  ;;  %v8299_v33 = vld [vmem:[#allocation338_spill] sm:$0xff] }
 0x26e   : > { %v2096_v60 = vmul.f32 0.1, %v1584_v45  ;;  %v2605_v12 = vadd.f32 %v2093_v58, %v8295_v63  ;;  %v2606_v9 = vadd.f32 %v2094_v5, %v8296_v13  ;;  %v2607_v32 = vadd.f32 %v2095_v7, %v8297_v40  ;;  %v1080_v11 = vld [vmem:[%s3396_s18 + $0xc38] sm:$0xff]  ;;  %v8300_v35 = vld [vmem:[#allocation339_spill] sm:$0xff]  ;;  %v8301_v19 = vld [vmem:[#allocation340_spill] sm:$0xff] }
 0x26f   : > { %v1585_v34 = vsub.f32 %v1073_v3, %v8299_v33  ;;  %3114 = vst [vmem:[%s3469_s21 + $0xbc8] sm:$0xff] %v2602_v6  ;;  %3115 = vst [vmem:[%s3469_s21 + $0xbd0] sm:$0xff] %v2603_v59  ;;  %v1586_v36 = vsub.f32 %v1074_v42, %v8300_v35  ;;  %v1587_v37 = vsub.f32 %v1075_v0, %v8301_v19  ;;  %v8302_v20 = vld [vmem:[#allocation341_spill] sm:$0xff]  ;;  %v1081_v15 = vld [vmem:[%s3396_s18 + $0xc40] sm:$0xff] }
 0x270   : > { %3116 = vst [vmem:[%s3469_s21 + $0xbd8] sm:$0xff] %v2604_v23  ;;  %v2608_v62 = vadd.f32 %v2096_v60, %v8298_v56  ;;  %v1588_v21 = vsub.f32 %v1076_v43, %v8302_v20  ;;  %3117 = vst [vmem:[%s3469_s21 + $0xbe0] sm:$0xff] %v2605_v12  ;;  %v8303_v38 = vld [vmem:[#allocation342_spill] sm:$0xff]  ;;  %v8304_v28 = vld [vmem:[#allocation343_spill] sm:$0xff] }
 0x271   : > { %3118 = vst [vmem:[%s3469_s21 + $0xbe8] sm:$0xff] %v2606_v9  ;;  %3119 = vst [vmem:[%s3469_s21 + $0xbf0] sm:$0xff] %v2607_v32  ;;  %v2097_v27 = vmul.f32 0.1, %v1585_v34  ;;  %v1589_v47 = vsub.f32 %v1077_v46, %v8303_v38  ;;  %v1590_v22 = vsub.f32 %v1078_v61, %v8304_v28  ;;  %v8305_v48 = vld [vmem:[#allocation344_spill] sm:$0xff]  ;;  %v1082_v50 = vld [vmem:[%s3396_s18 + $0xc48] sm:$0xff] }
 0x272   : > { %v1591_v49 = vsub.f32 %v1079_v31, %v8305_v48  ;;  %v1083_v29 = vld [vmem:[%s3396_s18 + $0xc50] sm:$0xff]  ;;  %v1084_v51 = vld [vmem:[%s3396_s18 + $0xc58] sm:$0xff]  ;;  %3120 = vst [vmem:[%s3469_s21 + $0xbf8] sm:$0xff] %v2608_v62  ;;  %v2098_v52 = vmul.f32 0.1, %v1586_v36  ;;  %v1085_v3 = vld [vmem:[%s3396_s18 + $0xc60] sm:$0xff] }
 0x273   : > { %v2099_v10 = vmul.f32 0.1, %v1587_v37  ;;  %v2100_v53 = vmul.f32 0.1, %v1588_v21  ;;  %v8306_v25 = vld [vmem:[#allocation345_spill] sm:$0xff]  ;;  %v2609_v1 = vadd.f32 %v2097_v27, %v8299_v33  ;;  %v1086_v2 = vld [vmem:[%s3396_s18 + $0xc68] sm:$0xff] }
 0x274   : > { %v1592_v17 = vsub.f32 %v1080_v11, %v8306_v25  ;;  %v2101_v30 = vmul.f32 0.1, %v1589_v47  ;;  %v2102_v54 = vmul.f32 0.1, %v1590_v22  ;;  %v2103_v8 = vmul.f32 0.1, %v1591_v49 }
 0x275   : > { %v2610_v16 = vadd.f32 %v2098_v52, %v8300_v35  ;;  %v2611_v26 = vadd.f32 %v2099_v10, %v8301_v19  ;;  %v2612_v18 = vadd.f32 %v2100_v53, %v8302_v20  ;;  %v1087_v63 = vld [vmem:[%s3396_s18 + $0xc70] sm:$0xff]  ;;  %3121 = vst [vmem:[%s3469_s21 + $0xc00] sm:$0xff] %v2609_v1  ;;  %v8307_v40 = vld [vmem:[#allocation346_spill] sm:$0xff]  ;;  %v1088_v42 = vld [vmem:[%s3396_s18 + $0xc78] sm:$0xff] }
 0x276   : > { %v2104_v24 = vmul.f32 0.1, %v1592_v17  ;;  %v2613_v39 = vadd.f32 %v2101_v30, %v8303_v38  ;;  %v2614_v13 = vadd.f32 %v2102_v54, %v8304_v28  ;;  %v2615_v14 = vadd.f32 %v2103_v8, %v8305_v48  ;;  %v8308_v43 = vld [vmem:[#allocation347_spill] sm:$0xff]  ;;  %v8309_v44 = vld [vmem:[#allocation348_spill] sm:$0xff]  ;;  %v8310_v56 = vld [vmem:[#allocation349_spill] sm:$0xff] }
 0x277   : > { %v1593_v41 = vsub.f32 %v1081_v15, %v8307_v40  ;;  %3122 = vst [vmem:[%s3469_s21 + $0xc08] sm:$0xff] %v2610_v16  ;;  %3123 = vst [vmem:[%s3469_s21 + $0xc10] sm:$0xff] %v2611_v26  ;;  %v1594_v55 = vsub.f32 %v1082_v50, %v8308_v43  ;;  %v1595_v4 = vsub.f32 %v1083_v29, %v8309_v44  ;;  %v1089_v57 = vld [vmem:[%s3396_s18 + $0xc80] sm:$0xff]  ;;  %v8312_v6 = vld [vmem:[#allocation351_spill] sm:$0xff] }
 0x278   : > { %3124 = vst [vmem:[%s3469_s21 + $0xc18] sm:$0xff] %v2612_v18  ;;  %v2616_v0 = vadd.f32 %v2104_v24, %v8306_v25  ;;  %v1596_v45 = vsub.f32 %v1084_v51, %v8310_v56  ;;  %3125 = vst [vmem:[%s3469_s21 + $0xc20] sm:$0xff] %v2613_v39  ;;  %v8311_v5 = vld [vmem:[#allocation350_spill] sm:$0xff]  ;;  %v1598_v59 = vsub.f32 %v1086_v2, %v8312_v6  ;;  %v8313_v23 = vld [vmem:[#allocation352_spill] sm:$0xff] }
 0x279   : > { %3126 = vst [vmem:[%s3469_s21 + $0xc28] sm:$0xff] %v2614_v13  ;;  %3127 = vst [vmem:[%s3469_s21 + $0xc30] sm:$0xff] %v2615_v14  ;;  %v2105_v58 = vmul.f32 0.1, %v1593_v41  ;;  %v1597_v7 = vsub.f32 %v1085_v3, %v8311_v5  ;;  %v1599_v60 = vsub.f32 %v1087_v63, %v8313_v23  ;;  %v1090_v46 = vld [vmem:[%s3396_s18 + $0xc88] sm:$0xff]  ;;  %v1091_v61 = vld [vmem:[%s3396_s18 + $0xc90] sm:$0xff] }
 0x27a   : > { %v1092_v31 = vld [vmem:[%s3396_s18 + $0xc98] sm:$0xff]  ;;  %3128 = vst [vmem:[%s3469_s21 + $0xc38] sm:$0xff] %v2616_v0  ;;  %v2106_v12 = vmul.f32 0.1, %v1594_v55  ;;  %v2107_v9 = vmul.f32 0.1, %v1595_v4 }
 0x27b   : > { %v2108_v32 = vmul.f32 0.1, %v1596_v45  ;;  %v8314_v33 = vld [vmem:[#allocation353_spill] sm:$0xff]  ;;  %v2617_v11 = vadd.f32 %v2105_v58, %v8307_v40  ;;  %v2109_v62 = vmul.f32 0.1, %v1597_v7  ;;  %v1093_v15 = vld [vmem:[%s3396_s18 + $0xca0] sm:$0xff] }
 0x27c   : > { %v1600_v34 = vsub.f32 %v1088_v42, %v8314_v33  ;;  %v2110_v35 = vmul.f32 0.1, %v1598_v59  ;;  %v2111_v36 = vmul.f32 0.1, %v1599_v60  ;;  %v2618_v19 = vadd.f32 %v2106_v12, %v8308_v43  ;;  %v1094_v27 = vld [vmem:[%s3396_s18 + $0xca8] sm:$0xff]  ;;  %v1095_v38 = vld [vmem:[%s3396_s18 + $0xcb0] sm:$0xff] }
 0x27d   : > { %v2619_v37 = vadd.f32 %v2107_v9, %v8309_v44  ;;  %v2620_v20 = vadd.f32 %v2108_v32, %v8310_v56  ;;  %3129 = vst [vmem:[%s3469_s21 + $0xc40] sm:$0xff] %v2617_v11  ;;  %v2621_v47 = vadd.f32 %v2109_v62, %v8311_v5  ;;  %v8315_v48 = vld [vmem:[#allocation354_spill] sm:$0xff]  ;;  %v1096_v50 = vld [vmem:[%s3396_s18 + $0xcb8] sm:$0xff]  ;;  %v8316_v51 = vld [vmem:[#allocation355_spill] sm:$0xff] }
 0x27e   : > { %v2112_v21 = vmul.f32 0.1, %v1600_v34  ;;  %v2622_v28 = vadd.f32 %v2110_v35, %v8312_v6  ;;  %v2623_v22 = vadd.f32 %v2111_v36, %v8313_v23  ;;  %v1601_v49 = vsub.f32 %v1089_v57, %v8315_v48  ;;  %3130 = vst [vmem:[%s3469_s21 + $0xc48] sm:$0xff] %v2618_v19  ;;  %v8317_v10 = vld [vmem:[#allocation356_spill] sm:$0xff]  ;;  %v8318_v25 = vld [vmem:[#allocation357_spill] sm:$0xff]  ;;  %v1097_v1 = vld [vmem:[%s3396_s18 + $0xcc0] sm:$0xff] }
 0x27f   : > { %3131 = vst [vmem:[%s3469_s21 + $0xc50] sm:$0xff] %v2619_v37  ;;  %3132 = vst [vmem:[%s3469_s21 + $0xc58] sm:$0xff] %v2620_v20  ;;  %v1602_v52 = vsub.f32 %v1090_v46, %v8316_v51  ;;  %v1603_v53 = vsub.f32 %v1091_v61, %v8317_v10  ;;  %v1604_v17 = vsub.f32 %v1092_v31, %v8318_v25  ;;  %v8319_v54 = vld [vmem:[#allocation358_spill] sm:$0xff]  ;;  %v8320_v16 = vld [vmem:[#allocation359_spill] sm:$0xff] }
 0x280   : > { %v2624_v29 = vadd.f32 %v2112_v21, %v8314_v33  ;;  %3133 = vst [vmem:[%s3469_s21 + $0xc60] sm:$0xff] %v2621_v47  ;;  %3134 = vst [vmem:[%s3469_s21 + $0xc68] sm:$0xff] %v2622_v28  ;;  %v2113_v30 = vmul.f32 0.1, %v1601_v49  ;;  %v1605_v8 = vsub.f32 %v1093_v15, %v8319_v54  ;;  %v1606_v26 = vsub.f32 %v1094_v27, %v8320_v16  ;;  %v8321_v18 = vld [vmem:[#allocation360_spill] sm:$0xff]  ;;  %v1098_v3 = vld [vmem:[%s3396_s18 + $0xcc8] sm:$0xff] }
 0x281   : > { %3135 = vst [vmem:[%s3469_s21 + $0xc70] sm:$0xff] %v2623_v22  ;;  %v1607_v24 = vsub.f32 %v1095_v38, %v8321_v18  ;;  %v1099_v2 = vld [vmem:[%s3396_s18 + $0xcd0] sm:$0xff]  ;;  %v1100_v63 = vld [vmem:[%s3396_s18 + $0xcd8] sm:$0xff]  ;;  %v2114_v39 = vmul.f32 0.1, %v1602_v52  ;;  %v1101_v57 = vld [vmem:[%s3396_s18 + $0xce0] sm:$0xff] }
 0x282   : > { %3136 = vst [vmem:[%s3469_s21 + $0xc78] sm:$0xff] %v2624_v29  ;;  %v2115_v13 = vmul.f32 0.1, %v1603_v53  ;;  %v2116_v14 = vmul.f32 0.1, %v1604_v17  ;;  %v8322_v40 = vld [vmem:[#allocation361_spill] sm:$0xff]  ;;  %v2625_v42 = vadd.f32 %v2113_v30, %v8315_v48 }
 0x283   : > { %v1608_v41 = vsub.f32 %v1096_v50, %v8322_v40  ;;  %v2117_v0 = vmul.f32 0.1, %v1605_v8  ;;  %v2118_v43 = vmul.f32 0.1, %v1606_v26  ;;  %v2119_v55 = vmul.f32 0.1, %v1607_v24 }
 0x284   : > { %v2626_v44 = vadd.f32 %v2114_v39, %v8316_v51  ;;  %v2627_v4 = vadd.f32 %v2115_v13, %v8317_v10  ;;  %v2628_v56 = vadd.f32 %v2116_v14, %v8318_v25  ;;  %v1102_v58 = vld [vmem:[%s3396_s18 + $0xce8] sm:$0xff]  ;;  %v1103_v5 = vld [vmem:[%s3396_s18 + $0xcf0] sm:$0xff]  ;;  %3137 = vst [vmem:[%s3469_s21 + $0xc80] sm:$0xff] %v2625_v42  ;;  %v8323_v23 = vld [vmem:[#allocation362_spill] sm:$0xff] }
 0x285   : > { %v2120_v45 = vmul.f32 0.1, %v1608_v41  ;;  %v2629_v7 = vadd.f32 %v2117_v0, %v8319_v54  ;;  %v2630_v6 = vadd.f32 %v2118_v43, %v8320_v16  ;;  %v2631_v59 = vadd.f32 %v2119_v55, %v8321_v18  ;;  %v1104_v46 = vld [vmem:[%s3396_s18 + $0xcf8] sm:$0xff]  ;;  %v8324_v31 = vld [vmem:[#allocation363_spill] sm:$0xff]  ;;  %v8325_v9 = vld [vmem:[#allocation364_spill] sm:$0xff] }
 0x286   : > { %v1609_v60 = vsub.f32 %v1097_v1, %v8323_v23  ;;  %3138 = vst [vmem:[%s3469_s21 + $0xc88] sm:$0xff] %v2626_v44  ;;  %3139 = vst [vmem:[%s3469_s21 + $0xc90] sm:$0xff] %v2627_v4  ;;  %v1610_v12 = vsub.f32 %v1098_v3, %v8324_v31  ;;  %v1611_v32 = vsub.f32 %v1099_v2, %v8325_v9  ;;  %v8326_v33 = vld [vmem:[#allocation365_spill] sm:$0xff]  ;;  %v1105_v11 = vld [vmem:[%s3396_s18 + $0xd00] sm:$0xff] }
 0x287   : > { %3140 = vst [vmem:[%s3469_s21 + $0xc98] sm:$0xff] %v2628_v56  ;;  %v2632_v61 = vadd.f32 %v2120_v45, %v8322_v40  ;;  %v1612_v34 = vsub.f32 %v1100_v63, %v8326_v33  ;;  %3141 = vst [vmem:[%s3469_s21 + $0xca0] sm:$0xff] %v2629_v7  ;;  %v8327_v35 = vld [vmem:[#allocation366_spill] sm:$0xff]  ;;  %v8328_v19 = vld [vmem:[#allocation367_spill] sm:$0xff] }
 0x288   : > { %3142 = vst [vmem:[%s3469_s21 + $0xca8] sm:$0xff] %v2630_v6  ;;  %3143 = vst [vmem:[%s3469_s21 + $0xcb0] sm:$0xff] %v2631_v59  ;;  %v2121_v62 = vmul.f32 0.1, %v1609_v60  ;;  %v1613_v36 = vsub.f32 %v1101_v57, %v8327_v35  ;;  %v1614_v37 = vsub.f32 %v1102_v58, %v8328_v19  ;;  %v8329_v20 = vld [vmem:[#allocation368_spill] sm:$0xff]  ;;  %v1106_v15 = vld [vmem:[%s3396_s18 + $0xd08] sm:$0xff] }
 0x289   : > { %v1615_v21 = vsub.f32 %v1103_v5, %v8329_v20  ;;  %v1107_v27 = vld [vmem:[%s3396_s18 + $0xd10] sm:$0xff]  ;;  %v1108_v38 = vld [vmem:[%s3396_s18 + $0xd18] sm:$0xff]  ;;  %3144 = vst [vmem:[%s3469_s21 + $0xcb8] sm:$0xff] %v2632_v61  ;;  %v2122_v47 = vmul.f32 0.1, %v1610_v12  ;;  %v1109_v1 = vld [vmem:[%s3396_s18 + $0xd20] sm:$0xff] }
 0x28a   : > { %v2123_v28 = vmul.f32 0.1, %v1611_v32  ;;  %v2124_v22 = vmul.f32 0.1, %v1612_v34  ;;  %v8330_v48 = vld [vmem:[#allocation369_spill] sm:$0xff]  ;;  %v2633_v50 = vadd.f32 %v2121_v62, %v8323_v23  ;;  %v1110_v30 = vld [vmem:[%s3396_s18 + $0xd28] sm:$0xff] }
 0x28b   : > { %v1616_v49 = vsub.f32 %v1104_v46, %v8330_v48  ;;  %v2125_v29 = vmul.f32 0.1, %v1613_v36  ;;  %v2126_v51 = vmul.f32 0.1, %v1614_v37  ;;  %v2127_v52 = vmul.f32 0.1, %v1615_v21 }
 0x28c   : > { %v2634_v10 = vadd.f32 %v2122_v47, %v8324_v31  ;;  %v2635_v53 = vadd.f32 %v2123_v28, %v8325_v9  ;;  %v2636_v25 = vadd.f32 %v2124_v22, %v8326_v33  ;;  %v1111_v54 = vld [vmem:[%s3396_s18 + $0xd30] sm:$0xff]  ;;  %3145 = vst [vmem:[%s3469_s21 + $0xcc0] sm:$0xff] %v2633_v50  ;;  %v8331_v18 = vld [vmem:[#allocation370_spill] sm:$0xff]  ;;  %v1112_v3 = vld [vmem:[%s3396_s18 + $0xd38] sm:$0xff] }
 0x28d   : > { %v2128_v17 = vmul.f32 0.1, %v1616_v49  ;;  %v2637_v8 = vadd.f32 %v2125_v29, %v8327_v35  ;;  %v2638_v16 = vadd.f32 %v2126_v51, %v8328_v19  ;;  %v2639_v26 = vadd.f32 %v2127_v52, %v8329_v20  ;;  %v8332_v63 = vld [vmem:[#allocation371_spill] sm:$0xff]  ;;  %v8333_v13 = vld [vmem:[#allocation372_spill] sm:$0xff]  ;;  %v8334_v40 = vld [vmem:[#allocation373_spill] sm:$0xff] }
 0x28e   : > { %v1617_v24 = vsub.f32 %v1105_v11, %v8331_v18  ;;  %3146 = vst [vmem:[%s3469_s21 + $0xcc8] sm:$0xff] %v2634_v10  ;;  %3147 = vst [vmem:[%s3469_s21 + $0xcd0] sm:$0xff] %v2635_v53  ;;  %v1618_v39 = vsub.f32 %v1106_v15, %v8332_v63  ;;  %v1619_v14 = vsub.f32 %v1107_v27, %v8333_v13  ;;  %v1113_v42 = vld [vmem:[%s3396_s18 + $0xd40] sm:$0xff]  ;;  %v8336_v44 = vld [vmem:[#allocation375_spill] sm:$0xff] }
 0x28f   : > { %3148 = vst [vmem:[%s3469_s21 + $0xcd8] sm:$0xff] %v2636_v25  ;;  %v2640_v2 = vadd.f32 %v2128_v17, %v8330_v48  ;;  %v1620_v41 = vsub.f32 %v1108_v38, %v8334_v40  ;;  %3149 = vst [vmem:[%s3469_s21 + $0xce0] sm:$0xff] %v2637_v8  ;;  %v8335_v43 = vld [vmem:[#allocation374_spill] sm:$0xff]  ;;  %v1622_v4 = vsub.f32 %v1110_v30, %v8336_v44  ;;  %v8337_v56 = vld [vmem:[#allocation376_spill] sm:$0xff] }
 0x290   : > { %3150 = vst [vmem:[%s3469_s21 + $0xce8] sm:$0xff] %v2638_v16  ;;  %3151 = vst [vmem:[%s3469_s21 + $0xcf0] sm:$0xff] %v2639_v26  ;;  %v2129_v0 = vmul.f32 0.1, %v1617_v24  ;;  %v1621_v55 = vsub.f32 %v1109_v1, %v8335_v43  ;;  %v1623_v45 = vsub.f32 %v1111_v54, %v8337_v56  ;;  %v1114_v57 = vld [vmem:[%s3396_s18 + $0xd48] sm:$0xff]  ;;  %v1115_v58 = vld [vmem:[%s3396_s18 + $0xd50] sm:$0xff] }
 0x291   : > { %v1116_v5 = vld [vmem:[%s3396_s18 + $0xd58] sm:$0xff]  ;;  %3152 = vst [vmem:[%s3469_s21 + $0xcf8] sm:$0xff] %v2640_v2  ;;  %v2130_v7 = vmul.f32 0.1, %v1618_v39  ;;  %v2131_v6 = vmul.f32 0.1, %v1619_v14 }
 0x292   : > { %v2132_v59 = vmul.f32 0.1, %v1620_v41  ;;  %v8338_v23 = vld [vmem:[#allocation377_spill] sm:$0xff]  ;;  %v2641_v46 = vadd.f32 %v2129_v0, %v8331_v18  ;;  %v2133_v61 = vmul.f32 0.1, %v1621_v55  ;;  %v1117_v11 = vld [vmem:[%s3396_s18 + $0xd60] sm:$0xff] }
 0x293   : > { %v1624_v60 = vsub.f32 %v1112_v3, %v8338_v23  ;;  %v2134_v31 = vmul.f32 0.1, %v1622_v4  ;;  %v2135_v12 = vmul.f32 0.1, %v1623_v45  ;;  %v2642_v9 = vadd.f32 %v2130_v7, %v8332_v63  ;;  %v1118_v62 = vld [vmem:[%s3396_s18 + $0xd68] sm:$0xff]  ;;  %v1119_v35 = vld [vmem:[%s3396_s18 + $0xd70] sm:$0xff] }
 0x294   : > { %v2643_v32 = vadd.f32 %v2131_v6, %v8333_v13  ;;  %v2644_v33 = vadd.f32 %v2132_v59, %v8334_v40  ;;  %3153 = vst [vmem:[%s3469_s21 + $0xd00] sm:$0xff] %v2641_v46  ;;  %v2645_v36 = vadd.f32 %v2133_v61, %v8335_v43  ;;  %v8339_v20 = vld [vmem:[#allocation378_spill] sm:$0xff]  ;;  %v1120_v15 = vld [vmem:[%s3396_s18 + $0xd78] sm:$0xff]  ;;  %v8340_v38 = vld [vmem:[#allocation379_spill] sm:$0xff] }
 0x295   : > { %v2136_v34 = vmul.f32 0.1, %v1624_v60  ;;  %v2646_v19 = vadd.f32 %v2134_v31, %v8336_v44  ;;  %v2647_v37 = vadd.f32 %v2135_v12, %v8337_v56  ;;  %v1625_v21 = vsub.f32 %v1113_v42, %v8339_v20  ;;  %3154 = vst [vmem:[%s3469_s21 + $0xd08] sm:$0xff] %v2642_v9  ;;  %v8341_v28 = vld [vmem:[#allocation380_spill] sm:$0xff]  ;;  %v8342_v48 = vld [vmem:[#allocation381_spill] sm:$0xff]  ;;  %v1121_v50 = vld [vmem:[%s3396_s18 + $0xd80] sm:$0xff] }
 0x296   : > { %3155 = vst [vmem:[%s3469_s21 + $0xd10] sm:$0xff] %v2643_v32  ;;  %3156 = vst [vmem:[%s3469_s21 + $0xd18] sm:$0xff] %v2644_v33  ;;  %v1626_v47 = vsub.f32 %v1114_v57, %v8340_v38  ;;  %v1627_v22 = vsub.f32 %v1115_v58, %v8341_v28  ;;  %v1628_v49 = vsub.f32 %v1116_v5, %v8342_v48  ;;  %v8343_v51 = vld [vmem:[#allocation382_spill] sm:$0xff]  ;;  %v8344_v10 = vld [vmem:[#allocation383_spill] sm:$0xff] }
 0x297   : > { %v2648_v27 = vadd.f32 %v2136_v34, %v8338_v23  ;;  %3157 = vst [vmem:[%s3469_s21 + $0xd20] sm:$0xff] %v2645_v36  ;;  %3158 = vst [vmem:[%s3469_s21 + $0xd28] sm:$0xff] %v2646_v19  ;;  %v2137_v29 = vmul.f32 0.1, %v1625_v21  ;;  %v1629_v52 = vsub.f32 %v1117_v11, %v8343_v51  ;;  %v1630_v53 = vsub.f32 %v1118_v62, %v8344_v10  ;;  %v8345_v25 = vld [vmem:[#allocation384_spill] sm:$0xff]  ;;  %v1122_v1 = vld [vmem:[%s3396_s18 + $0xd88] sm:$0xff] }
 0x298   : > { %3159 = vst [vmem:[%s3469_s21 + $0xd30] sm:$0xff] %v2647_v37  ;;  %v1631_v17 = vsub.f32 %v1119_v35, %v8345_v25  ;;  %v1123_v30 = vld [vmem:[%s3396_s18 + $0xd90] sm:$0xff]  ;;  %v1124_v54 = vld [vmem:[%s3396_s18 + $0xd98] sm:$0xff]  ;;  %v2138_v8 = vmul.f32 0.1, %v1626_v47  ;;  %v1125_v42 = vld [vmem:[%s3396_s18 + $0xda0] sm:$0xff] }
 0x299   : > { %3160 = vst [vmem:[%s3469_s21 + $0xd38] sm:$0xff] %v2648_v27  ;;  %v2139_v16 = vmul.f32 0.1, %v1627_v22  ;;  %v2140_v26 = vmul.f32 0.1, %v1628_v49  ;;  %v8346_v18 = vld [vmem:[#allocation385_spill] sm:$0xff]  ;;  %v2649_v3 = vadd.f32 %v2137_v29, %v8339_v20 }
 0x29a   : > { %v1632_v24 = vsub.f32 %v1120_v15, %v8346_v18  ;;  %v2141_v2 = vmul.f32 0.1, %v1629_v52  ;;  %v2142_v63 = vmul.f32 0.1, %v1630_v53  ;;  %v2143_v39 = vmul.f32 0.1, %v1631_v17 }
 0x29b   : > { %v2650_v13 = vadd.f32 %v2138_v8, %v8340_v38  ;;  %v2651_v14 = vadd.f32 %v2139_v16, %v8341_v28  ;;  %v2652_v40 = vadd.f32 %v2140_v26, %v8342_v48  ;;  %v1126_v0 = vld [vmem:[%s3396_s18 + $0xda8] sm:$0xff]  ;;  %v1127_v43 = vld [vmem:[%s3396_s18 + $0xdb0] sm:$0xff]  ;;  %3161 = vst [vmem:[%s3469_s21 + $0xd40] sm:$0xff] %v2649_v3  ;;  %v8347_v56 = vld [vmem:[#allocation386_spill] sm:$0xff] }
 0x29c   : > { %v2144_v41 = vmul.f32 0.1, %v1632_v24  ;;  %v2653_v55 = vadd.f32 %v2141_v2, %v8343_v51  ;;  %v2654_v44 = vadd.f32 %v2142_v63, %v8344_v10  ;;  %v2655_v4 = vadd.f32 %v2143_v39, %v8345_v25  ;;  %v1128_v57 = vld [vmem:[%s3396_s18 + $0xdb8] sm:$0xff]  ;;  %v8348_v5 = vld [vmem:[#allocation387_spill] sm:$0xff]  ;;  %v8349_v6 = vld [vmem:[#allocation388_spill] sm:$0xff] }
 0x29d   : > { %v1633_v45 = vsub.f32 %v1121_v50, %v8347_v56  ;;  %3162 = vst [vmem:[%s3469_s21 + $0xd48] sm:$0xff] %v2650_v13  ;;  %3163 = vst [vmem:[%s3469_s21 + $0xd50] sm:$0xff] %v2651_v14  ;;  %v1634_v7 = vsub.f32 %v1122_v1, %v8348_v5  ;;  %v1635_v59 = vsub.f32 %v1123_v30, %v8349_v6  ;;  %v8350_v23 = vld [vmem:[#allocation389_spill] sm:$0xff]  ;;  %v1129_v46 = vld [vmem:[%s3396_s18 + $0xdc0] sm:$0xff] }
 0x29e   : > { %3164 = vst [vmem:[%s3469_s21 + $0xd58] sm:$0xff] %v2652_v40  ;;  %v2656_v58 = vadd.f32 %v2144_v41, %v8346_v18  ;;  %v1636_v60 = vsub.f32 %v1124_v54, %v8350_v23  ;;  %3165 = vst [vmem:[%s3469_s21 + $0xd60] sm:$0xff] %v2653_v55  ;;  %v8351_v31 = vld [vmem:[#allocation390_spill] sm:$0xff]  ;;  %v8352_v9 = vld [vmem:[#allocation391_spill] sm:$0xff] }
 0x29f   : > { %3166 = vst [vmem:[%s3469_s21 + $0xd68] sm:$0xff] %v2654_v44  ;;  %3167 = vst [vmem:[%s3469_s21 + $0xd70] sm:$0xff] %v2655_v4  ;;  %v2145_v61 = vmul.f32 0.1, %v1633_v45  ;;  %v1637_v12 = vsub.f32 %v1125_v42, %v8351_v31  ;;  %v1638_v32 = vsub.f32 %v1126_v0, %v8352_v9  ;;  %v8353_v33 = vld [vmem:[#allocation392_spill] sm:$0xff]  ;;  %v1130_v11 = vld [vmem:[%s3396_s18 + $0xdc8] sm:$0xff] }
 0x2a0   : > { %v1639_v34 = vsub.f32 %v1127_v43, %v8353_v33  ;;  %v1131_v62 = vld [vmem:[%s3396_s18 + $0xdd0] sm:$0xff]  ;;  %v1132_v35 = vld [vmem:[%s3396_s18 + $0xdd8] sm:$0xff]  ;;  %3168 = vst [vmem:[%s3469_s21 + $0xd78] sm:$0xff] %v2656_v58  ;;  %v2146_v36 = vmul.f32 0.1, %v1634_v7  ;;  %v1133_v50 = vld [vmem:[%s3396_s18 + $0xde0] sm:$0xff] }
 0x2a1   : > { %v2147_v19 = vmul.f32 0.1, %v1635_v59  ;;  %v2148_v37 = vmul.f32 0.1, %v1636_v60  ;;  %v8354_v20 = vld [vmem:[#allocation393_spill] sm:$0xff]  ;;  %v2657_v15 = vadd.f32 %v2145_v61, %v8347_v56  ;;  %v1134_v29 = vld [vmem:[%s3396_s18 + $0xde8] sm:$0xff] }
 0x2a2   : > { %v1640_v21 = vsub.f32 %v1128_v57, %v8354_v20  ;;  %v2149_v27 = vmul.f32 0.1, %v1637_v12  ;;  %v2150_v38 = vmul.f32 0.1, %v1638_v32  ;;  %v2151_v47 = vmul.f32 0.1, %v1639_v34 }
 0x2a3   : > { %v2658_v28 = vadd.f32 %v2146_v36, %v8348_v5  ;;  %v2659_v22 = vadd.f32 %v2147_v19, %v8349_v6  ;;  %v2660_v48 = vadd.f32 %v2148_v37, %v8350_v23  ;;  %v1135_v51 = vld [vmem:[%s3396_s18 + $0xdf0] sm:$0xff]  ;;  %3169 = vst [vmem:[%s3469_s21 + $0xd80] sm:$0xff] %v2657_v15  ;;  %v8355_v25 = vld [vmem:[#allocation394_spill] sm:$0xff]  ;;  %v1136_v1 = vld [vmem:[%s3396_s18 + $0xdf8] sm:$0xff] }
 0x2a4   : > { %v2152_v49 = vmul.f32 0.1, %v1640_v21  ;;  %v2661_v52 = vadd.f32 %v2149_v27, %v8351_v31  ;;  %v2662_v10 = vadd.f32 %v2150_v38, %v8352_v9  ;;  %v2663_v53 = vadd.f32 %v2151_v47, %v8353_v33  ;;  %v8356_v54 = vld [vmem:[#allocation395_spill] sm:$0xff]  ;;  %v8357_v16 = vld [vmem:[#allocation396_spill] sm:$0xff]  ;;  %v8358_v18 = vld [vmem:[#allocation397_spill] sm:$0xff] }
 0x2a5   : > { %v1641_v17 = vsub.f32 %v1129_v46, %v8355_v25  ;;  %3170 = vst [vmem:[%s3469_s21 + $0xd88] sm:$0xff] %v2658_v28  ;;  %3171 = vst [vmem:[%s3469_s21 + $0xd90] sm:$0xff] %v2659_v22  ;;  %v1642_v8 = vsub.f32 %v1130_v11, %v8356_v54  ;;  %v1643_v26 = vsub.f32 %v1131_v62, %v8357_v16  ;;  %v1137_v3 = vld [vmem:[%s3396_s18 + $0xe00] sm:$0xff]  ;;  %v8360_v13 = vld [vmem:[#allocation399_spill] sm:$0xff] }
 0x2a6   : > { %3172 = vst [vmem:[%s3469_s21 + $0xd98] sm:$0xff] %v2660_v48  ;;  %v2664_v30 = vadd.f32 %v2152_v49, %v8354_v20  ;;  %v1644_v24 = vsub.f32 %v1132_v35, %v8358_v18  ;;  %3173 = vst [vmem:[%s3469_s21 + $0xda0] sm:$0xff] %v2661_v52  ;;  %v8359_v63 = vld [vmem:[#allocation398_spill] sm:$0xff]  ;;  %v1646_v14 = vsub.f32 %v1134_v29, %v8360_v13  ;;  %v8361_v40 = vld [vmem:[#allocation400_spill] sm:$0xff] }
 0x2a7   : > { %3174 = vst [vmem:[%s3469_s21 + $0xda8] sm:$0xff] %v2662_v10  ;;  %3175 = vst [vmem:[%s3469_s21 + $0xdb0] sm:$0xff] %v2663_v53  ;;  %v2153_v2 = vmul.f32 0.1, %v1641_v17  ;;  %v1645_v39 = vsub.f32 %v1133_v50, %v8359_v63  ;;  %v1647_v41 = vsub.f32 %v1135_v51, %v8361_v40  ;;  %v1138_v42 = vld [vmem:[%s3396_s18 + $0xe08] sm:$0xff]  ;;  %v1139_v0 = vld [vmem:[%s3396_s18 + $0xe10] sm:$0xff] }
 0x2a8   : > { %v1140_v43 = vld [vmem:[%s3396_s18 + $0xe18] sm:$0xff]  ;;  %3176 = vst [vmem:[%s3469_s21 + $0xdb8] sm:$0xff] %v2664_v30  ;;  %v2154_v55 = vmul.f32 0.1, %v1642_v8  ;;  %v2155_v44 = vmul.f32 0.1, %v1643_v26 }
 0x2a9   : > { %v2156_v4 = vmul.f32 0.1, %v1644_v24  ;;  %v8362_v56 = vld [vmem:[#allocation401_spill] sm:$0xff]  ;;  %v2665_v57 = vadd.f32 %v2153_v2, %v8355_v25  ;;  %v2157_v58 = vmul.f32 0.1, %v1645_v39  ;;  %v1141_v46 = vld [vmem:[%s3396_s18 + $0xe20] sm:$0xff] }
 0x2aa   : > { %v1648_v45 = vsub.f32 %v1136_v1, %v8362_v56  ;;  %v2158_v5 = vmul.f32 0.1, %v1646_v14  ;;  %v2159_v7 = vmul.f32 0.1, %v1647_v41  ;;  %v2666_v6 = vadd.f32 %v2154_v55, %v8356_v54  ;;  %v1142_v61 = vld [vmem:[%s3396_s18 + $0xe28] sm:$0xff]  ;;  %v1143_v31 = vld [vmem:[%s3396_s18 + $0xe30] sm:$0xff] }
 0x2ab   : > { %v2667_v59 = vadd.f32 %v2155_v44, %v8357_v16  ;;  %v2668_v23 = vadd.f32 %v2156_v4, %v8358_v18  ;;  %3177 = vst [vmem:[%s3469_s21 + $0xdc0] sm:$0xff] %v2665_v57  ;;  %v2669_v12 = vadd.f32 %v2157_v58, %v8359_v63  ;;  %v8363_v33 = vld [vmem:[#allocation402_spill] sm:$0xff]  ;;  %v1144_v11 = vld [vmem:[%s3396_s18 + $0xe38] sm:$0xff]  ;;  %v8364_v35 = vld [vmem:[#allocation403_spill] sm:$0xff] }
 0x2ac   : > { %v2160_v60 = vmul.f32 0.1, %v1648_v45  ;;  %v2670_v9 = vadd.f32 %v2158_v5, %v8360_v13  ;;  %v2671_v32 = vadd.f32 %v2159_v7, %v8361_v40  ;;  %v1649_v34 = vsub.f32 %v1137_v3, %v8363_v33  ;;  %3178 = vst [vmem:[%s3469_s21 + $0xdc8] sm:$0xff] %v2666_v6  ;;  %v8365_v19 = vld [vmem:[#allocation404_spill] sm:$0xff]  ;;  %v8366_v20 = vld [vmem:[#allocation405_spill] sm:$0xff]  ;;  %v1145_v15 = vld [vmem:[%s3396_s18 + $0xe40] sm:$0xff] }
 0x2ad   : > { %3179 = vst [vmem:[%s3469_s21 + $0xdd0] sm:$0xff] %v2667_v59  ;;  %3180 = vst [vmem:[%s3469_s21 + $0xdd8] sm:$0xff] %v2668_v23  ;;  %v1650_v36 = vsub.f32 %v1138_v42, %v8364_v35  ;;  %v1651_v37 = vsub.f32 %v1139_v0, %v8365_v19  ;;  %v1652_v21 = vsub.f32 %v1140_v43, %v8366_v20  ;;  %v8367_v38 = vld [vmem:[#allocation406_spill] sm:$0xff]  ;;  %v8368_v28 = vld [vmem:[#allocation407_spill] sm:$0xff] }
 0x2ae   : > { %v2672_v62 = vadd.f32 %v2160_v60, %v8362_v56  ;;  %3181 = vst [vmem:[%s3469_s21 + $0xde0] sm:$0xff] %v2669_v12  ;;  %3182 = vst [vmem:[%s3469_s21 + $0xde8] sm:$0xff] %v2670_v9  ;;  %v2161_v27 = vmul.f32 0.1, %v1649_v34  ;;  %v1653_v47 = vsub.f32 %v1141_v46, %v8367_v38  ;;  %v1654_v22 = vsub.f32 %v1142_v61, %v8368_v28  ;;  %v8369_v48 = vld [vmem:[#allocation408_spill] sm:$0xff]  ;;  %v1146_v50 = vld [vmem:[%s3396_s18 + $0xe48] sm:$0xff] }
 0x2af   : > { %3183 = vst [vmem:[%s3469_s21 + $0xdf0] sm:$0xff] %v2671_v32  ;;  %v1655_v49 = vsub.f32 %v1143_v31, %v8369_v48  ;;  %v1147_v29 = vld [vmem:[%s3396_s18 + $0xe50] sm:$0xff]  ;;  %v1148_v51 = vld [vmem:[%s3396_s18 + $0xe58] sm:$0xff]  ;;  %v2162_v52 = vmul.f32 0.1, %v1650_v36  ;;  %v1149_v3 = vld [vmem:[%s3396_s18 + $0xe60] sm:$0xff] }
 0x2b0   : > { %3184 = vst [vmem:[%s3469_s21 + $0xdf8] sm:$0xff] %v2672_v62  ;;  %v2163_v10 = vmul.f32 0.1, %v1651_v37  ;;  %v2164_v53 = vmul.f32 0.1, %v1652_v21  ;;  %v8370_v25 = vld [vmem:[#allocation409_spill] sm:$0xff]  ;;  %v2673_v1 = vadd.f32 %v2161_v27, %v8363_v33 }
 0x2b1   : > { %v1656_v17 = vsub.f32 %v1144_v11, %v8370_v25  ;;  %v2165_v30 = vmul.f32 0.1, %v1653_v47  ;;  %v2166_v54 = vmul.f32 0.1, %v1654_v22  ;;  %v2167_v8 = vmul.f32 0.1, %v1655_v49 }
 0x2b2   : > { %v2674_v16 = vadd.f32 %v2162_v52, %v8364_v35  ;;  %v2675_v26 = vadd.f32 %v2163_v10, %v8365_v19  ;;  %v2676_v18 = vadd.f32 %v2164_v53, %v8366_v20  ;;  %v1150_v2 = vld [vmem:[%s3396_s18 + $0xe68] sm:$0xff]  ;;  %v1151_v63 = vld [vmem:[%s3396_s18 + $0xe70] sm:$0xff]  ;;  %3185 = vst [vmem:[%s3469_s21 + $0xe00] sm:$0xff] %v2673_v1  ;;  %v8371_v40 = vld [vmem:[#allocation410_spill] sm:$0xff] }
 0x2b3   : > { %v2168_v24 = vmul.f32 0.1, %v1656_v17  ;;  %v2677_v39 = vadd.f32 %v2165_v30, %v8367_v38  ;;  %v2678_v13 = vadd.f32 %v2166_v54, %v8368_v28  ;;  %v2679_v14 = vadd.f32 %v2167_v8, %v8369_v48  ;;  %v1152_v42 = vld [vmem:[%s3396_s18 + $0xe78] sm:$0xff]  ;;  %v8372_v43 = vld [vmem:[#allocation411_spill] sm:$0xff]  ;;  %v8373_v44 = vld [vmem:[#allocation412_spill] sm:$0xff] }
 0x2b4   : > { %v1657_v41 = vsub.f32 %v1145_v15, %v8371_v40  ;;  %3186 = vst [vmem:[%s3469_s21 + $0xe08] sm:$0xff] %v2674_v16  ;;  %3187 = vst [vmem:[%s3469_s21 + $0xe10] sm:$0xff] %v2675_v26  ;;  %v1658_v55 = vsub.f32 %v1146_v50, %v8372_v43  ;;  %v1659_v4 = vsub.f32 %v1147_v29, %v8373_v44  ;;  %v8374_v56 = vld [vmem:[#allocation413_spill] sm:$0xff]  ;;  %v1153_v57 = vld [vmem:[%s3396_s18 + $0xe80] sm:$0xff] }
 0x2b5   : > { %3188 = vst [vmem:[%s3469_s21 + $0xe18] sm:$0xff] %v2676_v18  ;;  %v2680_v0 = vadd.f32 %v2168_v24, %v8370_v25  ;;  %v1660_v45 = vsub.f32 %v1148_v51, %v8374_v56  ;;  %3189 = vst [vmem:[%s3469_s21 + $0xe20] sm:$0xff] %v2677_v39  ;;  %v8375_v5 = vld [vmem:[#allocation414_spill] sm:$0xff]  ;;  %v8376_v6 = vld [vmem:[#allocation415_spill] sm:$0xff] }
 0x2b6   : > { %3190 = vst [vmem:[%s3469_s21 + $0xe28] sm:$0xff] %v2678_v13  ;;  %3191 = vst [vmem:[%s3469_s21 + $0xe30] sm:$0xff] %v2679_v14  ;;  %v2169_v58 = vmul.f32 0.1, %v1657_v41  ;;  %v1661_v7 = vsub.f32 %v1149_v3, %v8375_v5  ;;  %v1662_v59 = vsub.f32 %v1150_v2, %v8376_v6  ;;  %v8377_v23 = vld [vmem:[#allocation416_spill] sm:$0xff]  ;;  %v1154_v46 = vld [vmem:[%s3396_s18 + $0xe88] sm:$0xff] }
 0x2b7   : > { %v1663_v60 = vsub.f32 %v1151_v63, %v8377_v23  ;;  %v1155_v61 = vld [vmem:[%s3396_s18 + $0xe90] sm:$0xff]  ;;  %v1156_v31 = vld [vmem:[%s3396_s18 + $0xe98] sm:$0xff]  ;;  %3192 = vst [vmem:[%s3469_s21 + $0xe38] sm:$0xff] %v2680_v0  ;;  %v2170_v12 = vmul.f32 0.1, %v1658_v55  ;;  %v1157_v15 = vld [vmem:[%s3396_s18 + $0xea0] sm:$0xff] }
 0x2b8   : > { %v2171_v9 = vmul.f32 0.1, %v1659_v4  ;;  %v2172_v32 = vmul.f32 0.1, %v1660_v45  ;;  %v8378_v33 = vld [vmem:[#allocation417_spill] sm:$0xff]  ;;  %v2681_v11 = vadd.f32 %v2169_v58, %v8371_v40  ;;  %v1158_v27 = vld [vmem:[%s3396_s18 + $0xea8] sm:$0xff] }
 0x2b9   : > { %v1664_v34 = vsub.f32 %v1152_v42, %v8378_v33  ;;  %v2173_v62 = vmul.f32 0.1, %v1661_v7  ;;  %v2174_v35 = vmul.f32 0.1, %v1662_v59  ;;  %v2175_v36 = vmul.f32 0.1, %v1663_v60 }
 0x2ba   : > { %v2682_v19 = vadd.f32 %v2170_v12, %v8372_v43  ;;  %v2683_v37 = vadd.f32 %v2171_v9, %v8373_v44  ;;  %v2684_v20 = vadd.f32 %v2172_v32, %v8374_v56  ;;  %v1159_v38 = vld [vmem:[%s3396_s18 + $0xeb0] sm:$0xff]  ;;  %3193 = vst [vmem:[%s3469_s21 + $0xe40] sm:$0xff] %v2681_v11  ;;  %v8379_v48 = vld [vmem:[#allocation418_spill] sm:$0xff]  ;;  %v1160_v50 = vld [vmem:[%s3396_s18 + $0xeb8] sm:$0xff] }
 0x2bb   : > { %v2176_v21 = vmul.f32 0.1, %v1664_v34  ;;  %v2685_v47 = vadd.f32 %v2173_v62, %v8375_v5  ;;  %v2686_v28 = vadd.f32 %v2174_v35, %v8376_v6  ;;  %v2687_v22 = vadd.f32 %v2175_v36, %v8377_v23  ;;  %v8380_v51 = vld [vmem:[#allocation419_spill] sm:$0xff]  ;;  %v8381_v10 = vld [vmem:[#allocation420_spill] sm:$0xff]  ;;  %v8382_v25 = vld [vmem:[#allocation421_spill] sm:$0xff] }
 0x2bc   : > { %v1665_v49 = vsub.f32 %v1153_v57, %v8379_v48  ;;  %3194 = vst [vmem:[%s3469_s21 + $0xe48] sm:$0xff] %v2682_v19  ;;  %3195 = vst [vmem:[%s3469_s21 + $0xe50] sm:$0xff] %v2683_v37  ;;  %v1666_v52 = vsub.f32 %v1154_v46, %v8380_v51  ;;  %v1667_v53 = vsub.f32 %v1155_v61, %v8381_v10  ;;  %v1161_v1 = vld [vmem:[%s3396_s18 + $0xec0] sm:$0xff]  ;;  %v8384_v16 = vld [vmem:[#allocation423_spill] sm:$0xff] }
 0x2bd   : > { %3196 = vst [vmem:[%s3469_s21 + $0xe58] sm:$0xff] %v2684_v20  ;;  %v2688_v29 = vadd.f32 %v2176_v21, %v8378_v33  ;;  %v1668_v17 = vsub.f32 %v1156_v31, %v8382_v25  ;;  %3197 = vst [vmem:[%s3469_s21 + $0xe60] sm:$0xff] %v2685_v47  ;;  %v8383_v54 = vld [vmem:[#allocation422_spill] sm:$0xff]  ;;  %v1670_v26 = vsub.f32 %v1158_v27, %v8384_v16  ;;  %v8385_v18 = vld [vmem:[#allocation424_spill] sm:$0xff] }
 0x2be   : > { %3198 = vst [vmem:[%s3469_s21 + $0xe68] sm:$0xff] %v2686_v28  ;;  %3199 = vst [vmem:[%s3469_s21 + $0xe70] sm:$0xff] %v2687_v22  ;;  %v2177_v30 = vmul.f32 0.1, %v1665_v49  ;;  %v1669_v8 = vsub.f32 %v1157_v15, %v8383_v54  ;;  %v1671_v24 = vsub.f32 %v1159_v38, %v8385_v18  ;;  %v1162_v3 = vld [vmem:[%s3396_s18 + $0xec8] sm:$0xff]  ;;  %v1163_v2 = vld [vmem:[%s3396_s18 + $0xed0] sm:$0xff] }
 0x2bf   : > { %v1164_v63 = vld [vmem:[%s3396_s18 + $0xed8] sm:$0xff]  ;;  %3200 = vst [vmem:[%s3469_s21 + $0xe78] sm:$0xff] %v2688_v29  ;;  %v2178_v39 = vmul.f32 0.1, %v1666_v52  ;;  %v2179_v13 = vmul.f32 0.1, %v1667_v53 }
 0x2c0   : > { %v2180_v14 = vmul.f32 0.1, %v1668_v17  ;;  %v8386_v40 = vld [vmem:[#allocation425_spill] sm:$0xff]  ;;  %v2689_v42 = vadd.f32 %v2177_v30, %v8379_v48  ;;  %v2181_v0 = vmul.f32 0.1, %v1669_v8  ;;  %v1165_v57 = vld [vmem:[%s3396_s18 + $0xee0] sm:$0xff] }
 0x2c1   : > { %v1672_v41 = vsub.f32 %v1160_v50, %v8386_v40  ;;  %v2182_v43 = vmul.f32 0.1, %v1670_v26  ;;  %v2183_v55 = vmul.f32 0.1, %v1671_v24  ;;  %v2690_v44 = vadd.f32 %v2178_v39, %v8380_v51  ;;  %v1166_v58 = vld [vmem:[%s3396_s18 + $0xee8] sm:$0xff]  ;;  %v1167_v5 = vld [vmem:[%s3396_s18 + $0xef0] sm:$0xff] }
 0x2c2   : > { %v2691_v4 = vadd.f32 %v2179_v13, %v8381_v10  ;;  %v2692_v56 = vadd.f32 %v2180_v14, %v8382_v25  ;;  %3201 = vst [vmem:[%s3469_s21 + $0xe80] sm:$0xff] %v2689_v42  ;;  %v2693_v7 = vadd.f32 %v2181_v0, %v8383_v54  ;;  %v8387_v23 = vld [vmem:[#allocation426_spill] sm:$0xff]  ;;  %v1168_v46 = vld [vmem:[%s3396_s18 + $0xef8] sm:$0xff]  ;;  %v8388_v31 = vld [vmem:[#allocation427_spill] sm:$0xff] }
 0x2c3   : > { %v2184_v45 = vmul.f32 0.1, %v1672_v41  ;;  %v2694_v6 = vadd.f32 %v2182_v43, %v8384_v16  ;;  %v2695_v59 = vadd.f32 %v2183_v55, %v8385_v18  ;;  %v1673_v60 = vsub.f32 %v1161_v1, %v8387_v23  ;;  %3202 = vst [vmem:[%s3469_s21 + $0xe88] sm:$0xff] %v2690_v44  ;;  %v8389_v9 = vld [vmem:[#allocation428_spill] sm:$0xff]  ;;  %v8390_v33 = vld [vmem:[#allocation429_spill] sm:$0xff]  ;;  %v1169_v11 = vld [vmem:[%s3396_s18 + $0xf00] sm:$0xff] }
 0x2c4   : > { %3203 = vst [vmem:[%s3469_s21 + $0xe90] sm:$0xff] %v2691_v4  ;;  %3204 = vst [vmem:[%s3469_s21 + $0xe98] sm:$0xff] %v2692_v56  ;;  %v1674_v12 = vsub.f32 %v1162_v3, %v8388_v31  ;;  %v1675_v32 = vsub.f32 %v1163_v2, %v8389_v9  ;;  %v1676_v34 = vsub.f32 %v1164_v63, %v8390_v33  ;;  %v8391_v35 = vld [vmem:[#allocation430_spill] sm:$0xff]  ;;  %v8392_v19 = vld [vmem:[#allocation431_spill] sm:$0xff] }
 0x2c5   : > { %v2696_v61 = vadd.f32 %v2184_v45, %v8386_v40  ;;  %3205 = vst [vmem:[%s3469_s21 + $0xea0] sm:$0xff] %v2693_v7  ;;  %3206 = vst [vmem:[%s3469_s21 + $0xea8] sm:$0xff] %v2694_v6  ;;  %v2185_v62 = vmul.f32 0.1, %v1673_v60  ;;  %v1677_v36 = vsub.f32 %v1165_v57, %v8391_v35  ;;  %v1678_v37 = vsub.f32 %v1166_v58, %v8392_v19  ;;  %v8393_v20 = vld [vmem:[#allocation432_spill] sm:$0xff]  ;;  %v1170_v15 = vld [vmem:[%s3396_s18 + $0xf08] sm:$0xff] }
 0x2c6   : > { %3207 = vst [vmem:[%s3469_s21 + $0xeb0] sm:$0xff] %v2695_v59  ;;  %v1679_v21 = vsub.f32 %v1167_v5, %v8393_v20  ;;  %v1171_v27 = vld [vmem:[%s3396_s18 + $0xf10] sm:$0xff]  ;;  %v1172_v38 = vld [vmem:[%s3396_s18 + $0xf18] sm:$0xff]  ;;  %v2186_v47 = vmul.f32 0.1, %v1674_v12  ;;  %v1173_v1 = vld [vmem:[%s3396_s18 + $0xf20] sm:$0xff] }
 0x2c7   : > { %3208 = vst [vmem:[%s3469_s21 + $0xeb8] sm:$0xff] %v2696_v61  ;;  %v2187_v28 = vmul.f32 0.1, %v1675_v32  ;;  %v2188_v22 = vmul.f32 0.1, %v1676_v34  ;;  %v8394_v48 = vld [vmem:[#allocation433_spill] sm:$0xff]  ;;  %v2697_v50 = vadd.f32 %v2185_v62, %v8387_v23 }
 0x2c8   : > { %v1680_v49 = vsub.f32 %v1168_v46, %v8394_v48  ;;  %v2189_v29 = vmul.f32 0.1, %v1677_v36  ;;  %v2190_v51 = vmul.f32 0.1, %v1678_v37  ;;  %v2191_v52 = vmul.f32 0.1, %v1679_v21 }
 0x2c9   : > { %v2698_v10 = vadd.f32 %v2186_v47, %v8388_v31  ;;  %v2699_v53 = vadd.f32 %v2187_v28, %v8389_v9  ;;  %v2700_v25 = vadd.f32 %v2188_v22, %v8390_v33  ;;  %v1174_v30 = vld [vmem:[%s3396_s18 + $0xf28] sm:$0xff]  ;;  %v1175_v54 = vld [vmem:[%s3396_s18 + $0xf30] sm:$0xff]  ;;  %3209 = vst [vmem:[%s3469_s21 + $0xec0] sm:$0xff] %v2697_v50  ;;  %v8395_v18 = vld [vmem:[#allocation434_spill] sm:$0xff] }
 0x2ca   : > { %v2192_v17 = vmul.f32 0.1, %v1680_v49  ;;  %v2701_v8 = vadd.f32 %v2189_v29, %v8391_v35  ;;  %v2702_v16 = vadd.f32 %v2190_v51, %v8392_v19  ;;  %v2703_v26 = vadd.f32 %v2191_v52, %v8393_v20  ;;  %v1176_v3 = vld [vmem:[%s3396_s18 + $0xf38] sm:$0xff]  ;;  %v8396_v63 = vld [vmem:[#allocation435_spill] sm:$0xff]  ;;  %v8397_v13 = vld [vmem:[#allocation436_spill] sm:$0xff] }
 0x2cb   : > { %v1681_v24 = vsub.f32 %v1169_v11, %v8395_v18  ;;  %3210 = vst [vmem:[%s3469_s21 + $0xec8] sm:$0xff] %v2698_v10  ;;  %3211 = vst [vmem:[%s3469_s21 + $0xed0] sm:$0xff] %v2699_v53  ;;  %v1682_v39 = vsub.f32 %v1170_v15, %v8396_v63  ;;  %v1683_v14 = vsub.f32 %v1171_v27, %v8397_v13  ;;  %v8398_v40 = vld [vmem:[#allocation437_spill] sm:$0xff]  ;;  %v1177_v42 = vld [vmem:[%s3396_s18 + $0xf40] sm:$0xff] }
 0x2cc   : > { %3212 = vst [vmem:[%s3469_s21 + $0xed8] sm:$0xff] %v2700_v25  ;;  %v2704_v2 = vadd.f32 %v2192_v17, %v8394_v48  ;;  %v1684_v41 = vsub.f32 %v1172_v38, %v8398_v40  ;;  %3213 = vst [vmem:[%s3469_s21 + $0xee0] sm:$0xff] %v2701_v8  ;;  %v8399_v43 = vld [vmem:[#allocation438_spill] sm:$0xff]  ;;  %v8400_v44 = vld [vmem:[#allocation439_spill] sm:$0xff] }
 0x2cd   : > { %3214 = vst [vmem:[%s3469_s21 + $0xee8] sm:$0xff] %v2702_v16  ;;  %3215 = vst [vmem:[%s3469_s21 + $0xef0] sm:$0xff] %v2703_v26  ;;  %v2193_v0 = vmul.f32 0.1, %v1681_v24  ;;  %v1685_v55 = vsub.f32 %v1173_v1, %v8399_v43  ;;  %v1686_v4 = vsub.f32 %v1174_v30, %v8400_v44  ;;  %v8401_v56 = vld [vmem:[#allocation440_spill] sm:$0xff]  ;;  %v1178_v57 = vld [vmem:[%s3396_s18 + $0xf48] sm:$0xff] }
 0x2ce   : > { %v1687_v45 = vsub.f32 %v1175_v54, %v8401_v56  ;;  %v1179_v58 = vld [vmem:[%s3396_s18 + $0xf50] sm:$0xff]  ;;  %v1180_v5 = vld [vmem:[%s3396_s18 + $0xf58] sm:$0xff]  ;;  %3216 = vst [vmem:[%s3469_s21 + $0xef8] sm:$0xff] %v2704_v2  ;;  %v2194_v7 = vmul.f32 0.1, %v1682_v39  ;;  %v1181_v11 = vld [vmem:[%s3396_s18 + $0xf60] sm:$0xff] }
 0x2cf   : > { %v2195_v6 = vmul.f32 0.1, %v1683_v14  ;;  %v2196_v59 = vmul.f32 0.1, %v1684_v41  ;;  %v8402_v23 = vld [vmem:[#allocation441_spill] sm:$0xff]  ;;  %v2705_v46 = vadd.f32 %v2193_v0, %v8395_v18  ;;  %v1182_v62 = vld [vmem:[%s3396_s18 + $0xf68] sm:$0xff] }
 0x2d0   : > { %v1688_v60 = vsub.f32 %v1176_v3, %v8402_v23  ;;  %v2197_v61 = vmul.f32 0.1, %v1685_v55  ;;  %v2198_v31 = vmul.f32 0.1, %v1686_v4  ;;  %v2199_v12 = vmul.f32 0.1, %v1687_v45 }
 0x2d1   : > { %v2706_v9 = vadd.f32 %v2194_v7, %v8396_v63  ;;  %v2707_v32 = vadd.f32 %v2195_v6, %v8397_v13  ;;  %v2708_v33 = vadd.f32 %v2196_v59, %v8398_v40  ;;  %v1183_v35 = vld [vmem:[%s3396_s18 + $0xf70] sm:$0xff]  ;;  %3217 = vst [vmem:[%s3469_s21 + $0xf00] sm:$0xff] %v2705_v46  ;;  %v8403_v20 = vld [vmem:[#allocation442_spill] sm:$0xff]  ;;  %v1184_v15 = vld [vmem:[%s3396_s18 + $0xf78] sm:$0xff] }
 0x2d2   : > { %v2200_v34 = vmul.f32 0.1, %v1688_v60  ;;  %v2709_v36 = vadd.f32 %v2197_v61, %v8399_v43  ;;  %v2710_v19 = vadd.f32 %v2198_v31, %v8400_v44  ;;  %v2711_v37 = vadd.f32 %v2199_v12, %v8401_v56  ;;  %v8404_v38 = vld [vmem:[#allocation443_spill] sm:$0xff]  ;;  %v8405_v28 = vld [vmem:[#allocation444_spill] sm:$0xff]  ;;  %v8406_v48 = vld [vmem:[#allocation445_spill] sm:$0xff] }
 0x2d3   : > { %v1689_v21 = vsub.f32 %v1177_v42, %v8403_v20  ;;  %3218 = vst [vmem:[%s3469_s21 + $0xf08] sm:$0xff] %v2706_v9  ;;  %3219 = vst [vmem:[%s3469_s21 + $0xf10] sm:$0xff] %v2707_v32  ;;  %v1690_v47 = vsub.f32 %v1178_v57, %v8404_v38  ;;  %v1691_v22 = vsub.f32 %v1179_v58, %v8405_v28  ;;  %v1185_v50 = vld [vmem:[%s3396_s18 + $0xf80] sm:$0xff]  ;;  %v8408_v10 = vld [vmem:[#allocation447_spill] sm:$0xff] }
 0x2d4   : > { %3220 = vst [vmem:[%s3469_s21 + $0xf18] sm:$0xff] %v2708_v33  ;;  %v2712_v27 = vadd.f32 %v2200_v34, %v8402_v23  ;;  %v1692_v49 = vsub.f32 %v1180_v5, %v8406_v48  ;;  %3221 = vst [vmem:[%s3469_s21 + $0xf20] sm:$0xff] %v2709_v36  ;;  %v8407_v51 = vld [vmem:[#allocation446_spill] sm:$0xff]  ;;  %v1694_v53 = vsub.f32 %v1182_v62, %v8408_v10  ;;  %v8409_v25 = vld [vmem:[#allocation448_spill] sm:$0xff] }
 0x2d5   : > { %3222 = vst [vmem:[%s3469_s21 + $0xf28] sm:$0xff] %v2710_v19  ;;  %3223 = vst [vmem:[%s3469_s21 + $0xf30] sm:$0xff] %v2711_v37  ;;  %v2201_v29 = vmul.f32 0.1, %v1689_v21  ;;  %v1693_v52 = vsub.f32 %v1181_v11, %v8407_v51  ;;  %v1695_v17 = vsub.f32 %v1183_v35, %v8409_v25  ;;  %v1186_v1 = vld [vmem:[%s3396_s18 + $0xf88] sm:$0xff]  ;;  %v1187_v30 = vld [vmem:[%s3396_s18 + $0xf90] sm:$0xff] }
 0x2d6   : > { %v1188_v54 = vld [vmem:[%s3396_s18 + $0xf98] sm:$0xff]  ;;  %3224 = vst [vmem:[%s3469_s21 + $0xf38] sm:$0xff] %v2712_v27  ;;  %v2202_v8 = vmul.f32 0.1, %v1690_v47  ;;  %v2203_v16 = vmul.f32 0.1, %v1691_v22 }
 0x2d7   : > { %v2204_v26 = vmul.f32 0.1, %v1692_v49  ;;  %v8410_v18 = vld [vmem:[#allocation449_spill] sm:$0xff]  ;;  %v2713_v3 = vadd.f32 %v2201_v29, %v8403_v20  ;;  %v2205_v2 = vmul.f32 0.1, %v1693_v52  ;;  %v1189_v42 = vld [vmem:[%s3396_s18 + $0xfa0] sm:$0xff] }
 0x2d8   : > { %v1696_v24 = vsub.f32 %v1184_v15, %v8410_v18  ;;  %v2206_v63 = vmul.f32 0.1, %v1694_v53  ;;  %v2207_v39 = vmul.f32 0.1, %v1695_v17  ;;  %v2714_v13 = vadd.f32 %v2202_v8, %v8404_v38  ;;  %v1190_v0 = vld [vmem:[%s3396_s18 + $0xfa8] sm:$0xff]  ;;  %v1191_v43 = vld [vmem:[%s3396_s18 + $0xfb0] sm:$0xff] }
 0x2d9   : > { %v2715_v14 = vadd.f32 %v2203_v16, %v8405_v28  ;;  %v2716_v40 = vadd.f32 %v2204_v26, %v8406_v48  ;;  %3225 = vst [vmem:[%s3469_s21 + $0xf40] sm:$0xff] %v2713_v3  ;;  %v2717_v55 = vadd.f32 %v2205_v2, %v8407_v51  ;;  %v8411_v56 = vld [vmem:[#allocation450_spill] sm:$0xff]  ;;  %v1192_v57 = vld [vmem:[%s3396_s18 + $0xfb8] sm:$0xff]  ;;  %v8412_v5 = vld [vmem:[#allocation451_spill] sm:$0xff] }
 0x2da   : > { %v2208_v41 = vmul.f32 0.1, %v1696_v24  ;;  %v2718_v44 = vadd.f32 %v2206_v63, %v8408_v10  ;;  %v2719_v4 = vadd.f32 %v2207_v39, %v8409_v25  ;;  %v1697_v45 = vsub.f32 %v1185_v50, %v8411_v56  ;;  %3226 = vst [vmem:[%s3469_s21 + $0xf48] sm:$0xff] %v2714_v13  ;;  %v8413_v6 = vld [vmem:[#allocation452_spill] sm:$0xff]  ;;  %v8414_v23 = vld [vmem:[#allocation453_spill] sm:$0xff]  ;;  %v1193_v46 = vld [vmem:[%s3396_s18 + $0xfc0] sm:$0xff] }
 0x2db   : > { %3227 = vst [vmem:[%s3469_s21 + $0xf50] sm:$0xff] %v2715_v14  ;;  %3228 = vst [vmem:[%s3469_s21 + $0xf58] sm:$0xff] %v2716_v40  ;;  %v1698_v7 = vsub.f32 %v1186_v1, %v8412_v5  ;;  %v1699_v59 = vsub.f32 %v1187_v30, %v8413_v6  ;;  %v1700_v60 = vsub.f32 %v1188_v54, %v8414_v23  ;;  %v8415_v31 = vld [vmem:[#allocation454_spill] sm:$0xff]  ;;  %v8416_v9 = vld [vmem:[#allocation455_spill] sm:$0xff] }
 0x2dc   : > { %v2720_v58 = vadd.f32 %v2208_v41, %v8410_v18  ;;  %3229 = vst [vmem:[%s3469_s21 + $0xf60] sm:$0xff] %v2717_v55  ;;  %3230 = vst [vmem:[%s3469_s21 + $0xf68] sm:$0xff] %v2718_v44  ;;  %v2209_v61 = vmul.f32 0.1, %v1697_v45  ;;  %v1701_v12 = vsub.f32 %v1189_v42, %v8415_v31  ;;  %v1702_v32 = vsub.f32 %v1190_v0, %v8416_v9  ;;  %v8417_v33 = vld [vmem:[#allocation456_spill] sm:$0xff]  ;;  %v1194_v11 = vld [vmem:[%s3396_s18 + $0xfc8] sm:$0xff] }
 0x2dd   : > { %3231 = vst [vmem:[%s3469_s21 + $0xf70] sm:$0xff] %v2719_v4  ;;  %v1703_v34 = vsub.f32 %v1191_v43, %v8417_v33  ;;  %v1195_v62 = vld [vmem:[%s3396_s18 + $0xfd0] sm:$0xff]  ;;  %v1196_v35 = vld [vmem:[%s3396_s18 + $0xfd8] sm:$0xff]  ;;  %v2210_v36 = vmul.f32 0.1, %v1698_v7  ;;  %v1197_v50 = vld [vmem:[%s3396_s18 + $0xfe0] sm:$0xff] }
 0x2de   : > { %3232 = vst [vmem:[%s3469_s21 + $0xf78] sm:$0xff] %v2720_v58  ;;  %v2211_v19 = vmul.f32 0.1, %v1699_v59  ;;  %v2212_v37 = vmul.f32 0.1, %v1700_v60  ;;  %v8418_v20 = vld [vmem:[#allocation457_spill] sm:$0xff]  ;;  %v2721_v15 = vadd.f32 %v2209_v61, %v8411_v56 }
 0x2df   : > { %v1704_v21 = vsub.f32 %v1192_v57, %v8418_v20  ;;  %v2213_v27 = vmul.f32 0.1, %v1701_v12  ;;  %v2214_v38 = vmul.f32 0.1, %v1702_v32  ;;  %v2215_v47 = vmul.f32 0.1, %v1703_v34 }
 0x2e0   : > { %v2722_v28 = vadd.f32 %v2210_v36, %v8412_v5  ;;  %v2723_v22 = vadd.f32 %v2211_v19, %v8413_v6  ;;  %v2724_v48 = vadd.f32 %v2212_v37, %v8414_v23  ;;  %v1198_v29 = vld [vmem:[%s3396_s18 + $0xfe8] sm:$0xff]  ;;  %v1199_v51 = vld [vmem:[%s3396_s18 + $0xff0] sm:$0xff]  ;;  %3233 = vst [vmem:[%s3469_s21 + $0xf80] sm:$0xff] %v2721_v15  ;;  %v8419_v25 = vld [vmem:[#allocation458_spill] sm:$0xff] }
 0x2e1   : > { %v2216_v49 = vmul.f32 0.1, %v1704_v21  ;;  %v2725_v52 = vadd.f32 %v2213_v27, %v8415_v31  ;;  %v2726_v10 = vadd.f32 %v2214_v38, %v8416_v9  ;;  %v2727_v53 = vadd.f32 %v2215_v47, %v8417_v33  ;;  %v1200_v1 = vld [vmem:[%s3396_s18 + $0xff8] sm:$0xff]  ;;  %v8420_v54 = vld [vmem:[#allocation459_spill] sm:$0xff]  ;;  %v8421_v16 = vld [vmem:[#allocation460_spill] sm:$0xff] }
 0x2e2   : > { %v1705_v17 = vsub.f32 %v1193_v46, %v8419_v25  ;;  %3234 = vst [vmem:[%s3469_s21 + $0xf88] sm:$0xff] %v2722_v28  ;;  %3235 = vst [vmem:[%s3469_s21 + $0xf90] sm:$0xff] %v2723_v22  ;;  %v1706_v8 = vsub.f32 %v1194_v11, %v8420_v54  ;;  %v1707_v26 = vsub.f32 %v1195_v62, %v8421_v16  ;;  %v8422_v18 = vld [vmem:[#allocation461_spill] sm:$0xff]  ;;  %v8423_v2 = vld [vmem:[#allocation462_spill] sm:$0xff] }
 0x2e3   : > { %3236 = vst [vmem:[%s3469_s21 + $0xf98] sm:$0xff] %v2724_v48  ;;  %v2728_v30 = vadd.f32 %v2216_v49, %v8418_v20  ;;  %v1708_v24 = vsub.f32 %v1196_v35, %v8422_v18  ;;  %3237 = vst [vmem:[%s3469_s21 + $0xfa0] sm:$0xff] %v2725_v52  ;;  %v1709_v63 = vsub.f32 %v1197_v50, %v8423_v2  ;;  %v8424_v39 = vld [vmem:[#allocation463_spill] sm:$0xff]  ;;  %v8425_v14 = vld [vmem:[#allocation464_spill] sm:$0xff] }
 0x2e4   : > { %3238 = vst [vmem:[%s3469_s21 + $0xfa8] sm:$0xff] %v2726_v10  ;;  %3239 = vst [vmem:[%s3469_s21 + $0xfb0] sm:$0xff] %v2727_v53  ;;  %v2217_v3 = vmul.f32 0.1, %v1705_v17  ;;  %v1710_v13 = vsub.f32 %v1198_v29, %v8424_v39  ;;  %v1711_v40 = vsub.f32 %v1199_v51, %v8425_v14  ;;  %v2218_v41 = vmul.f32 0.1, %v1706_v8 }
 0x2e5   : > { %3240 = vst [vmem:[%s3469_s21 + $0xfb8] sm:$0xff] %v2728_v30  ;;  %v2219_v42 = vmul.f32 0.1, %v1707_v26  ;;  %v2220_v0 = vmul.f32 0.1, %v1708_v24  ;;  %v8426_v43 = vld [vmem:[#allocation465_spill] sm:$0xff] }
 0x2e6   : > { %v1712_v55 = vsub.f32 %v1200_v1, %v8426_v43  ;;  %v2729_v44 = vadd.f32 %v2217_v3, %v8419_v25  ;;  %v2221_v4 = vmul.f32 0.1, %v1709_v63  ;;  %v2222_v56 = vmul.f32 0.1, %v1710_v13 }
 0x2e7   : > { %v2223_v45 = vmul.f32 0.1, %v1711_v40  ;;  %v2730_v57 = vadd.f32 %v2218_v41, %v8420_v54  ;;  %v2731_v58 = vadd.f32 %v2219_v42, %v8421_v16  ;;  %v2732_v5 = vadd.f32 %v2220_v0, %v8422_v18 }
 0x2e8   : > { %v2224_v7 = vmul.f32 0.1, %v1712_v55  ;;  %3241 = vst [vmem:[%s3469_s21 + $0xfc0] sm:$0xff] %v2729_v44  ;;  %v2733_v6 = vadd.f32 %v2221_v4, %v8423_v2  ;;  %v2734_v59 = vadd.f32 %v2222_v56, %v8424_v39 }
 0x2e9   : > { %v2735_v23 = vadd.f32 %v2223_v45, %v8425_v14  ;;  %3242 = vst [vmem:[%s3469_s21 + $0xfc8] sm:$0xff] %v2730_v57  ;;  %3243 = vst [vmem:[%s3469_s21 + $0xfd0] sm:$0xff] %v2731_v58 }
 0x2ea   : > { %3244 = vst [vmem:[%s3469_s21 + $0xfd8] sm:$0xff] %v2732_v5  ;;  %v2736_v60 = vadd.f32 %v2224_v7, %v8426_v43  ;;  %3245 = vst [vmem:[%s3469_s21 + $0xfe0] sm:$0xff] %v2733_v6 }
 0x2eb   : > { %3246 = vst [vmem:[%s3469_s21 + $0xfe8] sm:$0xff] %v2734_v59  ;;  %3247 = vst [vmem:[%s3469_s21 + $0xff0] sm:$0xff] %v2735_v23 }
 0x2ec   : > { %3248 = vst [vmem:[%s3469_s21 + $0xff8] sm:$0xff] %v2736_v60 }
 0x2ed PF: > { %s12_s9 = sadd.s32 1, %s3359_s9  }
 0x2ee   : > { %p9_p4 = scmp.ge.s32.totalorder %s12_s9, 6  }
 0x2f0   :  { %11 = sbr.rel (!%p9_p4) target bundleno = 1 (0x1), region = 61 }

</bundles_post_ra>
